<compile_context>
chip_gen: v6e
topology: v6e:2x2x1
jax: 0.10.0
libtpu: 0.0.40
codegen_flags: <defaults>
</compile_context>

<pallas_src>
import jax
import jax.numpy as jnp
from jax.experimental import pallas as pl

# ----------------------------------------------------------------------------
# Constants (synthetic, consistent with the PyTorch module defaults)
# ----------------------------------------------------------------------------
NUM_CHAMPION_CLASSES = 16          # len(CONDENSED_CHAMPIONS_TO_I) (synthetic)
NUM_MINION_CLASSES = 8
NUM_TOWER_CLASSES = 6
NUM_ITEMS = 287
NUM_ITEMS_PER_CHAMPION = 7
NUM_PLAYERS = 10

MAX_NUM_CHAMPION_DETECTIONS = 8
MAX_NUM_MINION_DETECTIONS = 8
MAX_NUM_TOWER_DETECTIONS = 4
MAX_NUM_DETECTIONS = (MAX_NUM_CHAMPION_DETECTIONS
                      + MAX_NUM_MINION_DETECTIONS
                      + MAX_NUM_TOWER_DETECTIONS)
NUM_CONTINUOUS_F = 16

EMB_DIM = 128
HALF_DIM = EMB_DIM // 2
SEQ_LEN = 9
INTER_EMB_DIM = 512
NUM_ITEMS_IN_GAME = NUM_ITEMS_PER_CHAMPION * NUM_PLAYERS        # 70

OBS_DIM = NUM_CONTINUOUS_F + EMB_DIM + 3 * HALF_DIM             # 336
RAW_OBS_DIM = NUM_CONTINUOUS_F + MAX_NUM_DETECTIONS * 5 + NUM_ITEMS_IN_GAME  # 186
ACTION_DIM = 25 + 1 + 2 + 6                                     # 34

# merged champ/minion/tower ("CMT") branch layout
CMT_DIM = 2 * EMB_DIM              # 256 = 128 (champ) + 64 (minion) + 64 (tower)
CMT_COL_M = EMB_DIM                # minion columns 128:192
CMT_COL_T = EMB_DIM + HALF_DIM     # tower  columns 192:256
CMT_OFF_M = 24                     # minion one-hot rows 24:40 (champ = 0:24)
CMT_OFF_T = 40                     # tower  one-hot rows 40:48
CMT_ONEHOT = 48
ENT_SLOTS = 8                      # slots/frame in merged branch (tower 4 -> 8)
ITEM_SLOTS = 72                    # item slots padded 70 -> 72 (sublane aligned)
LSTM_BP = 8                        # LSTM batch padded to one sublane tile


# ----------------------------------------------------------------------------
# The single fused kernel:
#   one-hot gathers + entity MLPs + masked max-pool -> frame reducer
#   -> sublane-aligned LSTM -> fused action heads
# ----------------------------------------------------------------------------
def _garen_fused_kernel(
    # data (frame rows ordered time-major: r = t * B + b)
    cont_ref,      # (R, 16)       f32   continuous features
    ids_cmt_ref,   # (R*8, 3)      int32 [champ_id, minion_id+24, tower_id+40]
    det_cmt_ref,   # (R*8, 12)     f32   [champ(4) | minion(4) | tower(4)] det feats
    ids_item_ref,  # (R*72, 1)     int32 item ids (slots 70,71 are padding)
    scat_ref,      # (T*8, R)      bf16  0/1 scatter: frame row t*B+b -> t*8+b
    # weights (fused / block-diagonal, built in init_params)
    wg_cmt_ref,    # (48, 256)     bf16  blkdiag(emb_table @ W1_emb) per branch
    wd_cmt_ref,    # (12, 256)     f32   blkdiag det-feature part of W1
    w2_cmt_ref,    # (256, 256)    bf16  blkdiag second entity-MLP layers
    item_tbl_ref,  # (288, 64)     bf16  MLPItem(item_embedding) per item id
    wr1_cont_ref,  # (16, 512)     f32
    wr1_cmt_ref,   # (256, 512)    bf16
    wr1_item_ref,  # (64, 512)     bf16
    wr2_ref,       # (512, 128)    bf16
    wih_ref,       # (128, 512)    bf16
    whh_ref,       # (128, 512)    bf16
    head_w_ref,    # (128, 128)    bf16  fused heads, zero-padded to 128 cols
    bias_ref,      # (6, 512)      f32   packed f32 biases (see init_params)
    # output
    o_ref,         # (8, 128)      f32   padded logits; caller slices [:B, :34]
):
    f32, bf16 = jnp.float32, jnp.bfloat16
    R = cont_ref.shape[0]                  # B * T frames
    T = scat_ref.shape[0] // LSTM_BP       # sequence length
    H = EMB_DIM
    NEG = -jnp.inf

    def mm(a, b):
        return jnp.dot(a, b, preferred_element_type=f32)

    def onehot(cond):
        return jnp.where(cond, 1.0, 0.0).astype(bf16)

    def sig(x):   # sigmoid via EUP exp + EUP approx reciprocal (off the VPU)
        return pl.reciprocal(1.0 + jnp.exp(-x), approx=True)

    # ---- packed biases -------------------------------------------------------
    b1_cmt = bias_ref[0:1, 0:CMT_DIM]
    b2_cmt = bias_ref[1:2, 0:CMT_DIM]
    br1 = bias_ref[2:3, :]
    br2 = bias_ref[3:4, 0:EMB_DIM]
    blstm = bias_ref[4:5, :]
    head_b = bias_ref[5:6, 0:EMB_DIM]

    # ---- merged champ/minion/tower entity branch (block-diagonal) -----------
    ids = ids_cmt_ref[...]                                          # (R*8, 3)
    n_cmt = ids.shape[0]
    col = jax.lax.broadcasted_iota(jnp.int32, (n_cmt, CMT_ONEHOT), 1)
    oh = onehot((col == ids[:, 0:1]) | (col == ids[:, 1:2]) | (col == ids[:, 2:3]))
    h1 = jnp.maximum(
        mm(oh, wg_cmt_ref[...]) + mm(det_cmt_ref[...], wd_cmt_ref[...]) + b1_cmt,
        0.0)                                                        # (R*8, 256)
    y = mm(h1.astype(bf16), w2_cmt_ref[...]) + b2_cmt               # (R*8, 256)
    y = y.reshape(R, ENT_SLOTS, CMT_DIM)                            # aligned (8 | 8)
    slot = jax.lax.broadcasted_iota(jnp.int32, (ENT_SLOTS, CMT_DIM), 0)
    ccol = jax.lax.broadcasted_iota(jnp.int32, (ENT_SLOTS, CMT_DIM), 1)
    valid = (ccol < CMT_COL_T) | (slot < MAX_NUM_TOWER_DETECTIONS)  # mask tower pads
    pooled_cmt = jnp.max(jnp.where(valid, y, NEG), axis=1)          # (R, 256)

    # ---- items (entire MLP folded into the per-item output table) -----------
    idi = ids_item_ref[...]                                         # (R*72, 1)
    n_item = idi.shape[0]
    icol = jax.lax.broadcasted_iota(jnp.int32, (n_item, item_tbl_ref.shape[0]), 1)
    ohi = onehot(icol == idi)
    yi = mm(ohi, item_tbl_ref[...]).reshape(R, ITEM_SLOTS, HALF_DIM)
    islot = jax.lax.broadcasted_iota(jnp.int32, (ITEM_SLOTS, HALF_DIM), 0)
    pooled_item = jnp.max(jnp.where(islot < NUM_ITEMS_IN_GAME, yi, NEG), axis=1)

    # ---- frame reducer (first Linear split by input group; no concat) -------
    h_r = jnp.maximum(
        mm(cont_ref[...], wr1_cont_ref[...])
        + mm(pooled_cmt.astype(bf16), wr1_cmt_ref[...])
        + mm(pooled_item.astype(bf16), wr1_item_ref[...])
        + br1, 0.0)                                                 # (R, 512)
    frame = jnp.maximum(mm(h_r.astype(bf16), wr2_ref[...]) + br2, 0.0)   # (R, 128)

    # ---- LSTM: batch padded to 8 so every serial per-step slice is aligned --
    frame_p = mm(scat_ref[...], frame.astype(bf16))                 # (T*8, 128)
    gates_x = mm(frame_p.astype(bf16), wih_ref[...]) + blstm        # (T*8, 512)
    whh = whh_ref[...]
    h = jnp.zeros((LSTM_BP, H), f32)
    c = jnp.zeros((LSTM_BP, H), f32)
    for t in range(T):                       # T = 9, fully unrolled
        g = gates_x[t * LSTM_BP:(t + 1) * LSTM_BP, :] + mm(h.astype(bf16), whh)
        i_g = sig(g[:, 0:H])                 # PyTorch gate order: i, f, g, o
        f_g = sig(g[:, H:2 * H])
        g_g = jnp.tanh(g[:, 2 * H:3 * H])
        o_g = sig(g[:, 3 * H:4 * H])
        c = f_g * c + i_g * g_g
        h = o_g * jnp.tanh(c)

    # ---- fused action heads: [move(25)|attack(1)|xy(2,sigmoid)|abil(6)|pad] --
    logits = mm(h.astype(bf16), head_w_ref[...]) + head_b           # (8, 128)
    hcol = jax.lax.broadcasted_iota(jnp.int32, logits.shape, 1)
    o_ref[...] = jnp.where((hcol >= 26) & (hcol < 28), sig(logits), logits)


# ----------------------------------------------------------------------------
# Forward pass: plain-JAX slicing/padding glue + ONE fused pallas_call
# ----------------------------------------------------------------------------
def garen_forward(params, obs):
    """obs: (B, T, 186) float32 -> (B, 34) float32 action logits."""
    B, T, _ = obs.shape
    R = B * T
    assert B <= LSTM_BP, "kernel pads the LSTM batch to 8"
    NCF = NUM_CONTINUOUS_F
    MC, MM, MT = (MAX_NUM_CHAMPION_DETECTIONS, MAX_NUM_MINION_DETECTIONS,
                  MAX_NUM_TOWER_DETECTIONS)

    # time-major rows (r = t*B + b); the kernel scatters them to t*8+b for LSTM
    obs_t = jnp.transpose(obs, (1, 0, 2))                           # (T, B, 186)
    cont_f = obs_t[:, :, :NCF].reshape(R, NCF)

    det = obs_t[:, :, NCF:NCF + MAX_NUM_DETECTIONS * 5]
    det = det.reshape(T, B, MAX_NUM_DETECTIONS, 5)
    champ, minion, tower = det[:, :, :MC], det[:, :, MC:MC + MM], det[:, :, MC + MM:]

    # ids (clipped like the reference), pre-offset into the merged one-hot space
    ids_c = jnp.clip(champ[..., 0].astype(jnp.int32),
                     0, NUM_CHAMPION_CLASSES - 1)
    ids_m = jnp.clip(minion[..., 0].astype(jnp.int32) - NUM_CHAMPION_CLASSES,
                     0, NUM_MINION_CLASSES - 1) + CMT_OFF_M
    ids_t = jnp.clip(tower[..., 0].astype(jnp.int32)
                     - NUM_CHAMPION_CLASSES - NUM_MINION_CLASSES,
                     0, NUM_TOWER_CLASSES - 1) + CMT_OFF_T
    ids_t = jnp.pad(ids_t, ((0, 0), (0, 0), (0, ENT_SLOTS - MT)),
                    constant_values=CMT_OFF_T)    # pad slots -> masked in kernel
    ids_cmt = jnp.stack([ids_c, ids_m, ids_t], axis=-1).reshape(R * ENT_SLOTS, 3)

    tdet = jnp.pad(tower[..., 1:], ((0, 0), (0, 0), (0, ENT_SLOTS - MT), (0, 0)))
    det_cmt = jnp.concatenate([champ[..., 1:], minion[..., 1:], tdet],
                              axis=-1).reshape(R * ENT_SLOTS, 12)

    item_ids = obs_t[:, :, NCF + MAX_NUM_DETECTIONS * 5:].astype(jnp.int32)
    item_ids = jnp.pad(item_ids,
                       ((0, 0), (0, 0), (0, ITEM_SLOTS - NUM_ITEMS_IN_GAME)))
    ids_item = item_ids.reshape(R * ITEM_SLOTS, 1)

    # constant 0/1 row-scatter (t*B+b -> t*8+b); folded to a constant under jit
    rows = jnp.arange(T * LSTM_BP)
    cols = jnp.arange(R)
    scat = (((rows[:, None] % LSTM_BP) < B)
            & (cols[None, :] == (rows[:, None] // LSTM_BP) * B
               + rows[:, None] % LSTM_BP)).astype(jnp.bfloat16)

    # Single grid step: weights (~1 MiB) + data + intermediates (<4 MiB) are
    # all VMEM-resident; no tiling / pipelining needed at this size.
    out_pad = pl.pallas_call(
        _garen_fused_kernel,
        out_shape=jax.ShapeDtypeStruct((LSTM_BP, EMB_DIM), jnp.float32),
    )(
        cont_f, ids_cmt, det_cmt, ids_item, scat,
        params["wg_cmt"], params["wd_cmt"], params["w2_cmt"], params["item_tbl"],
        params["wr1_cont"], params["wr1_cmt"], params["wr1_item"], params["wr2"],
        params["lstm_wih"], params["lstm_whh"], params["head_w"],
        params["bias_pack"],
    )
    return out_pad[:B, :ACTION_DIM]                                 # (B, 34)


# ----------------------------------------------------------------------------
# Parameter construction (deterministic, synthetic), fused into kernel layout
# ----------------------------------------------------------------------------
def _linear(key, fan_in, fan_out):
    k1, k2 = jax.random.split(key)
    bound = 1.0 / (fan_in ** 0.5)
    w = jax.random.uniform(k1, (fan_in, fan_out), jnp.float32, -bound, bound)
    b = jax.random.uniform(k2, (1, fan_out), jnp.float32, -bound, bound)
    return w, b


def init_params(key):
    """Synthetic params, already fused/packed into the kernel layout.
    Real PyTorch weights are (out, in); transpose to (in, out) first, then run
    the same folding below."""
    f32, bf16 = jnp.float32, jnp.bfloat16
    keys = jax.random.split(key, 20)
    p = {}

    # embedding tables (PyTorch nn.Embedding default: N(0,1))
    champ_tbl = jax.random.normal(keys[0], (NUM_CHAMPION_CLASSES + 1, EMB_DIM), f32)
    minion_tbl = jax.random.normal(keys[1], (NUM_MINION_CLASSES + 1, HALF_DIM), f32)
    tower_tbl = jax.random.normal(keys[2], (NUM_TOWER_CLASSES + 1, HALF_DIM), f32)
    item_tbl = jax.random.normal(keys[3], (NUM_ITEMS + 1, HALF_DIM), f32)

    # per-entity MLPs ((in, out) layout)
    wc1, bc1 = _linear(keys[4], EMB_DIM + 4, EMB_DIM)
    wc2, bc2 = _linear(keys[5], EMB_DIM, EMB_DIM)
    wm1, bm1 = _linear(keys[6], HALF_DIM + 4, HALF_DIM)
    wm2, bm2 = _linear(keys[7], HALF_DIM, HALF_DIM)
    wt1, bt1 = _linear(keys[8], HALF_DIM + 4, HALF_DIM)
    wt2, bt2 = _linear(keys[9], HALF_DIM, HALF_DIM)
    wi1, bi1 = _linear(keys[10], HALF_DIM, HALF_DIM)
    wi2, bi2 = _linear(keys[11], HALF_DIM, HALF_DIM)

    # gather + first-layer fusion: emb_table @ W1_emb, block-diagonal over
    # [champ | minion | tower] columns with one-hot rows [0:24 | 24:40 | 40:48]
    champ_proj = champ_tbl @ wc1[:EMB_DIM]            # (17, 128)
    minion_proj = minion_tbl @ wm1[:HALF_DIM]         # (9, 64)
    tower_proj = tower_tbl @ wt1[:HALF_DIM]           # (7, 64)
    wg = jnp.zeros((CMT_ONEHOT, CMT_DIM), f32)
    wg = wg.at[:champ_proj.shape[0], :EMB_DIM].set(champ_proj)
    wg = wg.at[CMT_OFF_M:CMT_OFF_M + minion_proj.shape[0],
               CMT_COL_M:CMT_COL_T].set(minion_proj)
    wg = wg.at[CMT_OFF_T:CMT_OFF_T + tower_proj.shape[0],
               CMT_COL_T:].set(tower_proj)
    p["wg_cmt"] = wg.astype(bf16)

    # det-feature part of the first layers (tiny K=4 blocks, kept f32)
    wd = jnp.zeros((12, CMT_DIM), f32)
    wd = wd.at[0:4, :EMB_DIM].set(wc1[EMB_DIM:])
    wd = wd.at[4:8, CMT_COL_M:CMT_COL_T].set(wm1[HALF_DIM:])
    wd = wd.at[8:12, CMT_COL_T:].set(wt1[HALF_DIM:])
    p["wd_cmt"] = wd

    # second entity-MLP layers, block-diagonal
    w2 = jnp.zeros((CMT_DIM, CMT_DIM), f32)
    w2 = w2.at[:EMB_DIM, :EMB_DIM].set(wc2)
    w2 = w2.at[CMT_COL_M:CMT_COL_T, CMT_COL_M:CMT_COL_T].set(wm2)
    w2 = w2.at[CMT_COL_T:, CMT_COL_T:].set(wt2)
    p["w2_cmt"] = w2.astype(bf16)

    b1_cmt = jnp.concatenate([bc1, bm1, bt1], axis=1)[0]   # (256,)
    b2_cmt = jnp.concatenate([bc2, bm2, bt2], axis=1)[0]

    # item MLP folded completely into the embedding table (no det features)
    item_out = jnp.maximum(item_tbl @ wi1 + bi1, 0.0) @ wi2 + bi2   # (288, 64)
    p["item_tbl"] = item_out.astype(bf16)

    # frame reducer: Linear(336,512)-ReLU-Linear(512,128)-ReLU, first Linear
    # split by input group [cont(16) | champ+minion+tower(256) | item(64)]
    wr1, br1 = _linear(keys[12], OBS_DIM, INTER_EMB_DIM)
    wr2, br2 = _linear(keys[13], INTER_EMB_DIM, EMB_DIM)
    p["wr1_cont"] = wr1[:NUM_CONTINUOUS_F]                               # f32
    p["wr1_cmt"] = wr1[NUM_CONTINUOUS_F:NUM_CONTINUOUS_F + CMT_DIM].astype(bf16)
    p["wr1_item"] = wr1[NUM_CONTINUOUS_F + CMT_DIM:].astype(bf16)
    p["wr2"] = wr2.astype(bf16)

    # LSTM ((in, 4H) layout, gate order i|f|g|o); bias = b_ih + b_hh
    wih, bih = _linear(keys[14], EMB_DIM, 4 * EMB_DIM)
    whh, bhh = _linear(keys[15], EMB_DIM, 4 * EMB_DIM)
    p["lstm_wih"] = wih.astype(bf16)
    p["lstm_whh"] = whh.astype(bf16)
    blstm = (bih + bhh)[0]

    # fused action heads, zero-padded to a 128-wide output tile
    wmv, bmv = _linear(keys[16], EMB_DIM, 25)
    wat, bat = _linear(keys[17], EMB_DIM, 1)
    wxy, bxy = _linear(keys[18], EMB_DIM, 2)
    wab, bab = _linear(keys[19], EMB_DIM, 6)
    head_w = jnp.concatenate([wmv, wat, wxy, wab], axis=1)      # (128, 34)
    head_b = jnp.concatenate([bmv, bat, bxy, bab], axis=1)[0]   # (34,)
    p["head_w"] = jnp.pad(head_w,
                          ((0, 0), (0, EMB_DIM - ACTION_DIM))).astype(bf16)

    # all small f32 biases packed into one operand (one prologue DMA)
    bias_pack = jnp.zeros((6, INTER_EMB_DIM), f32)
    bias_pack = bias_pack.at[0, :CMT_DIM].set(b1_cmt)
    bias_pack = bias_pack.at[1, :CMT_DIM].set(b2_cmt)
    bias_pack = bias_pack.at[2, :].set(br1[0])
    bias_pack = bias_pack.at[3, :EMB_DIM].set(br2[0])
    bias_pack = bias_pack.at[4, :].set(blstm)
    bias_pack = bias_pack.at[5, :ACTION_DIM].set(head_b)
    p["bias_pack"] = bias_pack
    return p


# ----------------------------------------------------------------------------
# Driver
# ----------------------------------------------------------------------------
if __name__ == "__main__":
    B, T = 2, SEQ_LEN

    key = jax.random.PRNGKey(0)
    k_cont, k_det, k_ids, k_item, k_param = jax.random.split(key, 5)

    # structured synthetic observation:
    # [continuous | detections (id, 4 feats) x 20 | item ids x 70]
    cont = jax.random.normal(k_cont, (B, T, NUM_CONTINUOUS_F), jnp.float32)
    det_other = jax.random.uniform(k_det, (B, T, MAX_NUM_DETECTIONS, 5), jnp.float32)
    total_classes = NUM_CHAMPION_CLASSES + NUM_MINION_CLASSES + NUM_TOWER_CLASSES
    det_ids = jax.random.randint(
        k_ids, (B, T, MAX_NUM_DETECTIONS, 1), 0, total_classes).astype(jnp.float32)
    det = jnp.concatenate([det_ids, det_other[..., 1:]], axis=-1)
    det = det.reshape(B, T, MAX_NUM_DETECTIONS * 5)
    item_ids = jax.random.randint(
        k_item, (B, T, NUM_ITEMS_IN_GAME), 0, NUM_ITEMS + 1).astype(jnp.float32)
    obs = jnp.concatenate([cont, det, item_ids], axis=-1)         # (B, T, 186)

    params = init_params(k_param)

    fwd = jax.jit(garen_forward)
    out = jax.block_until_ready(fwd(params, obs))

    assert out.shape == (B, ACTION_DIM), out.shape
    assert bool(jnp.all(jnp.isfinite(out)))
    print("KERNEL_OK")
</pallas_src>

<mosaic_0001>
module attributes {stable_mosaic.version = 11 : i64} {
  func.func @_garen_fused_kernel(%arg0: memref<18x16xf32, #tpu.memory_space<vmem>>, %arg1: memref<144x3xi32, #tpu.memory_space<vmem>>, %arg2: memref<144x12xf32, #tpu.memory_space<vmem>>, %arg3: memref<1296x1xi32, #tpu.memory_space<vmem>>, %arg4: memref<72x18xbf16, #tpu.memory_space<vmem>>, %arg5: memref<48x256xbf16, #tpu.memory_space<vmem>>, %arg6: memref<12x256xf32, #tpu.memory_space<vmem>>, %arg7: memref<256x256xbf16, #tpu.memory_space<vmem>>, %arg8: memref<288x64xbf16, #tpu.memory_space<vmem>>, %arg9: memref<16x512xf32, #tpu.memory_space<vmem>>, %arg10: memref<256x512xbf16, #tpu.memory_space<vmem>>, %arg11: memref<64x512xbf16, #tpu.memory_space<vmem>>, %arg12: memref<512x128xbf16, #tpu.memory_space<vmem>>, %arg13: memref<128x512xbf16, #tpu.memory_space<vmem>>, %arg14: memref<128x512xbf16, #tpu.memory_space<vmem>>, %arg15: memref<128x128xbf16, #tpu.memory_space<vmem>>, %arg16: memref<6x512xf32, #tpu.memory_space<vmem>>, %arg17: memref<8x128xf32, #tpu.memory_space<vmem>>) attributes {dimension_semantics = [], scalar_prefetch = 0 : i64, scratch_operands = 0 : i64, tpu.core_type = #tpu.core_type<tc>} {
    %c0 = arith.constant 0 : index
    %c0_0 = arith.constant 0 : index
    %0 = vector.load %arg16[%c0, %c0_0] : memref<6x512xf32, #tpu.memory_space<vmem>>, vector<1x256xf32>
    %c1 = arith.constant 1 : index
    %c0_1 = arith.constant 0 : index
    %1 = vector.load %arg16[%c1, %c0_1] : memref<6x512xf32, #tpu.memory_space<vmem>>, vector<1x256xf32>
    %c2 = arith.constant 2 : index
    %c0_2 = arith.constant 0 : index
    %2 = vector.load %arg16[%c2, %c0_2] : memref<6x512xf32, #tpu.memory_space<vmem>>, vector<1x512xf32>
    %c3 = arith.constant 3 : index
    %c0_3 = arith.constant 0 : index
    %3 = vector.load %arg16[%c3, %c0_3] : memref<6x512xf32, #tpu.memory_space<vmem>>, vector<1x128xf32>
    %c4 = arith.constant 4 : index
    %c0_4 = arith.constant 0 : index
    %4 = vector.load %arg16[%c4, %c0_4] : memref<6x512xf32, #tpu.memory_space<vmem>>, vector<1x512xf32>
    %c5 = arith.constant 5 : index
    %c0_5 = arith.constant 0 : index
    %5 = vector.load %arg16[%c5, %c0_5] : memref<6x512xf32, #tpu.memory_space<vmem>>, vector<1x128xf32>
    %c0_6 = arith.constant 0 : index
    %c0_7 = arith.constant 0 : index
    %6 = vector.load %arg1[%c0_6, %c0_7] : memref<144x3xi32, #tpu.memory_space<vmem>>, vector<144x3xi32>
    %7 = tpu.iota {dimensions = array<i32: 1>} : vector<144x48xi32>
    %8 = vector.extract_strided_slice %6 {offsets = [0, 0], sizes = [144, 1], strides = [1, 1]} : vector<144x3xi32> to vector<144x1xi32>
    %9 = vector.broadcast %8 : vector<144x1xi32> to vector<144x48xi32>
    %10 = arith.cmpi eq, %7, %9 : vector<144x48xi32>
    %11 = vector.extract_strided_slice %6 {offsets = [0, 1], sizes = [144, 1], strides = [1, 1]} : vector<144x3xi32> to vector<144x1xi32>
    %12 = vector.broadcast %11 : vector<144x1xi32> to vector<144x48xi32>
    %13 = arith.cmpi eq, %7, %12 : vector<144x48xi32>
    %14 = arith.ori %10, %13 : vector<144x48xi1>
    %15 = vector.extract_strided_slice %6 {offsets = [0, 2], sizes = [144, 1], strides = [1, 1]} : vector<144x3xi32> to vector<144x1xi32>
    %16 = vector.broadcast %15 : vector<144x1xi32> to vector<144x48xi32>
    %17 = arith.cmpi eq, %7, %16 : vector<144x48xi32>
    %18 = arith.ori %14, %17 : vector<144x48xi1>
    %cst = arith.constant 1.000000e+00 : f32
    %cst_8 = arith.constant 0.000000e+00 : f32
    %19 = vector.broadcast %cst : f32 to vector<144x48xf32>
    %20 = vector.broadcast %cst_8 : f32 to vector<144x48xf32>
    %21 = arith.select %18, %19, %20 : vector<144x48xi1>, vector<144x48xf32>
    %22 = arith.truncf %21 : vector<144x48xf32> to vector<144x48xbf16>
    %c0_9 = arith.constant 0 : index
    %c0_10 = arith.constant 0 : index
    %23 = vector.load %arg5[%c0_9, %c0_10] : memref<48x256xbf16, #tpu.memory_space<vmem>>, vector<48x256xbf16>
    %cst_11 = arith.constant dense<0.000000e+00> : vector<144x256xf32>
    %24 = tpu.matmul %22, %23, %cst_11 {dimension_numbers = #tpu.dot_dimension_numbers<[1], [0], [0], [1], [0, 0, 1, 1], [], []>} : vector<144x48xbf16>, vector<48x256xbf16>, vector<144x256xf32> -> vector<144x256xf32>
    %c0_12 = arith.constant 0 : index
    %c0_13 = arith.constant 0 : index
    %25 = vector.load %arg2[%c0_12, %c0_13] : memref<144x12xf32, #tpu.memory_space<vmem>>, vector<144x12xf32>
    %c0_14 = arith.constant 0 : index
    %c0_15 = arith.constant 0 : index
    %26 = vector.load %arg6[%c0_14, %c0_15] : memref<12x256xf32, #tpu.memory_space<vmem>>, vector<12x256xf32>
    %cst_16 = arith.constant dense<0.000000e+00> : vector<144x256xf32>
    %27 = tpu.matmul %25, %26, %cst_16 {dimension_numbers = #tpu.dot_dimension_numbers<[1], [0], [0], [1], [0, 0, 1, 1], [], []>} : vector<144x12xf32>, vector<12x256xf32>, vector<144x256xf32> -> vector<144x256xf32>
    %28 = arith.addf %24, %27 : vector<144x256xf32>
    %29 = vector.broadcast %0 : vector<1x256xf32> to vector<144x256xf32>
    %30 = arith.addf %28, %29 : vector<144x256xf32>
    %cst_17 = arith.constant 0.000000e+00 : f32
    %31 = vector.broadcast %cst_17 : f32 to vector<144x256xf32>
    %32 = arith.maximumf %30, %31 : vector<144x256xf32>
    %33 = arith.truncf %32 : vector<144x256xf32> to vector<144x256xbf16>
    %c0_18 = arith.constant 0 : index
    %c0_19 = arith.constant 0 : index
    %34 = vector.load %arg7[%c0_18, %c0_19] : memref<256x256xbf16, #tpu.memory_space<vmem>>, vector<256x256xbf16>
    %cst_20 = arith.constant dense<0.000000e+00> : vector<144x256xf32>
    %35 = tpu.matmul %33, %34, %cst_20 {dimension_numbers = #tpu.dot_dimension_numbers<[1], [0], [0], [1], [0, 0, 1, 1], [], []>} : vector<144x256xbf16>, vector<256x256xbf16>, vector<144x256xf32> -> vector<144x256xf32>
    %36 = vector.broadcast %1 : vector<1x256xf32> to vector<144x256xf32>
    %37 = arith.addf %35, %36 : vector<144x256xf32>
    %38 = vector.shape_cast %37 : vector<144x256xf32> to vector<18x8x256xf32>
    %39 = tpu.iota {dimensions = array<i32: 0>} : vector<8x256xi32>
    %40 = tpu.iota {dimensions = array<i32: 1>} : vector<8x256xi32>
    %c192_i32 = arith.constant 192 : i32
    %41 = vector.broadcast %c192_i32 : i32 to vector<8x256xi32>
    %42 = arith.cmpi slt, %40, %41 : vector<8x256xi32>
    %c4_i32 = arith.constant 4 : i32
    %43 = vector.broadcast %c4_i32 : i32 to vector<8x256xi32>
    %44 = arith.cmpi slt, %39, %43 : vector<8x256xi32>
    %45 = arith.ori %42, %44 : vector<8x256xi1>
    %cst_21 = arith.constant 0xFF800000 : f32
    %46 = vector.shape_cast %45 : vector<8x256xi1> to vector<1x8x256xi1>
    %47 = vector.broadcast %46 : vector<1x8x256xi1> to vector<18x8x256xi1>
    %48 = vector.broadcast %cst_21 : f32 to vector<18x8x256xf32>
    %49 = arith.select %47, %38, %48 : vector<18x8x256xi1>, vector<18x8x256xf32>
    %cst_22 = arith.constant dense<0xFF800000> : vector<18x256xf32>
    %50 = vector.multi_reduction <maximumf>, %49, %cst_22 [1] : vector<18x8x256xf32> to vector<18x256xf32>
    %c0_23 = arith.constant 0 : index
    %c0_24 = arith.constant 0 : index
    %51 = vector.load %arg3[%c0_23, %c0_24] : memref<1296x1xi32, #tpu.memory_space<vmem>>, vector<1296x1xi32>
    %52 = tpu.iota {dimensions = array<i32: 1>} : vector<1296x288xi32>
    %53 = vector.broadcast %51 : vector<1296x1xi32> to vector<1296x288xi32>
    %54 = arith.cmpi eq, %52, %53 : vector<1296x288xi32>
    %cst_25 = arith.constant 1.000000e+00 : f32
    %cst_26 = arith.constant 0.000000e+00 : f32
    %55 = vector.broadcast %cst_25 : f32 to vector<1296x288xf32>
    %56 = vector.broadcast %cst_26 : f32 to vector<1296x288xf32>
    %57 = arith.select %54, %55, %56 : vector<1296x288xi1>, vector<1296x288xf32>
    %58 = arith.truncf %57 : vector<1296x288xf32> to vector<1296x288xbf16>
    %c0_27 = arith.constant 0 : index
    %c0_28 = arith.constant 0 : index
    %59 = vector.load %arg8[%c0_27, %c0_28] : memref<288x64xbf16, #tpu.memory_space<vmem>>, vector<288x64xbf16>
    %cst_29 = arith.constant dense<0.000000e+00> : vector<1296x64xf32>
    %60 = tpu.matmul %58, %59, %cst_29 {dimension_numbers = #tpu.dot_dimension_numbers<[1], [0], [0], [1], [0, 0, 1, 1], [], []>} : vector<1296x288xbf16>, vector<288x64xbf16>, vector<1296x64xf32> -> vector<1296x64xf32>
    %61 = vector.shape_cast %60 : vector<1296x64xf32> to vector<18x72x64xf32>
    %62 = tpu.iota {dimensions = array<i32: 0>} : vector<72x64xi32>
    %c70_i32 = arith.constant 70 : i32
    %63 = vector.broadcast %c70_i32 : i32 to vector<72x64xi32>
    %64 = arith.cmpi slt, %62, %63 : vector<72x64xi32>
    %cst_30 = arith.constant 0xFF800000 : f32
    %65 = vector.shape_cast %64 : vector<72x64xi1> to vector<1x72x64xi1>
    %66 = vector.broadcast %65 : vector<1x72x64xi1> to vector<18x72x64xi1>
    %67 = vector.broadcast %cst_30 : f32 to vector<18x72x64xf32>
    %68 = arith.select %66, %61, %67 : vector<18x72x64xi1>, vector<18x72x64xf32>
    %cst_31 = arith.constant dense<0xFF800000> : vector<18x64xf32>
    %69 = vector.multi_reduction <maximumf>, %68, %cst_31 [1] : vector<18x72x64xf32> to vector<18x64xf32>
    %c0_32 = arith.constant 0 : index
    %c0_33 = arith.constant 0 : index
    %70 = vector.load %arg0[%c0_32, %c0_33] : memref<18x16xf32, #tpu.memory_space<vmem>>, vector<18x16xf32>
    %c0_34 = arith.constant 0 : index
    %c0_35 = arith.constant 0 : index
    %71 = vector.load %arg9[%c0_34, %c0_35] : memref<16x512xf32, #tpu.memory_space<vmem>>, vector<16x512xf32>
    %cst_36 = arith.constant dense<0.000000e+00> : vector<18x512xf32>
    %72 = tpu.matmul %70, %71, %cst_36 {dimension_numbers = #tpu.dot_dimension_numbers<[1], [0], [0], [1], [0, 0, 1, 1], [], []>} : vector<18x16xf32>, vector<16x512xf32>, vector<18x512xf32> -> vector<18x512xf32>
    %73 = arith.truncf %50 : vector<18x256xf32> to vector<18x256xbf16>
    %c0_37 = arith.constant 0 : index
    %c0_38 = arith.constant 0 : index
    %74 = vector.load %arg10[%c0_37, %c0_38] : memref<256x512xbf16, #tpu.memory_space<vmem>>, vector<256x512xbf16>
    %cst_39 = arith.constant dense<0.000000e+00> : vector<18x512xf32>
    %75 = tpu.matmul %73, %74, %cst_39 {dimension_numbers = #tpu.dot_dimension_numbers<[1], [0], [0], [1], [0, 0, 1, 1], [], []>} : vector<18x256xbf16>, vector<256x512xbf16>, vector<18x512xf32> -> vector<18x512xf32>
    %76 = arith.addf %72, %75 : vector<18x512xf32>
    %77 = arith.truncf %69 : vector<18x64xf32> to vector<18x64xbf16>
    %c0_40 = arith.constant 0 : index
    %c0_41 = arith.constant 0 : index
    %78 = vector.load %arg11[%c0_40, %c0_41] : memref<64x512xbf16, #tpu.memory_space<vmem>>, vector<64x512xbf16>
    %cst_42 = arith.constant dense<0.000000e+00> : vector<18x512xf32>
    %79 = tpu.matmul %77, %78, %cst_42 {dimension_numbers = #tpu.dot_dimension_numbers<[1], [0], [0], [1], [0, 0, 1, 1], [], []>} : vector<18x64xbf16>, vector<64x512xbf16>, vector<18x512xf32> -> vector<18x512xf32>
    %80 = arith.addf %76, %79 : vector<18x512xf32>
    %81 = vector.broadcast %2 : vector<1x512xf32> to vector<18x512xf32>
    %82 = arith.addf %80, %81 : vector<18x512xf32>
    %cst_43 = arith.constant 0.000000e+00 : f32
    %83 = vector.broadcast %cst_43 : f32 to vector<18x512xf32>
    %84 = arith.maximumf %82, %83 : vector<18x512xf32>
    %85 = arith.truncf %84 : vector<18x512xf32> to vector<18x512xbf16>
    %c0_44 = arith.constant 0 : index
    %c0_45 = arith.constant 0 : index
    %86 = vector.load %arg12[%c0_44, %c0_45] : memref<512x128xbf16, #tpu.memory_space<vmem>>, vector<512x128xbf16>
    %cst_46 = arith.constant dense<0.000000e+00> : vector<18x128xf32>
    %87 = tpu.matmul %85, %86, %cst_46 {dimension_numbers = #tpu.dot_dimension_numbers<[1], [0], [0], [1], [0, 0, 1, 1], [], []>} : vector<18x512xbf16>, vector<512x128xbf16>, vector<18x128xf32> -> vector<18x128xf32>
    %88 = vector.broadcast %3 : vector<1x128xf32> to vector<18x128xf32>
    %89 = arith.addf %87, %88 : vector<18x128xf32>
    %cst_47 = arith.constant 0.000000e+00 : f32
    %90 = vector.broadcast %cst_47 : f32 to vector<18x128xf32>
    %91 = arith.maximumf %89, %90 : vector<18x128xf32>
    %c0_48 = arith.constant 0 : index
    %c0_49 = arith.constant 0 : index
    %92 = vector.load %arg4[%c0_48, %c0_49] : memref<72x18xbf16, #tpu.memory_space<vmem>>, vector<72x18xbf16>
    %93 = arith.truncf %91 : vector<18x128xf32> to vector<18x128xbf16>
    %cst_50 = arith.constant dense<0.000000e+00> : vector<72x128xf32>
    %94 = tpu.matmul %92, %93, %cst_50 {dimension_numbers = #tpu.dot_dimension_numbers<[1], [0], [0], [1], [0, 0, 1, 1], [], []>} : vector<72x18xbf16>, vector<18x128xbf16>, vector<72x128xf32> -> vector<72x128xf32>
    %95 = arith.truncf %94 : vector<72x128xf32> to vector<72x128xbf16>
    %c0_51 = arith.constant 0 : index
    %c0_52 = arith.constant 0 : index
    %96 = vector.load %arg13[%c0_51, %c0_52] : memref<128x512xbf16, #tpu.memory_space<vmem>>, vector<128x512xbf16>
    %cst_53 = arith.constant dense<0.000000e+00> : vector<72x512xf32>
    %97 = tpu.matmul %95, %96, %cst_53 {dimension_numbers = #tpu.dot_dimension_numbers<[1], [0], [0], [1], [0, 0, 1, 1], [], []>} : vector<72x128xbf16>, vector<128x512xbf16>, vector<72x512xf32> -> vector<72x512xf32>
    %98 = vector.broadcast %4 : vector<1x512xf32> to vector<72x512xf32>
    %99 = arith.addf %97, %98 : vector<72x512xf32>
    %c0_54 = arith.constant 0 : index
    %c0_55 = arith.constant 0 : index
    %100 = vector.load %arg14[%c0_54, %c0_55] : memref<128x512xbf16, #tpu.memory_space<vmem>>, vector<128x512xbf16>
    %cst_56 = arith.constant 0.000000e+00 : f32
    %101 = vector.broadcast %cst_56 : f32 to vector<8x128xf32>
    %cst_57 = arith.constant 0.000000e+00 : f32
    %102 = vector.broadcast %cst_57 : f32 to vector<8x128xf32>
    %103 = vector.extract_strided_slice %99 {offsets = [0, 0], sizes = [8, 512], strides = [1, 1]} : vector<72x512xf32> to vector<8x512xf32>
    %104 = arith.truncf %101 : vector<8x128xf32> to vector<8x128xbf16>
    %cst_58 = arith.constant dense<0.000000e+00> : vector<8x512xf32>
    %105 = tpu.matmul %104, %100, %cst_58 {dimension_numbers = #tpu.dot_dimension_numbers<[1], [0], [0], [1], [0, 0, 1, 1], [], []>} : vector<8x128xbf16>, vector<128x512xbf16>, vector<8x512xf32> -> vector<8x512xf32>
    %106 = arith.addf %103, %105 : vector<8x512xf32>
    %107 = vector.extract_strided_slice %106 {offsets = [0, 0], sizes = [8, 128], strides = [1, 1]} : vector<8x512xf32> to vector<8x128xf32>
    %cst_59 = arith.constant 0.000000e+00 : f32
    %108 = vector.broadcast %cst_59 : f32 to vector<8x128xf32>
    %109 = arith.subf %108, %107 : vector<8x128xf32>
    %110 = math.exp %109 : vector<8x128xf32>
    %cst_60 = arith.constant 1.000000e+00 : f32
    %111 = vector.broadcast %cst_60 : f32 to vector<8x128xf32>
    %112 = arith.addf %111, %110 : vector<8x128xf32>
    %113 = tpu.reciprocal %112 {approx = true} : vector<8x128xf32> -> vector<8x128xf32>
    %114 = vector.extract_strided_slice %106 {offsets = [0, 128], sizes = [8, 128], strides = [1, 1]} : vector<8x512xf32> to vector<8x128xf32>
    %cst_61 = arith.constant 0.000000e+00 : f32
    %115 = vector.broadcast %cst_61 : f32 to vector<8x128xf32>
    %116 = arith.subf %115, %114 : vector<8x128xf32>
    %117 = math.exp %116 : vector<8x128xf32>
    %cst_62 = arith.constant 1.000000e+00 : f32
    %118 = vector.broadcast %cst_62 : f32 to vector<8x128xf32>
    %119 = arith.addf %118, %117 : vector<8x128xf32>
    %120 = tpu.reciprocal %119 {approx = true} : vector<8x128xf32> -> vector<8x128xf32>
    %121 = vector.extract_strided_slice %106 {offsets = [0, 256], sizes = [8, 128], strides = [1, 1]} : vector<8x512xf32> to vector<8x128xf32>
    %122 = math.tanh %121 : vector<8x128xf32>
    %123 = vector.extract_strided_slice %106 {offsets = [0, 384], sizes = [8, 128], strides = [1, 1]} : vector<8x512xf32> to vector<8x128xf32>
    %cst_63 = arith.constant 0.000000e+00 : f32
    %124 = vector.broadcast %cst_63 : f32 to vector<8x128xf32>
    %125 = arith.subf %124, %123 : vector<8x128xf32>
    %126 = math.exp %125 : vector<8x128xf32>
    %cst_64 = arith.constant 1.000000e+00 : f32
    %127 = vector.broadcast %cst_64 : f32 to vector<8x128xf32>
    %128 = arith.addf %127, %126 : vector<8x128xf32>
    %129 = tpu.reciprocal %128 {approx = true} : vector<8x128xf32> -> vector<8x128xf32>
    %130 = arith.mulf %120, %102 : vector<8x128xf32>
    %131 = arith.mulf %113, %122 : vector<8x128xf32>
    %132 = arith.addf %130, %131 : vector<8x128xf32>
    %133 = math.tanh %132 : vector<8x128xf32>
    %134 = arith.mulf %129, %133 : vector<8x128xf32>
    %135 = vector.extract_strided_slice %99 {offsets = [8, 0], sizes = [8, 512], strides = [1, 1]} : vector<72x512xf32> to vector<8x512xf32>
    %136 = arith.truncf %134 : vector<8x128xf32> to vector<8x128xbf16>
    %cst_65 = arith.constant dense<0.000000e+00> : vector<8x512xf32>
    %137 = tpu.matmul %136, %100, %cst_65 {dimension_numbers = #tpu.dot_dimension_numbers<[1], [0], [0], [1], [0, 0, 1, 1], [], []>} : vector<8x128xbf16>, vector<128x512xbf16>, vector<8x512xf32> -> vector<8x512xf32>
    %138 = arith.addf %135, %137 : vector<8x512xf32>
    %139 = vector.extract_strided_slice %138 {offsets = [0, 0], sizes = [8, 128], strides = [1, 1]} : vector<8x512xf32> to vector<8x128xf32>
    %cst_66 = arith.constant 0.000000e+00 : f32
    %140 = vector.broadcast %cst_66 : f32 to vector<8x128xf32>
    %141 = arith.subf %140, %139 : vector<8x128xf32>
    %142 = math.exp %141 : vector<8x128xf32>
    %cst_67 = arith.constant 1.000000e+00 : f32
    %143 = vector.broadcast %cst_67 : f32 to vector<8x128xf32>
    %144 = arith.addf %143, %142 : vector<8x128xf32>
    %145 = tpu.reciprocal %144 {approx = true} : vector<8x128xf32> -> vector<8x128xf32>
    %146 = vector.extract_strided_slice %138 {offsets = [0, 128], sizes = [8, 128], strides = [1, 1]} : vector<8x512xf32> to vector<8x128xf32>
    %cst_68 = arith.constant 0.000000e+00 : f32
    %147 = vector.broadcast %cst_68 : f32 to vector<8x128xf32>
    %148 = arith.subf %147, %146 : vector<8x128xf32>
    %149 = math.exp %148 : vector<8x128xf32>
    %cst_69 = arith.constant 1.000000e+00 : f32
    %150 = vector.broadcast %cst_69 : f32 to vector<8x128xf32>
    %151 = arith.addf %150, %149 : vector<8x128xf32>
    %152 = tpu.reciprocal %151 {approx = true} : vector<8x128xf32> -> vector<8x128xf32>
    %153 = vector.extract_strided_slice %138 {offsets = [0, 256], sizes = [8, 128], strides = [1, 1]} : vector<8x512xf32> to vector<8x128xf32>
    %154 = math.tanh %153 : vector<8x128xf32>
    %155 = vector.extract_strided_slice %138 {offsets = [0, 384], sizes = [8, 128], strides = [1, 1]} : vector<8x512xf32> to vector<8x128xf32>
    %cst_70 = arith.constant 0.000000e+00 : f32
    %156 = vector.broadcast %cst_70 : f32 to vector<8x128xf32>
    %157 = arith.subf %156, %155 : vector<8x128xf32>
    %158 = math.exp %157 : vector<8x128xf32>
    %cst_71 = arith.constant 1.000000e+00 : f32
    %159 = vector.broadcast %cst_71 : f32 to vector<8x128xf32>
    %160 = arith.addf %159, %158 : vector<8x128xf32>
    %161 = tpu.reciprocal %160 {approx = true} : vector<8x128xf32> -> vector<8x128xf32>
    %162 = arith.mulf %152, %132 : vector<8x128xf32>
    %163 = arith.mulf %145, %154 : vector<8x128xf32>
    %164 = arith.addf %162, %163 : vector<8x128xf32>
    %165 = math.tanh %164 : vector<8x128xf32>
    %166 = arith.mulf %161, %165 : vector<8x128xf32>
    %167 = vector.extract_strided_slice %99 {offsets = [16, 0], sizes = [8, 512], strides = [1, 1]} : vector<72x512xf32> to vector<8x512xf32>
    %168 = arith.truncf %166 : vector<8x128xf32> to vector<8x128xbf16>
    %cst_72 = arith.constant dense<0.000000e+00> : vector<8x512xf32>
    %169 = tpu.matmul %168, %100, %cst_72 {dimension_numbers = #tpu.dot_dimension_numbers<[1], [0], [0], [1], [0, 0, 1, 1], [], []>} : vector<8x128xbf16>, vector<128x512xbf16>, vector<8x512xf32> -> vector<8x512xf32>
    %170 = arith.addf %167, %169 : vector<8x512xf32>
    %171 = vector.extract_strided_slice %170 {offsets = [0, 0], sizes = [8, 128], strides = [1, 1]} : vector<8x512xf32> to vector<8x128xf32>
    %cst_73 = arith.constant 0.000000e+00 : f32
    %172 = vector.broadcast %cst_73 : f32 to vector<8x128xf32>
    %173 = arith.subf %172, %171 : vector<8x128xf32>
    %174 = math.exp %173 : vector<8x128xf32>
    %cst_74 = arith.constant 1.000000e+00 : f32
    %175 = vector.broadcast %cst_74 : f32 to vector<8x128xf32>
    %176 = arith.addf %175, %174 : vector<8x128xf32>
    %177 = tpu.reciprocal %176 {approx = true} : vector<8x128xf32> -> vector<8x128xf32>
    %178 = vector.extract_strided_slice %170 {offsets = [0, 128], sizes = [8, 128], strides = [1, 1]} : vector<8x512xf32> to vector<8x128xf32>
    %cst_75 = arith.constant 0.000000e+00 : f32
    %179 = vector.broadcast %cst_75 : f32 to vector<8x128xf32>
    %180 = arith.subf %179, %178 : vector<8x128xf32>
    %181 = math.exp %180 : vector<8x128xf32>
    %cst_76 = arith.constant 1.000000e+00 : f32
    %182 = vector.broadcast %cst_76 : f32 to vector<8x128xf32>
    %183 = arith.addf %182, %181 : vector<8x128xf32>
    %184 = tpu.reciprocal %183 {approx = true} : vector<8x128xf32> -> vector<8x128xf32>
    %185 = vector.extract_strided_slice %170 {offsets = [0, 256], sizes = [8, 128], strides = [1, 1]} : vector<8x512xf32> to vector<8x128xf32>
    %186 = math.tanh %185 : vector<8x128xf32>
    %187 = vector.extract_strided_slice %170 {offsets = [0, 384], sizes = [8, 128], strides = [1, 1]} : vector<8x512xf32> to vector<8x128xf32>
    %cst_77 = arith.constant 0.000000e+00 : f32
    %188 = vector.broadcast %cst_77 : f32 to vector<8x128xf32>
    %189 = arith.subf %188, %187 : vector<8x128xf32>
    %190 = math.exp %189 : vector<8x128xf32>
    %cst_78 = arith.constant 1.000000e+00 : f32
    %191 = vector.broadcast %cst_78 : f32 to vector<8x128xf32>
    %192 = arith.addf %191, %190 : vector<8x128xf32>
    %193 = tpu.reciprocal %192 {approx = true} : vector<8x128xf32> -> vector<8x128xf32>
    %194 = arith.mulf %184, %164 : vector<8x128xf32>
    %195 = arith.mulf %177, %186 : vector<8x128xf32>
    %196 = arith.addf %194, %195 : vector<8x128xf32>
    %197 = math.tanh %196 : vector<8x128xf32>
    %198 = arith.mulf %193, %197 : vector<8x128xf32>
    %199 = vector.extract_strided_slice %99 {offsets = [24, 0], sizes = [8, 512], strides = [1, 1]} : vector<72x512xf32> to vector<8x512xf32>
    %200 = arith.truncf %198 : vector<8x128xf32> to vector<8x128xbf16>
    %cst_79 = arith.constant dense<0.000000e+00> : vector<8x512xf32>
    %201 = tpu.matmul %200, %100, %cst_79 {dimension_numbers = #tpu.dot_dimension_numbers<[1], [0], [0], [1], [0, 0, 1, 1], [], []>} : vector<8x128xbf16>, vector<128x512xbf16>, vector<8x512xf32> -> vector<8x512xf32>
    %202 = arith.addf %199, %201 : vector<8x512xf32>
    %203 = vector.extract_strided_slice %202 {offsets = [0, 0], sizes = [8, 128], strides = [1, 1]} : vector<8x512xf32> to vector<8x128xf32>
    %cst_80 = arith.constant 0.000000e+00 : f32
    %204 = vector.broadcast %cst_80 : f32 to vector<8x128xf32>
    %205 = arith.subf %204, %203 : vector<8x128xf32>
    %206 = math.exp %205 : vector<8x128xf32>
    %cst_81 = arith.constant 1.000000e+00 : f32
    %207 = vector.broadcast %cst_81 : f32 to vector<8x128xf32>
    %208 = arith.addf %207, %206 : vector<8x128xf32>
    %209 = tpu.reciprocal %208 {approx = true} : vector<8x128xf32> -> vector<8x128xf32>
    %210 = vector.extract_strided_slice %202 {offsets = [0, 128], sizes = [8, 128], strides = [1, 1]} : vector<8x512xf32> to vector<8x128xf32>
    %cst_82 = arith.constant 0.000000e+00 : f32
    %211 = vector.broadcast %cst_82 : f32 to vector<8x128xf32>
    %212 = arith.subf %211, %210 : vector<8x128xf32>
    %213 = math.exp %212 : vector<8x128xf32>
    %cst_83 = arith.constant 1.000000e+00 : f32
    %214 = vector.broadcast %cst_83 : f32 to vector<8x128xf32>
    %215 = arith.addf %214, %213 : vector<8x128xf32>
    %216 = tpu.reciprocal %215 {approx = true} : vector<8x128xf32> -> vector<8x128xf32>
    %217 = vector.extract_strided_slice %202 {offsets = [0, 256], sizes = [8, 128], strides = [1, 1]} : vector<8x512xf32> to vector<8x128xf32>
    %218 = math.tanh %217 : vector<8x128xf32>
    %219 = vector.extract_strided_slice %202 {offsets = [0, 384], sizes = [8, 128], strides = [1, 1]} : vector<8x512xf32> to vector<8x128xf32>
    %cst_84 = arith.constant 0.000000e+00 : f32
    %220 = vector.broadcast %cst_84 : f32 to vector<8x128xf32>
    %221 = arith.subf %220, %219 : vector<8x128xf32>
    %222 = math.exp %221 : vector<8x128xf32>
    %cst_85 = arith.constant 1.000000e+00 : f32
    %223 = vector.broadcast %cst_85 : f32 to vector<8x128xf32>
    %224 = arith.addf %223, %222 : vector<8x128xf32>
    %225 = tpu.reciprocal %224 {approx = true} : vector<8x128xf32> -> vector<8x128xf32>
    %226 = arith.mulf %216, %196 : vector<8x128xf32>
    %227 = arith.mulf %209, %218 : vector<8x128xf32>
    %228 = arith.addf %226, %227 : vector<8x128xf32>
    %229 = math.tanh %228 : vector<8x128xf32>
    %230 = arith.mulf %225, %229 : vector<8x128xf32>
    %231 = vector.extract_strided_slice %99 {offsets = [32, 0], sizes = [8, 512], strides = [1, 1]} : vector<72x512xf32> to vector<8x512xf32>
    %232 = arith.truncf %230 : vector<8x128xf32> to vector<8x128xbf16>
    %cst_86 = arith.constant dense<0.000000e+00> : vector<8x512xf32>
    %233 = tpu.matmul %232, %100, %cst_86 {dimension_numbers = #tpu.dot_dimension_numbers<[1], [0], [0], [1], [0, 0, 1, 1], [], []>} : vector<8x128xbf16>, vector<128x512xbf16>, vector<8x512xf32> -> vector<8x512xf32>
    %234 = arith.addf %231, %233 : vector<8x512xf32>
    %235 = vector.extract_strided_slice %234 {offsets = [0, 0], sizes = [8, 128], strides = [1, 1]} : vector<8x512xf32> to vector<8x128xf32>
    %cst_87 = arith.constant 0.000000e+00 : f32
    %236 = vector.broadcast %cst_87 : f32 to vector<8x128xf32>
    %237 = arith.subf %236, %235 : vector<8x128xf32>
    %238 = math.exp %237 : vector<8x128xf32>
    %cst_88 = arith.constant 1.000000e+00 : f32
    %239 = vector.broadcast %cst_88 : f32 to vector<8x128xf32>
    %240 = arith.addf %239, %238 : vector<8x128xf32>
    %241 = tpu.reciprocal %240 {approx = true} : vector<8x128xf32> -> vector<8x128xf32>
    %242 = vector.extract_strided_slice %234 {offsets = [0, 128], sizes = [8, 128], strides = [1, 1]} : vector<8x512xf32> to vector<8x128xf32>
    %cst_89 = arith.constant 0.000000e+00 : f32
    %243 = vector.broadcast %cst_89 : f32 to vector<8x128xf32>
    %244 = arith.subf %243, %242 : vector<8x128xf32>
    %245 = math.exp %244 : vector<8x128xf32>
    %cst_90 = arith.constant 1.000000e+00 : f32
    %246 = vector.broadcast %cst_90 : f32 to vector<8x128xf32>
    %247 = arith.addf %246, %245 : vector<8x128xf32>
    %248 = tpu.reciprocal %247 {approx = true} : vector<8x128xf32> -> vector<8x128xf32>
    %249 = vector.extract_strided_slice %234 {offsets = [0, 256], sizes = [8, 128], strides = [1, 1]} : vector<8x512xf32> to vector<8x128xf32>
    %250 = math.tanh %249 : vector<8x128xf32>
    %251 = vector.extract_strided_slice %234 {offsets = [0, 384], sizes = [8, 128], strides = [1, 1]} : vector<8x512xf32> to vector<8x128xf32>
    %cst_91 = arith.constant 0.000000e+00 : f32
    %252 = vector.broadcast %cst_91 : f32 to vector<8x128xf32>
    %253 = arith.subf %252, %251 : vector<8x128xf32>
    %254 = math.exp %253 : vector<8x128xf32>
    %cst_92 = arith.constant 1.000000e+00 : f32
    %255 = vector.broadcast %cst_92 : f32 to vector<8x128xf32>
    %256 = arith.addf %255, %254 : vector<8x128xf32>
    %257 = tpu.reciprocal %256 {approx = true} : vector<8x128xf32> -> vector<8x128xf32>
    %258 = arith.mulf %248, %228 : vector<8x128xf32>
    %259 = arith.mulf %241, %250 : vector<8x128xf32>
    %260 = arith.addf %258, %259 : vector<8x128xf32>
    %261 = math.tanh %260 : vector<8x128xf32>
    %262 = arith.mulf %257, %261 : vector<8x128xf32>
    %263 = vector.extract_strided_slice %99 {offsets = [40, 0], sizes = [8, 512], strides = [1, 1]} : vector<72x512xf32> to vector<8x512xf32>
    %264 = arith.truncf %262 : vector<8x128xf32> to vector<8x128xbf16>
    %cst_93 = arith.constant dense<0.000000e+00> : vector<8x512xf32>
    %265 = tpu.matmul %264, %100, %cst_93 {dimension_numbers = #tpu.dot_dimension_numbers<[1], [0], [0], [1], [0, 0, 1, 1], [], []>} : vector<8x128xbf16>, vector<128x512xbf16>, vector<8x512xf32> -> vector<8x512xf32>
    %266 = arith.addf %263, %265 : vector<8x512xf32>
    %267 = vector.extract_strided_slice %266 {offsets = [0, 0], sizes = [8, 128], strides = [1, 1]} : vector<8x512xf32> to vector<8x128xf32>
    %cst_94 = arith.constant 0.000000e+00 : f32
    %268 = vector.broadcast %cst_94 : f32 to vector<8x128xf32>
    %269 = arith.subf %268, %267 : vector<8x128xf32>
    %270 = math.exp %269 : vector<8x128xf32>
    %cst_95 = arith.constant 1.000000e+00 : f32
    %271 = vector.broadcast %cst_95 : f32 to vector<8x128xf32>
    %272 = arith.addf %271, %270 : vector<8x128xf32>
    %273 = tpu.reciprocal %272 {approx = true} : vector<8x128xf32> -> vector<8x128xf32>
    %274 = vector.extract_strided_slice %266 {offsets = [0, 128], sizes = [8, 128], strides = [1, 1]} : vector<8x512xf32> to vector<8x128xf32>
    %cst_96 = arith.constant 0.000000e+00 : f32
    %275 = vector.broadcast %cst_96 : f32 to vector<8x128xf32>
    %276 = arith.subf %275, %274 : vector<8x128xf32>
    %277 = math.exp %276 : vector<8x128xf32>
    %cst_97 = arith.constant 1.000000e+00 : f32
    %278 = vector.broadcast %cst_97 : f32 to vector<8x128xf32>
    %279 = arith.addf %278, %277 : vector<8x128xf32>
    %280 = tpu.reciprocal %279 {approx = true} : vector<8x128xf32> -> vector<8x128xf32>
    %281 = vector.extract_strided_slice %266 {offsets = [0, 256], sizes = [8, 128], strides = [1, 1]} : vector<8x512xf32> to vector<8x128xf32>
    %282 = math.tanh %281 : vector<8x128xf32>
    %283 = vector.extract_strided_slice %266 {offsets = [0, 384], sizes = [8, 128], strides = [1, 1]} : vector<8x512xf32> to vector<8x128xf32>
    %cst_98 = arith.constant 0.000000e+00 : f32
    %284 = vector.broadcast %cst_98 : f32 to vector<8x128xf32>
    %285 = arith.subf %284, %283 : vector<8x128xf32>
    %286 = math.exp %285 : vector<8x128xf32>
    %cst_99 = arith.constant 1.000000e+00 : f32
    %287 = vector.broadcast %cst_99 : f32 to vector<8x128xf32>
    %288 = arith.addf %287, %286 : vector<8x128xf32>
    %289 = tpu.reciprocal %288 {approx = true} : vector<8x128xf32> -> vector<8x128xf32>
    %290 = arith.mulf %280, %260 : vector<8x128xf32>
    %291 = arith.mulf %273, %282 : vector<8x128xf32>
    %292 = arith.addf %290, %291 : vector<8x128xf32>
    %293 = math.tanh %292 : vector<8x128xf32>
    %294 = arith.mulf %289, %293 : vector<8x128xf32>
    %295 = vector.extract_strided_slice %99 {offsets = [48, 0], sizes = [8, 512], strides = [1, 1]} : vector<72x512xf32> to vector<8x512xf32>
    %296 = arith.truncf %294 : vector<8x128xf32> to vector<8x128xbf16>
    %cst_100 = arith.constant dense<0.000000e+00> : vector<8x512xf32>
    %297 = tpu.matmul %296, %100, %cst_100 {dimension_numbers = #tpu.dot_dimension_numbers<[1], [0], [0], [1], [0, 0, 1, 1], [], []>} : vector<8x128xbf16>, vector<128x512xbf16>, vector<8x512xf32> -> vector<8x512xf32>
    %298 = arith.addf %295, %297 : vector<8x512xf32>
    %299 = vector.extract_strided_slice %298 {offsets = [0, 0], sizes = [8, 128], strides = [1, 1]} : vector<8x512xf32> to vector<8x128xf32>
    %cst_101 = arith.constant 0.000000e+00 : f32
    %300 = vector.broadcast %cst_101 : f32 to vector<8x128xf32>
    %301 = arith.subf %300, %299 : vector<8x128xf32>
    %302 = math.exp %301 : vector<8x128xf32>
    %cst_102 = arith.constant 1.000000e+00 : f32
    %303 = vector.broadcast %cst_102 : f32 to vector<8x128xf32>
    %304 = arith.addf %303, %302 : vector<8x128xf32>
    %305 = tpu.reciprocal %304 {approx = true} : vector<8x128xf32> -> vector<8x128xf32>
    %306 = vector.extract_strided_slice %298 {offsets = [0, 128], sizes = [8, 128], strides = [1, 1]} : vector<8x512xf32> to vector<8x128xf32>
    %cst_103 = arith.constant 0.000000e+00 : f32
    %307 = vector.broadcast %cst_103 : f32 to vector<8x128xf32>
    %308 = arith.subf %307, %306 : vector<8x128xf32>
    %309 = math.exp %308 : vector<8x128xf32>
    %cst_104 = arith.constant 1.000000e+00 : f32
    %310 = vector.broadcast %cst_104 : f32 to vector<8x128xf32>
    %311 = arith.addf %310, %309 : vector<8x128xf32>
    %312 = tpu.reciprocal %311 {approx = true} : vector<8x128xf32> -> vector<8x128xf32>
    %313 = vector.extract_strided_slice %298 {offsets = [0, 256], sizes = [8, 128], strides = [1, 1]} : vector<8x512xf32> to vector<8x128xf32>
    %314 = math.tanh %313 : vector<8x128xf32>
    %315 = vector.extract_strided_slice %298 {offsets = [0, 384], sizes = [8, 128], strides = [1, 1]} : vector<8x512xf32> to vector<8x128xf32>
    %cst_105 = arith.constant 0.000000e+00 : f32
    %316 = vector.broadcast %cst_105 : f32 to vector<8x128xf32>
    %317 = arith.subf %316, %315 : vector<8x128xf32>
    %318 = math.exp %317 : vector<8x128xf32>
    %cst_106 = arith.constant 1.000000e+00 : f32
    %319 = vector.broadcast %cst_106 : f32 to vector<8x128xf32>
    %320 = arith.addf %319, %318 : vector<8x128xf32>
    %321 = tpu.reciprocal %320 {approx = true} : vector<8x128xf32> -> vector<8x128xf32>
    %322 = arith.mulf %312, %292 : vector<8x128xf32>
    %323 = arith.mulf %305, %314 : vector<8x128xf32>
    %324 = arith.addf %322, %323 : vector<8x128xf32>
    %325 = math.tanh %324 : vector<8x128xf32>
    %326 = arith.mulf %321, %325 : vector<8x128xf32>
    %327 = vector.extract_strided_slice %99 {offsets = [56, 0], sizes = [8, 512], strides = [1, 1]} : vector<72x512xf32> to vector<8x512xf32>
    %328 = arith.truncf %326 : vector<8x128xf32> to vector<8x128xbf16>
    %cst_107 = arith.constant dense<0.000000e+00> : vector<8x512xf32>
    %329 = tpu.matmul %328, %100, %cst_107 {dimension_numbers = #tpu.dot_dimension_numbers<[1], [0], [0], [1], [0, 0, 1, 1], [], []>} : vector<8x128xbf16>, vector<128x512xbf16>, vector<8x512xf32> -> vector<8x512xf32>
    %330 = arith.addf %327, %329 : vector<8x512xf32>
    %331 = vector.extract_strided_slice %330 {offsets = [0, 0], sizes = [8, 128], strides = [1, 1]} : vector<8x512xf32> to vector<8x128xf32>
    %cst_108 = arith.constant 0.000000e+00 : f32
    %332 = vector.broadcast %cst_108 : f32 to vector<8x128xf32>
    %333 = arith.subf %332, %331 : vector<8x128xf32>
    %334 = math.exp %333 : vector<8x128xf32>
    %cst_109 = arith.constant 1.000000e+00 : f32
    %335 = vector.broadcast %cst_109 : f32 to vector<8x128xf32>
    %336 = arith.addf %335, %334 : vector<8x128xf32>
    %337 = tpu.reciprocal %336 {approx = true} : vector<8x128xf32> -> vector<8x128xf32>
    %338 = vector.extract_strided_slice %330 {offsets = [0, 128], sizes = [8, 128], strides = [1, 1]} : vector<8x512xf32> to vector<8x128xf32>
    %cst_110 = arith.constant 0.000000e+00 : f32
    %339 = vector.broadcast %cst_110 : f32 to vector<8x128xf32>
    %340 = arith.subf %339, %338 : vector<8x128xf32>
    %341 = math.exp %340 : vector<8x128xf32>
    %cst_111 = arith.constant 1.000000e+00 : f32
    %342 = vector.broadcast %cst_111 : f32 to vector<8x128xf32>
    %343 = arith.addf %342, %341 : vector<8x128xf32>
    %344 = tpu.reciprocal %343 {approx = true} : vector<8x128xf32> -> vector<8x128xf32>
    %345 = vector.extract_strided_slice %330 {offsets = [0, 256], sizes = [8, 128], strides = [1, 1]} : vector<8x512xf32> to vector<8x128xf32>
    %346 = math.tanh %345 : vector<8x128xf32>
    %347 = vector.extract_strided_slice %330 {offsets = [0, 384], sizes = [8, 128], strides = [1, 1]} : vector<8x512xf32> to vector<8x128xf32>
    %cst_112 = arith.constant 0.000000e+00 : f32
    %348 = vector.broadcast %cst_112 : f32 to vector<8x128xf32>
    %349 = arith.subf %348, %347 : vector<8x128xf32>
    %350 = math.exp %349 : vector<8x128xf32>
    %cst_113 = arith.constant 1.000000e+00 : f32
    %351 = vector.broadcast %cst_113 : f32 to vector<8x128xf32>
    %352 = arith.addf %351, %350 : vector<8x128xf32>
    %353 = tpu.reciprocal %352 {approx = true} : vector<8x128xf32> -> vector<8x128xf32>
    %354 = arith.mulf %344, %324 : vector<8x128xf32>
    %355 = arith.mulf %337, %346 : vector<8x128xf32>
    %356 = arith.addf %354, %355 : vector<8x128xf32>
    %357 = math.tanh %356 : vector<8x128xf32>
    %358 = arith.mulf %353, %357 : vector<8x128xf32>
    %359 = vector.extract_strided_slice %99 {offsets = [64, 0], sizes = [8, 512], strides = [1, 1]} : vector<72x512xf32> to vector<8x512xf32>
    %360 = arith.truncf %358 : vector<8x128xf32> to vector<8x128xbf16>
    %cst_114 = arith.constant dense<0.000000e+00> : vector<8x512xf32>
    %361 = tpu.matmul %360, %100, %cst_114 {dimension_numbers = #tpu.dot_dimension_numbers<[1], [0], [0], [1], [0, 0, 1, 1], [], []>} : vector<8x128xbf16>, vector<128x512xbf16>, vector<8x512xf32> -> vector<8x512xf32>
    %362 = arith.addf %359, %361 : vector<8x512xf32>
    %363 = vector.extract_strided_slice %362 {offsets = [0, 0], sizes = [8, 128], strides = [1, 1]} : vector<8x512xf32> to vector<8x128xf32>
    %cst_115 = arith.constant 0.000000e+00 : f32
    %364 = vector.broadcast %cst_115 : f32 to vector<8x128xf32>
    %365 = arith.subf %364, %363 : vector<8x128xf32>
    %366 = math.exp %365 : vector<8x128xf32>
    %cst_116 = arith.constant 1.000000e+00 : f32
    %367 = vector.broadcast %cst_116 : f32 to vector<8x128xf32>
    %368 = arith.addf %367, %366 : vector<8x128xf32>
    %369 = tpu.reciprocal %368 {approx = true} : vector<8x128xf32> -> vector<8x128xf32>
    %370 = vector.extract_strided_slice %362 {offsets = [0, 128], sizes = [8, 128], strides = [1, 1]} : vector<8x512xf32> to vector<8x128xf32>
    %cst_117 = arith.constant 0.000000e+00 : f32
    %371 = vector.broadcast %cst_117 : f32 to vector<8x128xf32>
    %372 = arith.subf %371, %370 : vector<8x128xf32>
    %373 = math.exp %372 : vector<8x128xf32>
    %cst_118 = arith.constant 1.000000e+00 : f32
    %374 = vector.broadcast %cst_118 : f32 to vector<8x128xf32>
    %375 = arith.addf %374, %373 : vector<8x128xf32>
    %376 = tpu.reciprocal %375 {approx = true} : vector<8x128xf32> -> vector<8x128xf32>
    %377 = vector.extract_strided_slice %362 {offsets = [0, 256], sizes = [8, 128], strides = [1, 1]} : vector<8x512xf32> to vector<8x128xf32>
    %378 = math.tanh %377 : vector<8x128xf32>
    %379 = vector.extract_strided_slice %362 {offsets = [0, 384], sizes = [8, 128], strides = [1, 1]} : vector<8x512xf32> to vector<8x128xf32>
    %cst_119 = arith.constant 0.000000e+00 : f32
    %380 = vector.broadcast %cst_119 : f32 to vector<8x128xf32>
    %381 = arith.subf %380, %379 : vector<8x128xf32>
    %382 = math.exp %381 : vector<8x128xf32>
    %cst_120 = arith.constant 1.000000e+00 : f32
    %383 = vector.broadcast %cst_120 : f32 to vector<8x128xf32>
    %384 = arith.addf %383, %382 : vector<8x128xf32>
    %385 = tpu.reciprocal %384 {approx = true} : vector<8x128xf32> -> vector<8x128xf32>
    %386 = arith.mulf %376, %356 : vector<8x128xf32>
    %387 = arith.mulf %369, %378 : vector<8x128xf32>
    %388 = arith.addf %386, %387 : vector<8x128xf32>
    %389 = math.tanh %388 : vector<8x128xf32>
    %390 = arith.mulf %385, %389 : vector<8x128xf32>
    %391 = arith.truncf %390 : vector<8x128xf32> to vector<8x128xbf16>
    %c0_121 = arith.constant 0 : index
    %c0_122 = arith.constant 0 : index
    %392 = vector.load %arg15[%c0_121, %c0_122] : memref<128x128xbf16, #tpu.memory_space<vmem>>, vector<128x128xbf16>
    %cst_123 = arith.constant dense<0.000000e+00> : vector<8x128xf32>
    %393 = tpu.matmul %391, %392, %cst_123 {dimension_numbers = #tpu.dot_dimension_numbers<[1], [0], [0], [1], [0, 0, 1, 1], [], []>} : vector<8x128xbf16>, vector<128x128xbf16>, vector<8x128xf32> -> vector<8x128xf32>
    %394 = vector.broadcast %5 : vector<1x128xf32> to vector<8x128xf32>
    %395 = arith.addf %393, %394 : vector<8x128xf32>
    %396 = tpu.iota {dimensions = array<i32: 1>} : vector<8x128xi32>
    %c26_i32 = arith.constant 26 : i32
    %397 = vector.broadcast %c26_i32 : i32 to vector<8x128xi32>
    %398 = arith.cmpi sge, %396, %397 : vector<8x128xi32>
    %c28_i32 = arith.constant 28 : i32
    %399 = vector.broadcast %c28_i32 : i32 to vector<8x128xi32>
    %400 = arith.cmpi slt, %396, %399 : vector<8x128xi32>
    %401 = arith.andi %398, %400 : vector<8x128xi1>
    %cst_124 = arith.constant 0.000000e+00 : f32
    %402 = vector.broadcast %cst_124 : f32 to vector<8x128xf32>
    %403 = arith.subf %402, %395 : vector<8x128xf32>
    %404 = math.exp %403 : vector<8x128xf32>
    %cst_125 = arith.constant 1.000000e+00 : f32
    %405 = vector.broadcast %cst_125 : f32 to vector<8x128xf32>
    %406 = arith.addf %405, %404 : vector<8x128xf32>
    %407 = tpu.reciprocal %406 {approx = true} : vector<8x128xf32> -> vector<8x128xf32>
    %408 = arith.select %401, %407, %395 : vector<8x128xi1>, vector<8x128xf32>
    %c0_126 = arith.constant 0 : index
    %c0_127 = arith.constant 0 : index
    %409 = vector.load %arg17[%c0_126, %c0_127] : memref<8x128xf32, #tpu.memory_space<vmem>>, vector<8x128xf32>
    tpu.vector_store %arg17[%c0_126, %c0_127], %408 {strides = array<i32>} : memref<8x128xf32, #tpu.memory_space<vmem>>, vector<8x128xf32>,
    return
  }
}

</mosaic_0001>

<bundles_post_ra>
// kernel: garen_forward.1
= control target key start
LH: loop header
LB: loop body
LE: loop exit
PB: predicated region body
PF: predicated region fallthrough
CT: control target
= control target key end

     0   :  { %v10819_v0 = vmov 1   ;;  %v17445_v1 = vmov 0   ;;  %v17447_v4 = vmov 0.0   ;;  %vm448_vm0 = vcmask 1043456   ;;  %s17425_s1 = inlined_call_operand.vmem [shape: s32[144,3], index: 1, kind: input, shape index: {}]   ;;  %s17426_s6 = inlined_call_operand.vmem [shape: f32[12,256], index: 6, kind: input, shape index: {}]   ;;  %s17427_s5 = inlined_call_operand.vmem [shape: bf16[48,256], index: 5, kind: input, shape index: {}]   ;;  %s17428_s2 = inlined_call_operand.vmem [shape: f32[144,12], index: 2, kind: input, shape index: {}]   ;;  %s17429_s3 = inlined_call_operand.vmem [shape: s32[1296,1], index: 3, kind: input, shape index: {}]   ;;  %s17430_s8 = inlined_call_operand.vmem [shape: bf16[288,64], index: 8, kind: input, shape index: {}]   ;;  %s17431_s7 = inlined_call_operand.vmem [shape: bf16[256,256], index: 7, kind: input, shape index: {}]   ;;  %s17432_s16 = inlined_call_operand.vmem [shape: f32[6,512], index: 16, kind: input, shape index: {}]   ;;  %s17433_s10 = inlined_call_operand.vmem [shape: bf16[256,512], index: 10, kind: input, shape index: {}]   ;;  %s17434_s9 = inlined_call_operand.vmem [shape: f32[16,512], index: 9, kind: input, shape index: {}]   ;;  %s17435_s0 = inlined_call_operand.vmem [shape: f32[18,16], index: 0, kind: input, shape index: {}]   ;;  %s17436_s11 = inlined_call_operand.vmem [shape: bf16[64,512], index: 11, kind: input, shape index: {}]   ;;  %s17437_s12 = inlined_call_operand.vmem [shape: bf16[512,128], index: 12, kind: input, shape index: {}]   ;;  %s17438_s4 = inlined_call_operand.vmem [shape: bf16[72,18], index: 4, kind: input, shape index: {}]   ;;  %s17439_s13 = inlined_call_operand.vmem [shape: bf16[128,512], index: 13, kind: input, shape index: {}]   ;;  %s17440_s14 = inlined_call_operand.vmem [shape: bf16[128,512], index: 14, kind: input, shape index: {}]   ;;  %s17441_s15 = inlined_call_operand.vmem [shape: bf16[128,128], index: 15, kind: input, shape index: {}]   ;;  %s17442_s17 = inlined_call_operand.vmem [shape: f32[8,128], index: 17, kind: output, shape index: {}]  }
   0x1   :  { %17845 = sst [smem:[#allocation226_spill]] %s17425_s1  ;;  %10270 = vset.pattern.permute.xlu1 %v10819_v0  ;;  %10269 = vset.pattern.permute.xlu0 %v17445_v1  ;;  %v10822_v5 = vmov 2   ;;  %v10303_v11 = vld [vmem:[%s17427_s5 + $0x20] ss:$8 sps:$4 sm:$0xff]   ;;  %v10305_v12 = vld [vmem:[%s17427_s5 + $0x24] ss:$8 sps:$4 sm:$0xff]   ;;  %v84_v57 = vlaneseq }
   0x2   :  { %17846 = sst [smem:[#allocation227_spill]] %s17426_s6  ;;  %615 = vmatprep.mubr.f32.mxu1 %v17447_v4  ;;  %519 = vmatprep.mubr.f32.mxu0 %v17447_v4  ;;  %v387_v13 = vld [vmem:[%s17428_s2 + $0x80] sm:$0xff]  ;;  %vm393_vm1 = vcmask 97280   ;;  %v10308_v14 = vld [vmem:[%s17427_s5 + $0x14] ss:$8 sps:$4 sm:$0xff]   ;;  %v388_v17 = vld [vmem:[%s17428_s2 + $0x88] sm:$0xff] }
   0x3   :  { %s17847_s26 = sld [smem:[#allocation226_spill]]  ;;  %v10306_v16 = vld [vmem:[%s17427_s5 + $0x10] ss:$8 sps:$4 sm:$0xff]   ;;  %v10311_v18 = vld [vmem:[%s17427_s5 + $0x4] ss:$8 sps:$4 sm:$0xff]   ;;  %v11170_v62 = vand.u32 127, %v84_v57 }
   0x4   :  { %s17848_s30 = sld [smem:[#allocation227_spill]]  ;;  %v371_v20 = vld [vmem:[%s17428_s2] sm:$0xff]  ;;  %v372_v23 = vld [vmem:[%s17428_s2 + $0x8] sm:$0xff]  ;;  %v373_v25 = vld [vmem:[%s17428_s2 + $0x10] sm:$0xff]  ;;  %vm658_vm12 = vcmask 392192  }
   0x5   :  { %v10309_v22 = vld [vmem:[%s17427_s5] ss:$8 sps:$4 sm:$0xff]   ;;  %v374_v27 = vld [vmem:[%s17428_s2 + $0x18] sm:$0xff]  ;;  %v377_v38 = vld [vmem:[%s17428_s2 + $0x30] sm:$0xff]  ;;  %17849 = vst [vmem:[#allocation2_spill] sm:$0xff] %v11170_v62 }
   0x6   :  { %v375_v32 = vld [vmem:[%s17428_s2 + $0x20] sm:$0xff]  ;;  %v376_v33 = vld [vmem:[%s17428_s2 + $0x28] sm:$0xff]  ;;  %v378_v40 = vld [vmem:[%s17428_s2 + $0x38] sm:$0xff] }
   0x7   :  { %v1501_v42 = vld [vmem:[%s17429_s3 + $0x8] sm:$0xff]  ;;  %v1504_v43 = vld [vmem:[%s17429_s3 + $0x20] sm:$0xff]  ;;  %v1506_v45 = vld [vmem:[%s17429_s3 + $0x30] sm:$0xff] }
   0x8   :  { %v379_v44 = vld [vmem:[%s17428_s2 + $0x40] sm:$0xff]  ;;  %v380_v46 = vld [vmem:[%s17428_s2 + $0x48] sm:$0xff]  ;;  %v1510_v48 = vld [vmem:[%s17429_s3 + $0x50] sm:$0xff] }
   0x9   :  { %v66_v2 = vld [vmem:[%s17847_s26] sm:$0xff]  ;;  %v67_v3 = vld [vmem:[%s17847_s26 + $0x8] sm:$0xff]  ;;  %v68_v9 = vld [vmem:[%s17847_s26 + $0x10] sm:$0xff] }
   0xa   :  { %159 = vperm.xlu1 %10270, %v66_v2   ;;  %87 = vperm.xlu0 %10269, %v66_v2   ;;  %v392_v6 = vld [vmem:[%s17848_s30 + $0x18] sm:$0xf]  ;;  %v391_v7 = vld [vmem:[%s17848_s30 + $0x10] sm:$0xf]  ;;  %v390_v8 = vld [vmem:[%s17848_s30 + $0x8] sm:$0xff] }
   0xb   :  { %10259 = vmatprep.subr.msk.mxu1 %vm448_vm0, %v392_v6  ;;  %9038 = vmatprep.subr.msk.mxu0 %vm448_vm0, %v392_v6  ;;  %v389_v10 = vld [vmem:[%s17848_s30] sm:$0xff]  ;;  %v72_v19 = vld [vmem:[%s17847_s26 + $0x30] sm:$0xff]  ;;  %v69_v21 = vld [vmem:[%s17847_s26 + $0x18] sm:$0xff] }
   0xc   :  { %10261 = vmatpush1.msk.msra.mxu1 %vm448_vm0, %v391_v7  ;;  %9039 = vmatpush1.msk.msra.mxu0 %vm448_vm0, %v391_v7  ;;  %v70_v15 = vld [vmem:[%s17847_s26 + $0x20] sm:$0xff]  ;;  %v71_v24 = vld [vmem:[%s17847_s26 + $0x28] sm:$0xff]  ;;  %v73_v26 = vld [vmem:[%s17847_s26 + $0x38] sm:$0xff] }
   0xd   :  { %10260 = vmatprep.subr.mxu1 %v390_v8  ;;  %485 = vmatprep.subr.mxu0 %v390_v8  ;;  %v75_v28 = vld [vmem:[%s17847_s26 + $0x48] sm:$0xff]  ;;  %v11022_v29 = vld [vmem:[%s17847_s26 + $0x58] sm:$0xff]  ;;  %v74_v31 = vld [vmem:[%s17847_s26 + $0x40] sm:$0xff] }
   0xe   :  { %162 = vperm.xlu1 %10270, %v67_v3   ;;  %90 = vperm.xlu0 %10269, %v67_v3   ;;  %v11028_v30 = vld [vmem:[%s17847_s26 + $0x68] sm:$0xff]  ;;  %v76_v34 = vld [vmem:[%s17847_s26 + $0x50] sm:$0xff]  ;;  %v11054_v35 = vld [vmem:[%s17847_s26 + $0x60] sm:$0xff] }
   0xf   :  { %10262 = vmatpush1.msra.mxu1 %v389_v10  ;;  %486 = vmatpush1.msra.mxu0 %v389_v10  ;;  %v11060_v36 = vld [vmem:[%s17847_s26 + $0x70] sm:$0xff]  ;;  %v11067_v37 = vld [vmem:[%s17847_s26 + $0x78] sm:$0xff]  ;;  %v11078_v39 = vld [vmem:[%s17847_s26 + $0x88] sm:$0xff] }
  0x10   :  { %696 = vmatprep.subr.bf16.mxu1 %v10305_v12  ;;  %9056 = vmatmul.mubr.msk.f32.vlgmr.msra.gmra.mxu1 %vm393_vm1, %v387_v13  ;;  %v11091_v41 = vld [vmem:[%s17847_s26 + $0x80] sm:$0xff]  ;;  %v1514_v50 = vld [vmem:[%s17429_s3 + $0x70] sm:$0xff]  ;;  %v382_v53 = vld [vmem:[%s17428_s2 + $0x58] sm:$0xff] }
  0x11   :  { %697 = vmatpush1.bf16.msra.mxu1 %v10303_v11  ;;  %621 = vmatprep.mubr.f32.mxu1 %v17447_v4  ;;  %v1508_v47 = vld [vmem:[%s17429_s3 + $0x40] sm:$0xff]  ;;  %v381_v51 = vld [vmem:[%s17428_s2 + $0x50] sm:$0xff]  ;;  %v384_v6 = vld [vmem:[%s17428_s2 + $0x68] sm:$0xff] }
  0x12   :  { %10272 = vset.pattern.permute.xlu1 %v10822_v5  ;;  %10271 = vset.pattern.permute.xlu0 %v10822_v5  ;;  %v1512_v49 = vld [vmem:[%s17429_s3 + $0x60] sm:$0xff]  ;;  %v1518_v54 = vld [vmem:[%s17429_s3 + $0x90] sm:$0xff] }
  0x13   :  { %252 = vperm.xlu1 %10272, %v67_v3   ;;  %249 = vperm.xlu0 %10271, %v66_v2   ;;  %v1516_v52 = vld [vmem:[%s17429_s3 + $0x80] sm:$0xff]  ;;  %v1522_v56 = vld [vmem:[%s17429_s3 + $0xb0] sm:$0xff] }
  0x14   :  { %698 = vmatprep.subr.bf16.mxu1 %v10308_v14  ;;  %9057 = vmatmul.mubr.msk.f32.gmra.mxu1 %vm393_vm1, %v388_v17  ;;  %v1520_v55 = vld [vmem:[%s17429_s3 + $0xa0] sm:$0xff]  ;;  %v1526_v3 = vld [vmem:[%s17429_s3 + $0xd0] sm:$0xff]  ;;  %v10312_v14 = vld [vmem:[%s17430_s8 + $0x38] sm:$0xff]  }
  0x15   :  { %699 = vmatpush1.bf16.msra.mxu1 %v10306_v16  ;;  %718 = vmatprep.mubr.bf16.mxu1 %v17445_v1  ;;  %v1524_v60 = vld [vmem:[%s17429_s3 + $0xc0] sm:$0xff]  ;;  %v1530_v11 = vld [vmem:[%s17429_s3 + $0xf0] sm:$0xff] }
  0x16   :  { %700 = vmatprep.subr.bf16.mxu1 %v10311_v18  ;;  %9040 = vmatmul.mubr.msk.f32.vlgmr.msra.gmra.mxu0 %vm393_vm1, %v371_v20  ;;  %v383_v61 = vld [vmem:[%s17428_s2 + $0x60] sm:$0xff] }
  0x17   :  { %10273 = vset.pattern.permute.xlu1 %v17445_v1  ;;  %255 = vperm.xlu0 %10271, %v68_v9   ;;  %v1528_v7 = vld [vmem:[%s17429_s3 + $0xe0] sm:$0xff] }
  0x18   :  { %93 = vperm.xlu1 %10273, %v68_v9   ;;  %525 = vmatprep.mubr.f32.mxu0 %v17447_v4  ;;  %v1532_v17 = vld [vmem:[%s17429_s3 + $0x100] sm:$0xff] }
  0x19   :  { %701 = vmatpush1.bf16.msra.mxu1 %v10309_v22  ;;  %v385_v22 = vld [vmem:[%s17428_s2 + $0x70] sm:$0xff] }
  0x1a   :  { %3752 = vmatprep.subr.bf16.mxu1 %v17445_v1  ;;  %9041 = vmatmul.mubr.msk.f32.gmra.mxu0 %vm393_vm1, %v372_v23 }
  0x1b   :  { %261 = vperm.xlu0 %10271, %v70_v15   ;;  %531 = vmatprep.mubr.f32.mxu0 %v17447_v4 }
  0x1c   :  { %10274 = vset.pattern.permute.xlu1 %v10819_v0 }
  0x1d   :  { %165 = vperm.xlu1 %10274, %v68_v9  }
  0x1e   :  { %9042 = vmatmul.mubr.msk.f32.gmra.mxu0 %vm393_vm1, %v373_v25 }
  0x1f   :  { %267 = vperm.xlu0 %10271, %v72_v19   ;;  %537 = vmatprep.mubr.f32.mxu0 %v17447_v4 }
  0x21   :  { %168 = vperm.xlu1 %10274, %v69_v21  }
  0x22   :  { %9043 = vmatmul.mubr.msk.f32.gmra.mxu0 %vm393_vm1, %v374_v27  ;;  %v386_v27 = vld [vmem:[%s17428_s2 + $0x78] sm:$0xff] }
  0x23   :  { %10281 = vset.pattern.permute.xlu0 %v17445_v1  ;;  %543 = vmatprep.mubr.f32.mxu0 %v17447_v4 }
  0x24   :  { %96 = vperm.xlu0 %10281, %v69_v21  }
  0x25   :  { %10275 = vset.pattern.permute.xlu1 %v10822_v5 }
  0x26   :  { %258 = vperm.xlu1 %10275, %v69_v21   ;;  %9044 = vmatmul.mubr.msk.f32.gmra.mxu0 %vm393_vm1, %v375_v32  ;;  %v1534_v21 = vld [vmem:[%s17429_s3 + $0x110] sm:$0xff] }
  0x27   :  { %549 = vmatprep.mubr.f32.mxu0 %v17447_v4  ;;  %v1538_v32 = vld [vmem:[%s17429_s3 + $0x130] sm:$0xff] }
  0x28   :  { %102 = vperm.xlu0 %10281, %v71_v24  }
  0x2a   :  { %10276 = vset.pattern.permute.xlu1 %v17445_v1  ;;  %9045 = vmatmul.mubr.msk.f32.gmra.mxu0 %vm393_vm1, %v376_v33  ;;  %v10316_v33 = vld [vmem:[%s17430_s8 + $0x18] sm:$0xff]  }
  0x2b   :  { %99 = vperm.xlu1 %10276, %v70_v15   ;;  %555 = vmatprep.mubr.f32.mxu0 %v17447_v4 }
  0x2c   :  { %108 = vperm.xlu0 %10281, %v73_v26  }
  0x2e   :  { %9046 = vmatmul.mubr.msk.f32.gmra.mxu0 %vm393_vm1, %v377_v38  ;;  %v10317_v38 = vld [vmem:[%s17430_s8 + $0x10] sm:$0xff]  }
  0x2f   :  { %10277 = vset.pattern.permute.xlu1 %v10819_v0  ;;  %561 = vmatprep.mubr.f32.mxu0 %v17447_v4 }
  0x30   :  { %171 = vperm.xlu1 %10277, %v70_v15   ;;  %114 = vperm.xlu0 %10281, %v75_v28  }
  0x32   :  { %9047 = vmatmul.mubr.msk.f32.gmra.mxu0 %vm393_vm1, %v378_v40  ;;  %v10326_v40 = vld [vmem:[%s17431_s7 + $0x74] ss:$8 sps:$4 sm:$0xff]  }
  0x33   :  { %567 = vmatprep.mubr.f32.mxu0 %v17447_v4  ;;  %1113 = vmatprep.subr.bf16.mxu0 %v10326_v40 }
  0x34   :  { %174 = vperm.xlu1 %10277, %v71_v24   ;;  %120 = vperm.xlu0 %10281, %v11022_v29  }
  0x36   :  { %9048 = vmatmul.mubr.msk.f32.gmra.mxu0 %vm393_vm1, %v379_v44  ;;  %v10318_v44 = vld [vmem:[%s17430_s8 + $0x8] sm:$0xff]  }
  0x37   :  { %573 = vmatprep.mubr.f32.mxu0 %v17447_v4 }
  0x38   :  { %10278 = vset.pattern.permute.xlu1 %v10822_v5  ;;  %126 = vperm.xlu0 %10281, %v11028_v30  }
  0x39   :  { %264 = vperm.xlu1 %10278, %v71_v24   ;;  %v10314_v24 = vld [vmem:[%s17430_s8 + $0x28] sm:$0xff]  }
  0x3a   :  { %9049 = vmatmul.mubr.msk.f32.gmra.mxu0 %vm393_vm1, %v380_v46  ;;  %v10330_v46 = vld [vmem:[%s17431_s7 + $0x64] ss:$8 sps:$4 sm:$0xff]  }
  0x3b   :  { %579 = vmatprep.mubr.f32.mxu0 %v17447_v4 }
  0x3c   :  { %10290 = vset.pattern.permute.xlu0 %v10822_v5 }
  0x3d   :  { %10279 = vset.pattern.permute.xlu1 %v17445_v1  ;;  %273 = vperm.xlu0 %10290, %v74_v31  }
  0x3e   :  { %105 = vperm.xlu1 %10279, %v72_v19   ;;  %9050 = vmatmul.mubr.msk.f32.gmra.mxu0 %vm393_vm1, %v381_v51  ;;  %v10334_v51 = vld [vmem:[%s17431_s7 + $0x54] ss:$8 sps:$4 sm:$0xff]  }
  0x3f   :  { %585 = vmatprep.mubr.f32.mxu0 %v17447_v4 }
  0x41   :  { %279 = vperm.xlu0 %10290, %v76_v34  }
  0x42   :  { %10280 = vset.pattern.permute.xlu1 %v10819_v0  ;;  %9051 = vmatmul.mubr.msk.f32.gmra.mxu0 %vm393_vm1, %v382_v53 }
  0x43   :  { %177 = vperm.xlu1 %10280, %v72_v19   ;;  %591 = vmatprep.mubr.f32.mxu0 %v17447_v4  ;;  %v10313_v19 = vld [vmem:[%s17430_s8 + $0x30] sm:$0xff]  }
  0x45   :  { %285 = vperm.xlu0 %10290, %v11054_v35  }
  0x46   :  { %9052 = vmatmul.mubr.msk.f32.gmra.mxu0 %vm393_vm1, %v383_v61 }
  0x47   :  { %180 = vperm.xlu1 %10280, %v73_v26   ;;  %597 = vmatprep.mubr.f32.mxu0 %v17447_v4 }
  0x49   :  { %291 = vperm.xlu0 %10290, %v11060_v36  }
  0x4a   :  { %9053 = vmatmul.mubr.msk.f32.gmra.mxu0 %vm393_vm1, %v384_v6  ;;  %v10336_v6 = vld [vmem:[%s17431_s7 + $0x40] ss:$8 sps:$4 sm:$0xff]  }
  0x4b   :  { %10282 = vset.pattern.permute.xlu1 %v10822_v5  ;;  %603 = vmatprep.mubr.f32.mxu0 %v17447_v4 }
  0x4c   :  { %270 = vperm.xlu1 %10282, %v73_v26   ;;  %v1536_v26 = vld [vmem:[%s17429_s3 + $0x120] sm:$0xff] }
  0x4d   :  { %10295 = vset.pattern.permute.xlu0 %v17445_v1 }
  0x4e   :  { %132 = vperm.xlu0 %10295, %v11067_v37   ;;  %9054 = vmatmul.mubr.msk.f32.gmra.mxu0 %vm393_vm1, %v385_v22  ;;  %v10343_v22 = vld [vmem:[%s17431_s7 + $0x20] ss:$8 sps:$4 sm:$0xff]  }
  0x4f   :  { %609 = vmatprep.mubr.f32.mxu0 %v17447_v4 }
  0x50   :  { %10283 = vset.pattern.permute.xlu1 %v17445_v1 }
  0x51   :  { %111 = vperm.xlu1 %10283, %v74_v31  }
  0x52   :  { %138 = vperm.xlu0 %10295, %v11078_v39   ;;  %9055 = vmatmul.mubr.msk.f32.gmra.mxu0 %vm393_vm1, %v386_v27 }
  0x55   :  { %10284 = vset.pattern.permute.xlu1 %v10819_v0 }
  0x56   :  { %183 = vperm.xlu1 %10284, %v74_v31   ;;  %10299 = vset.pattern.permute.xlu0 %v10822_v5 }
  0x57   :  { %297 = vperm.xlu0 %10299, %v11091_v41  }
  0x5a   :  { %186 = vperm.xlu1 %10284, %v75_v28  }
  0x5b   :  { %10302 = vset.pattern.permute.xlu0 %v17445_v1 }
  0x5c   :  { %1667 = vperm.xlu0 %10302, %v1501_v42  }
  0x5e   :  { %10285 = vset.pattern.permute.xlu1 %v10822_v5 }
  0x5f   :  { %276 = vperm.xlu1 %10285, %v75_v28   ;;  %v10315_v28 = vld [vmem:[%s17430_s8 + $0x20] sm:$0xff]  }
  0x60   :  { %1676 = vperm.xlu0 %10302, %v1504_v43   ;;  %v1542_v43 = vld [vmem:[%s17429_s3 + $0x150] sm:$0xff] }
  0x63   :  { %10286 = vset.pattern.permute.xlu1 %v17445_v1 }
  0x64   :  { %117 = vperm.xlu1 %10286, %v76_v34   ;;  %1682 = vperm.xlu0 %10302, %v1506_v45   ;;  %v10324_v45 = vld [vmem:[%s17431_s7 + $0x70] ss:$8 sps:$4 sm:$0xff]  }
  0x65   :  { %1114 = vmatpush1.bf16.msra.mxu0 %v10324_v45  ;;  %v10352_v45 = vld [vmem:[%s17431_s7 + $0xf0] ss:$8 sps:$4 sm:$0xff]  }
  0x66   :  { %1115 = vmatprep.subr.bf16.mxu0 %v10330_v46 }
  0x68   :  { %10287 = vset.pattern.permute.xlu1 %v10819_v0  ;;  %1688 = vperm.xlu0 %10302, %v1508_v47  }
  0x69   :  { %189 = vperm.xlu1 %10287, %v76_v34  }
  0x6c   :  { %1694 = vperm.xlu0 %10302, %v1510_v48  }
  0x6d   :  { %192 = vperm.xlu1 %10287, %v11022_v29  }
  0x70   :  { %1700 = vperm.xlu0 %10302, %v1512_v49   ;;  %v1500_v49 = vld [vmem:[%s17429_s3] sm:$0xff] }
  0x71   :  { %10288 = vset.pattern.permute.xlu1 %v10822_v5 }
  0x72   :  { %282 = vperm.xlu1 %10288, %v11022_v29  }
  0x74   :  { %1706 = vperm.xlu0 %10302, %v1514_v50   ;;  %v1544_v50 = vld [vmem:[%s17429_s3 + $0x160] sm:$0xff] }
  0x76   :  { %10289 = vset.pattern.permute.xlu1 %v17445_v1 }
  0x77   :  { %123 = vperm.xlu1 %10289, %v11054_v35  }
  0x78   :  { %1712 = vperm.xlu0 %10302, %v1516_v52  }
  0x7b   :  { %10291 = vset.pattern.permute.xlu1 %v10819_v0 }
  0x7c   :  { %195 = vperm.xlu1 %10291, %v11054_v35   ;;  %1718 = vperm.xlu0 %10302, %v1518_v54   ;;  %v1502_v54 = vld [vmem:[%s17429_s3 + $0x10] sm:$0xff] }
  0x80   :  { %198 = vperm.xlu1 %10291, %v11028_v30   ;;  %1724 = vperm.xlu0 %10302, %v1520_v55   ;;  %v1546_v55 = vld [vmem:[%s17429_s3 + $0x170] sm:$0xff] }
  0x84   :  { %10292 = vset.pattern.permute.xlu1 %v10822_v5  ;;  %1730 = vperm.xlu0 %10302, %v1522_v56   ;;  %v10320_v56 = vld [vmem:[%s17430_s8 + $0x78] sm:$0xff]  }
  0x85   :  { %288 = vperm.xlu1 %10292, %v11028_v30   ;;  %v160_v58 = vpop.permute.xlu1 %159  ;;  %v88_v59 = vpop.permute.xlu0 %87  ;;  %v10346_v30 = vld [vmem:[%s17431_s7 + $0x10] ss:$8 sps:$4 sm:$0xff]  }
  0x86   :  { %vm212_vm2 = vcmp.eq.s32.totalorder %v11170_v62, %v160_v58  ;;  %vm140_vm3 = vcmp.eq.s32.totalorder %v11170_v62, %v88_v59  ;;  %v10332_v58 = vld [vmem:[%s17431_s7 + $0x50] ss:$8 sps:$4 sm:$0xff]   ;;  %v10338_v59 = vld [vmem:[%s17431_s7 + $0x44] ss:$8 sps:$4 sm:$0xff]  }
  0x87   :  { %vm230_vm6 = vmor %vm140_vm3, %vm212_vm2 }
  0x88   :  { %1736 = vperm.xlu0 %10302, %v1524_v60  }
  0x89   :  { %10293 = vset.pattern.permute.xlu1 %v17445_v1  ;;  %v163_v63 = vpop.permute.xlu1 %162  ;;  %v91_v2 = vpop.permute.xlu0 %90 }
  0x8a   :  { %129 = vperm.xlu1 %10293, %v11060_v36   ;;  %vm213_vm4 = vcmp.eq.s32.totalorder %v11170_v62, %v163_v63  ;;  %vm141_vm5 = vcmp.eq.s32.totalorder %v11170_v62, %v91_v2  ;;  %v1503_v63 = vld [vmem:[%s17429_s3 + $0x18] sm:$0xff]  ;;  %v1548_v2 = vld [vmem:[%s17429_s3 + $0x180] sm:$0xff] }
  0x8b   :  { %vm231_vm7 = vmor %vm141_vm5, %vm213_vm4 }
  0x8c   :  { %1742 = vperm.xlu0 %10302, %v1526_v3  }
  0x8e   :  { %10294 = vset.pattern.permute.xlu1 %v10819_v0  ;;  %v253_v8 = vpop.permute.xlu1 %252  ;;  %v250_v9 = vpop.permute.xlu0 %249 }
  0x8f   :  { %vm303_vm8 = vcmp.eq.s32.totalorder %v11170_v62, %v253_v8  ;;  %vm302_vm9 = vcmp.eq.s32.totalorder %v11170_v62, %v250_v9  ;;  %201 = vperm.xlu1 %10294, %v11060_v36   ;;  %v1540_v36 = vld [vmem:[%s17429_s3 + $0x140] sm:$0xff] }
  0x90   :  { %vm321_vm10 = vmor %vm231_vm7, %vm303_vm8  ;;  %1748 = vperm.xlu0 %10302, %v1528_v7   ;;  %v10342_v7 = vld [vmem:[%s17431_s7 + $0x34] ss:$8 sps:$4 sm:$0xff]  }
  0x91   :  { %v339_v10 = vsel %vm321_vm10, 1.0, %v17447_v4  ;;  %vm320_vm11 = vmor %vm230_vm6, %vm302_vm9 }
  0x92   :  { %v338_v12 = vsel %vm320_vm11, 1.0, %v17447_v4  ;;  %v256_v13 = vpop.permute.xlu0 %255 }
  0x93   :  { %v356_v15 = vpack.c.bf16 %v339_v10, %v338_v12  ;;  %204 = vperm.xlu1 %10294, %v11067_v37   ;;  %v94_v16 = vpop.permute.xlu1 %93  ;;  %vm304_vm15 = vcmp.eq.s32.totalorder %v11170_v62, %v256_v13  ;;  %v10321_v10 = vld [vmem:[%s17430_s8 + $0x70] sm:$0xff]  }
  0x94   :  { %1754 = vperm.xlu0 %10302, %v1530_v11   ;;  %vm142_vm14 = vcmp.eq.s32.totalorder %v11170_v62, %v94_v16  ;;  %v10340_v16 = vld [vmem:[%s17431_s7 + $0x30] ss:$8 sps:$4 sm:$0xff]  }
  0x95   :  { %9064 = vmatmul.mubr.msk.bf16.vlgmr.msra.gmra.mxu1 %vm658_vm12, %v356_v15  ;;  %v1550_v15 = vld [vmem:[%s17429_s3 + $0x190] sm:$0xff] }
  0x96   :  { %v11208_v18 = vpop.permute.xlu0 %261  ;;  %728 = vmatprep.mubr.bf16.mxu1 %v17445_v1  ;;  %3753 = vmatpush1.bf16.msra.mxu1 %v10312_v14  ;;  %v1505_v14 = vld [vmem:[%s17429_s3 + $0x28] sm:$0xff] }
  0x97   :  { %10296 = vset.pattern.permute.xlu1 %v10822_v5  ;;  %3754 = vmatprep.subr.bf16.mxu1 %v17445_v1  ;;  %vm306_vm9 = vcmp.eq.s32.totalorder %v11170_v62, %v11208_v18  ;;  %v10322_v18 = vld [vmem:[%s17430_s8 + $0x68] sm:$0xff]  }
  0x98   :  { %294 = vperm.xlu1 %10296, %v11067_v37   ;;  %v166_v20 = vpop.permute.xlu1 %165  ;;  %1760 = vperm.xlu0 %10302, %v1532_v17   ;;  %v10345_v17 = vld [vmem:[%s17431_s7 + $0x24] ss:$8 sps:$4 sm:$0xff]  }
  0x99   :  { %vm214_vm13 = vcmp.eq.s32.totalorder %v11170_v62, %v166_v20  ;;  %v1507_v20 = vld [vmem:[%s17429_s3 + $0x38] sm:$0xff] }
  0x9a   :  { %v11224_v23 = vpop.permute.xlu0 %267  ;;  %3755 = vmatpush1.bf16.msra.mxu1 %v10313_v19  ;;  %vm232_vm0 = vmor %vm142_vm14, %vm214_vm13 }
  0x9b   :  { %3756 = vmatprep.subr.bf16.mxu1 %v17445_v1  ;;  %vm11247_vm2 = vmor %vm232_vm0, %vm304_vm15 }
  0x9c   :  { %10297 = vset.pattern.permute.xlu1 %v17445_v1  ;;  %v169_v25 = vpop.permute.xlu1 %168  ;;  %1766 = vperm.xlu0 %10302, %v1534_v21   ;;  %v1552_v21 = vld [vmem:[%s17429_s3 + $0x1a0] sm:$0xff] }
  0x9d   :  { %135 = vperm.xlu1 %10297, %v11091_v41   ;;  %vm215_vm3 = vcmp.eq.s32.totalorder %v11170_v62, %v169_v25  ;;  %v10348_v25 = vld [vmem:[%s17431_s7 + $0x14] ss:$8 sps:$4 sm:$0xff]  }
  0x9e   :  { %3757 = vmatpush1.bf16.msra.mxu1 %v10314_v24 }
  0x9f   :  { %v97_v29 = vpop.permute.xlu0 %96  ;;  %3758 = vmatprep.subr.bf16.mxu1 %v17445_v1 }
  0xa0   :  { %vm143_vm4 = vcmp.eq.s32.totalorder %v11170_v62, %v97_v29  ;;  %1772 = vperm.xlu0 %10302, %v1536_v26   ;;  %v10323_v26 = vld [vmem:[%s17430_s8 + $0x60] sm:$0xff]   ;;  %v1554_v29 = vld [vmem:[%s17429_s3 + $0x1b0] sm:$0xff] }
  0xa1   :  { %vm233_vm5 = vmor %vm143_vm4, %vm215_vm3  ;;  %10298 = vset.pattern.permute.xlu1 %v10819_v0  ;;  %v259_v31 = vpop.permute.xlu1 %258  ;;  %v340_v0 = vsel %vm11247_vm2, 1.0, %v17447_v4 }
  0xa2   :  { %vm305_vm1 = vcmp.eq.s32.totalorder %v11170_v62, %v259_v31  ;;  %207 = vperm.xlu1 %10298, %v11091_v41   ;;  %3759 = vmatpush1.bf16.msra.mxu1 %v10315_v28  ;;  %v1509_v28 = vld [vmem:[%s17429_s3 + $0x48] sm:$0xff] }
  0xa3   :  { %vm323_vm6 = vmor %vm233_vm5, %vm305_vm1  ;;  %v103_v34 = vpop.permute.xlu0 %102  ;;  %3760 = vmatprep.subr.bf16.mxu1 %v17445_v1  ;;  %vm308_vm5 = vcmp.eq.s32.totalorder %v11170_v62, %v11224_v23  ;;  %v10349_v23 = vld [vmem:[%s17431_s7] ss:$8 sps:$4 sm:$0xff]  }
  0xa4   :  { %v341_v35 = vsel %vm323_vm6, 1.0, %v17447_v4  ;;  %1778 = vperm.xlu0 %10302, %v1538_v32   ;;  %vm145_vm11 = vcmp.eq.s32.totalorder %v11170_v62, %v103_v34  ;;  %v10351_v32 = vld [vmem:[%s17431_s7 + $0x4] ss:$8 sps:$4 sm:$0xff]  }
  0xa5   :  { %v357_v37 = vpack.c.bf16 %v341_v35, %v340_v0  ;;  %v1511_v0 = vld [vmem:[%s17429_s3 + $0x58] sm:$0xff]  ;;  %v1556_v35 = vld [vmem:[%s17429_s3 + $0x1c0] sm:$0xff] }
  0xa6   :  { %210 = vperm.xlu1 %10298, %v11078_v39   ;;  %v100_v41 = vpop.permute.xlu1 %99  ;;  %3761 = vmatpush1.bf16.msra.mxu1 %v10316_v33  ;;  %v10327_v33 = vld [vmem:[%s17430_s8 + $0x58] sm:$0xff]  }
  0xa7   :  { %9065 = vmatmul.mubr.msk.bf16.gmra.mxu1 %vm658_vm12, %v357_v37  ;;  %v11278_v42 = vpop.permute.xlu0 %108  ;;  %3762 = vmatprep.subr.bf16.mxu1 %v17445_v1  ;;  %vm144_vm8 = vcmp.eq.s32.totalorder %v11170_v62, %v100_v41  ;;  %v1513_v41 = vld [vmem:[%s17429_s3 + $0x68] sm:$0xff] }
  0xa8   :  { %1784 = vperm.xlu0 %10302, %v1540_v36   ;;  %738 = vmatprep.mubr.bf16.mxu1 %v17445_v1  ;;  %vm147_vm6 = vcmp.eq.s32.totalorder %v11170_v62, %v11278_v42  ;;  %v10354_v36 = vld [vmem:[%s17431_s7 + $0xf4] ss:$8 sps:$4 sm:$0xff]  }
  0xa9   :  { %v1558_v42 = vld [vmem:[%s17429_s3 + $0x1d0] sm:$0xff] }
  0xaa   :  { %10300 = vset.pattern.permute.xlu1 %v10822_v5  ;;  %3763 = vmatpush1.bf16.msra.mxu1 %v10317_v38  ;;  %v10319_v5 = vld [vmem:[%s17430_s8] sm:$0xff]   ;;  %v10331_v38 = vld [vmem:[%s17430_s8 + $0x50] sm:$0xff]  }
  0xab   :  { %300 = vperm.xlu1 %10300, %v11078_v39   ;;  %v172_v47 = vpop.permute.xlu1 %171  ;;  %v11296_v48 = vpop.permute.xlu0 %114  ;;  %3764 = vmatprep.subr.bf16.mxu1 %v17445_v1  ;;  %v10328_v39 = vld [vmem:[%s17431_s7 + $0x60] ss:$8 sps:$4 sm:$0xff]  }
  0xac   :  { %1790 = vperm.xlu0 %10302, %v1542_v43   ;;  %vm216_vm7 = vcmp.eq.s32.totalorder %v11170_v62, %v172_v47  ;;  %1116 = vmatpush1.bf16.msra.mxu0 %v10328_v39  ;;  %v10335_v47 = vld [vmem:[%s17430_s8 + $0x48] sm:$0xff]   ;;  %v1515_v39 = vld [vmem:[%s17429_s3 + $0x78] sm:$0xff] }
  0xad   :  { %vm234_vm10 = vmor %vm144_vm8, %vm216_vm7  ;;  %1117 = vmatprep.subr.bf16.mxu0 %v10334_v51  ;;  %v1560_v51 = vld [vmem:[%s17429_s3 + $0x1e0] sm:$0xff] }
  0xae   :  { %3765 = vmatpush1.bf16.msra.mxu1 %v10318_v44  ;;  %vm11339_vm14 = vmor %vm234_vm10, %vm306_vm9 }
  0xaf   :  { %10301 = vset.pattern.permute.xlu1 %v17445_v1  ;;  %v175_v52 = vpop.permute.xlu1 %174  ;;  %v11317_v53 = vpop.permute.xlu0 %120  ;;  %3766 = vmatprep.subr.bf16.mxu1 %v17445_v1  ;;  %v342_v8 = vsel %vm11339_vm14, 1.0, %v17447_v4 }
  0xb0   :  { %1664 = vperm.xlu1 %10301, %v1500_v49   ;;  %1796 = vperm.xlu0 %10302, %v1544_v50   ;;  %vm217_vm13 = vcmp.eq.s32.totalorder %v11170_v62, %v175_v52  ;;  %v10357_v49 = vld [vmem:[%s17431_s7 + $0xe4] ss:$8 sps:$4 sm:$0xff]   ;;  %v10355_v52 = vld [vmem:[%s17431_s7 + $0xe0] ss:$8 sps:$4 sm:$0xff]  }
  0xb1   :  { %vm235_vm15 = vmor %vm145_vm11, %vm217_vm13  ;;  %1118 = vmatpush1.bf16.msra.mxu0 %v10332_v58  ;;  %v1517_v58 = vld [vmem:[%s17429_s3 + $0x88] sm:$0xff] }
  0xb2   :  { %3767 = vmatpush1.bf16.msra.mxu1 %v10319_v5  ;;  %1119 = vmatprep.subr.bf16.mxu0 %v10338_v59  ;;  %v1562_v59 = vld [vmem:[%s17429_s3 + $0x1f0] sm:$0xff] }
  0xb3   :  { %v11343_v61 = vpop.permute.xlu0 %126  ;;  %3768 = vmatprep.subr.bf16.mxu1 %v17445_v1 }
  0xb4   :  { %1670 = vperm.xlu1 %10301, %v1502_v54   ;;  %v265_v3 = vpop.permute.xlu1 %264  ;;  %1802 = vperm.xlu0 %10302, %v1546_v55   ;;  %v10339_v54 = vld [vmem:[%s17430_s8 + $0x40] sm:$0xff]   ;;  %v10360_v55 = vld [vmem:[%s17431_s7 + $0xd4] ss:$8 sps:$4 sm:$0xff]  }
  0xb5   :  { %vm307_vm0 = vcmp.eq.s32.totalorder %v11170_v62, %v265_v3  ;;  %1120 = vmatpush1.bf16.msra.mxu0 %v10336_v6  ;;  %v1519_v6 = vld [vmem:[%s17429_s3 + $0x98] sm:$0xff] }
  0xb6   :  { %vm325_vm2 = vmor %vm235_vm15, %vm307_vm0  ;;  %3769 = vmatpush2.bf16.msra.mxu1 %v10320_v56  ;;  %1121 = vmatprep.subr.bf16.mxu0 %v10342_v7  ;;  %v1564_v7 = vld [vmem:[%s17429_s3 + $0x200] sm:$0xff] }
  0xb7   :  { %v343_v9 = vsel %vm325_vm2, 1.0, %v17447_v4  ;;  %3770 = vmatprep.subr.bf16.mxu1 %v17445_v1  ;;  %vm149_vm2 = vcmp.eq.s32.totalorder %v11170_v62, %v11296_v48 }
  0xb8   :  { %v358_v11 = vpack.c.bf16 %v343_v9, %v342_v8  ;;  %1673 = vperm.xlu1 %10301, %v1503_v63   ;;  %1808 = vperm.xlu0 %10302, %v1548_v2   ;;  %v11367_v12 = vpop.permute.xlu0 %273  ;;  %v10358_v63 = vld [vmem:[%s17431_s7 + $0xd0] ss:$8 sps:$4 sm:$0xff]   ;;  %v10363_v2 = vld [vmem:[%s17431_s7 + $0xc4] ss:$8 sps:$4 sm:$0xff]   ;;  %v10361_v8 = vld [vmem:[%s17431_s7 + $0xc0] ss:$8 sps:$4 sm:$0xff]  }
  0xb9   :  { %v106_v13 = vpop.permute.xlu1 %105  ;;  %1122 = vmatpush1.bf16.msra.mxu0 %v10340_v16  ;;  %vm310_vm15 = vcmp.eq.s32.totalorder %v11170_v62, %v11367_v12  ;;  %v1566_v12 = vld [vmem:[%s17429_s3 + $0x210] sm:$0xff] }
  0xba   :  { %9066 = vmatmul.mubr.msk.bf16.gmra.mxu1 %vm658_vm12, %v358_v11  ;;  %1123 = vmatprep.subr.bf16.mxu0 %v10345_v17  ;;  %vm146_vm4 = vcmp.eq.s32.totalorder %v11170_v62, %v106_v13  ;;  %v1521_v11 = vld [vmem:[%s17429_s3 + $0xa8] sm:$0xff] }
  0xbb   :  { %748 = vmatprep.mubr.bf16.mxu1 %v17445_v1  ;;  %3771 = vmatpush2.bf16.msra.mxu1 %v10321_v10  ;;  %v10366_v10 = vld [vmem:[%s17431_s7 + $0xb4] ss:$8 sps:$4 sm:$0xff]  }
  0xbc   :  { %1679 = vperm.xlu1 %10301, %v1505_v14   ;;  %1814 = vperm.xlu0 %10302, %v1550_v15   ;;  %v11386_v19 = vpop.permute.xlu0 %279  ;;  %v10364_v14 = vld [vmem:[%s17431_s7 + $0xb0] ss:$8 sps:$4 sm:$0xff]   ;;  %v10369_v15 = vld [vmem:[%s17431_s7 + $0xa4] ss:$8 sps:$4 sm:$0xff]  }
  0xbd   :  { %3772 = vmatprep.subr.bf16.mxu1 %v17445_v1  ;;  %1124 = vmatpush1.bf16.msra.mxu0 %v10343_v22  ;;  %v10367_v22 = vld [vmem:[%s17431_s7 + $0xa0] ss:$8 sps:$4 sm:$0xff]  }
  0xbe   :  { %v178_v24 = vpop.permute.xlu1 %177  ;;  %1125 = vmatprep.subr.bf16.mxu0 %v10348_v25 }
  0xbf   :  { %3773 = vmatpush2.bf16.msra.mxu1 %v10322_v18  ;;  %vm218_vm3 = vcmp.eq.s32.totalorder %v11170_v62, %v178_v24  ;;  %v1523_v18 = vld [vmem:[%s17429_s3 + $0xb8] sm:$0xff] }
  0xc0   :  { %1685 = vperm.xlu1 %10301, %v1507_v20   ;;  %1820 = vperm.xlu0 %10302, %v1552_v21   ;;  %v11404_v27 = vpop.permute.xlu0 %285  ;;  %vm236_vm1 = vmor %vm146_vm4, %vm218_vm3  ;;  %v1568_v20 = vld [vmem:[%s17429_s3 + $0x220] sm:$0xff] }
  0xc1   :  { %3774 = vmatprep.subr.bf16.mxu1 %v17445_v1  ;;  %1126 = vmatpush1.bf16.msra.mxu0 %v10346_v30  ;;  %vm326_vm8 = vmor %vm236_vm1, %vm308_vm5  ;;  %v10370_v30 = vld [vmem:[%s17431_s7 + $0x90] ss:$8 sps:$4 sm:$0xff]  }
  0xc2   :  { %v181_v31 = vpop.permute.xlu1 %180  ;;  %1127 = vmatprep.subr.bf16.mxu0 %v10351_v32  ;;  %v344_v43 = vsel %vm326_vm8, 1.0, %v17447_v4  ;;  %v10375_v32 = vld [vmem:[%s17431_s7 + $0x84] ss:$8 sps:$4 sm:$0xff]  }
  0xc3   :  { %3775 = vmatpush2.bf16.msra.mxu1 %v10323_v26  ;;  %vm219_vm7 = vcmp.eq.s32.totalorder %v11170_v62, %v181_v31  ;;  %v10372_v26 = vld [vmem:[%s17431_s7 + $0x94] ss:$8 sps:$4 sm:$0xff]  }
  0xc4   :  { %1691 = vperm.xlu1 %10301, %v1509_v28   ;;  %1826 = vperm.xlu0 %10302, %v1554_v29   ;;  %v11426_v34 = vpop.permute.xlu0 %291  ;;  %vm237_vm9 = vmor %vm147_vm6, %vm219_vm7  ;;  %v1525_v28 = vld [vmem:[%s17429_s3 + $0xc8] sm:$0xff]  ;;  %v1570_v29 = vld [vmem:[%s17429_s3 + $0x230] sm:$0xff] }
  0xc5   :  { %3776 = vmatprep.subr.bf16.mxu1 %v17445_v1  ;;  %1128 = vmatpush1.bf16.msra.mxu0 %v10349_v23  ;;  %v10373_v23 = vld [vmem:[%s17431_s7 + $0x80] ss:$8 sps:$4 sm:$0xff]  }
  0xc6   :  { %1129 = vmatprep.subr.bf16.mxu0 %v10354_v36 }
  0xc7   :  { %v271_v37 = vpop.permute.xlu1 %270  ;;  %3777 = vmatpush2.bf16.msra.mxu1 %v10327_v33 }
  0xc8   :  { %vm309_vm10 = vcmp.eq.s32.totalorder %v11170_v62, %v271_v37  ;;  %1697 = vperm.xlu1 %10301, %v1511_v0   ;;  %1832 = vperm.xlu0 %10302, %v1556_v35   ;;  %v1527_v0 = vld [vmem:[%s17429_s3 + $0xd8] sm:$0xff]  ;;  %v1572_v35 = vld [vmem:[%s17429_s3 + $0x240] sm:$0xff] }
  0xc9   :  { %vm327_vm11 = vmor %vm237_vm9, %vm309_vm10  ;;  %v11448_v40 = vpop.permute.xlu0 %132  ;;  %3778 = vmatprep.subr.bf16.mxu1 %v17445_v1  ;;  %1130 = vmatpush2.bf16.msra.mxu0 %v10352_v45  ;;  %vm312_vm9 = vcmp.eq.s32.totalorder %v11170_v62, %v11386_v19  ;;  %v1576_v19 = vld [vmem:[%s17429_s3 + $0x260] sm:$0xff] }
  0xca   :  { %v345_v44 = vsel %vm327_vm11, 1.0, %v17447_v4  ;;  %1131 = vmatprep.subr.bf16.mxu0 %v10357_v49  ;;  %vm151_vm11 = vcmp.eq.s32.totalorder %v11170_v62, %v11317_v53  ;;  %v1533_v49 = vld [vmem:[%s17429_s3 + $0x108] sm:$0xff] }
  0xcb   :  { %v359_v46 = vpack.c.bf16 %v345_v44, %v344_v43  ;;  %3779 = vmatpush2.bf16.msra.mxu1 %v10331_v38  ;;  %v1529_v38 = vld [vmem:[%s17429_s3 + $0xe8] sm:$0xff]  ;;  %v1531_v44 = vld [vmem:[%s17429_s3 + $0xf8] sm:$0xff] }
  0xcc   :  { %1703 = vperm.xlu1 %10301, %v1513_v41   ;;  %v112_v50 = vpop.permute.xlu1 %111  ;;  %1838 = vperm.xlu0 %10302, %v1558_v42   ;;  %v1574_v41 = vld [vmem:[%s17429_s3 + $0x250] sm:$0xff] }
  0xcd   :  { %9067 = vmatmul.mubr.msk.bf16.gmra.mxu1 %vm658_vm12, %v359_v46  ;;  %v11469_v5 = vpop.permute.xlu0 %138  ;;  %3780 = vmatprep.subr.bf16.mxu1 %v17445_v1  ;;  %vm148_vm14 = vcmp.eq.s32.totalorder %v11170_v62, %v112_v50  ;;  %v1578_v50 = vld [vmem:[%s17429_s3 + $0x270] sm:$0xff] }
  0xce   :  { %758 = vmatprep.mubr.bf16.mxu1 %v17445_v1  ;;  %1132 = vmatpush2.bf16.msra.mxu0 %v10355_v52  ;;  %v1535_v52 = vld [vmem:[%s17429_s3 + $0x118] sm:$0xff] }
  0xcf   :  { %3781 = vmatpush2.bf16.msra.mxu1 %v10335_v47  ;;  %1133 = vmatprep.subr.bf16.mxu0 %v10360_v55 }
  0xd0   :  { %1709 = vperm.xlu1 %10301, %v1515_v39   ;;  %1844 = vperm.xlu0 %10302, %v1560_v51  }
  0xd1   :  { %v184_v56 = vpop.permute.xlu1 %183  ;;  %3782 = vmatprep.subr.bf16.mxu1 %v17445_v1 }
  0xd2   :  { %v11495_v60 = vpop.permute.xlu0 %297  ;;  %vm220_vm13 = vcmp.eq.s32.totalorder %v11170_v62, %v184_v56  ;;  %1134 = vmatpush2.bf16.msra.mxu0 %v10358_v63 }
  0xd3   :  { %3783 = vmatpush2.bf16.msra.mxu1 %v10339_v54  ;;  %vm238_vm0 = vmor %vm148_vm14, %vm220_vm13  ;;  %1135 = vmatprep.subr.bf16.mxu0 %v10363_v2  ;;  %v1580_v54 = vld [vmem:[%s17429_s3 + $0x280] sm:$0xff] }
  0xd4   :  { %1715 = vperm.xlu1 %10301, %v1517_v58   ;;  %1850 = vperm.xlu0 %10302, %v1562_v59   ;;  %vm328_vm4 = vmor %vm238_vm0, %vm310_vm15  ;;  %v1537_v58 = vld [vmem:[%s17429_s3 + $0x128] sm:$0xff]  ;;  %v1582_v59 = vld [vmem:[%s17429_s3 + $0x290] sm:$0xff] }
  0xd5   :  { %v187_v3 = vpop.permute.xlu1 %186  ;;  %v346_v16 = vsel %vm328_vm4, 1.0, %v17447_v4 }
  0xd6   :  { %vm221_vm3 = vcmp.eq.s32.totalorder %v11170_v62, %v187_v3  ;;  %1136 = vmatpush2.bf16.msra.mxu0 %v10361_v8  ;;  %v1539_v3 = vld [vmem:[%s17429_s3 + $0x138] sm:$0xff] }
  0xd7   :  { %v11516_v9 = vpop.permute.xlu0 %1667  ;;  %vm239_vm5 = vmor %vm149_vm2, %vm221_vm3  ;;  %1137 = vmatprep.subr.bf16.mxu0 %v10366_v10  ;;  %v1586_v10 = vld [vmem:[%s17429_s3 + $0x2b0] sm:$0xff] }
  0xd8   :  { %17854 = vst [vmem:[#allocation3_spill] sm:$0xff] %v11516_v9  ;;  %1721 = vperm.xlu1 %10301, %v1519_v6   ;;  %1856 = vperm.xlu0 %10302, %v1564_v7   ;;  %v1584_v6 = vld [vmem:[%s17429_s3 + $0x2a0] sm:$0xff] }
  0xda   :  { %v277_v13 = vpop.permute.xlu1 %276  ;;  %1138 = vmatpush2.bf16.msra.mxu0 %v10364_v14 }
  0xdb   :  { %vm311_vm1 = vcmp.eq.s32.totalorder %v11170_v62, %v277_v13  ;;  %v11534_v48 = vpop.permute.xlu0 %1676  ;;  %1139 = vmatprep.subr.bf16.mxu0 %v10369_v15  ;;  %v1543_v15 = vld [vmem:[%s17429_s3 + $0x158] sm:$0xff] }
  0xdc   :  { %17855 = vst [vmem:[#allocation4_spill] sm:$0xff] %v11534_v48  ;;  %vm329_vm6 = vmor %vm239_vm5, %vm311_vm1  ;;  %1727 = vperm.xlu1 %10301, %v1521_v11   ;;  %1862 = vperm.xlu0 %10302, %v1566_v12   ;;  %vm314_vm5 = vcmp.eq.s32.totalorder %v11170_v62, %v11404_v27  ;;  %v1541_v27 = vld [vmem:[%s17429_s3 + $0x148] sm:$0xff] }
  0xdd   :  { %v347_v17 = vsel %vm329_vm6, 1.0, %v17447_v4 }
  0xde   :  { %v360_v21 = vpack.c.bf16 %v347_v17, %v346_v16  ;;  %1140 = vmatpush2.bf16.msra.mxu0 %v10367_v22  ;;  %v1588_v16 = vld [vmem:[%s17429_s3 + $0x2c0] sm:$0xff] }
  0xdf   :  { %v118_v24 = vpop.permute.xlu1 %117  ;;  %v11550_v25 = vpop.permute.xlu0 %1682  ;;  %1141 = vmatprep.subr.bf16.mxu0 %v10372_v26  ;;  %v1592_v26 = vld [vmem:[%s17429_s3 + $0x2e0] sm:$0xff] }
  0xe0   :  { %17856 = vst [vmem:[#allocation5_spill] sm:$0xff] %v11550_v25  ;;  %1733 = vperm.xlu1 %10301, %v1523_v18   ;;  %1868 = vperm.xlu0 %10302, %v1568_v20   ;;  %vm150_vm8 = vcmp.eq.s32.totalorder %v11170_v62, %v118_v24  ;;  %v1545_v18 = vld [vmem:[%s17429_s3 + $0x168] sm:$0xff]  ;;  %v1590_v20 = vld [vmem:[%s17429_s3 + $0x2d0] sm:$0xff]  ;;  %v1547_v24 = vld [vmem:[%s17429_s3 + $0x178] sm:$0xff] }
  0xe1   :  { %9068 = vmatmul.mubr.msk.bf16.gmra.mxu1 %vm658_vm12, %v360_v21 }
  0xe2   :  { %768 = vmatprep.mubr.bf16.mxu1 %v17445_v1  ;;  %1142 = vmatpush2.bf16.msra.mxu0 %v10370_v30  ;;  %v1549_v30 = vld [vmem:[%s17429_s3 + $0x188] sm:$0xff] }
  0xe3   :  { %v11566_v31 = vpop.permute.xlu0 %1688  ;;  %1143 = vmatprep.subr.bf16.mxu0 %v10375_v32  ;;  %v1594_v32 = vld [vmem:[%s17429_s3 + $0x2f0] sm:$0xff] }
  0xe4   :  { %17857 = vst [vmem:[#allocation6_spill] sm:$0xff] %v11566_v31  ;;  %1739 = vperm.xlu1 %10301, %v1525_v28   ;;  %v190_v33 = vpop.permute.xlu1 %189  ;;  %1874 = vperm.xlu0 %10302, %v1570_v29  }
  0xe5   :  { %vm222_vm7 = vcmp.eq.s32.totalorder %v11170_v62, %v190_v33 }
  0xe6   :  { %vm240_vm10 = vmor %vm150_vm8, %vm222_vm7  ;;  %1144 = vmatpush2.bf16.msra.mxu0 %v10373_v23  ;;  %vm153_vm7 = vcmp.eq.s32.totalorder %v11170_v62, %v11343_v61 }
  0xe7   :  { %v11581_v36 = vpop.permute.xlu0 %1694  ;;  %9887 = vmatprep.subr.bf16.mxu0 %v17447_v4  ;;  %vm330_vm14 = vmor %vm240_vm10, %vm312_vm9 }
  0xe8   :  { %17858 = vst [vmem:[#allocation7_spill] sm:$0xff] %v11581_v36  ;;  %1745 = vperm.xlu1 %10301, %v1527_v0   ;;  %v193_v37 = vpop.permute.xlu1 %192  ;;  %1880 = vperm.xlu0 %10302, %v1572_v35   ;;  %v348_v45 = vsel %vm330_vm14, 1.0, %v17447_v4  ;;  %v1596_v35 = vld [vmem:[%s17429_s3 + $0x300] sm:$0xff] }
  0xe9   :  { %vm223_vm13 = vcmp.eq.s32.totalorder %v11170_v62, %v193_v37 }
  0xea   :  { %vm241_vm15 = vmor %vm151_vm11, %vm223_vm13 }
  0xeb   :  { %v11595_v42 = vpop.permute.xlu0 %1700 }
  0xec   :  { %17859 = vst [vmem:[#allocation8_spill] sm:$0xff] %v11595_v42  ;;  %1751 = vperm.xlu1 %10301, %v1529_v38   ;;  %1886 = vperm.xlu0 %10302, %v1574_v41  }
  0xed   :  { %v283_v43 = vpop.permute.xlu1 %282 }
  0xee   :  { %vm313_vm0 = vcmp.eq.s32.totalorder %v11170_v62, %v283_v43  ;;  %v1553_v43 = vld [vmem:[%s17429_s3 + $0x1a8] sm:$0xff] }
  0xef   :  { %vm331_vm2 = vmor %vm241_vm15, %vm313_vm0  ;;  %v11605_v53 = vpop.permute.xlu0 %1706  ;;  %vm155_vm0 = vcmp.eq.s32.totalorder %v11170_v62, %v11448_v40  ;;  %v1551_v40 = vld [vmem:[%s17429_s3 + $0x198] sm:$0xff] }
  0xf0   :  { %17860 = vst [vmem:[#allocation9_spill] sm:$0xff] %v11605_v53  ;;  %v349_v46 = vsel %vm331_vm2, 1.0, %v17447_v4  ;;  %1757 = vperm.xlu1 %10301, %v1531_v44   ;;  %1892 = vperm.xlu0 %10302, %v1576_v19   ;;  %v1598_v44 = vld [vmem:[%s17429_s3 + $0x310] sm:$0xff] }
  0xf1   :  { %v361_v47 = vpack.c.bf16 %v349_v46, %v348_v45  ;;  %v1555_v46 = vld [vmem:[%s17429_s3 + $0x1b8] sm:$0xff] }
  0xf2   :  { %v124_v39 = vpop.permute.xlu1 %123 }
  0xf3   :  { %9069 = vmatmul.mubr.msk.bf16.gmra.mxu1 %vm658_vm12, %v361_v47  ;;  %v11616_v51 = vpop.permute.xlu0 %1712  ;;  %vm152_vm4 = vcmp.eq.s32.totalorder %v11170_v62, %v124_v39  ;;  %v1600_v47 = vld [vmem:[%s17429_s3 + $0x320] sm:$0xff]  ;;  %v1557_v39 = vld [vmem:[%s17429_s3 + $0x1c8] sm:$0xff] }
  0xf4   :  { %17861 = vst [vmem:[#allocation10_spill] sm:$0xff] %v11616_v51  ;;  %1763 = vperm.xlu1 %10301, %v1533_v49   ;;  %1898 = vperm.xlu0 %10302, %v1578_v50  }
  0xf5   :  { %778 = vmatprep.mubr.bf16.mxu1 %v17445_v1 }
  0xf7   :  { %v196_v55 = vpop.permute.xlu1 %195  ;;  %v11625_v56 = vpop.permute.xlu0 %1718 }
  0xf8   :  { %17862 = vst [vmem:[#allocation11_spill] sm:$0xff] %v11625_v56  ;;  %1769 = vperm.xlu1 %10301, %v1535_v52   ;;  %1904 = vperm.xlu0 %10302, %v1580_v54   ;;  %vm224_vm3 = vcmp.eq.s32.totalorder %v11170_v62, %v196_v55  ;;  %v1602_v52 = vld [vmem:[%s17429_s3 + $0x330] sm:$0xff]  ;;  %v1559_v55 = vld [vmem:[%s17429_s3 + $0x1d8] sm:$0xff] }
  0xf9   :  { %vm242_vm1 = vmor %vm152_vm4, %vm224_vm3  ;;  %vm316_vm3 = vcmp.eq.s32.totalorder %v11170_v62, %v11426_v34 }
  0xfa   :  { %vm332_vm8 = vmor %vm242_vm1, %vm314_vm5 }
  0xfb   :  { %v199_v63 = vpop.permute.xlu1 %198  ;;  %v11634_v2 = vpop.permute.xlu0 %1724  ;;  %v350_v11 = vsel %vm332_vm8, 1.0, %v17447_v4 }
  0xfc   :  { %17863 = vst [vmem:[#allocation12_spill] sm:$0xff] %v11634_v2  ;;  %1775 = vperm.xlu1 %10301, %v1537_v58   ;;  %1910 = vperm.xlu0 %10302, %v1582_v59   ;;  %vm225_vm6 = vcmp.eq.s32.totalorder %v11170_v62, %v199_v63  ;;  %v1604_v58 = vld [vmem:[%s17429_s3 + $0x340] sm:$0xff]  ;;  %v11756_v63 = vadd.s32 128, %v11170_v62 }
  0xfd   :  { %vm243_vm9 = vmor %vm153_vm7, %vm225_vm6 }
  0xff   :  { %v11646_v7 = vpop.permute.xlu0 %1730 }
 0x100   :  { %17864 = vst [vmem:[#allocation13_spill] sm:$0xff] %v11646_v7  ;;  %1781 = vperm.xlu1 %10301, %v1539_v3   ;;  %v289_v8 = vpop.permute.xlu1 %288  ;;  %1916 = vperm.xlu0 %10302, %v1584_v6  }
 0x101   :  { %vm315_vm10 = vcmp.eq.s32.totalorder %v11170_v62, %v289_v8 }
 0x102   :  { %vm333_vm11 = vmor %vm243_vm9, %vm315_vm10  ;;  %vm318_vm9 = vcmp.eq.s32.totalorder %v11170_v62, %v11495_v60 }
 0x103   :  { %v351_v61 = vsel %vm333_vm11, 1.0, %v17447_v4  ;;  %v11659_v12 = vpop.permute.xlu0 %1736 }
 0x104   :  { %17865 = vst [vmem:[#allocation14_spill] sm:$0xff] %v11659_v12  ;;  %v362_v13 = vpack.c.bf16 %v351_v61, %v350_v11  ;;  %1787 = vperm.xlu1 %10301, %v1541_v27   ;;  %1922 = vperm.xlu0 %10302, %v1586_v10   ;;  %v1606_v27 = vld [vmem:[%s17429_s3 + $0x350] sm:$0xff]  ;;  %v1563_v61 = vld [vmem:[%s17429_s3 + $0x1f8] sm:$0xff] }
 0x105   :  { %v130_v14 = vpop.permute.xlu1 %129 }
 0x106   :  { %9070 = vmatmul.mubr.msk.bf16.gmra.mxu1 %vm658_vm12, %v362_v13  ;;  %vm154_vm14 = vcmp.eq.s32.totalorder %v11170_v62, %v130_v14  ;;  %v1608_v13 = vld [vmem:[%s17429_s3 + $0x360] sm:$0xff] }
 0x107   :  { %v11668_v17 = vpop.permute.xlu0 %1742  ;;  %788 = vmatprep.mubr.bf16.mxu1 %v17445_v1 }
 0x108   :  { %17866 = vst [vmem:[#allocation15_spill] sm:$0xff] %v11668_v17  ;;  %1793 = vperm.xlu1 %10301, %v1543_v15   ;;  %1928 = vperm.xlu0 %10302, %v1588_v16   ;;  %v17451_v16 = vmov 1.0|1.0  }
 0x10a   :  { %v202_v21 = vpop.permute.xlu1 %201 }
 0x10b   :  { %v11677_v22 = vpop.permute.xlu0 %1748  ;;  %vm226_vm13 = vcmp.eq.s32.totalorder %v11170_v62, %v202_v21 }
 0x10c   :  { %17867 = vst [vmem:[#allocation16_spill] sm:$0xff] %v11677_v22  ;;  %1799 = vperm.xlu1 %10301, %v1545_v18   ;;  %1934 = vperm.xlu0 %10302, %v1590_v20   ;;  %vm244_vm15 = vmor %vm154_vm14, %vm226_vm13  ;;  %vm157_vm13 = vcmp.eq.s32.totalorder %v11170_v62, %v11469_v5  ;;  %v1561_v5 = vld [vmem:[%s17429_s3 + $0x1e8] sm:$0xff]  ;;  %v1610_v20 = vld [vmem:[%s17429_s3 + $0x370] sm:$0xff] }
 0x10d   :  { %vm334_vm4 = vmor %vm244_vm15, %vm316_vm3  ;;  %vm2153_vm3 = vcmp.eq.s32.totalorder %v11756_v63, %v11516_v9  ;;  %v1565_v18 = vld [vmem:[%s17429_s3 + $0x208] sm:$0xff] }
 0x10e   :  { %v205_v28 = vpop.permute.xlu1 %204  ;;  %v352_v34 = vsel %vm334_vm4, 1.0, %v17447_v4 }
 0x10f   :  { %v11687_v29 = vpop.permute.xlu0 %1754  ;;  %vm227_vm2 = vcmp.eq.s32.totalorder %v11170_v62, %v205_v28  ;;  %v1612_v28 = vld [vmem:[%s17429_s3 + $0x380] sm:$0xff] }
 0x110   :  { %17868 = vst [vmem:[#allocation17_spill] sm:$0xff] %v11687_v29  ;;  %1805 = vperm.xlu1 %10301, %v1547_v24   ;;  %1940 = vperm.xlu0 %10302, %v1592_v26   ;;  %vm245_vm5 = vmor %vm155_vm0, %vm227_vm2  ;;  %v1567_v26 = vld [vmem:[%s17429_s3 + $0x218] sm:$0xff] }
 0x113   :  { %v295_v33 = vpop.permute.xlu1 %294  ;;  %v11700_v0 = vpop.permute.xlu0 %1760 }
 0x114   :  { %17869 = vst [vmem:[#allocation18_spill] sm:$0xff] %v11700_v0  ;;  %vm317_vm1 = vcmp.eq.s32.totalorder %v11170_v62, %v295_v33  ;;  %1811 = vperm.xlu1 %10301, %v1549_v30   ;;  %1946 = vperm.xlu0 %10302, %v1594_v32   ;;  %v1569_v33 = vld [vmem:[%s17429_s3 + $0x228] sm:$0xff] }
 0x115   :  { %vm335_vm6 = vmor %vm245_vm5, %vm317_vm1  ;;  %vm2152_vm1 = vcmp.eq.s32.totalorder %v11170_v62, %v11516_v9 }
 0x116   :  { %v353_v23 = vsel %vm335_vm6, 1.0, %v17447_v4 }
 0x117   :  { %v363_v37 = vpack.c.bf16 %v353_v23, %v352_v34  ;;  %v11711_v38 = vpop.permute.xlu0 %1766  ;;  %v1571_v23 = vld [vmem:[%s17429_s3 + $0x238] sm:$0xff] }
 0x118   :  { %17870 = vst [vmem:[#allocation19_spill] sm:$0xff] %v11711_v38  ;;  %1817 = vperm.xlu1 %10301, %v1551_v40   ;;  %v136_v41 = vpop.permute.xlu1 %135  ;;  %1952 = vperm.xlu0 %10302, %v1596_v35   ;;  %v1614_v40 = vld [vmem:[%s17429_s3 + $0x390] sm:$0xff] }
 0x119   :  { %9071 = vmatmul.mubr.msk.bf16.gmra.mxu1 %vm658_vm12, %v363_v37  ;;  %vm156_vm8 = vcmp.eq.s32.totalorder %v11170_v62, %v136_v41  ;;  %v1616_v37 = vld [vmem:[%s17429_s3 + $0x3a0] sm:$0xff] }
 0x11a   :  { %798 = vmatprep.mubr.bf16.mxu1 %v17445_v1 }
 0x11b   :  { %v11721_v19 = vpop.permute.xlu0 %1772 }
 0x11c   :  { %17871 = vst [vmem:[#allocation20_spill] sm:$0xff] %v11721_v19  ;;  %1823 = vperm.xlu1 %10301, %v1553_v43   ;;  %1958 = vperm.xlu0 %10302, %v1598_v44   ;;  %v1573_v44 = vld [vmem:[%s17429_s3 + $0x248] sm:$0xff] }
 0x11d   :  { %v208_v45 = vpop.permute.xlu1 %207 }
 0x11e   :  { %vm228_vm7 = vcmp.eq.s32.totalorder %v11170_v62, %v208_v45  ;;  %v1618_v45 = vld [vmem:[%s17429_s3 + $0x3b0] sm:$0xff] }
 0x11f   :  { %v11729_v49 = vpop.permute.xlu0 %1778  ;;  %vm246_vm10 = vmor %vm156_vm8, %vm228_vm7 }
 0x120   :  { %17872 = vst [vmem:[#allocation21_spill] sm:$0xff] %v11729_v49  ;;  %1829 = vperm.xlu1 %10301, %v1555_v46   ;;  %1964 = vperm.xlu0 %10302, %v1600_v47   ;;  %vm336_vm14 = vmor %vm246_vm10, %vm318_vm9 }
 0x121   :  { %v211_v50 = vpop.permute.xlu1 %210  ;;  %v354_v3 = vsel %vm336_vm14, 1.0, %v17447_v4 }
 0x122   :  { %vm229_vm11 = vcmp.eq.s32.totalorder %v11170_v62, %v211_v50  ;;  %v1575_v50 = vld [vmem:[%s17429_s3 + $0x258] sm:$0xff] }
 0x123   :  { %v11741_v54 = vpop.permute.xlu0 %1784  ;;  %vm247_vm15 = vmor %vm157_vm13, %vm229_vm11  ;;  %vm2162_vm13 = vcmp.eq.s32.totalorder %v11756_v63, %v11534_v48 }
 0x124   :  { %17873 = vst [vmem:[#allocation22_spill] sm:$0xff] %v11741_v54  ;;  %1835 = vperm.xlu1 %10301, %v1557_v39   ;;  %1970 = vperm.xlu0 %10302, %v1602_v52   ;;  %v11868_v39 = vpop.f32.mrf.mxu1  ;;  %v1620_v52 = vld [vmem:[%s17429_s3 + $0x3c0] sm:$0xff] }
 0x126   :  { %v301_v60 = vpop.permute.xlu1 %300 }
 0x127   :  { %vm319_vm0 = vcmp.eq.s32.totalorder %v11170_v62, %v301_v60  ;;  %v11753_v59 = vpop.permute.xlu0 %1790  ;;  %v1577_v60 = vld [vmem:[%s17429_s3 + $0x268] sm:$0xff] }
 0x128   :  { %17874 = vst [vmem:[#allocation23_spill] sm:$0xff] %v11753_v59  ;;  %vm337_vm2 = vmor %vm247_vm15, %vm319_vm0  ;;  %1841 = vperm.xlu1 %10301, %v1559_v55   ;;  %1976 = vperm.xlu0 %10302, %v1604_v58  }
 0x129   :  { %v355_v6 = vsel %vm337_vm2, 1.0, %v17447_v4  ;;  %vm2161_vm2 = vcmp.eq.s32.totalorder %v11170_v62, %v11534_v48  ;;  %v1595_v48 = vld [vmem:[%s17429_s3 + $0x2f8] sm:$0xff] }
 0x12a   :  { %v364_v8 = vpack.c.bf16 %v355_v6, %v354_v3  ;;  %v11889_v3 = vpop.f32.mrf.mxu1  ;;  %v1622_v6 = vld [vmem:[%s17429_s3 + $0x3d0] sm:$0xff] }
 0x12b   :  { %v11766_v10 = vpop.permute.xlu1 %1664  ;;  %v11768_v11 = vpop.permute.xlu0 %1796 }
 0x12c   :  { %17875 = vst [vmem:[#allocation24_spill] sm:$0xff] %v11766_v10  ;;  %17876 = vst [vmem:[#allocation25_spill] sm:$0xff] %v11768_v11  ;;  %1847 = vperm.xlu1 %10301, %v1561_v5   ;;  %9072 = vmatmul.mubr.msk.bf16.gmra.mxu1 %vm658_vm12, %v364_v8  ;;  %vm2150_vm4 = vcmp.eq.s32.totalorder %v11756_v63, %v11766_v10  ;;  %vm2149_vm6 = vcmp.eq.s32.totalorder %v11170_v62, %v11766_v10 }
 0x12d   :  { %1982 = vperm.xlu0 %10302, %v1606_v27   ;;  %vm9123_vm5 = vmpackc.low %vm2153_vm3, %vm2150_vm4  ;;  %vm2168_vm4 = vcmp.eq.s32.totalorder %v11756_v63, %v11550_v25  ;;  %v11899_v27 = vpop.f32.mrf.mxu1 }
 0x12e   :  { %9124 = vmatprep.mubr.msk.bf16.mxu1 %vm9123_vm5, %v17451_v16  ;;  %vm9125_vm12 = vmpackc.low %vm2152_vm1, %vm2149_vm6 }
 0x12f   :  { %v11785_v14 = vpop.permute.xlu1 %1670  ;;  %v11787_v15 = vpop.permute.xlu0 %1802 }
 0x130   :  { %17877 = vst [vmem:[#allocation26_spill] sm:$0xff] %v11785_v14  ;;  %17878 = vst [vmem:[#allocation27_spill] sm:$0xff] %v11787_v15  ;;  %1853 = vperm.xlu1 %10301, %v1563_v61   ;;  %vm2156_vm7 = vcmp.eq.s32.totalorder %v11756_v63, %v11785_v14  ;;  %vm2155_vm10 = vcmp.eq.s32.totalorder %v11170_v62, %v11785_v14  ;;  %v1579_v61 = vld [vmem:[%s17429_s3 + $0x278] sm:$0xff] }
 0x131   :  { %1988 = vperm.xlu0 %10302, %v1608_v13   ;;  %v521_v13 = vpop.f32.mrf.mxu0 }
 0x133   :  { %v11798_v21 = vpop.permute.xlu1 %1673  ;;  %v11800_v24 = vpop.permute.xlu0 %1808 }
 0x134   :  { %17879 = vst [vmem:[#allocation28_spill] sm:$0xff] %v11798_v21  ;;  %17880 = vst [vmem:[#allocation29_spill] sm:$0xff] %v11800_v24  ;;  %1859 = vperm.xlu1 %10301, %v1565_v18   ;;  %vm2159_vm8 = vcmp.eq.s32.totalorder %v11756_v63, %v11798_v21  ;;  %9126 = vmatmul.mubr.msk.bf16.vlgmr.msra.gmra.mxu1 %vm9125_vm12, %v17451_v16  ;;  %vm2158_vm11 = vcmp.eq.s32.totalorder %v11170_v62, %v11798_v21  ;;  %v1624_v18 = vld [vmem:[%s17429_s3 + $0x3e0] sm:$0xff] }
 0x135   :  { %1994 = vperm.xlu0 %10302, %v1610_v20   ;;  %vm9127_vm9 = vmpackc.low %vm2159_vm8, %vm2156_vm7  ;;  %vm2167_vm12 = vcmp.eq.s32.totalorder %v11170_v62, %v11550_v25  ;;  %vm2174_vm8 = vcmp.eq.s32.totalorder %v11756_v63, %v11566_v31 }
 0x136   :  { %9128 = vmatprep.mubr.msk.bf16.mxu1 %vm9127_vm9, %v17451_v16  ;;  %vm9129_vm15 = vmpackc.low %vm2158_vm11, %vm2155_vm10 }
 0x137   :  { %v11812_v30 = vpop.permute.xlu1 %1679  ;;  %v11814_v32 = vpop.permute.xlu0 %1814 }
 0x138   :  { %17881 = vst [vmem:[#allocation30_spill] sm:$0xff] %v11812_v30  ;;  %17882 = vst [vmem:[#allocation31_spill] sm:$0xff] %v11814_v32  ;;  %1865 = vperm.xlu1 %10301, %v1567_v26   ;;  %vm2165_vm14 = vcmp.eq.s32.totalorder %v11756_v63, %v11812_v30  ;;  %vm2164_vm3 = vcmp.eq.s32.totalorder %v11170_v62, %v11812_v30 }
 0x139   :  { %2000 = vperm.xlu0 %10302, %v1612_v28   ;;  %vm9131_vm0 = vmpackc.low %vm2165_vm14, %vm2162_vm13  ;;  %vm2173_vm13 = vcmp.eq.s32.totalorder %v11170_v62, %v11566_v31  ;;  %v11920_v28 = vpop.f32.mrf.mxu1 }
 0x13a   :  { %vm9133_vm1 = vmpackc.low %vm2164_vm3, %vm2161_vm2 }
 0x13b   :  { %v11830_v35 = vpop.permute.xlu1 %1685  ;;  %v11832_v34 = vpop.permute.xlu0 %1820 }
 0x13c   :  { %17883 = vst [vmem:[#allocation32_spill] sm:$0xff] %v11830_v35  ;;  %17884 = vst [vmem:[#allocation33_spill] sm:$0xff] %v11832_v34  ;;  %1871 = vperm.xlu1 %10301, %v1569_v33   ;;  %9130 = vmatmul.mubr.msk.bf16.gmra.mxu1 %vm9129_vm15, %v17451_v16  ;;  %vm2171_vm5 = vcmp.eq.s32.totalorder %v11756_v63, %v11830_v35  ;;  %vm2170_vm7 = vcmp.eq.s32.totalorder %v11170_v62, %v11830_v35  ;;  %v1581_v33 = vld [vmem:[%s17429_s3 + $0x288] sm:$0xff] }
 0x13d   :  { %2006 = vperm.xlu0 %10302, %v1614_v40   ;;  %9132 = vmatprep.mubr.msk.bf16.mxu1 %vm9131_vm0, %v17451_v16  ;;  %vm9135_vm6 = vmpackc.low %vm2171_vm5, %vm2168_vm4  ;;  %vm2180_vm15 = vcmp.eq.s32.totalorder %v11756_v63, %v11581_v36  ;;  %v11926_v40 = vshrl.u32 %v84_v57, 7  ;;  %vm2179_vm4 = vcmp.eq.s32.totalorder %v11170_v62, %v11581_v36  ;;  %v10377_v36 = vld [vmem:[%s17430_s8 + $0x80] sm:$0xff]  }
 0x13e   :  { %vm9137_vm10 = vmpackc.low %vm2170_vm7, %vm2167_vm12 }
 0x13f   :  { %v11842_v41 = vpop.permute.xlu1 %1691  ;;  %v11844_v43 = vpop.permute.xlu0 %1826  ;;  %17895 = vst [vmem:[#allocation44_spill] sm:$0xff] %v11926_v40 }
 0x140   :  { %17885 = vst [vmem:[#allocation34_spill] sm:$0xff] %v11842_v41  ;;  %17886 = vst [vmem:[#allocation35_spill] sm:$0xff] %v11844_v43  ;;  %1877 = vperm.xlu1 %10301, %v1571_v23   ;;  %vm2177_vm9 = vcmp.eq.s32.totalorder %v11756_v63, %v11842_v41  ;;  %vm2176_vm14 = vcmp.eq.s32.totalorder %v11170_v62, %v11842_v41  ;;  %v523_v23 = vpop.f32.mrf.mxu0  ;;  %v1613_v43 = vld [vmem:[%s17429_s3 + $0x388] sm:$0xff] }
 0x141   :  { %2012 = vperm.xlu0 %10302, %v1616_v37   ;;  %vm9139_vm11 = vmpackc.low %vm2177_vm9, %vm2174_vm8  ;;  %v1626_v37 = vld [vmem:[%s17429_s3 + $0x3f0] sm:$0xff]  ;;  %vm2185_vm8 = vcmp.eq.s32.totalorder %v11170_v62, %v11595_v42 }
 0x142   :  { %vm9141_vm2 = vmpackc.low %vm2176_vm14, %vm2173_vm13  ;;  %v527_v57 = vpop.f32.mrf.mxu0 }
 0x143   :  { %v11860_v46 = vpop.permute.xlu1 %1697  ;;  %v11862_v47 = vpop.permute.xlu0 %1832 }
 0x144   :  { %17887 = vst [vmem:[#allocation36_spill] sm:$0xff] %v11860_v46  ;;  %17888 = vst [vmem:[#allocation37_spill] sm:$0xff] %v11862_v47  ;;  %1883 = vperm.xlu1 %10301, %v1573_v44   ;;  %9134 = vmatmul.mubr.msk.bf16.gmra.mxu1 %vm9133_vm1, %v17451_v16  ;;  %vm2183_vm0 = vcmp.eq.s32.totalorder %v11756_v63, %v11860_v46  ;;  %vm2182_vm5 = vcmp.eq.s32.totalorder %v11170_v62, %v11860_v46  ;;  %v529_v46 = vpop.f32.mrf.mxu0 }
 0x145   :  { %2018 = vperm.xlu0 %10302, %v1618_v45   ;;  %9136 = vmatprep.mubr.msk.bf16.mxu1 %vm9135_vm6, %v17451_v16  ;;  %vm9143_vm3 = vmpackc.low %vm2183_vm0, %vm2180_vm15  ;;  %vm2186_vm1 = vcmp.eq.s32.totalorder %v11756_v63, %v11595_v42  ;;  %vm2191_vm15 = vcmp.eq.s32.totalorder %v11170_v62, %v11605_v53 }
 0x146   :  { %vm9145_vm12 = vmpackc.low %vm2182_vm5, %vm2179_vm4 }
 0x147   :  { %v11874_v55 = vpop.permute.xlu1 %1703  ;;  %v11876_v58 = vpop.permute.xlu0 %1838 }
 0x148   :  { %17889 = vst [vmem:[#allocation38_spill] sm:$0xff] %v11874_v55  ;;  %17890 = vst [vmem:[#allocation39_spill] sm:$0xff] %v11876_v58  ;;  %1889 = vperm.xlu1 %10301, %v1575_v50   ;;  %v11936_v50 = vsub.s32 1, %v11926_v40  ;;  %vm2189_vm6 = vcmp.eq.s32.totalorder %v11756_v63, %v11874_v55  ;;  %vm2188_vm9 = vcmp.eq.s32.totalorder %v11170_v62, %v11874_v55  ;;  %v10376_v55 = vld [vmem:[%s17430_s8 + $0x88] sm:$0xff]  }
 0x149   :  { %2024 = vperm.xlu0 %10302, %v1620_v52   ;;  %vm9147_vm7 = vmpackc.low %vm2189_vm6, %vm2186_vm1  ;;  %vm2197_vm1 = vcmp.eq.s32.totalorder %v11170_v62, %v11616_v51 }
 0x14a   :  { %17898 = vst [vmem:[#allocation47_spill] sm:$0xff] %v11936_v50  ;;  %vm9149_vm13 = vmpackc.low %vm2188_vm9, %vm2185_vm8 }
 0x14b   :  { %v11894_v5 = vpop.permute.xlu1 %1709  ;;  %v11896_v8 = vpop.permute.xlu0 %1844 }
 0x14c   :  { %17891 = vst [vmem:[#allocation40_spill] sm:$0xff] %v11894_v5  ;;  %17892 = vst [vmem:[#allocation41_spill] sm:$0xff] %v11896_v8  ;;  %1895 = vperm.xlu1 %10301, %v1577_v60   ;;  %9138 = vmatmul.mubr.msk.bf16.gmra.mxu1 %vm9137_vm10, %v17451_v16  ;;  %v11939_v60 = vsub.s32 0, %v11926_v40  ;;  %v1587_v8 = vld [vmem:[%s17429_s3 + $0x2b8] sm:$0xff]  ;;  %vm2192_vm10 = vcmp.eq.s32.totalorder %v11756_v63, %v11605_v53  ;;  %vm2194_vm0 = vcmp.eq.s32.totalorder %v11170_v62, %v11894_v5 }
 0x14d   :  { %2030 = vperm.xlu0 %10302, %v1622_v6   ;;  %9140 = vmatprep.mubr.msk.bf16.mxu1 %vm9139_vm11, %v17451_v16  ;;  %v1583_v6 = vld [vmem:[%s17429_s3 + $0x298] sm:$0xff]  ;;  %vm2195_vm11 = vcmp.eq.s32.totalorder %v11756_v63, %v11894_v5  ;;  %vm9153_vm4 = vmpackc.low %vm2194_vm0, %vm2191_vm15  ;;  %v1638_v5 = vld [vmem:[%s17429_s3 + $0x450] sm:$0xff] }
 0x14e   :  { %17899 = vst [vmem:[#allocation48_spill] sm:$0xff] %v11939_v60  ;;  %vm9151_vm14 = vmpackc.low %vm2195_vm11, %vm2192_vm10  ;;  %vm2203_vm10 = vcmp.eq.s32.totalorder %v11170_v62, %v11625_v56 }
 0x14f   :  { %v11908_v20 = vpop.permute.xlu1 %1715  ;;  %v11910_v26 = vpop.permute.xlu0 %1850 }
 0x150   :  { %17893 = vst [vmem:[#allocation42_spill] sm:$0xff] %v11908_v20  ;;  %17894 = vst [vmem:[#allocation43_spill] sm:$0xff] %v11910_v26  ;;  %1901 = vperm.xlu1 %10301, %v1579_v61   ;;  %v57_v61 = vld [vmem:[%s17432_s16] ss:$8 sm:$0x3]  ;;  %vm2200_vm6 = vcmp.eq.s32.totalorder %v11170_v62, %v11908_v20 }
 0x151   :  { %2036 = vperm.xlu0 %10302, %v1624_v18   ;;  %v1628_v18 = vld [vmem:[%s17429_s3 + $0x400] sm:$0xff]  ;;  %v11959_v4 = vrot.slane %v57_v61, %v11936_v50  ;;  %v11968_v26 = vrot.slane %v57_v61, %v11939_v60  ;;  %vm9157_vm8 = vmpackc.low %vm2200_vm6, %vm2197_vm1 }
 0x153   :  { %v11931_v44 = vpop.permute.xlu1 %1721  ;;  %v11933_v45 = vpop.permute.xlu0 %1856 }
 0x154   :  { %17896 = vst [vmem:[#allocation45_spill] sm:$0xff] %v11931_v44  ;;  %17897 = vst [vmem:[#allocation46_spill] sm:$0xff] %v11933_v45  ;;  %1907 = vperm.xlu1 %10301, %v1581_v33   ;;  %9142 = vmatmul.mubr.msk.bf16.gmra.mxu1 %vm9141_vm2, %v17451_v16  ;;  %vm2198_vm2 = vcmp.eq.s32.totalorder %v11756_v63, %v11616_v51  ;;  %vm2206_vm11 = vcmp.eq.s32.totalorder %v11170_v62, %v11931_v44 }
 0x155   :  { %v720_v52 = vpop.f32.mrf.mxu1  ;;  %2042 = vperm.xlu0 %10302, %v1626_v37   ;;  %9144 = vmatprep.mubr.msk.bf16.mxu1 %vm9143_vm3, %v17451_v16  ;;  %vm2201_vm3 = vcmp.eq.s32.totalorder %v11756_v63, %v11908_v20  ;;  %vm9161_vm15 = vmpackc.low %vm2206_vm11, %vm2203_vm10 }
 0x156   :  { %v721_v16 = vadd.f32 %v720_v52, %v521_v13  ;;  %vm9155_vm5 = vmpackc.low %vm2201_vm3, %vm2198_vm2  ;;  %vm2209_vm2 = vcmp.eq.s32.totalorder %v11170_v62, %v11634_v2 }
 0x157   :  { %v722_v33 = vpop.f32.mrf.mxu1  ;;  %v11952_v1 = vpop.permute.xlu1 %1727 }
 0x158   :  { %17900 = vst [vmem:[#allocation49_spill] sm:$0xff] %v11952_v1  ;;  %v723_v37 = vadd.f32 %v722_v33, %v523_v23  ;;  %v11961_v40 = vpop.permute.xlu0 %1862  ;;  %1913 = vperm.xlu1 %10301, %v1583_v6   ;;  %v1585_v23 = vld [vmem:[%s17429_s3 + $0x2a8] sm:$0xff]  ;;  %v1630_v6 = vld [vmem:[%s17429_s3 + $0x410] sm:$0xff]  ;;  %vm2212_vm3 = vcmp.eq.s32.totalorder %v11170_v62, %v11952_v1 }
 0x159   :  { %17901 = vst [vmem:[#allocation50_spill] sm:$0xff] %v11961_v40  ;;  %v724_v41 = vpop.f32.mrf.mxu1  ;;  %2048 = vperm.xlu0 %10302, %v1628_v18   ;;  %vm9165_vm1 = vmpackc.low %vm2212_vm3, %vm2209_vm2 }
 0x15a   :  { %v725_v33 = vadd.f32 %v724_v41, %v527_v57  ;;  %v821_v61 = vadd.f32 %v11959_v4, %v723_v37  ;;  %v820_v41 = vadd.f32 %v11968_v26, %v721_v16  ;;  %v17904_v57 = vmov 1.0|1.0   ;;  %v1632_v37 = vld [vmem:[%s17429_s3 + $0x420] sm:$0xff] }
 0x15b   :  { %v726_v13 = vpop.f32.mrf.mxu1  ;;  %v11979_v52 = vpop.permute.xlu1 %1733 }
 0x15c   :  { %17902 = vst [vmem:[#allocation51_spill] sm:$0xff] %v11979_v52  ;;  %v822_v18 = vadd.f32 %v11968_v26, %v725_v33  ;;  %v727_v50 = vadd.f32 %v726_v13, %v529_v46  ;;  %v11983_v60 = vpop.permute.xlu0 %1868  ;;  %1919 = vperm.xlu1 %10301, %v1585_v23   ;;  %9146 = vmatmul.mubr.msk.bf16.gmra.mxu1 %vm9145_vm12, %v17904_v57  ;;  %v857_v16 = vmax.f32 %v821_v61, 0.0  ;;  %v856_v13 = vmax.f32 %v820_v41, 0.0 }
 0x15d   :  { %17903 = vst [vmem:[#allocation52_spill] sm:$0xff] %v11983_v60  ;;  %2054 = vperm.xlu0 %10302, %v1630_v6   ;;  %9148 = vmatprep.mubr.msk.bf16.mxu1 %vm9147_vm7, %v17904_v57  ;;  %vm2204_vm12 = vcmp.eq.s32.totalorder %v11756_v63, %v11625_v56  ;;  %vm2207_vm7 = vcmp.eq.s32.totalorder %v11756_v63, %v11931_v44 }
 0x15e   :  { %v823_v35 = vadd.f32 %v11959_v4, %v727_v50  ;;  %v858_v46 = vmax.f32 %v822_v18, 0.0  ;;  %v533_v50 = vpop.f32.mrf.mxu0  ;;  %v1589_v18 = vld [vmem:[%s17429_s3 + $0x2c8] sm:$0xff]  ;;  %vm9159_vm9 = vmpackc.low %vm2207_vm7, %vm2204_vm12  ;;  %vm2215_vm12 = vcmp.eq.s32.totalorder %v11170_v62, %v11646_v7  ;;  %vm2218_vm7 = vcmp.eq.s32.totalorder %v11170_v62, %v11979_v52 }
 0x15f   :  { %v11995_v33 = vpop.permute.xlu1 %1739  ;;  %vm9169_vm10 = vmpackc.low %vm2218_vm7, %vm2215_vm12 }
 0x160   :  { %17905 = vst [vmem:[#allocation53_spill] sm:$0xff] %v11995_v33  ;;  %v859_v23 = vmax.f32 %v823_v35, 0.0  ;;  %v12001_v6 = vpop.permute.xlu0 %1874  ;;  %1925 = vperm.xlu1 %10301, %v1587_v8   ;;  %v892_v61 = vpack.c.bf16 %v858_v46, %v856_v13  ;;  %v1634_v8 = vld [vmem:[%s17429_s3 + $0x430] sm:$0xff]  ;;  %v1591_v46 = vld [vmem:[%s17429_s3 + $0x2d8] sm:$0xff] }
 0x161   :  { %2060 = vperm.xlu0 %10302, %v1632_v37   ;;  %v535_v37 = vpop.f32.mrf.mxu0 }
 0x162   :  { %v893_v42 = vpack.c.bf16 %v859_v23, %v857_v16 }
 0x163   :  { %v12010_v35 = vpop.permute.xlu1 %1745  ;;  %v539_v13 = vpop.f32.mrf.mxu0 }
 0x164   :  { %17906 = vst [vmem:[#allocation54_spill] sm:$0xff] %v12010_v35  ;;  %1145 = vmatprep.mubr.bf16.mxu0 %v893_v42  ;;  %v12018_v41 = vpop.permute.xlu0 %1880  ;;  %1931 = vperm.xlu1 %10301, %v1589_v18   ;;  %v1636_v42 = vld [vmem:[%s17429_s3 + $0x440] sm:$0xff] }
 0x165   :  { %1146 = vmatmul.mubr.bf16.vlgmr.msra.gmra.mxu0 %v892_v61  ;;  %9150 = vmatmul.mubr.msk.bf16.gmra.mxu1 %vm9149_vm13, %v17904_v57  ;;  %v1593_v61 = vld [vmem:[%s17429_s3 + $0x2e8] sm:$0xff]  ;;  %v541_v25 = vpop.f32.mrf.mxu0  ;;  %vm2210_vm13 = vcmp.eq.s32.totalorder %v11756_v63, %v11634_v2 }
 0x166   :  { %2066 = vperm.xlu0 %10302, %v1634_v8   ;;  %9152 = vmatprep.mubr.msk.bf16.mxu1 %vm9151_vm14, %v17904_v57  ;;  %v17908_v8 = vmov 0.0   ;;  %vm2213_vm14 = vcmp.eq.s32.totalorder %v11756_v63, %v11952_v1  ;;  %v1650_v1 = vld [vmem:[%s17429_s3 + $0x4b0] sm:$0xff] }
 0x167   :  { %v12025_v16 = vpop.permute.xlu1 %1751  ;;  %v730_v23 = vpop.f32.mrf.mxu1  ;;  %9888 = vmatpush3.bf16.msra.mxu0 %v10376_v55  ;;  %vm9163_vm0 = vmpackc.low %vm2213_vm14, %vm2210_vm13  ;;  %vm2221_vm13 = vcmp.eq.s32.totalorder %v11170_v62, %v11659_v12  ;;  %vm2224_vm14 = vcmp.eq.s32.totalorder %v11170_v62, %v11995_v33 }
 0x168   :  { %17907 = vst [vmem:[#allocation55_spill] sm:$0xff] %v12025_v16  ;;  %1937 = vperm.xlu1 %10301, %v1591_v46   ;;  %9889 = vmatprep.subr.bf16.mxu0 %v17908_v8  ;;  %v12042_v53 = vpop.permute.xlu0 %1886  ;;  %v731_v30 = vadd.f32 %v730_v23, %v533_v50  ;;  %v1640_v50 = vld [vmem:[%s17429_s3 + $0x460] sm:$0xff]  ;;  %vm9173_vm2 = vmpackc.low %vm2224_vm14, %vm2221_vm13 }
 0x169   :  { %v732_v18 = vpop.f32.mrf.mxu1  ;;  %17909 = vst [vmem:[#allocation56_spill] sm:$0xff] %v12042_v53 }
 0x16a   :  { %2072 = vperm.xlu0 %10302, %v1636_v42   ;;  %v733_v31 = vadd.f32 %v732_v18, %v535_v37  ;;  %v1597_v37 = vld [vmem:[%s17429_s3 + $0x308] sm:$0xff]  ;;  %v545_v18 = vpop.f32.mrf.mxu0 }
 0x16b   :  { %v12044_v55 = vpop.permute.xlu1 %1757  ;;  %v734_v46 = vpop.f32.mrf.mxu1  ;;  %9890 = vmatpush3.bf16.msra.mxu0 %v10377_v36 }
 0x16c   :  { %17910 = vst [vmem:[#allocation57_spill] sm:$0xff] %v12044_v55  ;;  %v735_v58 = vadd.f32 %v734_v46, %v539_v13  ;;  %1943 = vperm.xlu1 %10301, %v1593_v61   ;;  %v825_v36 = vadd.f32 %v11959_v4, %v733_v31 }
 0x16d   :  { %9154 = vmatmul.mubr.msk.bf16.gmra.mxu1 %vm9153_vm4, %v17904_v57  ;;  %v736_v42 = vpop.f32.mrf.mxu1  ;;  %vm2216_vm4 = vcmp.eq.s32.totalorder %v11756_v63, %v11646_v7 }
 0x16e   :  { %2078 = vperm.xlu0 %10302, %v1638_v5   ;;  %9156 = vmatprep.mubr.msk.bf16.mxu1 %vm9155_vm5, %v17904_v57  ;;  %v826_v47 = vadd.f32 %v11968_v26, %v735_v58  ;;  %v737_v21 = vadd.f32 %v736_v42, %v541_v25  ;;  %v12068_v5 = vpop.permute.xlu0 %1892  ;;  %v824_v25 = vadd.f32 %v11968_v26, %v731_v30  ;;  %v861_v61 = vmax.f32 %v825_v36, 0.0  ;;  %v1644_v36 = vld [vmem:[%s17429_s3 + $0x480] sm:$0xff] }
 0x16f   :  { %v12058_v14 = vpop.permute.xlu1 %1763  ;;  %17912 = vst [vmem:[#allocation59_spill] sm:$0xff] %v12068_v5  ;;  %vm2219_vm5 = vcmp.eq.s32.totalorder %v11756_v63, %v11979_v52 }
 0x170   :  { %17911 = vst [vmem:[#allocation58_spill] sm:$0xff] %v12058_v14  ;;  %1949 = vperm.xlu1 %10301, %v1595_v48   ;;  %v827_v58 = vadd.f32 %v11959_v4, %v737_v21  ;;  %v862_v31 = vmax.f32 %v826_v47, 0.0  ;;  %v1642_v48 = vld [vmem:[%s17429_s3 + $0x470] sm:$0xff]  ;;  %v860_v30 = vmax.f32 %v824_v25, 0.0  ;;  %v1599_v21 = vld [vmem:[%s17429_s3 + $0x318] sm:$0xff]  ;;  %v547_v25 = vpop.f32.mrf.mxu0  ;;  %vm9167_vm6 = vmpackc.low %vm2219_vm5, %vm2216_vm4  ;;  %vm2227_vm4 = vcmp.eq.s32.totalorder %v11170_v62, %v11668_v17 }
 0x171   :  { %vm2230_vm5 = vcmp.eq.s32.totalorder %v11170_v62, %v12010_v35 }
 0x172   :  { %2084 = vperm.xlu0 %10302, %v1640_v50   ;;  %v863_v23 = vmax.f32 %v827_v58, 0.0  ;;  %v12088_v46 = vpop.permute.xlu0 %1898  ;;  %v894_v50 = vpack.c.bf16 %v862_v31, %v860_v30  ;;  %v1601_v58 = vld [vmem:[%s17429_s3 + $0x328] sm:$0xff]  ;;  %vm9177_vm12 = vmpackc.low %vm2230_vm5, %vm2227_vm4 }
 0x173   :  { %v12079_v13 = vpop.permute.xlu1 %1769  ;;  %17914 = vst [vmem:[#allocation61_spill] sm:$0xff] %v12088_v46 }
 0x174   :  { %17913 = vst [vmem:[#allocation60_spill] sm:$0xff] %v12079_v13  ;;  %1955 = vperm.xlu1 %10301, %v1597_v37   ;;  %v895_v47 = vpack.c.bf16 %v863_v23, %v861_v61  ;;  %v1646_v23 = vld [vmem:[%s17429_s3 + $0x490] sm:$0xff] }
 0x175   :  { %9158 = vmatmul.mubr.msk.bf16.gmra.mxu1 %vm9157_vm8, %v17904_v57  ;;  %vm2222_vm8 = vcmp.eq.s32.totalorder %v11756_v63, %v11659_v12 }
 0x176   :  { %2090 = vperm.xlu0 %10302, %v1642_v48   ;;  %9160 = vmatprep.mubr.msk.bf16.mxu1 %vm9159_vm9, %v17904_v57  ;;  %v551_v48 = vpop.f32.mrf.mxu0  ;;  %v12112_v61 = vpop.permute.xlu0 %1904  ;;  %vm2225_vm9 = vcmp.eq.s32.totalorder %v11756_v63, %v11995_v33 }
 0x177   :  { %v12091_v42 = vpop.permute.xlu1 %1775  ;;  %1155 = vmatprep.mubr.bf16.mxu0 %v895_v47  ;;  %vm9171_vm11 = vmpackc.low %vm2225_vm9, %vm2222_vm8  ;;  %vm2233_vm8 = vcmp.eq.s32.totalorder %v11170_v62, %v11677_v22  ;;  %vm2236_vm9 = vcmp.eq.s32.totalorder %v11170_v62, %v12025_v16 }
 0x178   :  { %17915 = vst [vmem:[#allocation62_spill] sm:$0xff] %v12091_v42  ;;  %1961 = vperm.xlu1 %10301, %v1599_v21   ;;  %1156 = vmatmul.mubr.bf16.gmra.mxu0 %v894_v50  ;;  %v1603_v21 = vld [vmem:[%s17429_s3 + $0x338] sm:$0xff]  ;;  %v553_v56 = vpop.f32.mrf.mxu0  ;;  %vm9181_vm13 = vmpackc.low %vm2236_vm9, %vm2233_vm8 }
 0x17a   :  { %2096 = vperm.xlu0 %10302, %v1644_v36   ;;  %v740_v37 = vpop.f32.mrf.mxu1 }
 0x17b   :  { %v12107_v31 = vpop.permute.xlu1 %1781  ;;  %v741_v36 = vadd.f32 %v740_v37, %v545_v18  ;;  %v1605_v37 = vld [vmem:[%s17429_s3 + $0x348] sm:$0xff] }
 0x17c   :  { %17916 = vst [vmem:[#allocation63_spill] sm:$0xff] %v12107_v31  ;;  %1967 = vperm.xlu1 %10301, %v1601_v58   ;;  %v742_v30 = vpop.f32.mrf.mxu1  ;;  %v1648_v58 = vld [vmem:[%s17429_s3 + $0x4a0] sm:$0xff] }
 0x17d   :  { %9162 = vmatmul.mubr.msk.bf16.gmra.mxu1 %vm9161_vm15, %v17904_v57  ;;  %v743_v47 = vadd.f32 %v742_v30, %v547_v25  ;;  %vm2228_vm15 = vcmp.eq.s32.totalorder %v11756_v63, %v11668_v17  ;;  %v12263_v17 = vadd.s32 256, %v11170_v62 }
 0x17e   :  { %2102 = vperm.xlu0 %10302, %v1646_v23   ;;  %v744_v50 = vpop.f32.mrf.mxu1  ;;  %9164 = vmatprep.mubr.msk.bf16.mxu1 %vm9163_vm0, %v17904_v57  ;;  %v12136_v23 = vpop.permute.xlu0 %1910  ;;  %vm2231_vm0 = vcmp.eq.s32.totalorder %v11756_v63, %v12010_v35  ;;  %v1623_v35 = vld [vmem:[%s17429_s3 + $0x3d8] sm:$0xff] }
 0x17f   :  { %v745_v44 = vadd.f32 %v744_v50, %v551_v48  ;;  %v12119_v20 = vpop.permute.xlu1 %1787  ;;  %v829_v48 = vadd.f32 %v11959_v4, %v743_v47  ;;  %v557_v47 = vpop.f32.mrf.mxu0  ;;  %vm9175_vm3 = vmpackc.low %vm2231_vm0, %vm2228_vm15  ;;  %vm2239_vm15 = vcmp.eq.s32.totalorder %v11170_v62, %v11687_v29  ;;  %vm2242_vm0 = vcmp.eq.s32.totalorder %v11170_v62, %v12044_v55 }
 0x180   :  { %17917 = vst [vmem:[#allocation64_spill] sm:$0xff] %v12119_v20  ;;  %1973 = vperm.xlu1 %10301, %v1603_v21   ;;  %v746_v25 = vpop.f32.mrf.mxu1  ;;  %v828_v21 = vadd.f32 %v11968_v26, %v741_v36  ;;  %vm9185_vm4 = vmpackc.low %vm2242_vm0, %vm2239_vm15  ;;  %vm2349_vm8 = vcmp.eq.s32.totalorder %v12263_v17, %v11961_v40  ;;  %vm2355_vm15 = vcmp.eq.s32.totalorder %v12263_v17, %v11983_v60 }
 0x181   :  { %v830_v18 = vadd.f32 %v11968_v26, %v745_v44  ;;  %v747_v30 = vadd.f32 %v746_v25, %v553_v56  ;;  %v1607_v56 = vld [vmem:[%s17429_s3 + $0x358] sm:$0xff]  ;;  %vm2251_vm0 = vcmp.eq.s32.totalorder %v11170_v62, %v11711_v38  ;;  %v12352_v40 = vsel %vm2355_vm15, 1.0, %v17908_v8 }
 0x182   :  { %2108 = vperm.xlu0 %10302, %v1648_v58   ;;  %v865_v58 = vmax.f32 %v829_v48, 0.0  ;;  %v864_v25 = vmax.f32 %v828_v21, 0.0  ;;  %v559_v21 = vpop.f32.mrf.mxu0  ;;  %17941 = vst [vmem:[#allocation88_spill] sm:$0xff] %v12352_v40  ;;  %vm2267_vm15 = vcmp.eq.s32.totalorder %v11756_v63, %v12107_v31 }
 0x183   :  { %v12140_v50 = vpop.permute.xlu1 %1793  ;;  %v831_v44 = vadd.f32 %v11959_v4, %v747_v30  ;;  %v866_v2 = vmax.f32 %v830_v18, 0.0  ;;  %v12160_v18 = vpop.permute.xlu0 %1916  ;;  %v1609_v30 = vld [vmem:[%s17429_s3 + $0x368] sm:$0xff] }
 0x184   :  { %17918 = vst [vmem:[#allocation65_spill] sm:$0xff] %v12140_v50  ;;  %1979 = vperm.xlu1 %10301, %v1605_v37   ;;  %v1652_v37 = vld [vmem:[%s17429_s3 + $0x4c0] sm:$0xff] }
 0x185   :  { %9166 = vmatmul.mubr.msk.bf16.gmra.mxu1 %vm9165_vm1, %v17904_v57  ;;  %v867_v36 = vmax.f32 %v831_v44, 0.0  ;;  %vm2234_vm1 = vcmp.eq.s32.totalorder %v11756_v63, %v11677_v22 }
 0x186   :  { %2114 = vperm.xlu0 %10302, %v1650_v1   ;;  %9168 = vmatprep.mubr.msk.bf16.mxu1 %vm9167_vm6, %v17904_v57  ;;  %v896_v1 = vpack.c.bf16 %v866_v2, %v864_v25  ;;  %vm2237_vm6 = vcmp.eq.s32.totalorder %v11756_v63, %v12025_v16 }
 0x187   :  { %v12151_v51 = vpop.permute.xlu1 %1799  ;;  %v897_v48 = vpack.c.bf16 %v867_v36, %v865_v58  ;;  %v1611_v58 = vld [vmem:[%s17429_s3 + $0x378] sm:$0xff]  ;;  %v563_v36 = vpop.f32.mrf.mxu0  ;;  %vm9179_vm7 = vmpackc.low %vm2237_vm6, %vm2234_vm1  ;;  %vm2343_vm1 = vcmp.eq.s32.totalorder %v12263_v17, %v11933_v45  ;;  %vm2245_vm6 = vcmp.eq.s32.totalorder %v11170_v62, %v11700_v0 }
 0x188   :  { %17919 = vst [vmem:[#allocation66_spill] sm:$0xff] %v12151_v51  ;;  %1985 = vperm.xlu1 %10301, %v1607_v56   ;;  %v1654_v56 = vld [vmem:[%s17429_s3 + $0x4d0] sm:$0xff]  ;;  %v12178_v25 = vpop.permute.xlu0 %1922  ;;  %v12296_v45 = vsel %vm2343_vm1, 1.0, %v17908_v8 }
 0x189   :  { %1165 = vmatprep.mubr.bf16.mxu0 %v897_v48  ;;  %v565_v7 = vpop.f32.mrf.mxu0  ;;  %17934 = vst [vmem:[#allocation81_spill] sm:$0xff] %v12296_v45  ;;  %v1631_v45 = vld [vmem:[%s17429_s3 + $0x418] sm:$0xff] }
 0x18a   :  { %2120 = vperm.xlu0 %10302, %v1652_v37   ;;  %1166 = vmatmul.mubr.bf16.gmra.mxu0 %v896_v1  ;;  %v1656_v1 = vld [vmem:[%s17429_s3 + $0x4e0] sm:$0xff] }
 0x18b   :  { %v12169_v44 = vpop.permute.xlu1 %1805 }
 0x18c   :  { %17920 = vst [vmem:[#allocation67_spill] sm:$0xff] %v12169_v44  ;;  %1991 = vperm.xlu1 %10301, %v1609_v30  }
 0x18d   :  { %9170 = vmatmul.mubr.msk.bf16.gmra.mxu1 %vm9169_vm10, %v17904_v57  ;;  %v750_v2 = vpop.f32.mrf.mxu1  ;;  %vm2240_vm10 = vcmp.eq.s32.totalorder %v11756_v63, %v11687_v29 }
 0x18e   :  { %2126 = vperm.xlu0 %10302, %v1654_v56   ;;  %9172 = vmatprep.mubr.msk.bf16.mxu1 %vm9171_vm11, %v17904_v57  ;;  %v751_v56 = vadd.f32 %v750_v2, %v557_v47  ;;  %vm2243_vm11 = vcmp.eq.s32.totalorder %v11756_v63, %v12044_v55 }
 0x18f   :  { %v12181_v37 = vpop.permute.xlu1 %1811  ;;  %v752_v48 = vpop.f32.mrf.mxu1  ;;  %vm9183_vm14 = vmpackc.low %vm2243_vm11, %vm2240_vm10  ;;  %vm2255_vm10 = vcmp.eq.s32.totalorder %v11756_v63, %v12079_v13 }
 0x190   :  { %17921 = vst [vmem:[#allocation68_spill] sm:$0xff] %v12181_v37  ;;  %v753_v30 = vadd.f32 %v752_v48, %v559_v21  ;;  %1997 = vperm.xlu1 %10301, %v1611_v58   ;;  %v1658_v58 = vld [vmem:[%s17429_s3 + $0x4f0] sm:$0xff]  ;;  %v12202_v48 = vpop.permute.xlu0 %1928  ;;  %v832_v33 = vadd.f32 %v11968_v26, %v751_v56  ;;  %v1617_v56 = vld [vmem:[%s17429_s3 + $0x3a8] sm:$0xff] }
 0x191   :  { %v754_v52 = vpop.f32.mrf.mxu1  ;;  %17923 = vst [vmem:[#allocation70_spill] sm:$0xff] %v12202_v48 }
 0x192   :  { %2132 = vperm.xlu0 %10302, %v1656_v1   ;;  %v755_v12 = vadd.f32 %v754_v52, %v563_v36  ;;  %v833_v47 = vadd.f32 %v11959_v4, %v753_v30  ;;  %v1615_v52 = vld [vmem:[%s17429_s3 + $0x398] sm:$0xff]  ;;  %v868_v30 = vmax.f32 %v832_v33, 0.0 }
 0x193   :  { %v12197_v10 = vpop.permute.xlu1 %1817  ;;  %v756_v21 = vpop.f32.mrf.mxu1  ;;  %v1619_v33 = vld [vmem:[%s17429_s3 + $0x3b8] sm:$0xff] }
 0x194   :  { %17922 = vst [vmem:[#allocation69_spill] sm:$0xff] %v12197_v10  ;;  %v757_v2 = vadd.f32 %v756_v21, %v565_v7  ;;  %2003 = vperm.xlu1 %10301, %v1613_v43   ;;  %v834_v1 = vadd.f32 %v11968_v26, %v755_v12  ;;  %v1660_v7 = vld [vmem:[%s17429_s3 + $0x500] sm:$0xff]  ;;  %v869_v12 = vmax.f32 %v833_v47, 0.0  ;;  %v569_v21 = vpop.f32.mrf.mxu0 }
 0x195   :  { %9174 = vmatmul.mubr.msk.bf16.gmra.mxu1 %vm9173_vm2, %v17904_v57  ;;  %vm2246_vm2 = vcmp.eq.s32.totalorder %v11756_v63, %v11700_v0 }
 0x196   :  { %v835_v36 = vadd.f32 %v11959_v4, %v757_v2  ;;  %2138 = vperm.xlu0 %10302, %v1658_v58   ;;  %9176 = vmatprep.mubr.msk.bf16.mxu1 %vm9175_vm3, %v17904_v57  ;;  %v870_v9 = vmax.f32 %v834_v1, 0.0  ;;  %v12229_v58 = vpop.permute.xlu0 %1934  ;;  %vm2249_vm3 = vcmp.eq.s32.totalorder %v11756_v63, %v12058_v14 }
 0x197   :  { %v12213_v34 = vpop.permute.xlu1 %1823  ;;  %17925 = vst [vmem:[#allocation72_spill] sm:$0xff] %v12229_v58  ;;  %vm9187_vm5 = vmpackc.low %vm2249_vm3, %vm2246_vm2  ;;  %vm2254_vm2 = vcmp.eq.s32.totalorder %v11170_v62, %v12079_v13  ;;  %vm2361_vm3 = vcmp.eq.s32.totalorder %v12263_v17, %v12001_v6 }
 0x198   :  { %17924 = vst [vmem:[#allocation71_spill] sm:$0xff] %v12213_v34  ;;  %v871_v43 = vmax.f32 %v835_v36, 0.0  ;;  %2009 = vperm.xlu1 %10301, %v1615_v52   ;;  %v898_v1 = vpack.c.bf16 %v870_v9, %v868_v30  ;;  %v571_v52 = vpop.f32.mrf.mxu0 }
 0x19a   :  { %2144 = vperm.xlu0 %10302, %v1660_v7   ;;  %v899_v2 = vpack.c.bf16 %v871_v43, %v869_v12  ;;  %v12244_v9 = vpop.permute.xlu0 %1940  ;;  %v575_v12 = vpop.f32.mrf.mxu0  ;;  %v1621_v43 = vld [vmem:[%s17429_s3 + $0x3c8] sm:$0xff] }
 0x19b   :  { %v12231_v47 = vpop.permute.xlu1 %1829  ;;  %17928 = vst [vmem:[#allocation75_spill] sm:$0xff] %v12244_v9 }
 0x19c   :  { %17926 = vst [vmem:[#allocation73_spill] sm:$0xff] %v12231_v47  ;;  %2015 = vperm.xlu1 %10301, %v1617_v56   ;;  %1175 = vmatprep.mubr.bf16.mxu0 %v899_v2  ;;  %v577_v16 = vpop.f32.mrf.mxu0 }
 0x19d   :  { %9178 = vmatmul.mubr.msk.bf16.gmra.mxu1 %vm9177_vm12, %v17904_v57  ;;  %1176 = vmatmul.mubr.bf16.gmra.mxu0 %v898_v1  ;;  %vm2248_vm12 = vcmp.eq.s32.totalorder %v11170_v62, %v12058_v14 }
 0x19e   :  { %9180 = vmatprep.mubr.msk.bf16.mxu1 %vm9179_vm7, %v17904_v57  ;;  %v12259_v22 = vpop.permute.xlu0 %1946  ;;  %vm2252_vm7 = vcmp.eq.s32.totalorder %v11756_v63, %v11711_v38  ;;  %vm9189_vm11 = vmpackc.low %vm2248_vm12, %vm2245_vm6 }
 0x19f   :  { %v12238_v36 = vpop.permute.xlu1 %1835  ;;  %17930 = vst [vmem:[#allocation77_spill] sm:$0xff] %v12259_v22  ;;  %vm9193_vm6 = vmpackc.low %vm2254_vm2, %vm2251_vm0 }
 0x1a0   :  { %17927 = vst [vmem:[#allocation74_spill] sm:$0xff] %v12238_v36  ;;  %2021 = vperm.xlu1 %10301, %v1619_v33  }
 0x1a1   :  { %v760_v7 = vpop.f32.mrf.mxu1 }
 0x1a2   :  { %v761_v1 = vadd.f32 %v760_v7, %v569_v21 }
 0x1a3   :  { %v762_v30 = vpop.f32.mrf.mxu1  ;;  %v12253_v56 = vpop.permute.xlu1 %1841 }
 0x1a4   :  { %17929 = vst [vmem:[#allocation76_spill] sm:$0xff] %v12253_v56  ;;  %v763_v2 = vadd.f32 %v762_v30, %v571_v52  ;;  %2027 = vperm.xlu1 %10301, %v1621_v43   ;;  %v1625_v30 = vld [vmem:[%s17429_s3 + $0x3e8] sm:$0xff] }
 0x1a5   :  { %v764_v33 = vpop.f32.mrf.mxu1  ;;  %9182 = vmatmul.mubr.msk.bf16.gmra.mxu1 %vm9181_vm13, %v17904_v57  ;;  %vm9191_vm13 = vmpackc.low %vm2255_vm10, %vm2252_vm7  ;;  %vm2367_vm7 = vcmp.eq.s32.totalorder %v12263_v17, %v12018_v41  ;;  %vm2260_vm10 = vcmp.eq.s32.totalorder %v11170_v62, %v12091_v42 }
 0x1a6   :  { %9184 = vmatprep.mubr.msk.bf16.mxu1 %vm9183_vm14, %v17904_v57  ;;  %v765_v56 = vadd.f32 %v764_v33, %v575_v12  ;;  %v837_v21 = vadd.f32 %v11959_v4, %v763_v2  ;;  %v836_v12 = vadd.f32 %v11968_v26, %v761_v1  ;;  %v581_v2 = vpop.f32.mrf.mxu0 }
 0x1a7   :  { %v766_v36 = vpop.f32.mrf.mxu1  ;;  %v12265_v52 = vpop.permute.xlu1 %1847 }
 0x1a8   :  { %17931 = vst [vmem:[#allocation78_spill] sm:$0xff] %v12265_v52  ;;  %v767_v7 = vadd.f32 %v766_v36, %v577_v16  ;;  %2033 = vperm.xlu1 %10301, %v1623_v35   ;;  %v838_v43 = vadd.f32 %v11968_v26, %v765_v56  ;;  %v12286_v36 = vpop.permute.xlu0 %1952  ;;  %v873_v1 = vmax.f32 %v837_v21, 0.0  ;;  %v872_v56 = vmax.f32 %v836_v12, 0.0  ;;  %v1629_v12 = vld [vmem:[%s17429_s3 + $0x408] sm:$0xff] }
 0x1a9   :  { %17933 = vst [vmem:[#allocation80_spill] sm:$0xff] %v12286_v36 }
 0x1aa   :  { %v839_v33 = vadd.f32 %v11959_v4, %v767_v7  ;;  %v874_v16 = vmax.f32 %v838_v43, 0.0  ;;  %v1627_v7 = vld [vmem:[%s17429_s3 + $0x3f8] sm:$0xff]  ;;  %v583_v43 = vpop.f32.mrf.mxu0 }
 0x1ab   :  { %v12282_v35 = vpop.permute.xlu1 %1853 }
 0x1ac   :  { %17932 = vst [vmem:[#allocation79_spill] sm:$0xff] %v12282_v35  ;;  %v875_v55 = vmax.f32 %v839_v33, 0.0  ;;  %2039 = vperm.xlu1 %10301, %v1625_v30   ;;  %v900_v30 = vpack.c.bf16 %v874_v16, %v872_v56  ;;  %v12316_v33 = vpop.permute.xlu0 %1958 }
 0x1ad   :  { %9186 = vmatmul.mubr.msk.bf16.gmra.mxu1 %vm9185_vm4, %v17904_v57  ;;  %17936 = vst [vmem:[#allocation83_spill] sm:$0xff] %v12316_v33  ;;  %vm2258_vm4 = vcmp.eq.s32.totalorder %v11756_v63, %v11721_v19 }
 0x1ae   :  { %v901_v29 = vpack.c.bf16 %v875_v55, %v873_v1  ;;  %9188 = vmatprep.mubr.msk.bf16.mxu1 %vm9187_vm5, %v17904_v57  ;;  %v12324_v1 = vsel %vm2349_vm8, 1.0, %v17908_v8  ;;  %vm2261_vm5 = vcmp.eq.s32.totalorder %v11756_v63, %v12091_v42 }
 0x1af   :  { %v12298_v21 = vpop.permute.xlu1 %1859  ;;  %17937 = vst [vmem:[#allocation84_spill] sm:$0xff] %v12324_v1  ;;  %vm9195_vm12 = vmpackc.low %vm2261_vm5, %vm2258_vm4  ;;  %vm2263_vm5 = vcmp.eq.s32.totalorder %v11170_v62, %v11729_v49 }
 0x1b0   :  { %vm2346_vm9 = vcmp.eq.s32.totalorder %v12263_v17, %v12298_v21  ;;  %1185 = vmatprep.mubr.bf16.mxu0 %v901_v29  ;;  %2045 = vperm.xlu1 %10301, %v1627_v7   ;;  %v587_v29 = vpop.f32.mrf.mxu0 }
 0x1b1   :  { %v12311_v55 = vsel %vm2346_vm9, 1.0, %v17908_v8  ;;  %1186 = vmatmul.mubr.bf16.gmra.mxu0 %v900_v30  ;;  %vm2257_vm9 = vcmp.eq.s32.totalorder %v11170_v62, %v11721_v19 }
 0x1b2   :  { %17935 = vst [vmem:[#allocation82_spill] sm:$0xff] %v12311_v55  ;;  %v589_v0 = vpop.f32.mrf.mxu0  ;;  %vm9197_vm0 = vmpackc.low %vm2260_vm10, %vm2257_vm9 }
 0x1b3   :  { %v12326_v56 = vpop.permute.xlu1 %1865  ;;  %v770_v7 = vpop.f32.mrf.mxu1 }
 0x1b4   :  { %17938 = vst [vmem:[#allocation85_spill] sm:$0xff] %v12326_v56  ;;  %vm2352_vm14 = vcmp.eq.s32.totalorder %v12263_v17, %v12326_v56  ;;  %2051 = vperm.xlu1 %10301, %v1629_v12   ;;  %v771_v12 = vadd.f32 %v770_v7, %v581_v2  ;;  %v1633_v7 = vld [vmem:[%s17429_s3 + $0x428] sm:$0xff]  ;;  %v593_v38 = vpop.f32.mrf.mxu0 }
 0x1b5   :  { %v12336_v30 = vsel %vm2352_vm14, 1.0, %v17908_v8  ;;  %9190 = vmatmul.mubr.msk.bf16.gmra.mxu1 %vm9189_vm11, %v17904_v57  ;;  %v772_v16 = vpop.f32.mrf.mxu1  ;;  %vm2264_vm11 = vcmp.eq.s32.totalorder %v11756_v63, %v11729_v49 }
 0x1b6   :  { %17939 = vst [vmem:[#allocation86_spill] sm:$0xff] %v12336_v30  ;;  %v773_v14 = vadd.f32 %v772_v16, %v583_v43  ;;  %9192 = vmatprep.mubr.msk.bf16.mxu1 %vm9191_vm13, %v17904_v57  ;;  %v12356_v43 = vpop.permute.xlu0 %1964  ;;  %v12375_v30 = vsel %vm2361_vm3, 1.0, %v17908_v8  ;;  %vm2373_vm13 = vcmp.eq.s32.totalorder %v12263_v17, %v12042_v53  ;;  %vm9199_vm2 = vmpackc.low %vm2267_vm15, %vm2264_vm11  ;;  %vm2379_vm3 = vcmp.eq.s32.totalorder %v12263_v17, %v12068_v5 }
 0x1b7   :  { %v12345_v56 = vpop.permute.xlu1 %1871  ;;  %v774_v60 = vpop.f32.mrf.mxu1  ;;  %17942 = vst [vmem:[#allocation89_spill] sm:$0xff] %v12356_v43  ;;  %17944 = vst [vmem:[#allocation91_spill] sm:$0xff] %v12375_v30  ;;  %vm2391_vm11 = vcmp.eq.s32.totalorder %v12263_v17, %v12112_v61  ;;  %vm2272_vm15 = vcmp.eq.s32.totalorder %v11170_v62, %v12119_v20 }
 0x1b8   :  { %17940 = vst [vmem:[#allocation87_spill] sm:$0xff] %v12345_v56  ;;  %2057 = vperm.xlu1 %10301, %v1631_v45   ;;  %vm2358_vm1 = vcmp.eq.s32.totalorder %v12263_v17, %v12345_v56  ;;  %v775_v2 = vadd.f32 %v774_v60, %v587_v29  ;;  %v841_v55 = vadd.f32 %v11959_v4, %v773_v14 }
 0x1b9   :  { %v776_v16 = vpop.f32.mrf.mxu1  ;;  %v12369_v1 = vsel %vm2358_vm1, 1.0, %v17908_v8  ;;  %v840_v60 = vadd.f32 %v11968_v26, %v771_v12  ;;  %vm2266_vm1 = vcmp.eq.s32.totalorder %v11170_v62, %v12107_v31 }
 0x1ba   :  { %17943 = vst [vmem:[#allocation90_spill] sm:$0xff] %v12369_v1  ;;  %v777_v45 = vadd.f32 %v776_v16, %v589_v0  ;;  %v842_v13 = vadd.f32 %v11968_v26, %v775_v2  ;;  %v1635_v2 = vld [vmem:[%s17429_s3 + $0x438] sm:$0xff]  ;;  %v12400_v16 = vpop.permute.xlu0 %1970  ;;  %vm9201_vm9 = vmpackc.low %vm2266_vm1, %vm2263_vm5 }
 0x1bb   :  { %v12381_v56 = vpop.permute.xlu1 %1877  ;;  %17946 = vst [vmem:[#allocation93_spill] sm:$0xff] %v12400_v16  ;;  %v876_v40 = vmax.f32 %v840_v60, 0.0 }
 0x1bc   :  { %v843_v0 = vadd.f32 %v11959_v4, %v777_v45  ;;  %vm2364_vm8 = vcmp.eq.s32.totalorder %v12263_v17, %v12381_v56  ;;  %2063 = vperm.xlu1 %10301, %v1633_v7   ;;  %v878_v14 = vmax.f32 %v842_v13, 0.0  ;;  %v877_v45 = vmax.f32 %v841_v55, 0.0  ;;  %v1637_v7 = vld [vmem:[%s17429_s3 + $0x448] sm:$0xff] }
 0x1bd   :  { %v12392_v12 = vsel %vm2364_vm8, 1.0, %v17908_v8  ;;  %9194 = vmatmul.mubr.msk.bf16.gmra.mxu1 %vm9193_vm6, %v17904_v57  ;;  %v12406_v13 = vsel %vm2367_vm7, 1.0, %v17908_v8  ;;  %vm2385_vm6 = vcmp.eq.s32.totalorder %v12263_v17, %v12088_v46  ;;  %vm2270_vm7 = vcmp.eq.s32.totalorder %v11756_v63, %v11741_v54 }
 0x1be   :  { %17945 = vst [vmem:[#allocation92_spill] sm:$0xff] %v12392_v12  ;;  %v879_v29 = vmax.f32 %v843_v0, 0.0  ;;  %9196 = vmatprep.mubr.msk.bf16.mxu1 %vm9195_vm12, %v17904_v57  ;;  %17947 = vst [vmem:[#allocation94_spill] sm:$0xff] %v12406_v13  ;;  %v902_v60 = vpack.c.bf16 %v878_v14, %v876_v40  ;;  %v595_v40 = vpop.f32.mrf.mxu0  ;;  %v12444_v14 = vpop.permute.xlu0 %1976  ;;  %vm2273_vm8 = vcmp.eq.s32.totalorder %v11756_v63, %v12119_v20  ;;  %v12492_v46 = vsel %vm2385_vm6, 1.0, %v17908_v8 }
 0x1bf   :  { %v12410_v1 = vpop.permute.xlu1 %1883  ;;  %17951 = vst [vmem:[#allocation98_spill] sm:$0xff] %v12444_v14  ;;  %17957 = vst [vmem:[#allocation104_spill] sm:$0xff] %v12492_v46  ;;  %vm2403_vm6 = vcmp.eq.s32.totalorder %v12263_v17, %v12160_v18 }
 0x1c0   :  { %vm2370_vm14 = vcmp.eq.s32.totalorder %v12263_v17, %v12410_v1  ;;  %2069 = vperm.xlu1 %10301, %v1635_v2   ;;  %v903_v55 = vpack.c.bf16 %v879_v29, %v877_v45  ;;  %v12435_v29 = vsel %vm2373_vm13, 1.0, %v17908_v8  ;;  %vm9203_vm10 = vmpackc.low %vm2273_vm8, %vm2270_vm7  ;;  %vm2275_vm7 = vcmp.eq.s32.totalorder %v11170_v62, %v11753_v59 }
 0x1c1   :  { %v12421_v0 = vsel %vm2370_vm14, 1.0, %v17908_v8  ;;  %17949 = vst [vmem:[#allocation96_spill] sm:$0xff] %v12435_v29  ;;  %vm2269_vm14 = vcmp.eq.s32.totalorder %v11170_v62, %v11741_v54  ;;  %vm2278_vm8 = vcmp.eq.s32.totalorder %v11170_v62, %v12140_v50  ;;  %v1653_v54 = vld [vmem:[%s17429_s3 + $0x4c8] sm:$0xff] }
 0x1c2   :  { %17948 = vst [vmem:[#allocation95_spill] sm:$0xff] %v12421_v0  ;;  %1195 = vmatprep.mubr.bf16.mxu0 %v903_v55  ;;  %v1639_v55 = vld [vmem:[%s17429_s3 + $0x458] sm:$0xff]  ;;  %v599_v0 = vpop.f32.mrf.mxu0  ;;  %v12481_v12 = vpop.permute.xlu0 %1982  ;;  %vm9205_vm5 = vmpackc.low %vm2272_vm15, %vm2269_vm14 }
 0x1c3   :  { %v12437_v2 = vpop.permute.xlu1 %1889  ;;  %1196 = vmatmul.mubr.bf16.gmra.mxu0 %v902_v60  ;;  %17956 = vst [vmem:[#allocation103_spill] sm:$0xff] %v12481_v12  ;;  %vm9209_vm14 = vmpackc.low %vm2278_vm8, %vm2275_vm7 }
 0x1c4   :  { %17950 = vst [vmem:[#allocation97_spill] sm:$0xff] %v12437_v2  ;;  %vm2376_vm4 = vcmp.eq.s32.totalorder %v12263_v17, %v12437_v2  ;;  %2075 = vperm.xlu1 %10301, %v1637_v7   ;;  %v12461_v7 = vsel %vm2379_vm3, 1.0, %v17908_v8  ;;  %v601_v53 = vpop.f32.mrf.mxu0 }
 0x1c5   :  { %v12449_v45 = vsel %vm2376_vm4, 1.0, %v17908_v8  ;;  %9198 = vmatmul.mubr.msk.bf16.gmra.mxu1 %vm9197_vm0, %v17904_v57  ;;  %17953 = vst [vmem:[#allocation100_spill] sm:$0xff] %v12461_v7  ;;  %vm2276_vm0 = vcmp.eq.s32.totalorder %v11756_v63, %v11753_v59  ;;  %vm2279_vm4 = vcmp.eq.s32.totalorder %v11756_v63, %v12140_v50  ;;  %v1651_v50 = vld [vmem:[%s17429_s3 + $0x4b8] sm:$0xff] }
 0x1c6   :  { %17952 = vst [vmem:[#allocation99_spill] sm:$0xff] %v12449_v45  ;;  %v780_v30 = vpop.f32.mrf.mxu1  ;;  %9200 = vmatprep.mubr.msk.bf16.mxu1 %vm9199_vm2, %v17904_v57  ;;  %v1641_v45 = vld [vmem:[%s17429_s3 + $0x468] sm:$0xff]  ;;  %vm2397_vm2 = vcmp.eq.s32.totalorder %v12263_v17, %v12136_v23  ;;  %vm9207_vm1 = vmpackc.low %vm2279_vm4, %vm2276_vm0  ;;  %vm2415_vm0 = vcmp.eq.s32.totalorder %v12263_v17, %v12202_v48  ;;  %vm2284_vm4 = vcmp.eq.s32.totalorder %v11170_v62, %v12151_v51 }
 0x1c7   :  { %v12465_v13 = vpop.permute.xlu1 %1895 }
 0x1c8   :  { %17954 = vst [vmem:[#allocation101_spill] sm:$0xff] %v12465_v13  ;;  %vm2382_vm12 = vcmp.eq.s32.totalorder %v12263_v17, %v12465_v13  ;;  %2081 = vperm.xlu1 %10301, %v1639_v55   ;;  %v782_v60 = vpop.f32.mrf.mxu1  ;;  %v781_v13 = vadd.f32 %v780_v30, %v593_v38  ;;  %v1643_v38 = vld [vmem:[%s17429_s3 + $0x478] sm:$0xff]  ;;  %v1645_v30 = vld [vmem:[%s17429_s3 + $0x488] sm:$0xff] }
 0x1c9   :  { %v12476_v29 = vsel %vm2382_vm12, 1.0, %v17908_v8  ;;  %v783_v55 = vadd.f32 %v782_v60, %v595_v40 }
 0x1ca   :  { %17955 = vst [vmem:[#allocation102_spill] sm:$0xff] %v12476_v29  ;;  %v784_v19 = vpop.f32.mrf.mxu1 }
 0x1cb   :  { %v785_v5 = vadd.f32 %v784_v19, %v599_v0  ;;  %v12494_v2 = vpop.permute.xlu1 %1901  ;;  %v845_v19 = vadd.f32 %v11959_v4, %v783_v55  ;;  %v12526_v55 = vpop.permute.xlu0 %1988 }
 0x1cc   :  { %vm2388_vm13 = vcmp.eq.s32.totalorder %v12263_v17, %v12494_v2  ;;  %2087 = vperm.xlu1 %10301, %v1641_v45   ;;  %v786_v40 = vpop.f32.mrf.mxu1  ;;  %v844_v45 = vadd.f32 %v11968_v26, %v781_v13  ;;  %17960 = vst [vmem:[#allocation107_spill] sm:$0xff] %v12526_v55 }
 0x1cd   :  { %v846_v60 = vadd.f32 %v11968_v26, %v785_v5  ;;  %v12502_v42 = vsel %vm2388_vm13, 1.0, %v17908_v8  ;;  %9202 = vmatmul.mubr.msk.bf16.gmra.mxu1 %vm9201_vm9, %v17904_v57  ;;  %v787_v0 = vadd.f32 %v786_v40, %v601_v53  ;;  %v12515_v5 = vsel %vm2391_vm11, 1.0, %v17908_v8 }
 0x1ce   :  { %17958 = vst [vmem:[#allocation105_spill] sm:$0xff] %v12502_v42  ;;  %9204 = vmatprep.mubr.msk.bf16.mxu1 %vm9203_vm10, %v17904_v57  ;;  %17959 = vst [vmem:[#allocation106_spill] sm:$0xff] %v12515_v5  ;;  %v881_v46 = vmax.f32 %v845_v19, 0.0  ;;  %v880_v29 = vmax.f32 %v844_v45, 0.0  ;;  %vm2409_vm9 = vcmp.eq.s32.totalorder %v12263_v17, %v12178_v25  ;;  %vm2282_vm11 = vcmp.eq.s32.totalorder %v11756_v63, %v11768_v11 }
 0x1cf   :  { %v12520_v7 = vpop.permute.xlu1 %1907  ;;  %v847_v53 = vadd.f32 %v11959_v4, %v787_v0  ;;  %v882_v13 = vmax.f32 %v846_v60, 0.0  ;;  %v605_v60 = vpop.f32.mrf.mxu0  ;;  %v1647_v0 = vld [vmem:[%s17429_s3 + $0x498] sm:$0xff]  ;;  %vm2285_vm13 = vcmp.eq.s32.totalorder %v11756_v63, %v12151_v51 }
 0x1d0   :  { %vm2394_vm3 = vcmp.eq.s32.totalorder %v12263_v17, %v12520_v7  ;;  %2093 = vperm.xlu1 %10301, %v1643_v38   ;;  %v12548_v38 = vsel %vm2397_vm2, 1.0, %v17908_v8  ;;  %v12566_v5 = vpop.permute.xlu0 %1994  ;;  %vm9211_vm15 = vmpackc.low %vm2285_vm13, %vm2282_vm11  ;;  %vm2287_vm11 = vcmp.eq.s32.totalorder %v11170_v62, %v11787_v15  ;;  %vm2290_vm13 = vcmp.eq.s32.totalorder %v11170_v62, %v12169_v44 }
 0x1d1   :  { %v12534_v40 = vsel %vm2394_vm3, 1.0, %v17908_v8  ;;  %v883_v42 = vmax.f32 %v847_v53, 0.0  ;;  %17962 = vst [vmem:[#allocation109_spill] sm:$0xff] %v12548_v38  ;;  %v904_v45 = vpack.c.bf16 %v882_v13, %v880_v29  ;;  %17964 = vst [vmem:[#allocation111_spill] sm:$0xff] %v12566_v5  ;;  %v607_v20 = vpop.f32.mrf.mxu0  ;;  %v1649_v13 = vld [vmem:[%s17429_s3 + $0x4a8] sm:$0xff]  ;;  %vm2281_vm3 = vcmp.eq.s32.totalorder %v11170_v62, %v11768_v11 }
 0x1d2   :  { %17961 = vst [vmem:[#allocation108_spill] sm:$0xff] %v12534_v40  ;;  %vm9213_vm7 = vmpackc.low %vm2284_vm4, %vm2281_vm3 }
 0x1d3   :  { %v12550_v31 = vpop.permute.xlu1 %1913  ;;  %v905_v19 = vpack.c.bf16 %v883_v42, %v881_v46  ;;  %v12574_v46 = vsel %vm2403_vm6, 1.0, %v17908_v8  ;;  %vm9217_vm3 = vmpackc.low %vm2290_vm13, %vm2287_vm11 }
 0x1d4   :  { %vm2400_vm12 = vcmp.eq.s32.totalorder %v12263_v17, %v12550_v31  ;;  %2099 = vperm.xlu1 %10301, %v1645_v30   ;;  %17965 = vst [vmem:[#allocation112_spill] sm:$0xff] %v12574_v46 }
 0x1d5   :  { %v12560_v53 = vsel %vm2400_vm12, 1.0, %v17908_v8  ;;  %9206 = vmatmul.mubr.msk.bf16.gmra.mxu1 %vm9205_vm5, %v17904_v57  ;;  %1205 = vmatprep.mubr.bf16.mxu0 %v905_v19  ;;  %vm2288_vm5 = vcmp.eq.s32.totalorder %v11756_v63, %v11787_v15  ;;  %vm2291_vm12 = vcmp.eq.s32.totalorder %v11756_v63, %v12169_v44  ;;  %v1661_v44 = vld [vmem:[%s17429_s3 + $0x508] sm:$0xff] }
 0x1d6   :  { %17963 = vst [vmem:[#allocation110_spill] sm:$0xff] %v12560_v53  ;;  %9208 = vmatprep.mubr.msk.bf16.mxu1 %vm9207_vm1, %v17904_v57  ;;  %1206 = vmatmul.mubr.bf16.gmra.mxu0 %v904_v45  ;;  %v611_v45 = vpop.f32.mrf.mxu0  ;;  %v12603_v53 = vpop.permute.xlu0 %2000  ;;  %vm2421_vm1 = vcmp.eq.s32.totalorder %v12263_v17, %v12229_v58  ;;  %vm9215_vm8 = vmpackc.low %vm2291_vm12, %vm2288_vm5  ;;  %vm2439_vm5 = vcmp.eq.s32.totalorder %v12263_v17, %v12286_v36 }
 0x1d7   :  { %v12578_v42 = vpop.permute.xlu1 %1919  ;;  %17968 = vst [vmem:[#allocation115_spill] sm:$0xff] %v12603_v53  ;;  %vm2296_vm12 = vcmp.eq.s32.totalorder %v11170_v62, %v12181_v37 }
 0x1d8   :  { %vm2406_vm10 = vcmp.eq.s32.totalorder %v12263_v17, %v12578_v42  ;;  %2105 = vperm.xlu1 %10301, %v1647_v0   ;;  %v12597_v0 = vsel %vm2409_vm9, 1.0, %v17908_v8  ;;  %v613_v48 = vpop.f32.mrf.mxu0  ;;  %vm2427_vm9 = vcmp.eq.s32.totalorder %v12263_v17, %v12244_v9 }
 0x1d9   :  { %v12589_v29 = vsel %vm2406_vm10, 1.0, %v17908_v8  ;;  %v790_v30 = vpop.f32.mrf.mxu1  ;;  %17967 = vst [vmem:[#allocation114_spill] sm:$0xff] %v12597_v0 }
 0x1da   :  { %17966 = vst [vmem:[#allocation113_spill] sm:$0xff] %v12589_v29  ;;  %v791_v59 = vadd.f32 %v790_v30, %v605_v60  ;;  %v12642_v0 = vpop.permute.xlu0 %2006 }
 0x1db   :  { %v12599_v40 = vpop.permute.xlu1 %1925  ;;  %v792_v38 = vpop.f32.mrf.mxu1  ;;  %17972 = vst [vmem:[#allocation119_spill] sm:$0xff] %v12642_v0 }
 0x1dc   :  { %vm2412_vm2 = vcmp.eq.s32.totalorder %v12263_v17, %v12599_v40  ;;  %2111 = vperm.xlu1 %10301, %v1649_v13   ;;  %v793_v46 = vadd.f32 %v792_v38, %v607_v20  ;;  %v12620_v20 = vsel %vm2415_vm0, 1.0, %v17908_v8 }
 0x1dd   :  { %v12608_v19 = vsel %vm2412_vm2, 1.0, %v17908_v8  ;;  %9210 = vmatmul.mubr.msk.bf16.gmra.mxu1 %vm9209_vm14, %v17904_v57  ;;  %v794_v29 = vpop.f32.mrf.mxu1  ;;  %17970 = vst [vmem:[#allocation117_spill] sm:$0xff] %v12620_v20  ;;  %vm2294_vm14 = vcmp.eq.s32.totalorder %v11756_v63, %v11800_v24  ;;  %vm2297_vm2 = vcmp.eq.s32.totalorder %v11756_v63, %v12181_v37  ;;  %v18072_v37 = vld [vmem:[#allocation48_spill] sm:$0xff] }
 0x1de   :  { %17969 = vst [vmem:[#allocation116_spill] sm:$0xff] %v12608_v19  ;;  %v795_v49 = vadd.f32 %v794_v29, %v611_v45  ;;  %9212 = vmatprep.mubr.msk.bf16.mxu1 %vm9211_vm15, %v17904_v57  ;;  %v849_v29 = vadd.f32 %v11959_v4, %v793_v46  ;;  %vm2433_vm15 = vcmp.eq.s32.totalorder %v12263_v17, %v12259_v22  ;;  %vm9219_vm4 = vmpackc.low %vm2297_vm2, %vm2294_vm14 }
 0x1df   :  { %v12624_v38 = vpop.permute.xlu1 %1931  ;;  %v796_v13 = vpop.f32.mrf.mxu1  ;;  %vm2451_vm14 = vcmp.eq.s32.totalorder %v12263_v17, %v12356_v43  ;;  %vm2302_vm2 = vcmp.eq.s32.totalorder %v11170_v62, %v12197_v10 }
 0x1e0   :  { %v850_v60 = vadd.f32 %v11968_v26, %v795_v49  ;;  %vm2418_vm6 = vcmp.eq.s32.totalorder %v12263_v17, %v12624_v38  ;;  %2117 = vperm.xlu1 %10301, %v1651_v50   ;;  %v797_v45 = vadd.f32 %v796_v13, %v613_v48  ;;  %v848_v49 = vadd.f32 %v11968_v26, %v791_v59 }
 0x1e1   :  { %v12637_v30 = vsel %vm2418_vm6, 1.0, %v17908_v8  ;;  %v12654_v48 = vsel %vm2421_vm1, 1.0, %v17908_v8  ;;  %v885_v50 = vmax.f32 %v849_v29, 0.0  ;;  %vm2293_vm6 = vcmp.eq.s32.totalorder %v11170_v62, %v11800_v24 }
 0x1e2   :  { %17971 = vst [vmem:[#allocation118_spill] sm:$0xff] %v12637_v30  ;;  %17973 = vst [vmem:[#allocation120_spill] sm:$0xff] %v12654_v48  ;;  %v851_v46 = vadd.f32 %v11959_v4, %v797_v45  ;;  %v886_v59 = vmax.f32 %v850_v60, 0.0  ;;  %v1655_v45 = vld [vmem:[%s17429_s3 + $0x4d8] sm:$0xff]  ;;  %v884_v19 = vmax.f32 %v848_v49, 0.0  ;;  %v12689_v49 = vpop.permute.xlu0 %2012 }
 0x1e3   :  { %v12657_v13 = vpop.permute.xlu1 %1937  ;;  %17978 = vst [vmem:[#allocation125_spill] sm:$0xff] %v12689_v49  ;;  %vm9221_vm11 = vmpackc.low %vm2296_vm12, %vm2293_vm6 }
 0x1e4   :  { %17974 = vst [vmem:[#allocation121_spill] sm:$0xff] %v12657_v13  ;;  %vm2424_vm10 = vcmp.eq.s32.totalorder %v12263_v17, %v12657_v13  ;;  %2123 = vperm.xlu1 %10301, %v1653_v54   ;;  %v887_v20 = vmax.f32 %v851_v46, 0.0  ;;  %v12681_v54 = vsel %vm2427_vm9, 1.0, %v17908_v8  ;;  %v906_v60 = vpack.c.bf16 %v886_v59, %v884_v19 }
 0x1e5   :  { %v12667_v30 = vsel %vm2424_vm10, 1.0, %v17908_v8  ;;  %9214 = vmatmul.mubr.msk.bf16.gmra.mxu1 %vm9213_vm7, %v17904_v57  ;;  %17976 = vst [vmem:[#allocation123_spill] sm:$0xff] %v12681_v54  ;;  %v12710_v19 = vsel %vm2433_vm15, 1.0, %v17908_v8  ;;  %vm2303_vm9 = vcmp.eq.s32.totalorder %v11756_v63, %v12197_v10  ;;  %vm2445_vm10 = vcmp.eq.s32.totalorder %v12263_v17, %v12316_v33 }
 0x1e6   :  { %17975 = vst [vmem:[#allocation122_spill] sm:$0xff] %v12667_v30  ;;  %9216 = vmatprep.mubr.msk.bf16.mxu1 %vm9215_vm8, %v17904_v57  ;;  %v907_v46 = vpack.c.bf16 %v887_v20, %v885_v50  ;;  %v1657_v20 = vld [vmem:[%s17429_s3 + $0x4e8] sm:$0xff]  ;;  %17980 = vst [vmem:[#allocation127_spill] sm:$0xff] %v12710_v19  ;;  %v12728_v50 = vpop.permute.xlu0 %2018  ;;  %vm2300_vm8 = vcmp.eq.s32.totalorder %v11756_v63, %v11814_v32  ;;  %v12770_v51 = vsel %vm2445_vm10, 1.0, %v17908_v8 }
 0x1e7   :  { %v12683_v29 = vpop.permute.xlu1 %1943  ;;  %17983 = vst [vmem:[#allocation130_spill] sm:$0xff] %v12728_v50  ;;  %vm9223_vm13 = vmpackc.low %vm2303_vm9, %vm2300_vm8  ;;  %vm2463_vm8 = vcmp.eq.s32.totalorder %v12263_v17, %v12444_v14  ;;  %v18059_v14 = vld [vmem:[#allocation34_spill] sm:$0xff] }
 0x1e8   :  { %17977 = vst [vmem:[#allocation124_spill] sm:$0xff] %v12683_v29  ;;  %vm2430_vm0 = vcmp.eq.s32.totalorder %v12263_v17, %v12683_v29  ;;  %2129 = vperm.xlu1 %10301, %v1655_v45   ;;  %1215 = vmatprep.mubr.bf16.mxu0 %v907_v46  ;;  %v1659_v46 = vld [vmem:[%s17429_s3 + $0x4f8] sm:$0xff]  ;;  %17988 = vst [vmem:[#allocation135_spill] sm:$0xff] %v12770_v51 }
 0x1e9   :  { %v12696_v48 = vsel %vm2430_vm0, 1.0, %v17908_v8  ;;  %1216 = vmatmul.mubr.bf16.gmra.mxu0 %v906_v60  ;;  %vm2299_vm0 = vcmp.eq.s32.totalorder %v11170_v62, %v11814_v32  ;;  %v18071_v32 = vld [vmem:[#allocation43_spill] sm:$0xff] }
 0x1ea   :  { %17979 = vst [vmem:[#allocation126_spill] sm:$0xff] %v12696_v48  ;;  %vm9225_vm12 = vmpackc.low %vm2302_vm2, %vm2299_vm0  ;;  %vm2469_vm0 = vcmp.eq.s32.totalorder %v12263_v17, %v12481_v12  ;;  %vm3508_vm2 = vcmask 261120  }
 0x1eb   :  { %v12712_v59 = vpop.permute.xlu1 %1949 }
 0x1ec   :  { %17981 = vst [vmem:[#allocation128_spill] sm:$0xff] %v12712_v59  ;;  %vm2436_vm1 = vcmp.eq.s32.totalorder %v12263_v17, %v12712_v59  ;;  %2135 = vperm.xlu1 %10301, %v1657_v20   ;;  %v800_v60 = vpop.f32.mrf.mxu1  ;;  %v12738_v20 = vsel %vm2439_vm5, 1.0, %v17908_v8 }
 0x1ed   :  { %v12722_v45 = vsel %vm2436_vm1, 1.0, %v17908_v8  ;;  %9218 = vmatmul.mubr.msk.bf16.gmra.mxu1 %vm9217_vm3, %v17904_v57  ;;  %17984 = vst [vmem:[#allocation131_spill] sm:$0xff] %v12738_v20  ;;  %vm2457_vm3 = vcmp.eq.s32.totalorder %v12263_v17, %v12400_v16  ;;  %vm2309_vm1 = vcmp.eq.s32.totalorder %v11756_v63, %v12213_v34 }
 0x1ee   :  { %17982 = vst [vmem:[#allocation129_spill] sm:$0xff] %v12722_v45  ;;  %9220 = vmatprep.mubr.msk.bf16.mxu1 %vm9219_vm4, %v17904_v57  ;;  %v802_v48 = vpop.f32.mrf.mxu1 }
 0x1ef   :  { %v12740_v30 = vpop.permute.xlu1 %1955  ;;  %v803_v54 = vadd.f32 %v802_v48, %v11889_v3 }
 0x1f0   :  { %17985 = vst [vmem:[#allocation132_spill] sm:$0xff] %v12740_v30  ;;  %vm2442_vm7 = vcmp.eq.s32.totalorder %v12263_v17, %v12740_v30  ;;  %2141 = vperm.xlu1 %10301, %v1659_v46   ;;  %v804_v45 = vpop.f32.mrf.mxu1  ;;  %v801_v46 = vadd.f32 %v800_v60, %v11868_v39  ;;  %v12772_v39 = vpop.permute.xlu0 %2024 }
 0x1f1   :  { %v12752_v19 = vsel %vm2442_vm7, 1.0, %v17908_v8  ;;  %v805_v3 = vadd.f32 %v804_v45, %v11899_v27  ;;  %17989 = vst [vmem:[#allocation136_spill] sm:$0xff] %v12772_v39  ;;  %v853_v15 = vadd.f32 %v11959_v4, %v803_v54 }
 0x1f2   :  { %17986 = vst [vmem:[#allocation133_spill] sm:$0xff] %v12752_v19  ;;  %v806_v48 = vpop.f32.mrf.mxu1  ;;  %v852_v45 = vadd.f32 %v11968_v26, %v801_v46 }
 0x1f3   :  { %v12767_v33 = vpop.permute.xlu1 %1961  ;;  %v807_v60 = vadd.f32 %v806_v48, %v11920_v28  ;;  %v854_v20 = vadd.f32 %v11968_v26, %v805_v3  ;;  %v12799_v26 = vsel %vm2451_vm14, 1.0, %v17908_v8  ;;  %v889_v48 = vmax.f32 %v853_v15, 0.0  ;;  %v17999_v15 = vld [vmem:[#allocation24_spill] sm:$0xff] }
 0x1f4   :  { %17987 = vst [vmem:[#allocation134_spill] sm:$0xff] %v12767_v33  ;;  %2147 = vperm.xlu1 %10301, %v1661_v44   ;;  %vm2448_vm15 = vcmp.eq.s32.totalorder %v12263_v17, %v12767_v33  ;;  %v12781_v27 = vpop.f32.mrf.mxu1  ;;  %17993 = vst [vmem:[#allocation140_spill] sm:$0xff] %v12799_v26  ;;  %v12813_v44 = vpop.permute.xlu0 %2030  ;;  %v888_v51 = vmax.f32 %v852_v45, 0.0  ;;  %vm2151_vm7 = vcmp.eq.s32.totalorder %v12263_v17, %v17999_v15 }
 0x1f5   :  { %17990 = vst [vmem:[#allocation137_spill] sm:$0xff] %v12781_v27  ;;  %9222 = vmatmul.mubr.msk.bf16.gmra.mxu1 %vm9221_vm11, %v17904_v57  ;;  %v855_v19 = vadd.f32 %v11959_v4, %v807_v60  ;;  %v12787_v28 = vsel %vm2448_vm15, 1.0, %v17908_v8  ;;  %v890_v4 = vmax.f32 %v854_v20, 0.0  ;;  %v17995_v27 = vld [vmem:[#allocation33_spill] sm:$0xff]  ;;  %v12827_v20 = vsel %vm2457_vm3, 1.0, %v17908_v8 }
 0x1f6   :  { %17991 = vst [vmem:[#allocation138_spill] sm:$0xff] %v12787_v28  ;;  %9224 = vmatprep.mubr.msk.bf16.mxu1 %vm9223_vm13, %v17904_v57  ;;  %v3788_v54 = vpop.f32.mrf.mxu1  ;;  %vm2306_vm5 = vcmp.eq.s32.totalorder %v11756_v63, %v17995_v27  ;;  %18000 = vst [vmem:[#allocation24_spill] sm:$0xff] %v12827_v20  ;;  %vm10824_vm11 = vmmov 0   ;;  %vm2305_vm14 = vcmp.eq.s32.totalorder %v11170_v62, %v17995_v27  ;;  %vm2308_vm15 = vcmp.eq.s32.totalorder %v11170_v62, %v12213_v34  ;;  %v18054_v34 = vld [vmem:[#allocation11_spill] sm:$0xff]  ;;  %v18055_v27 = vld [vmem:[#allocation12_spill] sm:$0xff] }
 0x1f7   :  { %v12796_v3 = vpop.permute.xlu1 %1967  ;;  %v891_v46 = vmax.f32 %v855_v19, 0.0  ;;  %v17996_v54 = vld [vmem:[#allocation3_spill] sm:$0xff]  ;;  %v908_v10 = vpack.c.bf16 %v890_v4, %v888_v51  ;;  %vm9227_vm10 = vmpackc.low %vm2309_vm1, %vm2306_vm5  ;;  %v2637_v4 = vsel %vm2151_vm7, 1.0, %v17908_v8  ;;  %vm2475_vm7 = vcmp.eq.s32.totalorder %v12263_v17, %v12526_v55 }
 0x1f8   :  { %17992 = vst [vmem:[#allocation139_spill] sm:$0xff] %v12796_v3  ;;  %vm2454_vm4 = vcmp.eq.s32.totalorder %v12263_v17, %v12796_v3  ;;  %v12805_v60 = vpop.f32.mrf.mxu1  ;;  %vm2154_vm6 = vcmp.eq.s32.totalorder %v12263_v17, %v17996_v54  ;;  %17997 = vst [vmem:[#allocation3_spill] sm:$0xff] %v12813_v44  ;;  %v18073_v3 = vld [vmem:[#allocation38_spill] sm:$0xff] }
 0x1f9   :  { %17994 = vst [vmem:[#allocation141_spill] sm:$0xff] %v12805_v60  ;;  %v12816_v19 = vsel %vm2454_vm4, 1.0, %v17908_v8  ;;  %v909_v16 = vpack.c.bf16 %v891_v46, %v889_v48  ;;  %v2640_v51 = vsel %vm2154_vm6, 1.0, %v17908_v8  ;;  %vm2315_vm4 = vcmp.eq.s32.totalorder %v11756_v63, %v12231_v47  ;;  %vm9229_vm1 = vmpackc.low %vm2308_vm15, %vm2305_vm14 }
 0x1fa   :  { %17998 = vst [vmem:[#allocation142_spill] sm:$0xff] %v12816_v19  ;;  %v3791_v45 = vpop.f32.mrf.mxu1  ;;  %v18010_v19 = vld [vmem:[#allocation35_spill] sm:$0xff]  ;;  %vm2481_vm14 = vcmp.eq.s32.totalorder %v12263_v17, %v12566_v5  ;;  %v18025_v5 = vld [vmem:[#allocation4_spill] sm:$0xff] }
 0x1fb   :  { %v12831_v60 = vpop.permute.xlu1 %1973  ;;  %1225 = vmatprep.mubr.bf16.mxu0 %v909_v16  ;;  %v12860_v16 = vsel %vm2463_vm8, 1.0, %v17908_v8  ;;  %vm2312_vm3 = vcmp.eq.s32.totalorder %v11756_v63, %v18010_v19 }
 0x1fc   :  { %18001 = vst [vmem:[#allocation143_spill] sm:$0xff] %v12831_v60  ;;  %vm2460_vm9 = vcmp.eq.s32.totalorder %v12263_v17, %v12831_v60  ;;  %v12846_v45 = vpop.f32.mrf.mxu1  ;;  %1226 = vmatmul.mubr.bf16.gmra.mxu0 %v908_v10  ;;  %18004 = vst [vmem:[#allocation146_spill] sm:$0xff] %v12860_v16  ;;  %v12867_v10 = vpop.permute.xlu0 %2036 }
 0x1fd   :  { %v12844_v28 = vsel %vm2460_vm9, 1.0, %v17908_v8  ;;  %18003 = vst [vmem:[#allocation145_spill] sm:$0xff] %v12846_v45  ;;  %9226 = vmatmul.mubr.msk.bf16.gmra.mxu1 %vm9225_vm12, %v17904_v57  ;;  %9891 = vmatprep.mubr.msk.bf16.mxu0 %vm10824_vm11, %v17908_v8  ;;  %18006 = vst [vmem:[#allocation148_spill] sm:$0xff] %v12867_v10  ;;  %v18038_v45 = vld [vmem:[#allocation76_spill] sm:$0xff] }
 0x1fe   :  { %18002 = vst [vmem:[#allocation144_spill] sm:$0xff] %v12844_v28  ;;  %v3796_v48 = vpop.f32.mrf.mxu1  ;;  %9228 = vmatprep.mubr.msk.bf16.mxu1 %vm9227_vm10, %v17904_v57  ;;  %vm9231_vm8 = vmpackc.low %vm2315_vm4, %vm2312_vm3  ;;  %vm2311_vm10 = vcmp.eq.s32.totalorder %v11170_v62, %v18010_v19  ;;  %v18022_v19 = vld [vmem:[#allocation37_spill] sm:$0xff] }
 0x1ff   :  { %v12862_v26 = vpop.permute.xlu1 %1979  ;;  %v3123_v48 = vpack.c.bf16 %v2640_v51, %v2637_v4  ;;  %v18011_v51 = vld [vmem:[#allocation26_spill] sm:$0xff]  ;;  %v18012_v4 = vld [vmem:[#allocation28_spill] sm:$0xff]  ;;  %vm2318_vm15 = vcmp.eq.s32.totalorder %v11756_v63, %v18022_v19 }
 0x200   :  { %18005 = vst [vmem:[#allocation147_spill] sm:$0xff] %v12862_v26  ;;  %vm2466_vm13 = vcmp.eq.s32.totalorder %v12263_v17, %v12862_v26  ;;  %v12878_v15 = vpop.f32.mrf.mxu1  ;;  %vm2157_vm6 = vcmp.eq.s32.totalorder %v12263_v17, %v18011_v51  ;;  %vm2160_vm12 = vcmp.eq.s32.totalorder %v12263_v17, %v18012_v4  ;;  %v18058_v26 = vld [vmem:[#allocation14_spill] sm:$0xff] }
 0x201   :  { %v12876_v54 = vsel %vm2466_vm13, 1.0, %v17908_v8  ;;  %18008 = vst [vmem:[#allocation150_spill] sm:$0xff] %v12878_v15  ;;  %v2646_v55 = vsel %vm2160_vm12, 1.0, %v17908_v8  ;;  %vm2314_vm13 = vcmp.eq.s32.totalorder %v11170_v62, %v12231_v47  ;;  %v18023_v47 = vld [vmem:[#allocation74_spill] sm:$0xff] }
 0x202   :  { %18007 = vst [vmem:[#allocation149_spill] sm:$0xff] %v12876_v54  ;;  %v3799_v20 = vpop.f32.mrf.mxu1  ;;  %v12907_v54 = vpop.permute.xlu0 %2042  ;;  %vm9233_vm4 = vmpackc.low %vm2314_vm13, %vm2311_vm10  ;;  %vm2493_vm10 = vcmp.eq.s32.totalorder %v12263_v17, %v12642_v0  ;;  %v18040_v0 = vld [vmem:[#allocation7_spill] sm:$0xff] }
 0x203   :  { %v12884_v28 = vpop.permute.xlu1 %1985  ;;  %v12897_v20 = vsel %vm2469_vm0, 1.0, %v17908_v8  ;;  %18016 = vst [vmem:[#allocation153_spill] sm:$0xff] %v12907_v54  ;;  %vm2321_vm0 = vcmp.eq.s32.totalorder %v11756_v63, %v18023_v47 }
 0x204   :  { %18009 = vst [vmem:[#allocation151_spill] sm:$0xff] %v12884_v28  ;;  %vm2472_vm5 = vcmp.eq.s32.totalorder %v12263_v17, %v12884_v28  ;;  %18013 = vst [vmem:[#allocation26_spill] sm:$0xff] %v12897_v20  ;;  %v12902_v16 = vpop.f32.mrf.mxu1  ;;  %9892 = vmatmul.mubr.msk.bf16.vlgmr.msra.gmra.mxu0 %vm3508_vm2, %v3123_v48  ;;  %v12926_v48 = vsel %vm2475_vm7, 1.0, %v17908_v8  ;;  %v18026_v20 = vld [vmem:[#allocation30_spill] sm:$0xff]  ;;  %v18037_v28 = vld [vmem:[#allocation39_spill] sm:$0xff] }
 0x205   :  { %v12900_v46 = vsel %vm2472_vm5, 1.0, %v17908_v8  ;;  %18015 = vst [vmem:[#allocation152_spill] sm:$0xff] %v12902_v16  ;;  %9230 = vmatmul.mubr.msk.bf16.gmra.mxu1 %vm9229_vm1, %v17904_v57  ;;  %9895 = vmatprep.mubr.msk.bf16.mxu0 %vm10824_vm11, %v17908_v8  ;;  %v2643_v16 = vsel %vm2157_vm6, 1.0, %v17908_v8  ;;  %18018 = vst [vmem:[#allocation155_spill] sm:$0xff] %v12926_v48  ;;  %vm2163_vm5 = vcmp.eq.s32.totalorder %v12263_v17, %v18025_v5 }
 0x206   :  { %18014 = vst [vmem:[#allocation28_spill] sm:$0xff] %v12900_v46  ;;  %9232 = vmatprep.mubr.msk.bf16.mxu1 %vm9231_vm8, %v17904_v57  ;;  %v3804_v4 = vpop.f32.mrf.mxu1  ;;  %v12943_v15 = vpop.permute.xlu0 %2048  ;;  %vm2166_vm1 = vcmp.eq.s32.totalorder %v12263_v17, %v18026_v20  ;;  %vm2487_vm6 = vcmp.eq.s32.totalorder %v12263_v17, %v12603_v53  ;;  %vm9235_vm12 = vmpackc.low %vm2321_vm0, %vm2318_vm15  ;;  %v2649_v20 = vsel %vm2163_vm5, 1.0, %v17908_v8  ;;  %vm2317_vm8 = vcmp.eq.s32.totalorder %v11170_v62, %v18022_v19  ;;  %v18053_v19 = vld [vmem:[#allocation41_spill] sm:$0xff] }
 0x207   :  { %v12913_v12 = vpop.permute.xlu1 %1991  ;;  %18024 = vst [vmem:[#allocation159_spill] sm:$0xff] %v12943_v15  ;;  %v2652_v53 = vsel %vm2166_vm1, 1.0, %v17908_v8  ;;  %vm2327_vm15 = vcmp.eq.s32.totalorder %v11756_v63, %v18038_v45 }
 0x208   :  { %18017 = vst [vmem:[#allocation154_spill] sm:$0xff] %v12913_v12  ;;  %vm2478_vm9 = vcmp.eq.s32.totalorder %v12263_v17, %v12913_v12  ;;  %v12931_v51 = vpop.f32.mrf.mxu1 }
 0x209   :  { %v12929_v4 = vsel %vm2478_vm9, 1.0, %v17908_v8  ;;  %18020 = vst [vmem:[#allocation157_spill] sm:$0xff] %v12931_v51  ;;  %v3126_v51 = vpack.c.bf16 %v2646_v55, %v2643_v16  ;;  %vm2320_vm9 = vcmp.eq.s32.totalorder %v11170_v62, %v18023_v47 }
 0x20a   :  { %18019 = vst [vmem:[#allocation156_spill] sm:$0xff] %v12929_v4  ;;  %v3807_v46 = vpop.f32.mrf.mxu1  ;;  %vm9237_vm5 = vmpackc.low %vm2320_vm9, %vm2317_vm8 }
 0x20b   :  { %v12937_v12 = vpop.permute.xlu1 %1997  ;;  %v12952_v46 = vsel %vm2481_vm14, 1.0, %v17908_v8  ;;  %vm2324_vm14 = vcmp.eq.s32.totalorder %v11756_v63, %v18037_v28 }
 0x20c   :  { %18021 = vst [vmem:[#allocation158_spill] sm:$0xff] %v12937_v12  ;;  %vm2484_vm3 = vcmp.eq.s32.totalorder %v12263_v17, %v12937_v12  ;;  %18027 = vst [vmem:[#allocation4_spill] sm:$0xff] %v12952_v46  ;;  %v12957_v4 = vpop.f32.mrf.mxu1  ;;  %9896 = vmatmul.mubr.msk.bf16.gmra.mxu0 %vm3508_vm2, %v3126_v51  ;;  %v12982_v51 = vsel %vm2487_vm6, 1.0, %v17908_v8  ;;  %v12991_v46 = vpop.permute.xlu0 %2054  ;;  %vm2499_vm6 = vcmp.eq.s32.totalorder %v12263_v17, %v12689_v49 }
 0x20d   :  { %v12955_v48 = vsel %vm2484_vm3, 1.0, %v17908_v8  ;;  %18029 = vst [vmem:[#allocation160_spill] sm:$0xff] %v12957_v4  ;;  %9234 = vmatmul.mubr.msk.bf16.gmra.mxu1 %vm9233_vm4, %v17904_v57  ;;  %9899 = vmatprep.mubr.msk.bf16.mxu0 %vm10824_vm11, %v17908_v8  ;;  %18031 = vst [vmem:[#allocation162_spill] sm:$0xff] %v12982_v51  ;;  %vm2181_vm3 = vcmp.eq.s32.totalorder %v12263_v17, %v18040_v0  ;;  %v13018_v51 = vsel %vm2493_vm10, 1.0, %v17908_v8 }
 0x20e   :  { %18028 = vst [vmem:[#allocation30_spill] sm:$0xff] %v12955_v48  ;;  %9236 = vmatprep.mubr.msk.bf16.mxu1 %vm9235_vm12, %v17904_v57  ;;  %v3812_v5 = vpop.f32.mrf.mxu1  ;;  %18034 = vst [vmem:[#allocation165_spill] sm:$0xff] %v12991_v46  ;;  %v18041_v48 = vld [vmem:[#allocation32_spill] sm:$0xff] }
 0x20f   :  { %v12969_v16 = vpop.permute.xlu1 %2003  ;;  %vm2172_vm1 = vcmp.eq.s32.totalorder %v12263_v17, %v18041_v48  ;;  %vm9239_vm12 = vmpackc.low %vm2327_vm15, %vm2324_vm14  ;;  %vm2326_vm14 = vcmp.eq.s32.totalorder %v11170_v62, %v18038_v45  ;;  %vm2505_vm15 = vcmp.eq.s32.totalorder %v12263_v17, %v12728_v50  ;;  %v18065_v50 = vld [vmem:[#allocation16_spill] sm:$0xff] }
 0x210   :  { %18030 = vst [vmem:[#allocation161_spill] sm:$0xff] %v12969_v16  ;;  %vm2490_vm7 = vcmp.eq.s32.totalorder %v12263_v17, %v12969_v16  ;;  %v12987_v55 = vpop.f32.mrf.mxu1  ;;  %v18035_v16 = vld [vmem:[#allocation5_spill] sm:$0xff]  ;;  %v13059_v47 = vpop.permute.xlu0 %2060 }
 0x211   :  { %v12985_v5 = vsel %vm2490_vm7, 1.0, %v17908_v8  ;;  %18033 = vst [vmem:[#allocation164_spill] sm:$0xff] %v12987_v55  ;;  %vm2169_vm13 = vcmp.eq.s32.totalorder %v12263_v17, %v18035_v16  ;;  %v18039_v55 = vld [vmem:[#allocation6_spill] sm:$0xff] }
 0x212   :  { %18032 = vst [vmem:[#allocation163_spill] sm:$0xff] %v12985_v5  ;;  %v3815_v12 = vpop.f32.mrf.mxu1  ;;  %vm2175_vm0 = vcmp.eq.s32.totalorder %v12263_v17, %v18039_v55  ;;  %18042 = vst [vmem:[#allocation6_spill] sm:$0xff] %v13018_v51  ;;  %v18047_v51 = vld [vmem:[#allocation9_spill] sm:$0xff]  ;;  %v18048_v16 = vld [vmem:[#allocation10_spill] sm:$0xff] }
 0x213   :  { %v12997_v4 = vpop.permute.xlu1 %2009  ;;  %v3129_v12 = vpack.c.bf16 %v2652_v53, %v2649_v20  ;;  %v2655_v53 = vsel %vm2169_vm13, 1.0, %v17908_v8  ;;  %v13039_v20 = vsel %vm2175_vm0, 1.0, %v17908_v8  ;;  %vm2193_vm8 = vcmp.eq.s32.totalorder %v12263_v17, %v18047_v51  ;;  %18049 = vst [vmem:[#allocation9_spill] sm:$0xff] %v13059_v47 }
 0x214   :  { %18036 = vst [vmem:[#allocation5_spill] sm:$0xff] %v12997_v4  ;;  %vm2496_vm4 = vcmp.eq.s32.totalorder %v12263_v17, %v12997_v4  ;;  %v13023_v0 = vpop.f32.mrf.mxu1  ;;  %v13042_v4 = vsel %vm2181_vm3, 1.0, %v17908_v8  ;;  %vm2199_vm9 = vcmp.eq.s32.totalorder %v12263_v17, %v18048_v16  ;;  %vm2323_vm13 = vcmp.eq.s32.totalorder %v11170_v62, %v18037_v28  ;;  %v13153_v16 = vpop.permute.xlu0 %2066 }
 0x215   :  { %v13021_v55 = vsel %vm2496_vm4, 1.0, %v17908_v8  ;;  %18044 = vst [vmem:[#allocation32_spill] sm:$0xff] %v13023_v0  ;;  %9238 = vmatmul.mubr.msk.bf16.gmra.mxu1 %vm9237_vm5, %v17904_v57  ;;  %9900 = vmatmul.mubr.msk.bf16.gmra.mxu0 %vm3508_vm2, %v3129_v12  ;;  %v18045_v0 = vld [vmem:[#allocation8_spill] sm:$0xff]  ;;  %v13071_v51 = vsel %vm2499_vm6, 1.0, %v17908_v8  ;;  %vm2330_vm0 = vcmp.eq.s32.totalorder %v11756_v63, %v18053_v19  ;;  %vm2333_vm3 = vcmp.eq.s32.totalorder %v11756_v63, %v12265_v52 }
 0x216   :  { %18043 = vst [vmem:[#allocation7_spill] sm:$0xff] %v13021_v55  ;;  %vm2187_vm7 = vcmp.eq.s32.totalorder %v12263_v17, %v18045_v0  ;;  %9240 = vmatprep.mubr.msk.bf16.mxu1 %vm9239_vm12, %v17904_v57  ;;  %v3820_v12 = vpop.f32.mrf.mxu1  ;;  %9903 = vmatprep.mubr.msk.bf16.mxu0 %vm10824_vm11, %v17908_v8  ;;  %v2658_v55 = vsel %vm2172_vm1, 1.0, %v17908_v8  ;;  %18050 = vst [vmem:[#allocation10_spill] sm:$0xff] %v13071_v51  ;;  %vm2205_vm4 = vcmp.eq.s32.totalorder %v12263_v17, %v18054_v34 }
 0x217   :  { %v13047_v5 = vpop.permute.xlu1 %2015  ;;  %v13090_v49 = vsel %vm2187_vm7, 1.0, %v17908_v8  ;;  %vm2211_vm5 = vcmp.eq.s32.totalorder %v12263_v17, %v18055_v27  ;;  %vm2223_vm6 = vcmp.eq.s32.totalorder %v12263_v17, %v18058_v26  ;;  %vm9241_vm7 = vmpackc.low %vm2326_vm14, %vm2323_vm13  ;;  %v3132_v0 = vpack.c.bf16 %v2658_v55, %v2655_v53  ;;  %18063 = vst [vmem:[#allocation34_spill] sm:$0xff] %v13153_v16 }
 0x218   :  { %18046 = vst [vmem:[#allocation8_spill] sm:$0xff] %v13047_v5  ;;  %vm2502_vm10 = vcmp.eq.s32.totalorder %v12263_v17, %v13047_v5  ;;  %v13076_v12 = vpop.f32.mrf.mxu1  ;;  %v13143_v55 = vsel %vm2205_vm4, 1.0, %v17908_v8  ;;  %v13149_v53 = vsel %vm2211_vm5, 1.0, %v17908_v8  ;;  %v13169_v27 = vsel %vm2223_vm6, 1.0, %v17908_v8 }
 0x219   :  { %v13074_v48 = vsel %vm2502_vm10, 1.0, %v17908_v8  ;;  %18052 = vst [vmem:[#allocation167_spill] sm:$0xff] %v13076_v12  ;;  %v13093_v12 = vsel %vm2193_vm8, 1.0, %v17908_v8  ;;  %vm2178_vm8 = vcmp.eq.s32.totalorder %v12263_v17, %v18059_v14  ;;  %vm2511_vm10 = vcmp.eq.s32.totalorder %v12263_v17, %v12772_v39 }
 0x21a   :  { %18051 = vst [vmem:[#allocation166_spill] sm:$0xff] %v13074_v48  ;;  %v3823_v5 = vpop.f32.mrf.mxu1  ;;  %v18057_v48 = vld [vmem:[#allocation13_spill] sm:$0xff]  ;;  %vm2235_vm14 = vcmp.eq.s32.totalorder %v12263_v17, %v18065_v50  ;;  %v2664_v26 = vsel %vm2178_vm8, 1.0, %v17908_v8  ;;  %vm2332_vm4 = vcmp.eq.s32.totalorder %v11170_v62, %v12265_v52  ;;  %vm2336_vm5 = vcmp.eq.s32.totalorder %v11756_v63, %v18071_v32 }
 0x21b   :  { %v13099_v51 = vpop.permute.xlu1 %2021  ;;  %vm2217_vm1 = vcmp.eq.s32.totalorder %v12263_v17, %v18057_v48  ;;  %v13117_v5 = vsel %vm2199_vm9, 1.0, %v17908_v8  ;;  %vm9243_vm9 = vmpackc.low %vm2333_vm3, %vm2330_vm0  ;;  %v9035_v48 = vld [vmem:[%s17432_s16 + $0x1] ss:$8 sm:$0x3]  ;;  %vm2329_vm0 = vcmp.eq.s32.totalorder %v11170_v62, %v18053_v19  ;;  %vm2339_vm6 = vcmp.eq.s32.totalorder %v11756_v63, %v12282_v35 }
 0x21c   :  { %18056 = vst [vmem:[#allocation11_spill] sm:$0xff] %v13099_v51  ;;  %vm2508_vm12 = vcmp.eq.s32.totalorder %v12263_v17, %v13099_v51  ;;  %v13125_v51 = vsel %vm2505_vm15, 1.0, %v17908_v8  ;;  %v13130_v45 = vpop.f32.mrf.mxu1  ;;  %v13163_v34 = vsel %vm2217_vm1, 1.0, %v17908_v8  ;;  %vm2517_vm1 = vcmp.eq.s32.totalorder %v12263_v17, %v12813_v44 }
 0x21d   :  { %18060 = vst [vmem:[#allocation12_spill] sm:$0xff] %v13125_v51  ;;  %v13128_v28 = vsel %vm2508_vm12, 1.0, %v17908_v8  ;;  %18062 = vst [vmem:[#allocation14_spill] sm:$0xff] %v13130_v45  ;;  %9242 = vmatmul.mubr.msk.bf16.gmra.mxu1 %vm9241_vm7, %v17904_v57  ;;  %9904 = vmatmul.mubr.msk.bf16.gmra.mxu0 %vm3508_vm2, %v3132_v0  ;;  %v18064_v45 = vld [vmem:[#allocation15_spill] sm:$0xff]  ;;  %v13212_v24 = vrot.slane %v9035_v48, %v18072_v37  ;;  %vm2190_vm12 = vcmp.eq.s32.totalorder %v12263_v17, %v18073_v3  ;;  %v18083_v3 = vld [vmem:[#allocation45_spill] sm:$0xff] }
 0x21e   :  { %18061 = vst [vmem:[#allocation13_spill] sm:$0xff] %v13128_v28  ;;  %9244 = vmatprep.mubr.msk.bf16.mxu1 %vm9243_vm9, %v17904_v57  ;;  %vm2229_vm13 = vcmp.eq.s32.totalorder %v12263_v17, %v18064_v45  ;;  %v3828_v0 = vpop.f32.mrf.mxu1  ;;  %9907 = vmatprep.mubr.msk.bf16.mxu0 %vm10824_vm11, %v17908_v8  ;;  %v18067_v28 = vld [vmem:[#allocation36_spill] sm:$0xff]  ;;  %v13236_v45 = vpop.permute.xlu0 %2072  ;;  %v3135_v50 = vpack.c.bf16 %v2664_v26, %v13039_v20 }
 0x21f   :  { %v13175_v51 = vpop.permute.xlu1 %2027  ;;  %vm2184_vm15 = vcmp.eq.s32.totalorder %v12263_v17, %v18067_v28  ;;  %v13198_v0 = vsel %vm2511_vm10, 1.0, %v17908_v8  ;;  %v13220_v39 = vsel %vm2229_vm13, 1.0, %v17908_v8  ;;  %vm9245_vm10 = vmpackc.low %vm2332_vm4, %vm2329_vm0  ;;  %v18082_v26 = vld [vmem:[#allocation44_spill] sm:$0xff]  ;;  %vm2208_vm4 = vcmp.eq.s32.totalorder %v12263_v17, %v18083_v3 }
 0x220   :  { %18066 = vst [vmem:[#allocation15_spill] sm:$0xff] %v13175_v51  ;;  %vm2514_vm3 = vcmp.eq.s32.totalorder %v12263_v17, %v13175_v51  ;;  %18068 = vst [vmem:[#allocation16_spill] sm:$0xff] %v13198_v0  ;;  %v13203_v60 = vpop.f32.mrf.mxu1  ;;  %v18074_v51 = vld [vmem:[#allocation40_spill] sm:$0xff]  ;;  %v13254_v33 = vsel %vm2184_vm15, 1.0, %v17908_v8  ;;  %vm2523_vm15 = vcmp.eq.s32.totalorder %v12263_v17, %v12867_v10  ;;  %vm1241_vm0 = vcmp.lt.s32.totalorder %v18082_v26, 4 }
 0x221   :  { %v13201_v14 = vsel %vm2514_vm3, 1.0, %v17908_v8  ;;  %18070 = vst [vmem:[#allocation168_spill] sm:$0xff] %v13203_v60  ;;  %v13226_v60 = vsel %vm2235_vm14, 1.0, %v17908_v8  ;;  %vm2196_vm7 = vcmp.eq.s32.totalorder %v12263_v17, %v18074_v51  ;;  %18077 = vst [vmem:[#allocation40_spill] sm:$0xff] %v13236_v45  ;;  %vm1240_vm14 = vcmp.lt.s32.totalorder %v11756_v63, 192  ;;  %v18084_v51 = vld [vmem:[#allocation46_spill] sm:$0xff] }
 0x222   :  { %18069 = vst [vmem:[#allocation36_spill] sm:$0xff] %v13201_v14  ;;  %v3831_v37 = vpop.f32.mrf.mxu1  ;;  %v18076_v14 = vld [vmem:[#allocation42_spill] sm:$0xff]  ;;  %vm9247_vm13 = vmpackc.low %vm2339_vm6, %vm2336_vm5  ;;  %v13293_v44 = vsel %vm2196_vm7, 1.0, %v17908_v8  ;;  %vm2335_vm3 = vcmp.eq.s32.totalorder %v11170_v62, %v18071_v32  ;;  %vm2342_vm5 = vcmp.eq.s32.totalorder %v11756_v63, %v18084_v51  ;;  %vm2338_vm6 = vcmp.eq.s32.totalorder %v11170_v62, %v12282_v35  ;;  %v13338_v10 = vpop.permute.xlu0 %2078  ;;  %v18102_v35 = vld [vmem:[#allocation85_spill] sm:$0xff] }
 0x223   :  { %v13232_v0 = vpop.permute.xlu1 %2033  ;;  %vm2202_vm8 = vcmp.eq.s32.totalorder %v12263_v17, %v18076_v14  ;;  %v18078_v37 = vld [vmem:[#allocation47_spill] sm:$0xff]  ;;  %vm13328_vm7 = vmor %vm1240_vm14, %vm1241_vm0  ;;  %18090 = vst [vmem:[#allocation172_spill] sm:$0xff] %v13338_v10  ;;  %v13348_v59 = vsel %vm2208_vm4, 1.0, %v17908_v8 }
 0x224   :  { %18075 = vst [vmem:[#allocation38_spill] sm:$0xff] %v13232_v0  ;;  %vm2520_vm9 = vcmp.eq.s32.totalorder %v12263_v17, %v13232_v0  ;;  %v13248_v43 = vrot.slane %v9035_v48, %v18078_v37  ;;  %v13260_v0 = vsel %vm2517_vm1, 1.0, %v17908_v8  ;;  %v13287_v37 = vsel %vm2190_vm12, 1.0, %v17908_v8 }
 0x225   :  { %18079 = vst [vmem:[#allocation42_spill] sm:$0xff] %v13260_v0  ;;  %v13263_v52 = vsel %vm2520_vm9, 1.0, %v17908_v8  ;;  %v1147_v19 = vpop.f32.mrf.mxu0  ;;  %v13265_v20 = vpop.f32.mrf.mxu1  ;;  %9246 = vmatmul.mubr.msk.bf16.gmra.mxu1 %vm9245_vm10, %v17904_v57  ;;  %9908 = vmatmul.mubr.msk.bf16.gmra.mxu0 %vm3508_vm2, %v3135_v50  ;;  %vm2341_vm1 = vcmp.eq.s32.totalorder %v11170_v62, %v18084_v51  ;;  %vm2345_vm12 = vcmp.eq.s32.totalorder %v11756_v63, %v12298_v21 }
 0x226   :  { %18080 = vst [vmem:[#allocation169_spill] sm:$0xff] %v13263_v52  ;;  %18081 = vst [vmem:[#allocation170_spill] sm:$0xff] %v13265_v20  ;;  %v1148_v48 = vadd.f32 %v1147_v19, %v13212_v24  ;;  %9248 = vmatprep.mubr.msk.bf16.mxu1 %vm9247_vm13, %v17904_v57  ;;  %v13299_v19 = vsel %vm2202_vm8, 1.0, %v17908_v8  ;;  %9911 = vmatprep.mubr.msk.bf16.mxu0 %vm10824_vm11, %v17908_v8  ;;  %vm2529_vm9 = vcmp.eq.s32.totalorder %v12263_v17, %v12907_v54 }
 0x227   :  { %v1149_v50 = vpop.f32.mrf.mxu0  ;;  %v3836_v28 = vpop.f32.mrf.mxu1  ;;  %vm9249_vm13 = vmpackc.low %vm2338_vm6, %vm2335_vm3 }
 0x228   :  { %v1284_v0 = vrot.slane %v1148_v48, 4  ;;  %v1150_v52 = vadd.f32 %v1149_v50, %v13248_v43  ;;  %v13310_v14 = vpop.permute.xlu1 %2039  ;;  %v13322_v28 = vsel %vm2523_vm15, 1.0, %v17908_v8  ;;  %vm9251_vm3 = vmpackc.low %vm2345_vm12, %vm2342_vm5  ;;  %vm2535_vm5 = vcmp.eq.s32.totalorder %v12263_v17, %v12943_v15 }
 0x229   :  { %18085 = vst [vmem:[#allocation45_spill] sm:$0xff] %v13310_v14  ;;  %18086 = vst [vmem:[#allocation46_spill] sm:$0xff] %v13322_v28  ;;  %vm2526_vm8 = vcmp.eq.s32.totalorder %v12263_v17, %v13310_v14  ;;  %v1151_v20 = vpop.f32.mrf.mxu0  ;;  %v13334_v30 = vpop.f32.mrf.mxu1  ;;  %v18092_v14 = vld [vmem:[#allocation49_spill] sm:$0xff]  ;;  %vm2344_vm12 = vcmp.eq.s32.totalorder %v11170_v62, %v12298_v21 }
 0x22a   :  { %18089 = vst [vmem:[#allocation171_spill] sm:$0xff] %v13334_v30  ;;  %v1285_v36 = vmax.f32 %v1148_v48, %v1284_v0  ;;  %v13341_v26 = vsel %vm2526_vm8, 1.0, %v17908_v8  ;;  %v1152_v11 = vadd.f32 %v1151_v20, %v13212_v24  ;;  %vm2214_vm10 = vcmp.eq.s32.totalorder %v12263_v17, %v18092_v14 }
 0x22b   :  { %18091 = vst [vmem:[#allocation173_spill] sm:$0xff] %v13341_v26  ;;  %v1153_v22 = vpop.f32.mrf.mxu0  ;;  %v3839_v29 = vpop.f32.mrf.mxu1  ;;  %v3138_v0 = vpack.c.bf16 %v13254_v33, %v13042_v4  ;;  %v1249_v20 = vsel %vm13328_vm7, %v1150_v52, -inf  ;;  %v18095_v33 = vld [vmem:[#allocation53_spill] sm:$0xff]  ;;  %v13399_v54 = vsel %vm2214_vm10, 1.0, %v17908_v8  ;;  %vm2351_vm8 = vcmp.eq.s32.totalorder %v11756_v63, %v18102_v35 }
 0x22c   :  { %v1286_v48 = vrot.slane %v1285_v36, 2  ;;  %v1296_v9 = vrot.slane %v1152_v11, 4  ;;  %v1154_v3 = vadd.f32 %v1153_v22, %v13248_v43  ;;  %v13359_v13 = vpop.permute.xlu1 %2045  ;;  %v18094_v29 = vld [vmem:[#allocation51_spill] sm:$0xff]  ;;  %vm2226_vm15 = vcmp.eq.s32.totalorder %v12263_v17, %v18095_v33 }
 0x22d   :  { %18093 = vst [vmem:[#allocation49_spill] sm:$0xff] %v13359_v13  ;;  %vm2220_vm14 = vcmp.eq.s32.totalorder %v12263_v17, %v18094_v29  ;;  %v13375_v22 = vsel %vm2529_vm9, 1.0, %v17908_v8  ;;  %vm2532_vm0 = vcmp.eq.s32.totalorder %v12263_v17, %v13359_v13  ;;  %v13379_v52 = vpop.f32.mrf.mxu1  ;;  %9250 = vmatmul.mubr.msk.bf16.gmra.mxu1 %vm9249_vm13, %v17904_v57  ;;  %9912 = vmatmul.mubr.msk.bf16.gmra.mxu0 %vm3508_vm2, %v3138_v0  ;;  %v1290_v13 = vrot.slane %v1249_v20, 4  ;;  %v13409_v0 = vpop.permute.xlu0 %2084  ;;  %v18103_v29 = vld [vmem:[#allocation54_spill] sm:$0xff]  ;;  %vm9253_vm13 = vmpackc.low %vm2344_vm12, %vm2341_vm1 }
 0x22e   :  { %18096 = vst [vmem:[#allocation51_spill] sm:$0xff] %v13375_v22  ;;  %18097 = vst [vmem:[#allocation53_spill] sm:$0xff] %v13379_v52  ;;  %v1287_v4 = vmax.f32 %v1285_v36, %v1286_v48  ;;  %v1297_v30 = vmax.f32 %v1152_v11, %v1296_v9  ;;  %v1251_v28 = vsel %vm13328_vm7, %v1154_v3, -inf  ;;  %v13391_v26 = vsel %vm2532_vm0, 1.0, %v17908_v8  ;;  %9252 = vmatprep.mubr.msk.bf16.mxu1 %vm9251_vm3, %v17904_v57  ;;  %v18099_v36 = vld [vmem:[#allocation50_spill] sm:$0xff] }
 0x22f   :  { %18098 = vst [vmem:[#allocation174_spill] sm:$0xff] %v13391_v26  ;;  %v1302_v52 = vrot.slane %v1251_v28, 4  ;;  %v3844_v9 = vpop.f32.mrf.mxu1  ;;  %9915 = vmatprep.mubr.msk.bf16.mxu0 %vm10824_vm11, %v17908_v8  ;;  %vm2348_vm4 = vcmp.eq.s32.totalorder %v11756_v63, %v18099_v36  ;;  %18100 = vst [vmem:[#allocation50_spill] sm:$0xff] %v13409_v0  ;;  %vm2347_vm6 = vcmp.eq.s32.totalorder %v11170_v62, %v18099_v36  ;;  %v13425_v11 = vsel %vm2226_vm15, 1.0, %v17908_v8 }
 0x230   :  { %v1288_v14 = vrot.slane %v1287_v4, 1  ;;  %v1298_v48 = vrot.slane %v1297_v30, 2  ;;  %v13411_v3 = vpop.permute.xlu1 %2051  ;;  %v13419_v9 = vsel %vm2220_vm14, 1.0, %v17908_v8  ;;  %vm2232_vm10 = vcmp.eq.s32.totalorder %v12263_v17, %v18103_v29  ;;  %vm9255_vm1 = vmpackc.low %vm2351_vm8, %vm2348_vm4 }
 0x231   :  { %18101 = vst [vmem:[#allocation175_spill] sm:$0xff] %v13411_v3  ;;  %v1303_v22 = vmax.f32 %v1251_v28, %v1302_v52  ;;  %v13429_v26 = vpop.f32.mrf.mxu1  ;;  %vm2538_vm9 = vcmp.eq.s32.totalorder %v12263_v17, %v13411_v3  ;;  %v13441_v33 = vsel %vm2535_vm5, 1.0, %v17908_v8  ;;  %v1291_v21 = vmax.f32 %v1249_v20, %v1290_v13 }
 0x232   :  { %v1289_v32 = vmax.f32 %v1287_v4, %v1288_v14  ;;  %v1299_v58 = vmax.f32 %v1297_v30, %v1298_v48  ;;  %18104 = vst [vmem:[#allocation85_spill] sm:$0xff] %v13441_v33  ;;  %v13444_v28 = vsel %vm2538_vm9, 1.0, %v17908_v8  ;;  %vm2541_vm14 = vcmp.eq.s32.totalorder %v12263_v17, %v12991_v46  ;;  %v18107_v48 = vld [vmem:[#allocation52_spill] sm:$0xff]  ;;  %v18112_v46 = vld [vmem:[#allocation87_spill] sm:$0xff] }
 0x233   :  { %18105 = vst [vmem:[#allocation54_spill] sm:$0xff] %v13444_v28  ;;  %v3847_v52 = vpop.f32.mrf.mxu1  ;;  %v3141_v13 = vpack.c.bf16 %v13287_v37, %v13090_v49  ;;  %vm2354_vm15 = vcmp.eq.s32.totalorder %v11756_v63, %v18107_v48  ;;  %vm2353_vm0 = vcmp.eq.s32.totalorder %v11170_v62, %v18107_v48  ;;  %v13478_v49 = vsel %vm2232_vm10, 1.0, %v17908_v8  ;;  %v13480_v37 = vpop.permute.xlu0 %2090 }
 0x234   :  { %v1300_v30 = vrot.slane %v1299_v58, 1  ;;  %v13453_v14 = vpop.permute.xlu1 %2057  ;;  %v1304_v52 = vrot.slane %v1303_v22, 2  ;;  %18108 = vst [vmem:[#allocation52_spill] sm:$0xff] %v13480_v37  ;;  %v5737_v4 = vpack.c.bf16 %v1289_v32, %v1289_v32  ;;  %vm2360_vm4 = vcmp.eq.s32.totalorder %v11756_v63, %v12001_v6 }
 0x235   :  { %18106 = vst [vmem:[#allocation176_spill] sm:$0xff] %v13453_v14  ;;  %v13463_v15 = vpop.f32.mrf.mxu1  ;;  %9254 = vmatmul.mubr.msk.bf16.gmra.mxu1 %vm9253_vm13, %v17904_v57  ;;  %vm2544_vm3 = vcmp.eq.s32.totalorder %v12263_v17, %v13453_v14  ;;  %9916 = vmatmul.mubr.msk.bf16.gmra.mxu0 %vm3508_vm2, %v3141_v13  ;;  %v13492_v29 = vsel %vm2541_vm14, 1.0, %v17908_v8  ;;  %v1292_v20 = vrot.slane %v1291_v21, 2  ;;  %vm2350_vm5 = vcmp.eq.s32.totalorder %v11170_v62, %v18102_v35 }
 0x236   :  { %v1301_v51 = vmax.f32 %v1299_v58, %v1300_v30  ;;  %9256 = vmatprep.mubr.msk.bf16.mxu1 %vm9255_vm1, %v17904_v57  ;;  %18109 = vst [vmem:[#allocation177_spill] sm:$0xff] %v13492_v29  ;;  %v13495_v32 = vsel %vm2544_vm3, 1.0, %v17908_v8  ;;  %9919 = vmatprep.mubr.msk.bf16.mxu0 %vm10824_vm11, %v17908_v8  ;;  %v3144_v30 = vpack.c.bf16 %v13293_v44, %v13093_v12  ;;  %vm17789_vm10 = vcmask 1041409   ;;  %vm9257_vm1 = vmpackc.low %vm2350_vm5, %vm2347_vm6 }
 0x237   :  { %18110 = vst [vmem:[#allocation178_spill] sm:$0xff] %v13495_v32  ;;  %v3852_v58 = vpop.f32.mrf.mxu1  ;;  %vm2547_vm12 = vcmp.eq.s32.totalorder %v12263_v17, %v13059_v47  ;;  %vm2357_vm8 = vcmp.eq.s32.totalorder %v11756_v63, %v18112_v46  ;;  %vm2553_vm9 = vcmp.eq.s32.totalorder %v12263_v17, %v13153_v16  ;;  %v1305_v44 = vmax.f32 %v1303_v22, %v1304_v52 }
 0x238   :  { %v5739_v13 = vpack.c.bf16 %v1301_v51, %v1301_v51  ;;  %v13507_v28 = vpop.permute.xlu1 %2063  ;;  %v1157_v12 = vpop.f32.mrf.mxu0  ;;  %v5873_v14 = vunpack.c.l.b16 %v5737_v4  ;;  %vm2356_vm14 = vcmp.eq.s32.totalorder %v11170_v62, %v18112_v46  ;;  %v13521_v33 = vsel %vm2547_vm12, 1.0, %v17908_v8  ;;  %vm9259_vm5 = vmpackc.low %vm2357_vm8, %vm2354_vm15 }
 0x239   :  { %18111 = vst [vmem:[#allocation179_spill] sm:$0xff] %v13507_v28  ;;  %v13513_v58 = vpop.f32.mrf.mxu1  ;;  %vm2550_vm13 = vcmp.eq.s32.totalorder %v12263_v17, %v13507_v28  ;;  %v1158_v51 = vadd.f32 %v1157_v12, %v13212_v24  ;;  %18114 = vst [vmem:[#allocation180_spill] sm:$0xff] %v13521_v33  ;;  %v1293_v29 = vmax.f32 %v1291_v21, %v1292_v20  ;;  %v13532_v4 = vpop.permute.xlu0 %2096  ;;  %v13546_v36 = vsel %vm2553_vm9, 1.0, %v17908_v8 }
 0x23a   :  { %18113 = vst [vmem:[#allocation87_spill] sm:$0xff] %v13513_v58  ;;  %v5875_v3 = vunpack.c.l.b16 %v5739_v13  ;;  %v13524_v32 = vsel %vm2550_vm13, 1.0, %v17908_v8  ;;  %v1159_v22 = vpop.f32.mrf.mxu0  ;;  %18116 = vst [vmem:[#allocation182_spill] sm:$0xff] %v13532_v4  ;;  %vm2559_vm6 = vcmp.eq.s32.totalorder %v12263_v17, %v13236_v45  ;;  %v1306_v35 = vrot.slane %v1305_v44, 1 }
 0x23b   :  { %18115 = vst [vmem:[#allocation181_spill] sm:$0xff] %v13524_v32  ;;  %v3855_v52 = vpop.f32.mrf.mxu1  ;;  %v1308_v20 = vrot.slane %v1158_v51, 4  ;;  %v1160_v12 = vadd.f32 %v1159_v22, %v13248_v43  ;;  %18118 = vst [vmem:[#allocation184_spill] sm:$0xff] %v13546_v36  ;;  %vm2359_vm12 = vcmp.eq.s32.totalorder %v11170_v62, %v12001_v6  ;;  %vm2363_vm9 = vcmp.eq.s32.totalorder %v11756_v63, %v12381_v56 }
 0x23c   :  { %v13535_v13 = vsel %vm17789_vm10, %v5875_v3, %v5873_v14  ;;  %v13540_v47 = vpop.permute.xlu1 %2069  ;;  %v1161_v3 = vpop.f32.mrf.mxu0  ;;  %v1294_v32 = vrot.slane %v1293_v29, 1  ;;  %vm2366_vm15 = vcmp.eq.s32.totalorder %v11756_v63, %v12018_v41  ;;  %vm13590_vm8 = vmpackc.low %vm2356_vm14, %vm2353_vm0  ;;  %vm2565_vm14 = vcmp.eq.s32.totalorder %v12263_v17, %v13338_v10 }
 0x23d   :  { %18117 = vst [vmem:[#allocation183_spill] sm:$0xff] %v13540_v47  ;;  %vm2556_vm3 = vcmp.eq.s32.totalorder %v12263_v17, %v13540_v47  ;;  %v13552_v14 = vpop.f32.mrf.mxu1  ;;  %9258 = vmatmul.mubr.msk.bf16.gmra.mxu1 %vm9257_vm1, %v17904_v57  ;;  %v1309_v22 = vmax.f32 %v1158_v51, %v1308_v20  ;;  %v1253_v52 = vsel %vm13328_vm7, %v1160_v12, -inf  ;;  %v1162_v33 = vadd.f32 %v1161_v3, %v13212_v24  ;;  %vm13617_vm0 = vmpackc.low %vm2363_vm9, %vm2360_vm4 }
 0x23e   :  { %18119 = vst [vmem:[#allocation185_spill] sm:$0xff] %v13552_v14  ;;  %v13564_v21 = vsel %vm2556_vm3, 1.0, %v17908_v8  ;;  %9920 = vmatmul.mubr.msk.bf16.gmra.mxu0 %vm3508_vm2, %v3144_v30  ;;  %9260 = vmatprep.mubr.msk.bf16.mxu1 %vm9259_vm5, %v17904_v57  ;;  %v1314_v51 = vrot.slane %v1253_v52, 4  ;;  %v1163_v12 = vpop.f32.mrf.mxu0  ;;  %v3147_v14 = vpack.c.bf16 %v13299_v19, %v13117_v5  ;;  %v1307_v20 = vmax.f32 %v1305_v44, %v1306_v35  ;;  %v13604_v19 = vpop.permute.xlu0 %2102 }
 0x23f   :  { %18120 = vst [vmem:[#allocation186_spill] sm:$0xff] %v13564_v21  ;;  %v3860_v16 = vpop.f32.mrf.mxu1  ;;  %9923 = vmatprep.mubr.msk.bf16.mxu0 %vm10824_vm11, %v17908_v8  ;;  %v1310_v30 = vrot.slane %v1309_v22, 2  ;;  %v1320_v3 = vrot.slane %v1162_v33, 4  ;;  %v1164_v47 = vadd.f32 %v1163_v12, %v13248_v43  ;;  %v13598_v12 = vsel %vm2559_vm6, 1.0, %v17908_v8  ;;  %18125 = vst [vmem:[#allocation189_spill] sm:$0xff] %v13604_v19 }
 0x240   :  { %v13580_v28 = vpop.permute.xlu1 %2075  ;;  %18124 = vst [vmem:[#allocation188_spill] sm:$0xff] %v13598_v12  ;;  %v1315_v36 = vmax.f32 %v1253_v52, %v1314_v51  ;;  %v10378_v52 = vld [vmem:[%s17433_s10 + $0xe0] ss:$16 sps:$4 sm:$0xff]   ;;  %vm2362_vm1 = vcmp.eq.s32.totalorder %v11170_v62, %v12381_v56  ;;  %vm2369_vm4 = vcmp.eq.s32.totalorder %v11756_v63, %v12410_v1  ;;  %v13648_v45 = vsel %vm2565_vm14, 1.0, %v17908_v8 }
 0x241   :  { %18121 = vst [vmem:[#allocation187_spill] sm:$0xff] %v13580_v28  ;;  %vm2562_vm13 = vcmp.eq.s32.totalorder %v12263_v17, %v13580_v28  ;;  %v13602_v5 = vpop.f32.mrf.mxu1  ;;  %v1311_v46 = vmax.f32 %v1309_v22, %v1310_v30  ;;  %v1321_v48 = vmax.f32 %v1162_v33, %v1320_v3  ;;  %v1255_v21 = vsel %vm13328_vm7, %v1164_v47, -inf  ;;  %18130 = vst [vmem:[#allocation192_spill] sm:$0xff] %v13648_v45 }
 0x242   :  { %v13609_v58 = vsel %vm2562_vm13, 1.0, %v17908_v8  ;;  %v1295_v33 = vmax.f32 %v1293_v29, %v1294_v32  ;;  %v1316_v35 = vrot.slane %v1315_v36, 2  ;;  %v10380_v29 = vld [vmem:[%s17433_s10 + $0xe4] ss:$16 sps:$4 sm:$0xff]   ;;  %v5740_v32 = vpack.c.bf16 %v1307_v20, %v1307_v20  ;;  %vm13683_vm14 = vmpackc.low %vm2362_vm1, %vm2359_vm12 }
 0x243   :  { %18126 = vst [vmem:[#allocation190_spill] sm:$0xff] %v13609_v58  ;;  %v3863_v22 = vpop.f32.mrf.mxu1  ;;  %v1312_v51 = vrot.slane %v1311_v46, 1  ;;  %v1322_v30 = vrot.slane %v1321_v48, 2  ;;  %v1326_v47 = vrot.slane %v1255_v21, 4  ;;  %vm2365_vm3 = vcmp.eq.s32.totalorder %v11170_v62, %v12018_v41  ;;  %6274 = vmatprep.subr.bf16.mxu1 %v10380_v29  ;;  %vm13706_vm12 = vmpackc.low %vm2369_vm4, %vm2366_vm15 }
 0x244   :  { %v13630_v3 = vpop.permute.xlu1 %2081  ;;  %v1317_v22 = vmax.f32 %v1315_v36, %v1316_v35  ;;  %vm2368_vm5 = vcmp.eq.s32.totalorder %v11170_v62, %v12410_v1  ;;  %vm2571_vm9 = vcmp.eq.s32.totalorder %v12263_v17, %v13409_v0  ;;  %v5738_v36 = vpack.c.bf16 %v1295_v33, %v1295_v33  ;;  %6275 = vmatpush1.bf16.msra.mxu1 %v10378_v52 }
 0x245   :  { %18129 = vst [vmem:[#allocation191_spill] sm:$0xff] %v13630_v3  ;;  %v13639_v12 = vpop.f32.mrf.mxu1  ;;  %9262 = vmatmul.mubr.msk.bf16.gmra.mxu1 %vm13590_vm8, %v17904_v57  ;;  %v1313_v58 = vmax.f32 %v1311_v46, %v1312_v51  ;;  %v1323_v28 = vmax.f32 %v1321_v48, %v1322_v30  ;;  %vm2568_vm6 = vcmp.eq.s32.totalorder %v12263_v17, %v13630_v3  ;;  %v13669_v48 = vpop.permute.xlu0 %2108  ;;  %vm17786_vm13 = vcmask 1042434  }
 0x246   :  { %9924 = vmatmul.mubr.msk.bf16.gmra.mxu0 %vm3508_vm2, %v3147_v14  ;;  %9264 = vmatprep.mubr.msk.bf16.mxu1 %vm13617_vm0, %v17904_v57  ;;  %v1318_v20 = vrot.slane %v1317_v22, 1  ;;  %v13663_v16 = vsel %vm2568_vm6, 1.0, %v17908_v8  ;;  %v18132_v14 = vld [vmem:[#allocation56_spill] sm:$0xff]  ;;  %v5876_v30 = vunpack.c.l.b16 %v5740_v32  ;;  %vm5913_vm0 = vcmask 1043459  }
 0x247   :  { %18131 = vst [vmem:[#allocation193_spill] sm:$0xff] %v13663_v16  ;;  %v3868_v46 = vpop.f32.mrf.mxu1  ;;  %9927 = vmatprep.mubr.msk.bf16.mxu0 %vm10824_vm11, %v17908_v8  ;;  %18133 = vst [vmem:[#allocation56_spill] sm:$0xff] %v13669_v48  ;;  %v5741_v44 = vpack.c.bf16 %v1313_v58, %v1313_v58  ;;  %v1324_v35 = vrot.slane %v1323_v28, 1  ;;  %v1327_v10 = vmax.f32 %v1255_v21, %v1326_v47  ;;  %v13691_v52 = vsel %vm2571_vm9, 1.0, %v17908_v8  ;;  %v18143_v58 = vld [vmem:[#allocation97_spill] sm:$0xff] }
 0x248   :  { %v13673_v51 = vpop.permute.xlu1 %2087  ;;  %v1319_v46 = vmax.f32 %v1317_v22, %v1318_v20  ;;  %18136 = vst [vmem:[#allocation194_spill] sm:$0xff] %v13691_v52  ;;  %vm2577_vm8 = vcmp.eq.s32.totalorder %v12263_v17, %v13480_v37  ;;  %v5874_v6 = vunpack.c.l.b16 %v5738_v36  ;;  %vm2583_vm1 = vcmp.eq.s32.totalorder %v12263_v17, %v13532_v4 }
 0x249   :  { %v13675_v3 = vpop.f32.mrf.mxu1  ;;  %v5877_v29 = vunpack.c.l.b16 %v5741_v44  ;;  %v1325_v21 = vmax.f32 %v1323_v28, %v1324_v35  ;;  %vm2574_vm6 = vcmp.eq.s32.totalorder %v12263_v17, %v13673_v51  ;;  %v1328_v45 = vrot.slane %v1327_v10, 2 }
 0x24a   :  { %v5742_v56 = vpack.c.bf16 %v1319_v46, %v1319_v46  ;;  %v13698_v47 = vsel %vm2574_vm6, 1.0, %v17908_v8  ;;  %v1167_v32 = vpop.f32.mrf.mxu0  ;;  %vm2375_vm4 = vcmp.eq.s32.totalorder %v11756_v63, %v18143_v58  ;;  %vm2371_vm9 = vcmp.eq.s32.totalorder %v11170_v62, %v18132_v14 }
 0x24b   :  { %18137 = vst [vmem:[#allocation195_spill] sm:$0xff] %v13698_v47  ;;  %v3871_v22 = vpop.f32.mrf.mxu1  ;;  %v5912_v20 = vsel %vm17786_vm13, %v5877_v29, %v13535_v13  ;;  %v5743_v36 = vpack.c.bf16 %v1325_v21, %v1325_v21  ;;  %v1168_v35 = vadd.f32 %v1167_v32, %v13212_v24  ;;  %v13725_v13 = vpop.permute.xlu0 %2114  ;;  %vm2589_vm6 = vcmp.eq.s32.totalorder %v12263_v17, %v13604_v19  ;;  %v18156_v47 = vld [vmem:[#allocation59_spill] sm:$0xff] }
 0x24c   :  { %v13715_v46 = vpop.permute.xlu1 %2093  ;;  %v5923_v22 = vsel %vm17789_vm10, %v5876_v30, %v5874_v6  ;;  %v5878_v33 = vunpack.c.l.b16 %v5742_v56  ;;  %v1169_v16 = vpop.f32.mrf.mxu0  ;;  %18141 = vst [vmem:[#allocation197_spill] sm:$0xff] %v13725_v13  ;;  %v18142_v30 = vpack.c.bf16 %v13348_v59, %v13143_v55  ;;  %v13743_v6 = vsel %vm2577_vm8, 1.0, %v17908_v8  ;;  %vm13779_vm8 = vmpackc.low %vm2368_vm5, %vm2365_vm3 }
 0x24d   :  { %18140 = vst [vmem:[#allocation196_spill] sm:$0xff] %v13715_v46  ;;  %v13720_v0 = vpop.f32.mrf.mxu1  ;;  %9266 = vmatmul.mubr.msk.bf16.gmra.mxu1 %vm13683_vm14, %v17904_v57  ;;  %v5879_v29 = vunpack.c.l.b16 %v5743_v36  ;;  %v1332_v21 = vrot.slane %v1168_v35, 4  ;;  %vm2580_vm15 = vcmp.eq.s32.totalorder %v12263_v17, %v13715_v46  ;;  %v1170_v32 = vadd.f32 %v1169_v16, %v13248_v43  ;;  %18144 = vst [vmem:[#allocation97_spill] sm:$0xff] %v13743_v6 }
 0x24e   :  { %9928 = vmatmul.mubr.msk.bf16.gmra.mxu0 %vm3508_vm2, %v18142_v30  ;;  %9268 = vmatprep.mubr.msk.bf16.mxu1 %vm13706_vm12, %v17904_v57  ;;  %v13746_v16 = vsel %vm17786_vm13, %v5878_v33, %v5923_v22  ;;  %v13749_v59 = vsel %vm2580_vm15, 1.0, %v17908_v8  ;;  %v1171_v55 = vpop.f32.mrf.mxu0  ;;  %v13768_v22 = vsel %vm2583_vm1, 1.0, %v17908_v8  ;;  %vm18151_vm3 = vcmp.eq.s32.totalorder %v11756_v63, %v18132_v14 }
 0x24f   :  { %18145 = vst [vmem:[#allocation198_spill] sm:$0xff] %v13749_v59  ;;  %v3876_v56 = vpop.f32.mrf.mxu1  ;;  %9931 = vmatprep.mubr.msk.bf16.mxu0 %vm10824_vm11, %v17908_v8  ;;  %v13754_v28 = vsel %vm5913_vm0, %v5879_v29, %v5912_v20  ;;  %v1333_v36 = vmax.f32 %v1168_v35, %v1332_v21  ;;  %v1257_v44 = vsel %vm13328_vm7, %v1170_v32, -inf  ;;  %18147 = vst [vmem:[#allocation200_spill] sm:$0xff] %v13768_v22  ;;  %v18161_v22 = vld [vmem:[#allocation61_spill] sm:$0xff] }
 0x250   :  { %v13760_v33 = vpop.permute.xlu1 %2099  ;;  %v1338_v20 = vrot.slane %v1257_v44, 4  ;;  %v1172_v35 = vadd.f32 %v1171_v55, %v13212_v24  ;;  %v1173_v29 = vpop.f32.mrf.mxu0  ;;  %v1329_v56 = vmax.f32 %v1327_v10, %v1328_v45  ;;  %vm13797_vm5 = vmpackc.low %vm2375_vm4, %vm18151_vm3  ;;  %v3153_v52 = vpack.c.bf16 %v13399_v54, %v13149_v53 }
 0x251   :  { %18146 = vst [vmem:[#allocation199_spill] sm:$0xff] %v13760_v33  ;;  %v13771_v21 = vpop.f32.mrf.mxu1  ;;  %v1334_v30 = vrot.slane %v1333_v36, 2  ;;  %vm2586_vm14 = vcmp.eq.s32.totalorder %v12263_v17, %v13760_v33  ;;  %v1174_v55 = vadd.f32 %v1173_v29, %v13248_v43  ;;  %v13801_v45 = vpop.permute.xlu0 %2120  ;;  %vm2378_vm12 = vcmp.eq.s32.totalorder %v11756_v63, %v18156_v47 }
 0x252   :  { %v1339_v6 = vmax.f32 %v1257_v44, %v1338_v20  ;;  %v1344_v59 = vrot.slane %v1172_v35, 4  ;;  %v13789_v41 = vsel %vm2586_vm14, 1.0, %v17908_v8  ;;  %18154 = vst [vmem:[#allocation202_spill] sm:$0xff] %v13801_v45  ;;  %vm2374_vm15 = vcmp.eq.s32.totalorder %v11170_v62, %v18143_v58 }
 0x253   :  { %18150 = vst [vmem:[#allocation201_spill] sm:$0xff] %v13789_v41  ;;  %v3879_v1 = vpop.f32.mrf.mxu1  ;;  %v1335_v29 = vmax.f32 %v1333_v36, %v1334_v30  ;;  %v1259_v20 = vsel %vm13328_vm7, %v1174_v55, -inf  ;;  %v13822_v36 = vsel %vm2589_vm6, 1.0, %v17908_v8  ;;  %v1330_v30 = vrot.slane %v1329_v56, 1  ;;  %vm13863_vm13 = vmpackc.low %vm2374_vm15, %vm2371_vm9 }
 0x254   :  { %v13807_v1 = vpop.permute.xlu1 %2105  ;;  %v1340_v4 = vrot.slane %v1339_v6, 2  ;;  %v1345_v33 = vmax.f32 %v1172_v35, %v1344_v59  ;;  %v1350_v37 = vrot.slane %v1259_v20, 4  ;;  %18157 = vst [vmem:[#allocation59_spill] sm:$0xff] %v13822_v36  ;;  %vm2595_vm4 = vcmp.eq.s32.totalorder %v12263_v17, %v13669_v48 }
 0x255   :  { %18155 = vst [vmem:[#allocation203_spill] sm:$0xff] %v13807_v1  ;;  %v13813_v46 = vpop.f32.mrf.mxu1  ;;  %9270 = vmatmul.mubr.msk.bf16.gmra.mxu1 %vm13779_vm8, %v17904_v57  ;;  %v1336_v54 = vrot.slane %v1335_v29, 1  ;;  %vm2592_vm1 = vcmp.eq.s32.totalorder %v12263_v17, %v13807_v1  ;;  %vm2377_vm8 = vcmp.eq.s32.totalorder %v11170_v62, %v18156_v47  ;;  %vm2384_vm6 = vcmp.eq.s32.totalorder %v11756_v63, %v18161_v22 }
 0x256   :  { %9932 = vmatmul.mubr.msk.bf16.gmra.mxu0 %vm3508_vm2, %v3153_v52  ;;  %9272 = vmatprep.mubr.msk.bf16.mxu1 %vm13797_vm5, %v17904_v57  ;;  %v1341_v53 = vmax.f32 %v1339_v6, %v1340_v4  ;;  %v1346_v59 = vrot.slane %v1345_v33, 2  ;;  %v1351_v35 = vmax.f32 %v1259_v20, %v1350_v37  ;;  %v13831_v32 = vsel %vm2592_vm1, 1.0, %v17908_v8  ;;  %v18160_v37 = vld [vmem:[#allocation101_spill] sm:$0xff] }
 0x257   :  { %18158 = vst [vmem:[#allocation204_spill] sm:$0xff] %v13831_v32  ;;  %v3884_v55 = vpop.f32.mrf.mxu1  ;;  %9935 = vmatprep.mubr.msk.bf16.mxu0 %vm10824_vm11, %v17908_v8  ;;  %v1337_v52 = vmax.f32 %v1335_v29, %v1336_v54  ;;  %vm2380_vm14 = vcmp.eq.s32.totalorder %v11170_v62, %v18160_v37  ;;  %vm2381_vm3 = vcmp.eq.s32.totalorder %v11756_v63, %v18160_v37  ;;  %v13853_v29 = vpop.permute.xlu0 %2126  ;;  %vm5915_vm5 = vcmask 1044484  }
 0x258   :  { %v13841_v4 = vpop.permute.xlu1 %2111  ;;  %v1342_v6 = vrot.slane %v1341_v53, 1  ;;  %v1347_v20 = vmax.f32 %v1345_v33, %v1346_v59  ;;  %v1352_v55 = vrot.slane %v1351_v35, 2  ;;  %18162 = vst [vmem:[#allocation101_spill] sm:$0xff] %v13853_v29  ;;  %v13871_v59 = vsel %vm2595_vm4, 1.0, %v17908_v8 }
 0x259   :  { %18159 = vst [vmem:[#allocation205_spill] sm:$0xff] %v13841_v4  ;;  %v13847_v44 = vpop.f32.mrf.mxu1  ;;  %v5745_v54 = vpack.c.bf16 %v1337_v52, %v1337_v52  ;;  %vm2598_vm1 = vcmp.eq.s32.totalorder %v12263_v17, %v13841_v4  ;;  %18165 = vst [vmem:[#allocation61_spill] sm:$0xff] %v13871_v59  ;;  %v1331_v52 = vmax.f32 %v1329_v56, %v1330_v30  ;;  %vm5917_vm15 = vcmask 1045509  }
 0x25a   :  { %v1348_v10 = vrot.slane %v1347_v20, 1  ;;  %v13874_v36 = vsel %vm2598_vm1, 1.0, %v17908_v8  ;;  %vm2601_vm10 = vcmp.eq.s32.totalorder %v12263_v17, %v13725_v13  ;;  %v1343_v58 = vmax.f32 %v1341_v53, %v1342_v6  ;;  %v10383_v6 = vld [vmem:[%s17433_s10 + $0xc4] ss:$16 sps:$4 sm:$0xff]  }
 0x25b   :  { %18166 = vst [vmem:[#allocation206_spill] sm:$0xff] %v13874_v36  ;;  %v3887_v32 = vpop.f32.mrf.mxu1  ;;  %v5881_v14 = vunpack.c.l.b16 %v5745_v54  ;;  %vm2387_vm9 = vcmp.eq.s32.totalorder %v11756_v63, %v12494_v2  ;;  %v1353_v56 = vmax.f32 %v1351_v35, %v1352_v55  ;;  %vm2607_vm4 = vcmp.eq.s32.totalorder %v12263_v17, %v13801_v45  ;;  %6276 = vmatprep.subr.bf16.mxu1 %v10383_v6 }
 0x25c   :  { %v13880_v4 = vpop.permute.xlu1 %2117  ;;  %v1349_v48 = vmax.f32 %v1347_v20, %v1348_v10  ;;  %v18168_v10 = vpack.c.bf16 %v13419_v9, %v13163_v34  ;;  %v13916_v34 = vsel %vm2601_vm10, 1.0, %v17908_v8  ;;  %v5744_v9 = vpack.c.bf16 %v1331_v52, %v1331_v52 }
 0x25d   :  { %18167 = vst [vmem:[#allocation207_spill] sm:$0xff] %v13880_v4  ;;  %v13884_v30 = vpop.f32.mrf.mxu1  ;;  %9274 = vmatmul.mubr.msk.bf16.gmra.mxu1 %vm13863_vm13, %v17904_v57  ;;  %v1177_v32 = vpop.f32.mrf.mxu0  ;;  %v5916_v53 = vsel %vm5915_vm5, %v5881_v14, %v13754_v28  ;;  %vm2604_vm1 = vcmp.eq.s32.totalorder %v12263_v17, %v13880_v4  ;;  %vm9275_vm13 = vmpackc.low %vm2381_vm3, %vm2378_vm12  ;;  %v10381_v28 = vld [vmem:[%s17433_s10 + $0xc0] ss:$16 sps:$4 sm:$0xff]   ;;  %v13935_v52 = vsel %vm2607_vm4, 1.0, %v17908_v8  ;;  %vm2613_vm10 = vcmp.eq.s32.totalorder %v12263_v17, %v13853_v29 }
 0x25e   :  { %9936 = vmatmul.mubr.msk.bf16.gmra.mxu0 %vm3508_vm2, %v18168_v10  ;;  %v1178_v35 = vadd.f32 %v1177_v32, %v13212_v24  ;;  %18169 = vst [vmem:[#allocation208_spill] sm:$0xff] %v13916_v34  ;;  %v5747_v20 = vpack.c.bf16 %v1349_v48, %v1349_v48  ;;  %v13919_v55 = vsel %vm2604_vm1, 1.0, %v17908_v8  ;;  %9276 = vmatprep.mubr.msk.bf16.mxu1 %vm9275_vm13, %v17904_v57  ;;  %v13924_v14 = vpop.permute.xlu0 %2132  ;;  %18173 = vst [vmem:[#allocation212_spill] sm:$0xff] %v13935_v52 }
 0x25f   :  { %18170 = vst [vmem:[#allocation209_spill] sm:$0xff] %v13919_v55  ;;  %v3892_v54 = vpop.f32.mrf.mxu1  ;;  %v1179_v33 = vpop.f32.mrf.mxu0  ;;  %9939 = vmatprep.mubr.msk.bf16.mxu0 %vm10824_vm11, %v17908_v8  ;;  %18171 = vst [vmem:[#allocation210_spill] sm:$0xff] %v13924_v14  ;;  %v5746_v32 = vpack.c.bf16 %v1343_v58, %v1343_v58  ;;  %v1354_v58 = vrot.slane %v1353_v56, 1  ;;  %6277 = vmatpush1.bf16.msra.mxu1 %v10381_v28  ;;  %v5880_v55 = vunpack.c.l.b16 %v5744_v9  ;;  %v13968_v47 = vsel %vm2613_vm10, 1.0, %v17908_v8 }
 0x260   :  { %v1356_v41 = vrot.slane %v1178_v35, 4  ;;  %v13928_v59 = vpop.permute.xlu1 %2123  ;;  %v1180_v48 = vadd.f32 %v1179_v33, %v13248_v43  ;;  %v5883_v54 = vunpack.c.l.b16 %v5747_v20  ;;  %vm9277_vm3 = vmpackc.low %vm2380_vm14, %vm2377_vm8  ;;  %vm2383_vm1 = vcmp.eq.s32.totalorder %v11170_v62, %v18161_v22 }
 0x261   :  { %18172 = vst [vmem:[#allocation211_spill] sm:$0xff] %v13928_v59  ;;  %v13939_v36 = vpop.f32.mrf.mxu1  ;;  %v1181_v10 = vpop.f32.mrf.mxu0  ;;  %vm2610_vm12 = vcmp.eq.s32.totalorder %v12263_v17, %v13928_v59  ;;  %vm9279_vm14 = vmpackc.low %vm2387_vm9, %vm2384_vm6  ;;  %vm2619_vm6 = vcmp.eq.s32.totalorder %v12263_v17, %v13924_v14  ;;  %vm2390_vm9 = vcmp.eq.s32.totalorder %v11756_v63, %v12112_v61  ;;  %vm2386_vm13 = vcmp.eq.s32.totalorder %v11170_v62, %v12494_v2 }
 0x262   :  { %v1357_v34 = vmax.f32 %v1178_v35, %v1356_v41  ;;  %v1261_v6 = vsel %vm13328_vm7, %v1180_v48, -inf  ;;  %v1182_v33 = vadd.f32 %v1181_v10, %v13212_v24  ;;  %v13947_v45 = vsel %vm5917_vm15, %v5883_v54, %v5916_v53  ;;  %v18176_v10 = vld [vmem:[#allocation55_spill] sm:$0xff] }
 0x263   :  { %v13950_v20 = vsel %vm2610_vm12, 1.0, %v17908_v8  ;;  %v1362_v13 = vrot.slane %v1261_v6, 4  ;;  %v3895_v4 = vpop.f32.mrf.mxu1  ;;  %v5882_v41 = vunpack.c.l.b16 %v5746_v32  ;;  %vm2238_vm4 = vcmp.eq.s32.totalorder %v12263_v17, %v18176_v10  ;;  %18177 = vst [vmem:[#allocation55_spill] sm:$0xff] %v13968_v47 }
 0x264   :  { %18174 = vst [vmem:[#allocation213_spill] sm:$0xff] %v13950_v20  ;;  %v1358_v35 = vrot.slane %v1357_v34, 2  ;;  %v1368_v9 = vrot.slane %v1182_v33, 4  ;;  %v13960_v53 = vpop.permute.xlu1 %2129  ;;  %v1355_v32 = vmax.f32 %v1353_v56, %v1354_v58  ;;  %vm2393_vm10 = vcmp.eq.s32.totalorder %v11756_v63, %v12520_v7 }
 0x265   :  { %18175 = vst [vmem:[#allocation214_spill] sm:$0xff] %v13960_v53  ;;  %v1363_v4 = vmax.f32 %v1261_v6, %v1362_v13  ;;  %vm2616_vm8 = vcmp.eq.s32.totalorder %v12263_v17, %v13960_v53  ;;  %v13972_v37 = vpop.f32.mrf.mxu1  ;;  %9278 = vmatmul.mubr.msk.bf16.gmra.mxu1 %vm9277_vm3, %v17904_v57  ;;  %v18179_v13 = vpack.c.bf16 %v13425_v11, %v13169_v27  ;;  %v13991_v6 = vpop.permute.xlu0 %2138 }
 0x266   :  { %v1359_v48 = vmax.f32 %v1357_v34, %v1358_v35  ;;  %v1369_v54 = vmax.f32 %v1182_v33, %v1368_v9  ;;  %v13982_v28 = vsel %vm2616_vm8, 1.0, %v17908_v8  ;;  %9280 = vmatprep.mubr.msk.bf16.mxu1 %vm9279_vm14, %v17904_v57  ;;  %18180 = vst [vmem:[#allocation216_spill] sm:$0xff] %v13991_v6  ;;  %v5925_v27 = vsel %vm5913_vm0, %v5880_v55, %v13746_v16  ;;  %vm9281_vm8 = vmpackc.low %vm2386_vm13, %vm2383_vm1 }
 0x267   :  { %18178 = vst [vmem:[#allocation215_spill] sm:$0xff] %v13982_v28  ;;  %9940 = vmatmul.mubr.msk.bf16.gmra.mxu0 %vm3508_vm2, %v18179_v13  ;;  %v1364_v52 = vrot.slane %v1363_v4, 2  ;;  %v3900_v34 = vpop.f32.mrf.mxu1  ;;  %v5926_v35 = vsel %vm5915_vm5, %v5882_v41, %v5925_v27  ;;  %v5748_v55 = vpack.c.bf16 %v1355_v32, %v1355_v32  ;;  %v3162_v41 = vpack.c.bf16 %v13478_v49, %v13220_v39  ;;  %vm9283_vm13 = vmpackc.low %vm2393_vm10, %vm2390_vm9 }
 0x268   :  { %9943 = vmatprep.mubr.msk.bf16.mxu0 %vm10824_vm11, %v17908_v8  ;;  %v1360_v11 = vrot.slane %v1359_v48, 1  ;;  %v1370_v58 = vrot.slane %v1369_v54, 2  ;;  %v14001_v33 = vpop.permute.xlu1 %2135  ;;  %v14017_v27 = vsel %vm2619_vm6, 1.0, %v17908_v8  ;;  %vm2625_vm14 = vcmp.eq.s32.totalorder %v12263_v17, %v13991_v6  ;;  %v18200_v6 = vld [vmem:[#allocation62_spill] sm:$0xff] }
 0x269   :  { %18181 = vst [vmem:[#allocation217_spill] sm:$0xff] %v14001_v33  ;;  %v1365_v9 = vmax.f32 %v1363_v4, %v1364_v52  ;;  %v14010_v16 = vpop.f32.mrf.mxu1  ;;  %vm2622_vm12 = vcmp.eq.s32.totalorder %v12263_v17, %v14001_v33  ;;  %18182 = vst [vmem:[#allocation218_spill] sm:$0xff] %v14017_v27  ;;  %v18184_v52 = vld [vmem:[#allocation17_spill] sm:$0xff]  ;;  %vm2389_vm6 = vcmp.eq.s32.totalorder %v11170_v62, %v12112_v61  ;;  %v14039_v22 = vpop.permute.xlu0 %2144  ;;  %vm5919_vm1 = vcmask 1046534  }
 0x26a   :  { %v1361_v13 = vmax.f32 %v1359_v48, %v1360_v11  ;;  %v1371_v34 = vmax.f32 %v1369_v54, %v1370_v58  ;;  %v14020_v2 = vsel %vm2622_vm12, 1.0, %v17908_v8  ;;  %vm2241_vm3 = vcmp.eq.s32.totalorder %v12263_v17, %v18184_v52  ;;  %18186 = vst [vmem:[#allocation220_spill] sm:$0xff] %v14039_v22 }
 0x26b   :  { %v1366_v56 = vrot.slane %v1365_v9, 1  ;;  %18183 = vst [vmem:[#allocation219_spill] sm:$0xff] %v14020_v2  ;;  %v3903_v47 = vpop.f32.mrf.mxu1  ;;  %v5884_v10 = vunpack.c.l.b16 %v5748_v55  ;;  %vm2396_vm12 = vcmp.eq.s32.totalorder %v11756_v63, %v12136_v23  ;;  %v14062_v55 = vpop.f32.mrf.mxu0  ;;  %vm2631_vm9 = vcmp.eq.s32.totalorder %v12263_v17, %v14039_v22  ;;  %v18193_v22 = vld [vmem:[#allocation18_spill] sm:$0xff] }
 0x26c   :  { %v5749_v4 = vpack.c.bf16 %v1361_v13, %v1361_v13  ;;  %v1372_v39 = vrot.slane %v1371_v34, 1  ;;  %v14031_v32 = vpop.permute.xlu1 %2141  ;;  %v2724_v47 = vsel %vm2238_vm4, 1.0, %v17908_v8  ;;  %vm2392_vm10 = vcmp.eq.s32.totalorder %v11170_v62, %v12520_v7 }
 0x26d   :  { %18185 = vst [vmem:[#allocation17_spill] sm:$0xff] %v14031_v32  ;;  %v1367_v48 = vmax.f32 %v1365_v9, %v1366_v56  ;;  %v14041_v54 = vpop.f32.mrf.mxu1  ;;  %9282 = vmatmul.mubr.msk.bf16.gmra.mxu1 %vm9281_vm8, %v17904_v57  ;;  %vm2628_vm4 = vcmp.eq.s32.totalorder %v12263_v17, %v14031_v32  ;;  %v14060_v56 = vsel %vm2625_vm14, 1.0, %v17908_v8  ;;  %vm2399_vm8 = vcmp.eq.s32.totalorder %v11756_v63, %v12550_v31 }
 0x26e   :  { %v5885_v11 = vunpack.c.l.b16 %v5749_v4  ;;  %v1373_v58 = vmax.f32 %v1371_v34, %v1372_v39  ;;  %9284 = vmatprep.mubr.msk.bf16.mxu1 %vm9283_vm13, %v17904_v57  ;;  %18187 = vst [vmem:[#allocation221_spill] sm:$0xff] %v14060_v56  ;;  %v14065_v13 = vsel %vm2628_vm4, 1.0, %v17908_v8  ;;  %vm17833_vm14 = vcmask 1047559   ;;  %vm9285_vm4 = vmpackc.low %vm2392_vm10, %vm2389_vm6 }
 0x26f   :  { %9944 = vmatmul.mubr.msk.bf16.gmra.mxu0 %vm3508_vm2, %v3162_v41  ;;  %v5750_v9 = vpack.c.bf16 %v1367_v48, %v1367_v48  ;;  %18188 = vst [vmem:[#allocation222_spill] sm:$0xff] %v14065_v13  ;;  %v3908_v34 = vpop.f32.mrf.mxu1  ;;  %v14092_v39 = vsel %vm2631_vm9, 1.0, %v17908_v8  ;;  %vm9287_vm6 = vmpackc.low %vm2399_vm8, %vm2396_vm12  ;;  %vm2395_vm12 = vcmp.eq.s32.totalorder %v11170_v62, %v12136_v23  ;;  %vm2402_vm10 = vcmp.eq.s32.totalorder %v11756_v63, %v12160_v18  ;;  %v10384_v23 = vld [vmem:[%s17433_s10 + $0xe8] ss:$16 sps:$4 sm:$0xff]  }
 0x270   :  { %9947 = vmatprep.mubr.msk.bf16.mxu0 %vm10824_vm11, %v17908_v8  ;;  %v5920_v41 = vsel %vm5919_vm1, %v5885_v11, %v13947_v45  ;;  %v5751_v4 = vpack.c.bf16 %v1373_v58, %v1373_v58  ;;  %v14075_v48 = vpop.permute.xlu1 %2147  ;;  %v5927_v11 = vsel %vm5917_vm15, %v5884_v10, %v5926_v35  ;;  %v3165_v58 = vpack.c.bf16 %v2724_v47, %v13226_v60  ;;  %v18192_v10 = vld [vmem:[#allocation57_spill] sm:$0xff] }
 0x271   :  { %18189 = vst [vmem:[#allocation223_spill] sm:$0xff] %v14075_v48  ;;  %v5886_v34 = vunpack.c.l.b16 %v5750_v9  ;;  %v1187_v49 = vpop.f32.mrf.mxu0  ;;  %v14081_v27 = vpop.f32.mrf.mxu1  ;;  %vm2634_vm13 = vcmp.eq.s32.totalorder %v12263_v17, %v14075_v48  ;;  %18190 = vst [vmem:[#allocation224_spill] sm:$0xff] %v14092_v39  ;;  %vm2244_vm9 = vcmp.eq.s32.totalorder %v12263_v17, %v18192_v10  ;;  %vm2405_vm8 = vcmp.eq.s32.totalorder %v11756_v63, %v12578_v42 }
 0x272   :  { %v5887_v2 = vunpack.c.l.b16 %v5751_v4  ;;  %v1188_v45 = vadd.f32 %v1187_v49, %v13212_v24  ;;  %v14095_v9 = vsel %vm2634_vm13, 1.0, %v17908_v8 }
 0x273   :  { %18191 = vst [vmem:[#allocation225_spill] sm:$0xff] %v14095_v9  ;;  %v1189_v56 = vpop.f32.mrf.mxu0  ;;  %v3911_v4 = vpop.f32.mrf.mxu1  ;;  %v14098_v13 = vsel %vm5919_vm1, %v5886_v34, %v5927_v11 }
 0x274   :  { %v14107_v60 = vsel %vm17833_vm14, %v5887_v2, %v5920_v41  ;;  %v1380_v49 = vrot.slane %v1188_v45, 4  ;;  %v1190_v47 = vadd.f32 %v1189_v56, %v13248_v43  ;;  %v2727_v56 = vsel %vm2241_vm3, 1.0, %v17908_v8 }
 0x275   :  { %v1191_v34 = vpop.f32.mrf.mxu0  ;;  %v14114_v11 = vpop.f32.mrf.mxu1  ;;  %9286 = vmatmul.mubr.msk.bf16.gmra.mxu1 %vm9285_vm4, %v17904_v57  ;;  %vm2398_vm3 = vcmp.eq.s32.totalorder %v11170_v62, %v12550_v31  ;;  %v10386_v31 = vld [vmem:[%s17433_s10 + $0xec] ss:$16 sps:$4 sm:$0xff]   ;;  %vm2247_vm4 = vcmp.eq.s32.totalorder %v12263_v17, %v18193_v22  ;;  %vm18205_vm14 = vcmask 1042434  }
 0x276   :  { %v1381_v61 = vmax.f32 %v1188_v45, %v1380_v49  ;;  %v1265_v7 = vsel %vm13328_vm7, %v1190_v47, -inf  ;;  %v1192_v2 = vadd.f32 %v1191_v34, %v13212_v24  ;;  %9288 = vmatprep.mubr.msk.bf16.mxu1 %vm9287_vm6, %v17904_v57  ;;  %v2730_v45 = vsel %vm2244_vm9, 1.0, %v17908_v8  ;;  %vm9289_vm13 = vmpackc.low %vm2398_vm3, %vm2395_vm12  ;;  %6325 = vmatprep.subr.bf16.mxu0 %v10386_v31  ;;  %v18196_v31 = vld [vmem:[#allocation60_spill] sm:$0xff] }
 0x277   :  { %9948 = vmatmul.mubr.msk.bf16.gmra.mxu0 %vm3508_vm2, %v3165_v58  ;;  %v1193_v41 = vpop.f32.mrf.mxu0  ;;  %v3916_v4 = vpop.f32.mrf.mxu1  ;;  %v1386_v52 = vrot.slane %v1265_v7, 4  ;;  %v3168_v9 = vpack.c.bf16 %v2730_v45, %v2727_v56  ;;  %vm9291_vm9 = vmpackc.low %vm2405_vm8, %vm2402_vm10  ;;  %vm2401_vm12 = vcmp.eq.s32.totalorder %v11170_v62, %v12160_v18  ;;  %vm2404_vm10 = vcmp.eq.s32.totalorder %v11170_v62, %v12578_v42 }
 0x278   :  { %9951 = vmatprep.mubr.msk.bf16.mxu0 %vm10824_vm11, %v17908_v8  ;;  %v1382_v49 = vrot.slane %v1381_v61, 2  ;;  %v1392_v47 = vrot.slane %v1192_v2, 4  ;;  %v1194_v10 = vadd.f32 %v1193_v41, %v13248_v43  ;;  %6326 = vmatpush1.bf16.msra.mxu0 %v10384_v23  ;;  %vm2408_vm3 = vcmp.eq.s32.totalorder %v11756_v63, %v12178_v25 }
 0x279   :  { %v14142_v58 = vpop.f32.mrf.mxu1  ;;  %vm2411_vm8 = vcmp.eq.s32.totalorder %v11756_v63, %v12599_v40 }
 0x27a   :  { %v1383_v34 = vmax.f32 %v1381_v61, %v1382_v49  ;;  %v1393_v4 = vmax.f32 %v1192_v2, %v1392_v47  ;;  %v1267_v41 = vsel %vm13328_vm7, %v1194_v10, -inf  ;;  %v1387_v61 = vmax.f32 %v1265_v7, %v1386_v52 }
 0x27b   :  { %v1398_v35 = vrot.slane %v1267_v41, 4  ;;  %v3919_v39 = vpop.f32.mrf.mxu1  ;;  %v2733_v47 = vsel %vm2247_vm4, 1.0, %v17908_v8  ;;  %vm2256_vm4 = vcmp.eq.s32.totalorder %v12263_v17, %v18196_v31  ;;  %v18198_v31 = vld [vmem:[#allocation70_spill] sm:$0xff] }
 0x27c   :  { %v1384_v28 = vrot.slane %v1383_v34, 1  ;;  %v1394_v20 = vrot.slane %v1393_v4, 2  ;;  %v18194_v39 = vld [vmem:[#allocation58_spill] sm:$0xff] }
 0x27d   :  { %v1399_v2 = vmax.f32 %v1267_v41, %v1398_v35  ;;  %v14156_v49 = vpop.f32.mrf.mxu1  ;;  %9290 = vmatmul.mubr.msk.bf16.gmra.mxu1 %vm9289_vm13, %v17904_v57  ;;  %vm2250_vm6 = vcmp.eq.s32.totalorder %v12263_v17, %v18194_v39 }
 0x27e   :  { %v1385_v56 = vmax.f32 %v1383_v34, %v1384_v28  ;;  %v1395_v45 = vmax.f32 %v1393_v4, %v1394_v20  ;;  %9292 = vmatprep.mubr.msk.bf16.mxu1 %vm9291_vm9, %v17904_v57  ;;  %v2736_v52 = vsel %vm2250_vm6, 1.0, %v17908_v8  ;;  %v1388_v20 = vrot.slane %v1387_v61, 2  ;;  %v18195_v34 = vld [vmem:[#allocation19_spill] sm:$0xff]  ;;  %vm9293_vm9 = vmpackc.low %vm2404_vm10, %vm2401_vm12 }
 0x27f   :  { %9952 = vmatmul.mubr.msk.bf16.gmra.mxu0 %vm3508_vm2, %v3168_v9  ;;  %v1400_v35 = vrot.slane %v1399_v2, 2  ;;  %v3924_v7 = vpop.f32.mrf.mxu1  ;;  %vm2253_vm13 = vcmp.eq.s32.totalorder %v12263_v17, %v18195_v34  ;;  %v3171_v23 = vpack.c.bf16 %v2736_v52, %v2733_v47  ;;  %vm9295_vm6 = vmpackc.low %vm2411_vm8, %vm2408_vm3  ;;  %vm2407_vm12 = vcmp.eq.s32.totalorder %v11170_v62, %v12178_v25 }
 0x280   :  { %9955 = vmatprep.mubr.msk.bf16.mxu0 %vm10824_vm11, %v17908_v8  ;;  %v1396_v10 = vrot.slane %v1395_v45, 1  ;;  %v5753_v22 = vpack.c.bf16 %v1385_v56, %v1385_v56  ;;  %v1389_v7 = vmax.f32 %v1387_v61, %v1388_v20  ;;  %v10387_v61 = vld [vmem:[%s17433_s10 + $0xa0] ss:$16 sps:$4 sm:$0xff]   ;;  %v2739_v52 = vsel %vm2253_vm13, 1.0, %v17908_v8 }
 0x281   :  { %v14180_v28 = vpop.f32.mrf.mxu1  ;;  %v1401_v4 = vmax.f32 %v1399_v2, %v1400_v35  ;;  %v2742_v20 = vsel %vm2256_vm4, 1.0, %v17908_v8  ;;  %vm18197_vm10 = vcmask 1041409   ;;  %vm2414_vm3 = vcmp.eq.s32.totalorder %v11756_v63, %v18198_v31 }
 0x282   :  { %v1397_v9 = vmax.f32 %v1395_v45, %v1396_v10  ;;  %v5889_v2 = vunpack.c.l.b16 %v5753_v22  ;;  %v10389_v10 = vld [vmem:[%s17433_s10 + $0xa4] ss:$16 sps:$4 sm:$0xff]   ;;  %vm2410_vm8 = vcmp.eq.s32.totalorder %v11170_v62, %v12599_v40  ;;  %vm2417_vm13 = vcmp.eq.s32.totalorder %v11756_v63, %v12624_v38 }
 0x283   :  { %v3927_v41 = vpop.f32.mrf.mxu1  ;;  %v1197_v18 = vpop.f32.mrf.mxu0  ;;  %v1402_v22 = vrot.slane %v1401_v4, 1  ;;  %6278 = vmatprep.subr.bf16.mxu1 %v10389_v10  ;;  %v18199_v10 = vld [vmem:[#allocation20_spill] sm:$0xff] }
 0x284   :  { %v5755_v42 = vpack.c.bf16 %v1397_v9, %v1397_v9  ;;  %v1198_v39 = vadd.f32 %v1197_v18, %v13212_v24  ;;  %6279 = vmatpush1.bf16.msra.mxu1 %v10387_v61  ;;  %vm2259_vm4 = vcmp.eq.s32.totalorder %v12263_v17, %v18199_v10 }
 0x285   :  { %v14191_v48 = vpop.f32.mrf.mxu1  ;;  %9294 = vmatmul.mubr.msk.bf16.gmra.mxu1 %vm9293_vm9, %v17904_v57  ;;  %v1199_v56 = vpop.f32.mrf.mxu0  ;;  %vm2262_vm9 = vcmp.eq.s32.totalorder %v12263_v17, %v18200_v6  ;;  %v1403_v61 = vmax.f32 %v1401_v4, %v1402_v22  ;;  %v2745_v4 = vsel %vm2259_vm4, 1.0, %v17908_v8 }
 0x286   :  { %v5891_v45 = vunpack.c.l.b16 %v5755_v42  ;;  %v1404_v35 = vrot.slane %v1198_v39, 4  ;;  %v1200_v47 = vadd.f32 %v1199_v56, %v13248_v43  ;;  %9296 = vmatprep.mubr.msk.bf16.mxu1 %vm9295_vm6, %v17904_v57  ;;  %vm9297_vm6 = vmpackc.low %vm2410_vm8, %vm2407_vm12  ;;  %v2748_v22 = vsel %vm2262_vm9, 1.0, %v17908_v8 }
 0x287   :  { %9956 = vmatmul.mubr.msk.bf16.gmra.mxu0 %vm3508_vm2, %v3171_v23  ;;  %v3932_v9 = vpop.f32.mrf.mxu1  ;;  %v1201_v41 = vpop.f32.mrf.mxu0  ;;  %vm2413_vm12 = vcmp.eq.s32.totalorder %v11170_v62, %v18198_v31  ;;  %vm2416_vm8 = vcmp.eq.s32.totalorder %v11170_v62, %v12624_v38 }
 0x288   :  { %9959 = vmatprep.mubr.msk.bf16.mxu0 %vm10824_vm11, %v17908_v8  ;;  %v14222_v18 = vsel %vm18197_vm10, %v5891_v45, %v5889_v2  ;;  %v1405_v23 = vmax.f32 %v1198_v39, %v1404_v35  ;;  %v1269_v34 = vsel %vm13328_vm7, %v1200_v47, -inf  ;;  %v1202_v42 = vadd.f32 %v1201_v41, %v13212_v24  ;;  %vm9299_vm10 = vmpackc.low %vm2417_vm13, %vm2414_vm3 }
 0x289   :  { %v1410_v56 = vrot.slane %v1269_v34, 4  ;;  %v14233_v9 = vpop.f32.mrf.mxu1  ;;  %v1203_v2 = vpop.f32.mrf.mxu0  ;;  %v1390_v39 = vrot.slane %v1389_v7, 1  ;;  %v3174_v41 = vpack.c.bf16 %v2742_v20, %v2739_v52 }
 0x28a   :  { %v1406_v45 = vrot.slane %v1405_v23, 2  ;;  %v1416_v35 = vrot.slane %v1202_v42, 4  ;;  %v1204_v47 = vadd.f32 %v1203_v2, %v13248_v43 }
 0x28b   :  { %v1411_v32 = vmax.f32 %v1269_v34, %v1410_v56  ;;  %v3935_v14 = vpop.f32.mrf.mxu1  ;;  %v1391_v25 = vmax.f32 %v1389_v7, %v1390_v39  ;;  %v5756_v7 = vpack.c.bf16 %v1403_v61, %v1403_v61 }
 0x28c   :  { %v1407_v33 = vmax.f32 %v1405_v23, %v1406_v45  ;;  %v1417_v29 = vmax.f32 %v1202_v42, %v1416_v35  ;;  %v1271_v2 = vsel %vm13328_vm7, %v1204_v47, -inf  ;;  %v18201_v45 = vld [vmem:[#allocation72_spill] sm:$0xff] }
 0x28d   :  { %v1412_v53 = vrot.slane %v1411_v32, 2  ;;  %v1422_v52 = vrot.slane %v1271_v2, 4  ;;  %v14248_v20 = vpop.f32.mrf.mxu1  ;;  %9298 = vmatmul.mubr.msk.bf16.gmra.mxu1 %vm9297_vm6, %v17904_v57  ;;  %vm2420_vm3 = vcmp.eq.s32.totalorder %v11756_v63, %v18201_v45  ;;  %v5754_v47 = vpack.c.bf16 %v1391_v25, %v1391_v25  ;;  %vm9301_vm6 = vmpackc.low %vm2416_vm8, %vm2413_vm12 }
 0x28e   :  { %v1408_v40 = vrot.slane %v1407_v33, 1  ;;  %v1418_v14 = vrot.slane %v1417_v29, 2  ;;  %9300 = vmatprep.mubr.msk.bf16.mxu1 %vm9299_vm10, %v17904_v57  ;;  %v5892_v38 = vunpack.c.l.b16 %v5756_v7  ;;  %vm18206_vm12 = vcmask 1041409  }
 0x28f   :  { %9960 = vmatmul.mubr.msk.bf16.gmra.mxu0 %vm3508_vm2, %v3174_v41  ;;  %v1413_v23 = vmax.f32 %v1411_v32, %v1412_v53  ;;  %v1423_v34 = vmax.f32 %v1271_v2, %v1422_v52  ;;  %v3940_v42 = vpop.f32.mrf.mxu1  ;;  %v18202_v32 = vld [vmem:[#allocation121_spill] sm:$0xff] }
 0x290   :  { %9963 = vmatprep.mubr.msk.bf16.mxu0 %vm10824_vm11, %v17908_v8  ;;  %v1409_v56 = vmax.f32 %v1407_v33, %v1408_v40  ;;  %v1419_v39 = vmax.f32 %v1417_v29, %v1418_v14  ;;  %vm2423_vm13 = vcmp.eq.s32.totalorder %v11756_v63, %v18202_v32  ;;  %v18203_v2 = vld [vmem:[#allocation21_spill] sm:$0xff]  ;;  %v3177_v29 = vpack.c.bf16 %v2748_v22, %v2745_v4  ;;  %v18204_v40 = vld [vmem:[#allocation63_spill] sm:$0xff] }
 0x291   :  { %v1414_v6 = vrot.slane %v1413_v23, 1  ;;  %v1424_v35 = vrot.slane %v1423_v34, 2  ;;  %v14275_v53 = vpop.f32.mrf.mxu1  ;;  %vm2265_vm4 = vcmp.eq.s32.totalorder %v12263_v17, %v18203_v2  ;;  %vm2268_vm9 = vcmp.eq.s32.totalorder %v12263_v17, %v18204_v40  ;;  %vm9303_vm10 = vmpackc.low %vm2423_vm13, %vm2420_vm3 }
 0x292   :  { %v5757_v10 = vpack.c.bf16 %v1409_v56, %v1409_v56  ;;  %v1420_v41 = vrot.slane %v1419_v39, 1  ;;  %v5890_v4 = vunpack.c.l.b16 %v5754_v47  ;;  %vm2422_vm8 = vcmp.eq.s32.totalorder %v11170_v62, %v18202_v32 }
 0x293   :  { %v1415_v33 = vmax.f32 %v1413_v23, %v1414_v6  ;;  %v1425_v61 = vmax.f32 %v1423_v34, %v1424_v35  ;;  %v3943_v52 = vpop.f32.mrf.mxu1  ;;  %v2751_v23 = vsel %vm2265_vm4, 1.0, %v17908_v8  ;;  %v2754_v34 = vsel %vm2268_vm9, 1.0, %v17908_v8 }
 0x294   :  { %v5893_v14 = vunpack.c.l.b16 %v5757_v10  ;;  %v1421_v42 = vmax.f32 %v1419_v39, %v1420_v41  ;;  %v18207_v41 = vld [vmem:[#allocation75_spill] sm:$0xff]  ;;  %vm18208_vm13 = vcmask 1042434   ;;  %v18210_v52 = vld [vmem:[#allocation124_spill] sm:$0xff] }
 0x295   :  { %v5758_v25 = vpack.c.bf16 %v1415_v33, %v1415_v33  ;;  %v1426_v56 = vrot.slane %v1425_v61, 1  ;;  %v14286_v59 = vpop.f32.mrf.mxu1  ;;  %9302 = vmatmul.mubr.msk.bf16.gmra.mxu1 %vm9301_vm6, %v17904_v57  ;;  %vm2426_vm3 = vcmp.eq.s32.totalorder %v11756_v63, %v18207_v41  ;;  %vm2429_vm4 = vcmp.eq.s32.totalorder %v11756_v63, %v18210_v52 }
 0x296   :  { %v5931_v31 = vsel %vm18205_vm14, %v5893_v14, %v14222_v18  ;;  %v5759_v22 = vpack.c.bf16 %v1421_v42, %v1421_v42  ;;  %9304 = vmatprep.mubr.msk.bf16.mxu1 %vm9303_vm10, %v17904_v57  ;;  %v1207_v6 = vpop.f32.mrf.mxu0  ;;  %vm2419_vm14 = vcmp.eq.s32.totalorder %v11170_v62, %v18201_v45  ;;  %v5937_v18 = vsel %vm18206_vm12, %v5892_v38, %v5890_v4  ;;  %v18211_v42 = vld [vmem:[#allocation22_spill] sm:$0xff] }
 0x297   :  { %9964 = vmatmul.mubr.msk.bf16.gmra.mxu0 %vm3508_vm2, %v3177_v29  ;;  %v5894_v7 = vunpack.c.l.b16 %v5758_v25  ;;  %v1427_v39 = vmax.f32 %v1425_v61, %v1426_v56  ;;  %v3948_v35 = vpop.f32.mrf.mxu1  ;;  %v1208_v10 = vadd.f32 %v1207_v6, %v13212_v24  ;;  %vm2271_vm9 = vcmp.eq.s32.totalorder %v12263_v17, %v18211_v42  ;;  %v18212_v56 = vld [vmem:[#allocation64_spill] sm:$0xff]  ;;  %vm9305_vm10 = vmpackc.low %vm2422_vm8, %vm2419_vm14 }
 0x298   :  { %9967 = vmatprep.mubr.msk.bf16.mxu0 %vm10824_vm11, %v17908_v8  ;;  %v5895_v47 = vunpack.c.l.b16 %v5759_v22  ;;  %v1209_v33 = vpop.f32.mrf.mxu0  ;;  %v3180_v25 = vpack.c.bf16 %v2754_v34, %v2751_v23  ;;  %vm2274_vm6 = vcmp.eq.s32.totalorder %v12263_v17, %v18212_v56  ;;  %vm9307_vm14 = vmpackc.low %vm2429_vm4, %vm2426_vm3  ;;  %vm2425_vm12 = vcmp.eq.s32.totalorder %v11170_v62, %v18207_v41 }
 0x299   :  { %v5938_v2 = vsel %vm18208_vm13, %v5894_v7, %v5937_v18  ;;  %v5760_v29 = vpack.c.bf16 %v1427_v39, %v1427_v39  ;;  %v14318_v61 = vpop.f32.mrf.mxu1  ;;  %v1428_v38 = vrot.slane %v1208_v10, 4  ;;  %v1210_v14 = vadd.f32 %v1209_v33, %v13248_v43 }
 0x29a   :  { %18209 = vst [vmem:[#allocation57_spill] sm:$0xff] %v14318_v61  ;;  %v14323_v40 = vsel %vm5913_vm0, %v5895_v47, %v5931_v31  ;;  %v1211_v22 = vpop.f32.mrf.mxu0  ;;  %v1184_v31 = vadd.f32 %v14062_v55, %v13248_v43  ;;  %vm2428_vm3 = vcmp.eq.s32.totalorder %v11170_v62, %v18210_v52 }
 0x29b   :  { %v5896_v4 = vunpack.c.l.b16 %v5760_v29  ;;  %v3951_v7 = vpop.f32.mrf.mxu1  ;;  %v1429_v39 = vmax.f32 %v1208_v10, %v1428_v38  ;;  %v1273_v23 = vsel %vm13328_vm7, %v1210_v14, -inf  ;;  %v1212_v34 = vadd.f32 %v1211_v22, %v13212_v24 }
 0x29c   :  { %v1434_v6 = vrot.slane %v1273_v23, 4  ;;  %v1213_v35 = vpop.f32.mrf.mxu0  ;;  %v2757_v10 = vsel %vm2271_vm9, 1.0, %v17908_v8  ;;  %v2760_v29 = vsel %vm2274_vm6, 1.0, %v17908_v8  ;;  %v1263_v38 = vsel %vm13328_vm7, %v1184_v31, -inf  ;;  %v10390_v7 = vld [vmem:[%s17433_s10 + $0xc8] ss:$16 sps:$4 sm:$0xff]   ;;  %vm9309_vm9 = vmpackc.low %vm2428_vm3, %vm2425_vm12 }
 0x29d   :  { %v14341_v18 = vpop.f32.mrf.mxu1  ;;  %9306 = vmatmul.mubr.msk.bf16.gmra.mxu1 %vm9305_vm10, %v17904_v57  ;;  %v14351_v55 = vsel %vm5913_vm0, %v5896_v4, %v5938_v2  ;;  %v1430_v45 = vrot.slane %v1429_v39, 2  ;;  %v1440_v32 = vrot.slane %v1212_v34, 4  ;;  %v1214_v47 = vadd.f32 %v1213_v35, %v13248_v43  ;;  %v10392_v31 = vld [vmem:[%s17433_s10 + $0xcc] ss:$16 sps:$4 sm:$0xff]  }
 0x29e   :  { %18213 = vst [vmem:[#allocation18_spill] sm:$0xff] %v14341_v18  ;;  %9308 = vmatprep.mubr.msk.bf16.mxu1 %vm9307_vm14, %v17904_v57  ;;  %v1435_v2 = vmax.f32 %v1273_v23, %v1434_v6  ;;  %v18216_v23 = vld [vmem:[#allocation128_spill] sm:$0xff]  ;;  %v18217_v35 = vld [vmem:[#allocation23_spill] sm:$0xff]  ;;  %6327 = vmatprep.subr.bf16.mxu0 %v10392_v31  ;;  %v1374_v19 = vrot.slane %v1263_v38, 4  ;;  %v18218_v18 = vld [vmem:[#allocation65_spill] sm:$0xff] }
 0x29f   :  { %9968 = vmatmul.mubr.msk.bf16.gmra.mxu0 %vm3508_vm2, %v3180_v25  ;;  %v3956_v33 = vpop.f32.mrf.mxu1  ;;  %v1431_v14 = vmax.f32 %v1429_v39, %v1430_v45  ;;  %v1441_v25 = vmax.f32 %v1212_v34, %v1440_v32  ;;  %v1275_v4 = vsel %vm13328_vm7, %v1214_v47, -inf  ;;  %v18215_v39 = vld [vmem:[#allocation77_spill] sm:$0xff]  ;;  %vm2435_vm13 = vcmp.eq.s32.totalorder %v11756_v63, %v18216_v23 }
 0x2a0   :  { %9971 = vmatprep.mubr.msk.bf16.mxu0 %vm10824_vm11, %v17908_v8  ;;  %v1436_v42 = vrot.slane %v1435_v2, 2  ;;  %v1446_v56 = vrot.slane %v1275_v4, 4  ;;  %vm2432_vm8 = vcmp.eq.s32.totalorder %v11756_v63, %v18215_v39  ;;  %vm2277_vm4 = vcmp.eq.s32.totalorder %v12263_v17, %v18217_v35  ;;  %6328 = vmatpush1.bf16.msra.mxu0 %v10390_v7  ;;  %v18220_v35 = vld [vmem:[#allocation80_spill] sm:$0xff] }
 0x2a1   :  { %v14374_v22 = vpop.f32.mrf.mxu1  ;;  %v1432_v34 = vrot.slane %v1431_v14, 1  ;;  %v1442_v6 = vrot.slane %v1441_v25, 2  ;;  %v3183_v33 = vpack.c.bf16 %v2760_v29, %v2757_v10  ;;  %vm2280_vm6 = vcmp.eq.s32.totalorder %v12263_v17, %v18218_v18  ;;  %vm9311_vm10 = vmpackc.low %vm2435_vm13, %vm2432_vm8  ;;  %v18219_v29 = vld [vmem:[#allocation25_spill] sm:$0xff] }
 0x2a2   :  { %18214 = vst [vmem:[#allocation58_spill] sm:$0xff] %v14374_v22  ;;  %v1437_v45 = vmax.f32 %v1435_v2, %v1436_v42  ;;  %v1447_v32 = vmax.f32 %v1275_v4, %v1446_v56  ;;  %v2763_v10 = vsel %vm2277_vm4, 1.0, %v17908_v8  ;;  %vm2283_vm14 = vcmp.eq.s32.totalorder %v12263_v17, %v18219_v29  ;;  %v10395_v29 = vld [vmem:[%s17433_s10 + $0x84] ss:$16 sps:$4 sm:$0xff]  }
 0x2a3   :  { %v3959_v47 = vpop.f32.mrf.mxu1  ;;  %v1433_v22 = vmax.f32 %v1431_v14, %v1432_v34  ;;  %v1443_v1 = vmax.f32 %v1441_v25, %v1442_v6  ;;  %v2766_v56 = vsel %vm2280_vm6, 1.0, %v17908_v8  ;;  %vm2431_vm12 = vcmp.eq.s32.totalorder %v11170_v62, %v18215_v39  ;;  %6280 = vmatprep.subr.bf16.mxu1 %v10395_v29 }
 0x2a4   :  { %v1438_v61 = vrot.slane %v1437_v45, 1  ;;  %v1448_v2 = vrot.slane %v1447_v32, 2  ;;  %vm2434_vm3 = vcmp.eq.s32.totalorder %v11170_v62, %v18216_v23  ;;  %vm2438_vm8 = vcmp.eq.s32.totalorder %v11756_v63, %v18220_v35 }
 0x2a5   :  { %v14396_v4 = vpop.f32.mrf.mxu1  ;;  %9310 = vmatmul.mubr.msk.bf16.gmra.mxu1 %vm9309_vm9, %v17904_v57  ;;  %v5761_v41 = vpack.c.bf16 %v1433_v22, %v1433_v22  ;;  %v1444_v52 = vrot.slane %v1443_v1, 1  ;;  %v1375_v22 = vmax.f32 %v1263_v38, %v1374_v19  ;;  %v18222_v38 = vld [vmem:[#allocation66_spill] sm:$0xff]  ;;  %vm9313_vm9 = vmpackc.low %vm2434_vm3, %vm2431_vm12  ;;  %v2769_v23 = vsel %vm2283_vm14, 1.0, %v17908_v8 }
 0x2a6   :  { %9312 = vmatprep.mubr.msk.bf16.mxu1 %vm9311_vm10, %v17904_v57  ;;  %v1439_v14 = vmax.f32 %v1437_v45, %v1438_v61  ;;  %v1449_v25 = vmax.f32 %v1447_v32, %v1448_v2  ;;  %v18221_v45 = vld [vmem:[#allocation132_spill] sm:$0xff]  ;;  %vm2286_vm4 = vcmp.eq.s32.totalorder %v12263_v17, %v18222_v38  ;;  %vm2437_vm10 = vcmp.eq.s32.totalorder %v11170_v62, %v18220_v35 }
 0x2a7   :  { %9972 = vmatmul.mubr.msk.bf16.gmra.mxu0 %vm3508_vm2, %v3183_v33  ;;  %v3964_v42 = vpop.f32.mrf.mxu1  ;;  %v5897_v7 = vunpack.c.l.b16 %v5761_v41  ;;  %v1445_v31 = vmax.f32 %v1443_v1, %v1444_v52  ;;  %vm2441_vm13 = vcmp.eq.s32.totalorder %v11756_v63, %v18221_v45  ;;  %v3186_v41 = vpack.c.bf16 %v2766_v56, %v2763_v10 }
 0x2a8   :  { %9975 = vmatprep.mubr.msk.bf16.mxu0 %vm10824_vm11, %v17908_v8  ;;  %v5762_v61 = vpack.c.bf16 %v1439_v14, %v1439_v14  ;;  %v1450_v34 = vrot.slane %v1449_v25, 1  ;;  %v1376_v52 = vrot.slane %v1375_v22, 2  ;;  %vm9315_vm6 = vmpackc.low %vm2441_vm13, %vm2438_vm8  ;;  %v2772_v10 = vsel %vm2286_vm4, 1.0, %v17908_v8 }
 0x2a9   :  { %v14423_v6 = vpop.f32.mrf.mxu1  ;;  %v5933_v19 = vsel %vm5915_vm5, %v5897_v7, %v14323_v40  ;;  %v5763_v1 = vpack.c.bf16 %v1445_v31, %v1445_v31  ;;  %v1217_v18 = vpop.f32.mrf.mxu0  ;;  %vm2440_vm14 = vcmp.eq.s32.totalorder %v11170_v62, %v18221_v45 }
 0x2aa   :  { %v5898_v32 = vunpack.c.l.b16 %v5762_v61  ;;  %v1451_v47 = vmax.f32 %v1449_v25, %v1450_v34  ;;  %v1218_v33 = vadd.f32 %v1217_v18, %v13212_v24  ;;  %vm9317_vm13 = vmpackc.low %vm2440_vm14, %vm2437_vm10 }
 0x2ab   :  { %v3967_v2 = vpop.f32.mrf.mxu1  ;;  %v5899_v40 = vunpack.c.l.b16 %v5763_v1  ;;  %v1219_v14 = vpop.f32.mrf.mxu0 }
 0x2ac   :  { %v5764_v42 = vpack.c.bf16 %v1451_v47, %v1451_v47  ;;  %v1452_v7 = vrot.slane %v1218_v33, 4  ;;  %v1220_v31 = vadd.f32 %v1219_v14, %v13248_v43  ;;  %v5940_v39 = vsel %vm5915_vm5, %v5898_v32, %v14351_v55  ;;  %v10393_v55 = vld [vmem:[%s17433_s10 + $0x80] ss:$16 sps:$4 sm:$0xff]  }
 0x2ad   :  { %v14441_v61 = vpop.f32.mrf.mxu1  ;;  %9314 = vmatmul.mubr.msk.bf16.gmra.mxu1 %vm9313_vm9, %v17904_v57  ;;  %v14461_v25 = vsel %vm5917_vm15, %v5899_v40, %v5933_v19  ;;  %v1221_v56 = vpop.f32.mrf.mxu0  ;;  %v1377_v32 = vmax.f32 %v1375_v22, %v1376_v52  ;;  %v18226_v52 = vld [vmem:[#allocation27_spill] sm:$0xff] }
 0x2ae   :  { %9316 = vmatprep.mubr.msk.bf16.mxu1 %vm9315_vm6, %v17904_v57  ;;  %v5900_v34 = vunpack.c.l.b16 %v5764_v42  ;;  %v1453_v1 = vmax.f32 %v1218_v33, %v1452_v7  ;;  %v1277_v18 = vsel %vm13328_vm7, %v1220_v31, -inf  ;;  %v1222_v19 = vadd.f32 %v1221_v56, %v13212_v24  ;;  %6281 = vmatpush1.bf16.msra.mxu1 %v10393_v55  ;;  %v18224_v7 = vld [vmem:[#allocation83_spill] sm:$0xff]  ;;  %v18225_v31 = vld [vmem:[#allocation134_spill] sm:$0xff] }
 0x2af   :  { %9976 = vmatmul.mubr.msk.bf16.gmra.mxu0 %vm3508_vm2, %v3186_v41  ;;  %v3972_v38 = vpop.f32.mrf.mxu1  ;;  %v1458_v47 = vrot.slane %v1277_v18, 4  ;;  %v1223_v2 = vpop.f32.mrf.mxu0  ;;  %vm2444_vm12 = vcmp.eq.s32.totalorder %v11756_v63, %v18224_v7  ;;  %vm2447_vm3 = vcmp.eq.s32.totalorder %v11756_v63, %v18225_v31  ;;  %vm2289_vm8 = vcmp.eq.s32.totalorder %v12263_v17, %v18226_v52 }
 0x2b0   :  { %9979 = vmatprep.mubr.msk.bf16.mxu0 %vm10824_vm11, %v17908_v8  ;;  %v1454_v33 = vrot.slane %v1453_v1, 2  ;;  %v1464_v41 = vrot.slane %v1222_v19, 4  ;;  %v1224_v40 = vadd.f32 %v1223_v2, %v13248_v43  ;;  %v14484_v42 = vsel %vm5917_vm15, %v5900_v34, %v5940_v39  ;;  %vm9319_vm9 = vmpackc.low %vm2447_vm3, %vm2444_vm12 }
 0x2b1   :  { %v14481_v14 = vpop.f32.mrf.mxu1  ;;  %v1459_v22 = vmax.f32 %v1277_v18, %v1458_v47  ;;  %v3189_v55 = vpack.c.bf16 %v2772_v10, %v2769_v23  ;;  %v1378_v39 = vrot.slane %v1377_v32, 1  ;;  %v18227_v47 = vld [vmem:[#allocation67_spill] sm:$0xff]  ;;  %v2775_v23 = vsel %vm2289_vm8, 1.0, %v17908_v8 }
 0x2b2   :  { %18223 = vst [vmem:[#allocation19_spill] sm:$0xff] %v14481_v14  ;;  %v1455_v56 = vmax.f32 %v1453_v1, %v1454_v33  ;;  %v1465_v29 = vmax.f32 %v1222_v19, %v1464_v41  ;;  %v1279_v38 = vsel %vm13328_vm7, %v1224_v40, -inf  ;;  %vm2292_vm4 = vcmp.eq.s32.totalorder %v12263_v17, %v18227_v47 }
 0x2b3   :  { %v3975_v2 = vpop.f32.mrf.mxu1  ;;  %v1460_v34 = vrot.slane %v1459_v22, 2  ;;  %v1470_v18 = vrot.slane %v1279_v38, 4  ;;  %v1379_v47 = vmax.f32 %v1377_v32, %v1378_v39  ;;  %vm2443_vm6 = vcmp.eq.s32.totalorder %v11170_v62, %v18224_v7  ;;  %v18232_v39 = vld [vmem:[#allocation29_spill] sm:$0xff] }
 0x2b4   :  { %v1456_v1 = vrot.slane %v1455_v56, 1  ;;  %v1466_v19 = vrot.slane %v1465_v29, 2  ;;  %v2778_v2 = vsel %vm2292_vm4, 1.0, %v17908_v8  ;;  %vm2446_vm10 = vcmp.eq.s32.totalorder %v11170_v62, %v18225_v31  ;;  %v18233_v31 = vld [vmem:[#allocation68_spill] sm:$0xff] }
 0x2b5   :  { %v14502_v33 = vpop.f32.mrf.mxu1  ;;  %9318 = vmatmul.mubr.msk.bf16.gmra.mxu1 %vm9317_vm13, %v17904_v57  ;;  %v1461_v35 = vmax.f32 %v1459_v22, %v1460_v34  ;;  %v1471_v45 = vmax.f32 %v1279_v38, %v1470_v18  ;;  %vm2295_vm3 = vcmp.eq.s32.totalorder %v12263_v17, %v18232_v39  ;;  %vm2298_vm8 = vcmp.eq.s32.totalorder %v12263_v17, %v18233_v31  ;;  %vm9321_vm13 = vmpackc.low %vm2446_vm10, %vm2443_vm6  ;;  %v18237_v31 = vld [vmem:[#allocation143_spill] sm:$0xff] }
 0x2b6   :  { %18228 = vst [vmem:[#allocation60_spill] sm:$0xff] %v14502_v33  ;;  %9320 = vmatprep.mubr.msk.bf16.mxu1 %vm9319_vm9, %v17904_v57  ;;  %v1457_v10 = vmax.f32 %v1455_v56, %v1456_v1  ;;  %v1467_v41 = vmax.f32 %v1465_v29, %v1466_v19  ;;  %v18230_v56 = vld [vmem:[#allocation89_spill] sm:$0xff]  ;;  %v18231_v29 = vld [vmem:[#allocation139_spill] sm:$0xff]  ;;  %v3192_v1 = vpack.c.bf16 %v2778_v2, %v2775_v23  ;;  %v2781_v7 = vsel %vm2295_vm3, 1.0, %v17908_v8 }
 0x2b7   :  { %9980 = vmatmul.mubr.msk.bf16.gmra.mxu0 %vm3508_vm2, %v3189_v55  ;;  %v3980_v40 = vpop.f32.mrf.mxu1  ;;  %v1462_v22 = vrot.slane %v1461_v35, 1  ;;  %v1472_v38 = vrot.slane %v1471_v45, 2  ;;  %vm2450_vm14 = vcmp.eq.s32.totalorder %v11756_v63, %v18230_v56  ;;  %vm2453_vm12 = vcmp.eq.s32.totalorder %v11756_v63, %v18231_v29 }
 0x2b8   :  { %9983 = vmatprep.mubr.msk.bf16.mxu0 %vm10824_vm11, %v17908_v8  ;;  %v5765_v55 = vpack.c.bf16 %v1457_v10, %v1457_v10  ;;  %v1468_v52 = vrot.slane %v1467_v41, 1  ;;  %v5752_v10 = vpack.c.bf16 %v1379_v47, %v1379_v47  ;;  %vm9323_vm4 = vmpackc.low %vm2453_vm12, %vm2450_vm14  ;;  %v2784_v2 = vsel %vm2298_vm8, 1.0, %v17908_v8 }
 0x2b9   :  { %v14524_v34 = vpop.f32.mrf.mxu1  ;;  %v1463_v18 = vmax.f32 %v1461_v35, %v1462_v22  ;;  %v1473_v32 = vmax.f32 %v1471_v45, %v1472_v38  ;;  %vm2449_vm6 = vcmp.eq.s32.totalorder %v11170_v62, %v18230_v56  ;;  %vm2452_vm10 = vcmp.eq.s32.totalorder %v11170_v62, %v18231_v29  ;;  %v10398_v56 = vld [vmem:[%s17433_s10 + $0xac] ss:$16 sps:$4 sm:$0xff]  }
 0x2ba   :  { %18229 = vst [vmem:[#allocation70_spill] sm:$0xff] %v14524_v34  ;;  %v5901_v19 = vunpack.c.l.b16 %v5765_v55  ;;  %v1469_v40 = vmax.f32 %v1467_v41, %v1468_v52  ;;  %v18234_v41 = vld [vmem:[#allocation31_spill] sm:$0xff]  ;;  %vm18235_vm14 = vcmask 1047559   ;;  %vm2459_vm3 = vcmp.eq.s32.totalorder %v11756_v63, %v18237_v31  ;;  %6329 = vmatprep.subr.bf16.mxu0 %v10398_v56 }
 0x2bb   :  { %v3983_v33 = vpop.f32.mrf.mxu1  ;;  %v5766_v34 = vpack.c.bf16 %v1463_v18, %v1463_v18  ;;  %v1474_v14 = vrot.slane %v1473_v32, 1  ;;  %vm2301_vm9 = vcmp.eq.s32.totalorder %v12263_v17, %v18234_v41  ;;  %v18243_v41 = vld [vmem:[#allocation98_spill] sm:$0xff] }
 0x2bc   :  { %v5935_v35 = vsel %vm5919_vm1, %v5901_v19, %v14461_v25  ;;  %v5767_v45 = vpack.c.bf16 %v1469_v40, %v1469_v40  ;;  %v1227_v25 = vpop.f32.mrf.mxu0  ;;  %v18236_v40 = vld [vmem:[#allocation93_spill] sm:$0xff]  ;;  %v2787_v29 = vsel %vm2301_vm9, 1.0, %v17908_v8 }
 0x2bd   :  { %v14539_v22 = vpop.f32.mrf.mxu1  ;;  %9322 = vmatmul.mubr.msk.bf16.gmra.mxu1 %vm9321_vm13, %v17904_v57  ;;  %v5902_v33 = vunpack.c.l.b16 %v5766_v34  ;;  %v1475_v23 = vmax.f32 %v1473_v32, %v1474_v14  ;;  %v1228_v38 = vadd.f32 %v1227_v25, %v13212_v24  ;;  %v5888_v34 = vunpack.c.l.b16 %v5752_v10  ;;  %vm9325_vm13 = vmpackc.low %vm2452_vm10, %vm2449_vm6 }
 0x2be   :  { %9324 = vmatprep.mubr.msk.bf16.mxu1 %vm9323_vm4, %v17904_v57  ;;  %v5903_v47 = vunpack.c.l.b16 %v5767_v45  ;;  %v1229_v52 = vpop.f32.mrf.mxu0  ;;  %vm2456_vm12 = vcmp.eq.s32.totalorder %v11756_v63, %v18236_v40  ;;  %vm18240_vm4 = vmmov %vm18235_vm14  ;;  %vm2455_vm9 = vcmp.eq.s32.totalorder %v11170_v62, %v18236_v40  ;;  %vm2462_vm10 = vcmp.eq.s32.totalorder %v11756_v63, %v18243_v41 }
 0x2bf   :  { %9984 = vmatmul.mubr.msk.bf16.gmra.mxu0 %vm3508_vm2, %v3192_v1  ;;  %v3988_v55 = vpop.f32.mrf.mxu1  ;;  %v5768_v14 = vpack.c.bf16 %v1475_v23, %v1475_v23  ;;  %v5942_v18 = vsel %vm5919_vm1, %v5902_v33, %v14484_v42  ;;  %v1476_v39 = vrot.slane %v1228_v38, 4  ;;  %v1230_v1 = vadd.f32 %v1229_v52, %v13248_v43  ;;  %vm9327_vm6 = vmpackc.low %vm2459_vm3, %vm2456_vm12 }
 0x2c0   :  { %9987 = vmatprep.mubr.msk.bf16.mxu0 %vm10824_vm11, %v17908_v8  ;;  %v5936_v32 = vsel %vm18235_vm14, %v5903_v47, %v5935_v35  ;;  %v1231_v42 = vpop.f32.mrf.mxu0  ;;  %v3195_v33 = vpack.c.bf16 %v2784_v2, %v2781_v7  ;;  %v18239_v55 = vld [vmem:[#allocation69_spill] sm:$0xff]  ;;  %v5929_v7 = vsel %vm18240_vm4, %v5888_v34, %v14098_v13  ;;  %vm18241_vm14 = vmmov %vm18240_vm4  ;;  %vm2458_vm12 = vcmp.eq.s32.totalorder %v11170_v62, %v18237_v31 }
 0x2c1   :  { %v14571_v19 = vpop.f32.mrf.mxu1  ;;  %v14578_v10 = vpack.c.b16 %v5936_v32, %v14107_v60  ;;  %v5904_v45 = vunpack.c.l.b16 %v5768_v14  ;;  %v1477_v23 = vmax.f32 %v1228_v38, %v1476_v39  ;;  %v1281_v35 = vsel %vm13328_vm7, %v1230_v1, -inf  ;;  %v10396_v13 = vld [vmem:[%s17433_s10 + $0xa8] ss:$16 sps:$4 sm:$0xff]  }
 0x2c2   :  { %v1232_v25 = vadd.f32 %v1231_v42, %v13212_v24  ;;  %vm2304_vm8 = vcmp.eq.s32.totalorder %v12263_v17, %v18239_v55  ;;  %v1482_v60 = vrot.slane %v1281_v35, 4  ;;  %v1233_v14 = vpop.f32.mrf.mxu0  ;;  %6330 = vmatpush1.bf16.msra.mxu0 %v10396_v13  ;;  %vm5311_vm3 = vcmask 523264  }
 0x2c3   :  { %18238 = vst [vmem:[#allocation20_spill] sm:$0xff] %v14578_v10  ;;  %v3991_v47 = vpop.f32.mrf.mxu1  ;;  %v5943_v2 = vsel %vm18241_vm14, %v5904_v45, %v5942_v18  ;;  %v1478_v38 = vrot.slane %v1477_v23, 2  ;;  %v1234_v52 = vadd.f32 %v1233_v14, %v13248_v43  ;;  %v2790_v39 = vsel %vm2304_vm8, 1.0, %v17908_v8  ;;  %v18247_v10 = vld [vmem:[#allocation33_spill] sm:$0xff] }
 0x2c4   :  { %v1488_v24 = vrot.slane %v1232_v25, 4  ;;  %v14610_v43 = vpack.c.b16 %v5943_v2, %v5929_v7  ;;  %v1483_v34 = vmax.f32 %v1281_v35, %v1482_v60  ;;  %v4467_v18 = vpop.f32.mrf.mxu0  ;;  %v18245_v7 = vld [vmem:[#allocation147_spill] sm:$0xff]  ;;  %vm2307_vm8 = vcmp.eq.s32.totalorder %v12263_v17, %v18247_v10 }
 0x2c5   :  { %v14595_v32 = vpop.f32.mrf.mxu1  ;;  %9326 = vmatmul.mubr.msk.bf16.gmra.mxu1 %vm9325_vm13, %v17904_v57  ;;  %v1479_v1 = vmax.f32 %v1477_v23, %v1478_v38  ;;  %v1283_v45 = vsel %vm13328_vm7, %v1234_v52, -inf  ;;  %vm2465_vm7 = vcmp.eq.s32.totalorder %v11756_v63, %v18245_v7  ;;  %vm9329_vm13 = vmpackc.low %vm2458_vm12, %vm2455_vm9  ;;  %vm2464_vm9 = vcmp.eq.s32.totalorder %v11170_v62, %v18245_v7  ;;  %v18250_v10 = vld [vmem:[#allocation151_spill] sm:$0xff]  ;;  %v18256_v7 = vld [vmem:[#allocation73_spill] sm:$0xff] }
 0x2c6   :  { %18242 = vst [vmem:[#allocation62_spill] sm:$0xff] %v14610_v43  ;;  %9328 = vmatprep.mubr.msk.bf16.mxu1 %vm9327_vm6, %v17904_v57  ;;  %v1489_v42 = vmax.f32 %v1232_v25, %v1488_v24  ;;  %v1494_v35 = vrot.slane %v1283_v45, 4  ;;  %v9893_v55 = vpop.f32.mrf.mxu0  ;;  %v18244_v25 = vld [vmem:[#allocation137_spill] sm:$0xff]  ;;  %v3198_v43 = vpack.c.bf16 %v2790_v39, %v2787_v29  ;;  %vm9331_vm14 = vmpackc.low %vm2465_vm7, %vm2462_vm10  ;;  %vm2461_vm6 = vcmp.eq.s32.totalorder %v11170_v62, %v18243_v41 }
 0x2c7   :  { %9988 = vmatmul.mubr.msk.bf16.gmra.mxu0 %vm3508_vm2, %v3195_v33  ;;  %v3996_v47 = vpop.f32.mrf.mxu1  ;;  %v1484_v33 = vrot.slane %v1483_v34, 2  ;;  %v1480_v50 = vrot.slane %v1479_v1, 1  ;;  %v4468_v60 = vadd.f32 %v4467_v18, %v18244_v25  ;;  %vm2471_vm10 = vcmp.eq.s32.totalorder %v11756_v63, %v18250_v10  ;;  %vm9333_vm7 = vmpackc.low %vm2464_vm9, %vm2461_vm6 }
 0x2c8   :  { %9991 = vmatprep.mubr.msk.bf16.mxu0 %vm10824_vm11, %v17908_v8  ;;  %v1490_v23 = vrot.slane %v1489_v42, 2  ;;  %v1495_v38 = vmax.f32 %v1283_v45, %v1494_v35  ;;  %v4470_v24 = vpop.f32.mrf.mxu0  ;;  %v18246_v47 = vld [vmem:[#allocation141_spill] sm:$0xff]  ;;  %vm2470_vm9 = vcmp.eq.s32.totalorder %v11170_v62, %v18250_v10 }
 0x2c9   :  { %v14633_v14 = vpop.f32.mrf.mxu1  ;;  %v1485_v2 = vmax.f32 %v1483_v34, %v1484_v33  ;;  %v1481_v52 = vmax.f32 %v1479_v1, %v1480_v50  ;;  %v4471_v13 = vadd.f32 %v4470_v24, %v18246_v47  ;;  %v18248_v33 = vld [vmem:[#allocation71_spill] sm:$0xff] }
 0x2ca   :  { %v1491_v56 = vmax.f32 %v1489_v42, %v1490_v23  ;;  %v1496_v18 = vrot.slane %v1495_v38, 2  ;;  %v9894_v45 = vpop.f32.mrf.mxu0  ;;  %vm2310_vm4 = vcmp.eq.s32.totalorder %v12263_v17, %v18248_v33  ;;  %v5312_v42 = vsel %vm5311_vm3, %v4468_v60, -inf  ;;  %v18249_v60 = vld [vmem:[#allocation145_spill] sm:$0xff] }
 0x2cb   :  { %v3999_v55 = vpop.f32.mrf.mxu1  ;;  %v1486_v34 = vrot.slane %v1485_v2, 1  ;;  %v5313_v35 = vsel %vm5311_vm3, %v4471_v13, -inf  ;;  %v5769_v23 = vpack.c.bf16 %v1481_v52, %v1481_v52 }
 0x2cc   :  { %v1492_v1 = vrot.slane %v1491_v56, 1  ;;  %v1497_v31 = vmax.f32 %v1495_v38, %v1496_v18  ;;  %v5314_v29 = vmax.f32 %v5312_v42, %v5313_v35  ;;  %v4475_v39 = vpop.f32.mrf.mxu0  ;;  %v18251_v35 = vld [vmem:[#allocation150_spill] sm:$0xff] }
 0x2cd   :  { %v14650_v50 = vpop.f32.mrf.mxu1  ;;  %9330 = vmatmul.mubr.msk.bf16.gmra.mxu1 %vm9329_vm13, %v17904_v57  ;;  %v1487_v40 = vmax.f32 %v1485_v2, %v1486_v34  ;;  %v4476_v24 = vadd.f32 %v4475_v39, %v18249_v60  ;;  %v2793_v2 = vsel %vm2307_vm8, 1.0, %v17908_v8 }
 0x2ce   :  { %9332 = vmatprep.mubr.msk.bf16.mxu1 %vm9331_vm14, %v17904_v57  ;;  %v1493_v25 = vmax.f32 %v1491_v56, %v1492_v1  ;;  %v1498_v38 = vrot.slane %v1497_v31, 1  ;;  %v9897_v13 = vpop.f32.mrf.mxu0  ;;  %v5905_v1 = vunpack.c.l.b16 %v5769_v23  ;;  %vm2316_vm14 = vcmp.eq.s32.totalorder %v12263_v17, %v18256_v7  ;;  %v18262_v7 = vld [vmem:[#allocation107_spill] sm:$0xff] }
 0x2cf   :  { %9992 = vmatmul.mubr.msk.bf16.gmra.mxu0 %vm3508_vm2, %v3198_v43  ;;  %v4004_v47 = vpop.f32.mrf.mxu1  ;;  %v2796_v43 = vsel %vm2310_vm4, 1.0, %v17908_v8  ;;  %v5315_v56 = vsel %vm5311_vm3, %v4476_v24, -inf  ;;  %v5770_v34 = vpack.c.bf16 %v1487_v40, %v1487_v40  ;;  %v18252_v13 = vld [vmem:[#allocation103_spill] sm:$0xff]  ;;  %vm18254_vm4 = vcmask 1041409  }
 0x2d0   :  { %9995 = vmatprep.mubr.msk.bf16.mxu0 %vm10824_vm11, %v17908_v8  ;;  %v5771_v52 = vpack.c.bf16 %v1493_v25, %v1493_v25  ;;  %v1499_v18 = vmax.f32 %v1497_v31, %v1498_v38  ;;  %v5316_v45 = vmax.f32 %v5314_v29, %v5315_v56  ;;  %v4478_v33 = vpop.f32.mrf.mxu0  ;;  %v3201_v47 = vpack.c.bf16 %v2796_v43, %v2793_v2  ;;  %v18253_v29 = vld [vmem:[#allocation35_spill] sm:$0xff]  ;;  %vm18258_vm6 = vmmov %vm18254_vm4 }
 0x2d1   :  { %v14677_v55 = vpop.f32.mrf.mxu1  ;;  %v4479_v39 = vadd.f32 %v4478_v33, %v18251_v35  ;;  %vm2468_vm12 = vcmp.eq.s32.totalorder %v11756_v63, %v18252_v13  ;;  %vm2313_vm8 = vcmp.eq.s32.totalorder %v12263_v17, %v18253_v29  ;;  %v5906_v24 = vunpack.c.l.b16 %v5770_v34 }
 0x2d2   :  { %v5907_v42 = vunpack.c.l.b16 %v5771_v52  ;;  %v9898_v40 = vpop.f32.mrf.mxu0  ;;  %v5772_v31 = vpack.c.bf16 %v1499_v18, %v1499_v18  ;;  %vm9335_vm13 = vmpackc.low %vm2471_vm10, %vm2468_vm12  ;;  %v18257_v52 = vld [vmem:[#allocation152_spill] sm:$0xff]  ;;  %v2799_v34 = vsel %vm2313_vm8, 1.0, %v17908_v8  ;;  %vm2467_vm12 = vcmp.eq.s32.totalorder %v11170_v62, %v18252_v13  ;;  %v18264_v13 = vld [vmem:[#allocation74_spill] sm:$0xff] }
 0x2d3   :  { %v4007_v60 = vpop.f32.mrf.mxu1  ;;  %v5317_v23 = vsel %vm5311_vm3, %v4479_v39, -inf  ;;  %v18260_v39 = vld [vmem:[#allocation154_spill] sm:$0xff]  ;;  %v18261_v40 = vld [vmem:[#allocation157_spill] sm:$0xff]  ;;  %vm9337_vm8 = vmpackc.low %vm2470_vm9, %vm2467_vm12 }
 0x2d4   :  { %v14700_v41 = vsel %vm18254_vm4, %v5907_v42, %v5905_v1  ;;  %v5318_v2 = vmax.f32 %v5316_v45, %v5317_v23  ;;  %v5908_v38 = vunpack.c.l.b16 %v5772_v31  ;;  %v2802_v45 = vsel %vm2316_vm14, 1.0, %v17908_v8 }
 0x2d5   :  { %v14693_v25 = vpop.f32.mrf.mxu1  ;;  %9334 = vmatmul.mubr.msk.bf16.gmra.mxu1 %vm9333_vm7, %v17904_v57  ;;  %18255 = vst [vmem:[#allocation72_spill] sm:$0xff] %v14700_v41  ;;  %v4483_v43 = vpop.f32.mrf.mxu0  ;;  %vm2477_vm10 = vcmp.eq.s32.totalorder %v11756_v63, %v18260_v39  ;;  %v3204_v23 = vpack.c.bf16 %v2802_v45, %v2799_v34  ;;  %vm2474_vm7 = vcmp.eq.s32.totalorder %v11756_v63, %v18262_v7  ;;  %v18275_v41 = vld [vmem:[#allocation115_spill] sm:$0xff] }
 0x2d6   :  { %9336 = vmatprep.mubr.msk.bf16.mxu1 %vm9335_vm13, %v17904_v57  ;;  %v4484_v56 = vadd.f32 %v4483_v43, %v18257_v52  ;;  %v14710_v1 = vsel %vm18258_vm6, %v5908_v38, %v5906_v24  ;;  %vm9339_vm13 = vmpackc.low %vm2477_vm10, %vm2474_vm7  ;;  %vm2322_vm14 = vcmp.eq.s32.totalorder %v12263_v17, %v18264_v13  ;;  %vm2476_vm6 = vcmp.eq.s32.totalorder %v11170_v62, %v18260_v39  ;;  %v18269_v39 = vld [vmem:[#allocation111_spill] sm:$0xff] }
 0x2d7   :  { %9996 = vmatmul.mubr.msk.bf16.gmra.mxu0 %vm3508_vm2, %v3201_v47  ;;  %v4012_v18 = vpop.f32.mrf.mxu1  ;;  %v9901_v33 = vpop.f32.mrf.mxu0  ;;  %18259 = vst [vmem:[#allocation121_spill] sm:$0xff] %v14710_v1  ;;  %vm2473_vm10 = vcmp.eq.s32.totalorder %v11170_v62, %v18262_v7  ;;  %vm2480_vm12 = vcmp.eq.s32.totalorder %v11756_v63, %v18269_v39  ;;  %v18271_v7 = vld [vmem:[#allocation76_spill] sm:$0xff]  ;;  %v18276_v1 = vld [vmem:[#allocation41_spill] sm:$0xff] }
 0x2d8   :  { %9999 = vmatprep.mubr.msk.bf16.mxu0 %vm10824_vm11, %v17908_v8  ;;  %v5319_v42 = vsel %vm5311_vm3, %v4484_v56, -inf  ;;  %v18265_v56 = vld [vmem:[#allocation160_spill] sm:$0xff]  ;;  %vm9341_vm7 = vmpackc.low %vm2476_vm6, %vm2473_vm10  ;;  %vm2479_vm10 = vcmp.eq.s32.totalorder %v11170_v62, %v18269_v39 }
 0x2d9   :  { %v14720_v35 = vpop.f32.mrf.mxu1  ;;  %v5320_v60 = vmax.f32 %v5318_v2, %v5319_v42  ;;  %v4486_v47 = vpop.f32.mrf.mxu0  ;;  %v18263_v2 = vld [vmem:[#allocation37_spill] sm:$0xff]  ;;  %v2808_v42 = vsel %vm2322_vm14, 1.0, %v17908_v8 }
 0x2da   :  { %v4487_v31 = vadd.f32 %v4486_v47, %v18261_v40  ;;  %vm2319_vm4 = vcmp.eq.s32.totalorder %v12263_v17, %v18263_v2  ;;  %v18266_v40 = vld [vmem:[#allocation158_spill] sm:$0xff] }
 0x2db   :  { %v4015_v29 = vpop.f32.mrf.mxu1  ;;  %v9902_v10 = vpop.f32.mrf.mxu0  ;;  %v2805_v45 = vsel %vm2319_vm4, 1.0, %v17908_v8  ;;  %vm2483_vm9 = vcmp.eq.s32.totalorder %v11756_v63, %v18266_v40  ;;  %vm2328_vm4 = vcmp.eq.s32.totalorder %v12263_v17, %v18271_v7  ;;  %vm2482_vm6 = vcmp.eq.s32.totalorder %v11170_v62, %v18266_v40 }
 0x2dc   :  { %v5321_v24 = vsel %vm5311_vm3, %v4487_v31, -inf }
 0x2dd   :  { %v14730_v43 = vpop.f32.mrf.mxu1  ;;  %9338 = vmatmul.mubr.msk.bf16.gmra.mxu1 %vm9337_vm8, %v17904_v57  ;;  %v5322_v38 = vmax.f32 %v5320_v60, %v5321_v24  ;;  %v4491_v52 = vpop.f32.mrf.mxu0  ;;  %v18268_v24 = vld [vmem:[#allocation164_spill] sm:$0xff] }
 0x2de   :  { %9340 = vmatprep.mubr.msk.bf16.mxu1 %vm9339_vm13, %v17904_v57  ;;  %v4492_v18 = vadd.f32 %v4491_v52, %v18265_v56  ;;  %v3207_v52 = vpack.c.bf16 %v2808_v42, %v2805_v45  ;;  %vm9343_vm13 = vmpackc.low %vm2483_vm9, %vm2480_vm12  ;;  %v18272_v42 = vld [vmem:[#allocation32_spill] sm:$0xff]  ;;  %vm2486_vm12 = vcmp.eq.s32.totalorder %v11756_v63, %v18275_v41 }
 0x2df   :  { %10000 = vmatmul.mubr.msk.bf16.gmra.mxu0 %vm3508_vm2, %v3204_v23  ;;  %v4020_v33 = vpop.f32.mrf.mxu1  ;;  %v9905_v34 = vpop.f32.mrf.mxu0  ;;  %v18267_v23 = vld [vmem:[#allocation44_spill] sm:$0xff] }
 0x2e0   :  { %10003 = vmatprep.mubr.msk.bf16.mxu0 %vm10824_vm11, %v17908_v8  ;;  %v5323_v60 = vsel %vm5311_vm3, %v4492_v18, -inf  ;;  %v14752_v10 = vadd.s32 64, %v18267_v23  ;;  %v18270_v18 = vld [vmem:[#allocation39_spill] sm:$0xff] }
 0x2e1   :  { %v14747_v47 = vpop.f32.mrf.mxu1  ;;  %v5324_v31 = vmax.f32 %v5322_v38, %v5323_v60  ;;  %v4494_v29 = vpop.f32.mrf.mxu0  ;;  %vm2325_vm8 = vcmp.eq.s32.totalorder %v12263_v17, %v18270_v18  ;;  %v10401_v18 = vld [vmem:[%s17433_s10 + $0x64] ss:$16 sps:$4 sm:$0xff]  }
 0x2e2   :  { %v4495_v2 = vadd.f32 %v4494_v29, %v18268_v24  ;;  %vm5130_vm14 = vcmp.lt.s32.totalorder %v14752_v10, 70  ;;  %v2811_v24 = vsel %vm2325_vm8, 1.0, %v17908_v8  ;;  %6282 = vmatprep.subr.bf16.mxu1 %v10401_v18  ;;  %vm2331_vm8 = vcmp.eq.s32.totalorder %v12263_v17, %v18276_v1  ;;  %v18279_v1 = vld [vmem:[#allocation14_spill] sm:$0xff] }
 0x2e3   :  { %v4023_v13 = vpop.f32.mrf.mxu1  ;;  %v9906_v56 = vpop.f32.mrf.mxu0 }
 0x2e4   :  { %v5325_v38 = vsel %vm5311_vm3, %v4495_v2, -inf  ;;  %v2814_v13 = vsel %vm2328_vm4, 1.0, %v17908_v8  ;;  %v10399_v56 = vld [vmem:[%s17433_s10 + $0x60] ss:$16 sps:$4 sm:$0xff]  }
 0x2e5   :  { %v14762_v33 = vpop.f32.mrf.mxu1  ;;  %9342 = vmatmul.mubr.msk.bf16.gmra.mxu1 %vm9341_vm7, %v17904_v57  ;;  %v5326_v34 = vmax.f32 %v5324_v31, %v5325_v38  ;;  %v4499_v45 = vpop.f32.mrf.mxu0  ;;  %v18274_v38 = vld [vmem:[#allocation161_spill] sm:$0xff]  ;;  %v3210_v23 = vpack.c.bf16 %v2814_v13, %v2811_v24  ;;  %vm9345_vm7 = vmpackc.low %vm2482_vm6, %vm2479_vm10  ;;  %v18278_v24 = vld [vmem:[#allocation78_spill] sm:$0xff]  ;;  %vm2485_vm10 = vcmp.eq.s32.totalorder %v11170_v62, %v18275_v41 }
 0x2e6   :  { %9344 = vmatprep.mubr.msk.bf16.mxu1 %vm9343_vm13, %v17904_v57  ;;  %v4500_v60 = vadd.f32 %v4499_v45, %v18272_v42  ;;  %vm2489_vm9 = vcmp.eq.s32.totalorder %v11756_v63, %v18274_v38  ;;  %v10402_v42 = vld [vmem:[%s17433_s10 + $0x88] ss:$16 sps:$4 sm:$0xff]   ;;  %6283 = vmatpush1.bf16.msra.mxu1 %v10399_v56  ;;  %vm2334_vm4 = vcmp.eq.s32.totalorder %v12263_v17, %v18278_v24  ;;  %v2817_v56 = vsel %vm2331_vm8, 1.0, %v17908_v8  ;;  %v18281_v24 = vld [vmem:[#allocation168_spill] sm:$0xff] }
 0x2e7   :  { %10004 = vmatmul.mubr.msk.bf16.gmra.mxu0 %vm3508_vm2, %v3207_v52  ;;  %v4028_v29 = vpop.f32.mrf.mxu1  ;;  %v9909_v2 = vpop.f32.mrf.mxu0  ;;  %vm9347_vm13 = vmpackc.low %vm2489_vm9, %vm2486_vm12  ;;  %vm2488_vm6 = vcmp.eq.s32.totalorder %v11170_v62, %v18274_v38  ;;  %v18285_v41 = vld [vmem:[#allocation79_spill] sm:$0xff] }
 0x2e8   :  { %10007 = vmatprep.mubr.msk.bf16.mxu0 %vm10824_vm11, %v17908_v8  ;;  %v5157_v31 = vsel %vm5130_vm14, %v4500_v60, -inf  ;;  %v10404_v60 = vld [vmem:[%s17433_s10 + $0x8c] ss:$16 sps:$4 sm:$0xff]  }
 0x2e9   :  { %v14782_v52 = vpop.f32.mrf.mxu1  ;;  %v5327_v7 = vsel %vm5311_vm3, %v5157_v31, -inf  ;;  %v4502_v45 = vpop.f32.mrf.mxu0  ;;  %6331 = vmatprep.subr.bf16.mxu0 %v10404_v60  ;;  %v18280_v60 = vld [vmem:[#allocation5_spill] sm:$0xff] }
 0x2ea   :  { %18273 = vst [vmem:[#allocation21_spill] sm:$0xff] %v14782_v52  ;;  %v14801_v29 = vmax.f32 %v5326_v34, %v5327_v7  ;;  %v18277_v52 = vld [vmem:[#allocation167_spill] sm:$0xff]  ;;  %6332 = vmatpush1.bf16.msra.mxu0 %v10402_v42  ;;  %v2820_v7 = vsel %vm2334_vm4, 1.0, %v17908_v8  ;;  %vm2495_vm9 = vcmp.eq.s32.totalorder %v11756_v63, %v18280_v60  ;;  %vm2340_vm4 = vcmp.eq.s32.totalorder %v12263_v17, %v18285_v41 }
 0x2eb   :  { %v4031_v2 = vpop.f32.mrf.mxu1  ;;  %v9910_v31 = vpop.f32.mrf.mxu0  ;;  %v4503_v39 = vadd.f32 %v4502_v45, %v18277_v52  ;;  %v18289_v41 = vld [vmem:[#allocation171_spill] sm:$0xff] }
 0x2ed   :  { %v14811_v34 = vpop.f32.mrf.mxu1  ;;  %9346 = vmatmul.mubr.msk.bf16.gmra.mxu1 %vm9345_vm7, %v17904_v57  ;;  %v4507_v40 = vpop.f32.mrf.mxu0  ;;  %v5335_v45 = vsel %vm5311_vm3, %v4503_v39, -inf  ;;  %vm9349_vm7 = vmpackc.low %vm2488_vm6, %vm2485_vm10  ;;  %vm2494_vm6 = vcmp.eq.s32.totalorder %v11170_v62, %v18280_v60 }
 0x2ee   :  { %9348 = vmatprep.mubr.msk.bf16.mxu1 %vm9347_vm13, %v17904_v57  ;;  %v4508_v13 = vadd.f32 %v4507_v40, %v18279_v1 }
 0x2ef   :  { %10008 = vmatmul.mubr.msk.bf16.gmra.mxu0 %vm3508_vm2, %v3210_v23  ;;  %v4036_v52 = vpop.f32.mrf.mxu1  ;;  %v9913_v18 = vpop.f32.mrf.mxu0 }
 0x2f0   :  { %10011 = vmatprep.mubr.msk.bf16.mxu0 %vm10824_vm11, %v17908_v8  ;;  %v5336_v23 = vsel %vm5311_vm3, %v4508_v13, -inf  ;;  %v3213_v52 = vpack.c.bf16 %v2820_v7, %v2817_v56  ;;  %v18282_v18 = vld [vmem:[#allocation119_spill] sm:$0xff]  ;;  %v18286_v7 = vld [vmem:[#allocation170_spill] sm:$0xff] }
 0x2f1   :  { %v14830_v42 = vpop.f32.mrf.mxu1  ;;  %v5337_v2 = vmax.f32 %v5335_v45, %v5336_v23  ;;  %v4510_v31 = vpop.f32.mrf.mxu0  ;;  %vm2492_vm12 = vcmp.eq.s32.totalorder %v11756_v63, %v18282_v18  ;;  %v18284_v45 = vld [vmem:[#allocation43_spill] sm:$0xff]  ;;  %vm2491_vm10 = vcmp.eq.s32.totalorder %v11170_v62, %v18282_v18  ;;  %v18292_v18 = vld [vmem:[#allocation53_spill] sm:$0xff] }
 0x2f2   :  { %v4511_v40 = vadd.f32 %v4510_v31, %v18281_v24  ;;  %vm9351_vm8 = vmpackc.low %vm2495_vm9, %vm2492_vm12  ;;  %vm2337_vm13 = vcmp.eq.s32.totalorder %v12263_v17, %v18284_v45 }
 0x2f3   :  { %v4039_v1 = vpop.f32.mrf.mxu1  ;;  %v9914_v38 = vpop.f32.mrf.mxu0 }
 0x2f4   :  { %v5338_v39 = vsel %vm5311_vm3, %v4511_v40, -inf  ;;  %v2823_v1 = vsel %vm2337_vm13, 1.0, %v17908_v8  ;;  %v2826_v38 = vsel %vm2340_vm4, 1.0, %v17908_v8 }
 0x2f5   :  { %v14840_v13 = vpop.f32.mrf.mxu1  ;;  %9350 = vmatmul.mubr.msk.bf16.gmra.mxu1 %vm9349_vm7, %v17904_v57  ;;  %v5339_v23 = vmax.f32 %v5337_v2, %v5338_v39  ;;  %v4515_v56 = vpop.f32.mrf.mxu0  ;;  %vm9353_vm7 = vmpackc.low %vm2494_vm6, %vm2491_vm10 }
 0x2f6   :  { %18283 = vst [vmem:[#allocation63_spill] sm:$0xff] %v14840_v13  ;;  %9352 = vmatprep.mubr.msk.bf16.mxu1 %vm9351_vm8, %v17904_v57  ;;  %v4516_v31 = vadd.f32 %v4515_v56, %v18286_v7  ;;  %v18309_v13 = vld [vmem:[#allocation38_spill] sm:$0xff] }
 0x2f7   :  { %10012 = vmatmul.mubr.msk.bf16.gmra.mxu0 %vm3508_vm2, %v3213_v52  ;;  %v4044_v24 = vpop.f32.mrf.mxu1  ;;  %v9917_v40 = vpop.f32.mrf.mxu0  ;;  %v18288_v52 = vld [vmem:[#allocation8_spill] sm:$0xff] }
 0x2f8   :  { %10015 = vmatprep.mubr.msk.bf16.mxu0 %vm10824_vm11, %v17908_v8  ;;  %v5340_v17 = vsel %vm5311_vm3, %v4516_v31, -inf  ;;  %vm2501_vm9 = vcmp.eq.s32.totalorder %v11756_v63, %v18288_v52  ;;  %v3216_v24 = vpack.c.bf16 %v2826_v38, %v2823_v1  ;;  %v18290_v40 = vld [vmem:[#allocation125_spill] sm:$0xff]  ;;  %vm2500_vm13 = vcmp.eq.s32.totalorder %v11170_v62, %v18288_v52 }
 0x2f9   :  { %v14857_v2 = vpop.f32.mrf.mxu1  ;;  %v5341_v39 = vmax.f32 %v5339_v23, %v5340_v17  ;;  %v4518_v45 = vpop.f32.mrf.mxu0  ;;  %vm2498_vm12 = vcmp.eq.s32.totalorder %v11756_v63, %v18290_v40  ;;  %vm2497_vm6 = vcmp.eq.s32.totalorder %v11170_v62, %v18290_v40  ;;  %v18297_v40 = vld [vmem:[#allocation82_spill] sm:$0xff] }
 0x2fa   :  { %18287 = vst [vmem:[#allocation75_spill] sm:$0xff] %v14857_v2  ;;  %v4519_v56 = vadd.f32 %v4518_v45, %v18289_v41  ;;  %vm9355_vm8 = vmpackc.low %vm2501_vm9, %vm2498_vm12 }
 0x2fb   :  { %v4047_v7 = vpop.f32.mrf.mxu1  ;;  %v9918_v60 = vpop.f32.mrf.mxu0  ;;  %vm9357_vm10 = vmpackc.low %vm2500_vm13, %vm2497_vm6 }
 0x2fc   :  { %v5342_v31 = vsel %vm5311_vm3, %v4519_v56, -inf  ;;  %v5329_v60 = vrot.slane %v14801_v29, 4 }
 0x2fd   :  { %v14867_v2 = vpop.f32.mrf.mxu1  ;;  %9354 = vmatmul.mubr.msk.bf16.gmra.mxu1 %vm9353_vm7, %v17904_v57  ;;  %v5343_v23 = vmax.f32 %v5341_v39, %v5342_v31  ;;  %v18294_v39 = vld [vmem:[#allocation11_spill] sm:$0xff] }
 0x2fe   :  { %18291 = vst [vmem:[#allocation124_spill] sm:$0xff] %v14867_v2  ;;  %v4523_v17 = vpop.f32.mrf.mxu0  ;;  %9356 = vmatprep.mubr.msk.bf16.mxu1 %vm9355_vm8, %v17904_v57  ;;  %vm2507_vm4 = vcmp.eq.s32.totalorder %v11756_v63, %v18294_v39  ;;  %vm2506_vm7 = vcmp.eq.s32.totalorder %v11170_v62, %v18294_v39 }
 0x2ff   :  { %10016 = vmatmul.mubr.msk.bf16.gmra.mxu0 %vm3508_vm2, %v3216_v24  ;;  %v4524_v1 = vadd.f32 %v4523_v17, %v18292_v18  ;;  %v4052_v38 = vpop.f32.mrf.mxu1  ;;  %v18295_v18 = vld [vmem:[#allocation130_spill] sm:$0xff] }
 0x300   :  { %10019 = vmatprep.mubr.msk.bf16.mxu0 %vm10824_vm11, %v17908_v8  ;;  %v9921_v45 = vpop.f32.mrf.mxu0  ;;  %vm2504_vm9 = vcmp.eq.s32.totalorder %v11756_v63, %v18295_v18  ;;  %vm2503_vm13 = vcmp.eq.s32.totalorder %v11170_v62, %v18295_v18  ;;  %v10405_v18 = vld [vmem:[%s17433_s10 + $0x40] ss:$16 sps:$4 sm:$0xff]  }
 0x301   :  { %v5344_v41 = vsel %vm5311_vm3, %v4524_v1, -inf  ;;  %v14878_v56 = vpop.f32.mrf.mxu1  ;;  %vm9359_vm12 = vmpackc.low %vm2507_vm4, %vm2504_vm9 }
 0x302   :  { %18293 = vst [vmem:[#allocation22_spill] sm:$0xff] %v14878_v56  ;;  %v5345_v7 = vmax.f32 %v5343_v23, %v5344_v41  ;;  %v4526_v24 = vpop.f32.mrf.mxu0  ;;  %v18298_v41 = vld [vmem:[#allocation81_spill] sm:$0xff]  ;;  %vm9361_vm6 = vmpackc.low %vm2506_vm7, %vm2503_vm13 }
 0x303   :  { %v4527_v31 = vadd.f32 %v4526_v24, %v13429_v26  ;;  %v4055_v17 = vpop.f32.mrf.mxu1  ;;  %v18299_v56 = vpack.c.bf16 %v18297_v40, %v18298_v41  ;;  %v5330_v26 = vmax.f32 %v14801_v29, %v5329_v60  ;;  %v18302_v29 = vld [vmem:[#allocation87_spill] sm:$0xff]  ;;  %v18303_v41 = vld [vmem:[#allocation136_spill] sm:$0xff] }
 0x304   :  { %v9922_v52 = vpop.f32.mrf.mxu0  ;;  %vm2510_vm4 = vcmp.eq.s32.totalorder %v11756_v63, %v18303_v41  ;;  %vm2509_vm7 = vcmp.eq.s32.totalorder %v11170_v62, %v18303_v41  ;;  %v18311_v41 = vld [vmem:[#allocation90_spill] sm:$0xff] }
 0x305   :  { %v5346_v1 = vsel %vm5311_vm3, %v4527_v31, -inf  ;;  %v14889_v38 = vpop.f32.mrf.mxu1  ;;  %9358 = vmatmul.mubr.msk.bf16.gmra.mxu1 %vm9357_vm10, %v17904_v57 }
 0x306   :  { %18296 = vst [vmem:[#allocation64_spill] sm:$0xff] %v14889_v38  ;;  %v5347_v23 = vmax.f32 %v5345_v7, %v5346_v1  ;;  %v4531_v45 = vpop.f32.mrf.mxu0  ;;  %9360 = vmatprep.mubr.msk.bf16.mxu1 %vm9359_vm12, %v17904_v57  ;;  %v18301_v1 = vld [vmem:[#allocation15_spill] sm:$0xff]  ;;  %vm2519_vm12 = vcmp.eq.s32.totalorder %v11756_v63, %v18309_v13 }
 0x307   :  { %10020 = vmatmul.mubr.msk.bf16.gmra.mxu0 %vm3508_vm2, %v18299_v56  ;;  %v4532_v24 = vadd.f32 %v4531_v45, %v13463_v15  ;;  %v4060_v17 = vpop.f32.mrf.mxu1  ;;  %vm2513_vm8 = vcmp.eq.s32.totalorder %v11756_v63, %v18301_v1  ;;  %v5331_v15 = vrot.slane %v5330_v26, 2  ;;  %vm2512_vm10 = vcmp.eq.s32.totalorder %v11170_v62, %v18301_v1 }
 0x308   :  { %10023 = vmatprep.mubr.msk.bf16.mxu0 %vm10824_vm11, %v17908_v8  ;;  %v9925_v31 = vpop.f32.mrf.mxu0  ;;  %vm9363_vm9 = vmpackc.low %vm2513_vm8, %vm2510_vm4 }
 0x309   :  { %v5348_v7 = vsel %vm5311_vm3, %v4532_v24, -inf  ;;  %v14904_v52 = vpop.f32.mrf.mxu1  ;;  %vm9365_vm13 = vmpackc.low %vm2512_vm10, %vm2509_vm7 }
 0x30a   :  { %18300 = vst [vmem:[#allocation77_spill] sm:$0xff] %v14904_v52  ;;  %v5349_v56 = vmax.f32 %v5347_v23, %v5348_v7  ;;  %v4534_v40 = vpop.f32.mrf.mxu0  ;;  %v10407_v23 = vld [vmem:[%s17433_s10 + $0x44] ss:$16 sps:$4 sm:$0xff]  }
 0x30b   :  { %v4535_v60 = vadd.f32 %v4534_v40, %v18302_v29  ;;  %v4063_v45 = vpop.f32.mrf.mxu1  ;;  %v18305_v40 = vld [vmem:[#allocation86_spill] sm:$0xff]  ;;  %v18306_v29 = vld [vmem:[#allocation84_spill] sm:$0xff]  ;;  %6284 = vmatprep.subr.bf16.mxu1 %v10407_v23  ;;  %v18310_v23 = vld [vmem:[#allocation3_spill] sm:$0xff] }
 0x30c   :  { %v9926_v39 = vpop.f32.mrf.mxu0  ;;  %v18307_v45 = vpack.c.bf16 %v18305_v40, %v18306_v29  ;;  %6285 = vmatpush1.bf16.msra.mxu1 %v10405_v18  ;;  %v18308_v29 = vld [vmem:[#allocation185_spill] sm:$0xff]  ;;  %vm2516_vm8 = vcmp.eq.s32.totalorder %v11756_v63, %v18310_v23  ;;  %vm2515_vm10 = vcmp.eq.s32.totalorder %v11170_v62, %v18310_v23 }
 0x30d   :  { %v5166_v24 = vsel %vm5130_vm14, %v4535_v60, -inf  ;;  %v14915_v17 = vpop.f32.mrf.mxu1  ;;  %9362 = vmatmul.mubr.msk.bf16.gmra.mxu1 %vm9361_vm6, %v17904_v57  ;;  %v10408_v60 = vld [vmem:[%s17433_s10 + $0x68] ss:$16 sps:$4 sm:$0xff]   ;;  %v10410_v39 = vld [vmem:[%s17433_s10 + $0x6c] ss:$16 sps:$4 sm:$0xff]   ;;  %vm9367_vm4 = vmpackc.low %vm2519_vm12, %vm2516_vm8  ;;  %vm2518_vm6 = vcmp.eq.s32.totalorder %v11170_v62, %v18309_v13 }
 0x30e   :  { %18304 = vst [vmem:[#allocation128_spill] sm:$0xff] %v14915_v17  ;;  %v5350_v31 = vsel %vm5311_vm3, %v5166_v24, -inf  ;;  %v4539_v7 = vpop.f32.mrf.mxu0  ;;  %9364 = vmatprep.mubr.msk.bf16.mxu1 %vm9363_vm9, %v17904_v57  ;;  %v5332_v17 = vmax.f32 %v5330_v26, %v5331_v15  ;;  %6333 = vmatprep.subr.bf16.mxu0 %v10410_v39  ;;  %vm9369_vm7 = vmpackc.low %vm2518_vm6, %vm2515_vm10 }
 0x30f   :  { %10024 = vmatmul.mubr.msk.bf16.gmra.mxu0 %vm3508_vm2, %v18307_v45  ;;  %v5351_v52 = vmax.f32 %v5349_v56, %v5350_v31  ;;  %v4068_v38 = vpop.f32.mrf.mxu1  ;;  %v4540_v45 = vadd.f32 %v4539_v7, %v18308_v29 }
 0x310   :  { %10027 = vmatprep.mubr.msk.bf16.mxu0 %vm10824_vm11, %v17908_v8  ;;  %v9929_v24 = vpop.f32.mrf.mxu0  ;;  %6334 = vmatpush1.bf16.msra.mxu0 %v10408_v60  ;;  %v5333_v26 = vrot.slane %v5332_v17, 1 }
 0x311   :  { %v5352_v40 = vrot.slane %v5351_v52, 4  ;;  %v14941_v2 = vpop.f32.mrf.mxu1  ;;  %v5358_v7 = vsel %vm5311_vm3, %v4540_v45, -inf  ;;  %v18312_v24 = vld [vmem:[#allocation88_spill] sm:$0xff] }
 0x312   :  { %v4542_v38 = vpop.f32.mrf.mxu0  ;;  %v5334_v29 = vmax.f32 %v5332_v17, %v5333_v26  ;;  %v10413_v17 = vld [vmem:[%s17433_s10 + $0x24] ss:$16 sps:$4 sm:$0xff]   ;;  %v18314_v26 = vld [vmem:[#allocation45_spill] sm:$0xff] }
 0x313   :  { %v5353_v56 = vmax.f32 %v5351_v52, %v5352_v40  ;;  %v4543_v15 = vadd.f32 %v4542_v38, %v13602_v5  ;;  %v4071_v18 = vpop.f32.mrf.mxu1  ;;  %v18313_v40 = vpack.c.bf16 %v18311_v41, %v18312_v24  ;;  %vm2525_vm9 = vcmp.eq.s32.totalorder %v11756_v63, %v18314_v26  ;;  %6286 = vmatprep.subr.bf16.mxu1 %v10413_v17  ;;  %v10414_v17 = vld [vmem:[%s17433_s10] ss:$16 sps:$4 sm:$0xff]  }
 0x314   :  { %v9930_v1 = vpop.f32.mrf.mxu0 }
 0x315   :  { %v5354_v31 = vrot.slane %v5353_v56, 2  ;;  %v5359_v60 = vsel %vm5311_vm3, %v4543_v15, -inf  ;;  %v14952_v39 = vpop.f32.mrf.mxu1  ;;  %9366 = vmatmul.mubr.msk.bf16.gmra.mxu1 %vm9365_vm13, %v17904_v57  ;;  %vm2524_vm13 = vcmp.eq.s32.totalorder %v11170_v62, %v18314_v26  ;;  %v10417_v26 = vld [vmem:[%s17433_s10 + $0x1e0] ss:$16 sps:$4 sm:$0xff]  }
 0x316   :  { %v5360_v5 = vmax.f32 %v5358_v7, %v5359_v60  ;;  %v4547_v52 = vpop.f32.mrf.mxu0  ;;  %9368 = vmatprep.mubr.msk.bf16.mxu1 %vm9367_vm4, %v17904_v57  ;;  %vm18319_vm4 = vcmask 1041409  }
 0x317   :  { %10028 = vmatmul.mubr.msk.bf16.gmra.mxu0 %vm3508_vm2, %v18313_v40  ;;  %v5355_v45 = vmax.f32 %v5353_v56, %v5354_v31  ;;  %v4548_v38 = vadd.f32 %v4547_v52, %v13639_v12  ;;  %v4076_v15 = vpop.f32.mrf.mxu1  ;;  %v10411_v31 = vld [vmem:[%s17433_s10 + $0x20] ss:$16 sps:$4 sm:$0xff]   ;;  %v6552_v52 = vpack.c.bf16 %v5334_v29, %v5334_v29 }
 0x318   :  { %10031 = vmatprep.mubr.msk.bf16.mxu0 %vm10824_vm11, %v17908_v8  ;;  %v9933_v18 = vpop.f32.mrf.mxu0  ;;  %6287 = vmatpush1.bf16.msra.mxu1 %v10411_v31  ;;  %v18316_v29 = vld [vmem:[#allocation92_spill] sm:$0xff] }
 0x319   :  { %v5356_v1 = vrot.slane %v5355_v45, 1  ;;  %v5361_v7 = vsel %vm5311_vm3, %v4548_v38, -inf  ;;  %v14969_v60 = vpop.f32.mrf.mxu1  ;;  %v18315_v38 = vld [vmem:[#allocation148_spill] sm:$0xff] }
 0x31a   :  { %v5362_v12 = vmax.f32 %v5360_v5, %v5361_v7  ;;  %v4550_v56 = vpop.f32.mrf.mxu0  ;;  %vm2522_vm12 = vcmp.eq.s32.totalorder %v11756_v63, %v18315_v38 }
 0x31b   :  { %v5357_v41 = vmax.f32 %v5355_v45, %v5356_v1  ;;  %v4551_v24 = vadd.f32 %v4550_v56, %v13675_v3  ;;  %v4079_v40 = vpop.f32.mrf.mxu1  ;;  %vm9371_vm8 = vmpackc.low %vm2525_vm9, %vm2522_vm12  ;;  %v10416_v3 = vld [vmem:[%s17433_s10 + $0x4] ss:$16 sps:$4 sm:$0xff]   ;;  %v18317_v45 = vld [vmem:[#allocation91_spill] sm:$0xff]  ;;  %v6604_v56 = vunpack.c.l.b16 %v6552_v52  ;;  %vm2521_vm9 = vcmp.eq.s32.totalorder %v11170_v62, %v18315_v38 }
 0x31c   :  { %v9934_v5 = vpop.f32.mrf.mxu0  ;;  %v18318_v1 = vpack.c.bf16 %v18316_v29, %v18317_v45  ;;  %6288 = vmatprep.subr.bf16.mxu1 %v10416_v3  ;;  %v18320_v52 = vld [vmem:[#allocation49_spill] sm:$0xff]  ;;  %vm9373_vm12 = vmpackc.low %vm2524_vm13, %vm2521_vm9 }
 0x31d   :  { %v6553_v15 = vpack.c.bf16 %v5357_v41, %v5357_v41  ;;  %v5363_v18 = vsel %vm5311_vm3, %v4551_v24, -inf  ;;  %v14988_v7 = vpop.f32.mrf.mxu1  ;;  %9370 = vmatmul.mubr.msk.bf16.gmra.mxu1 %vm9369_vm7, %v17904_v57  ;;  %vm2531_vm6 = vcmp.eq.s32.totalorder %v11756_v63, %v18320_v52  ;;  %v18321_v45 = vld [vmem:[#allocation153_spill] sm:$0xff] }
 0x31e   :  { %v5364_v23 = vmax.f32 %v5362_v12, %v5363_v18  ;;  %v4555_v13 = vpop.f32.mrf.mxu0  ;;  %9372 = vmatprep.mubr.msk.bf16.mxu1 %vm9371_vm8, %v17904_v57  ;;  %6289 = vmatpush1.bf16.msra.mxu1 %v10414_v17  ;;  %vm2528_vm10 = vcmp.eq.s32.totalorder %v11756_v63, %v18321_v45  ;;  %vm2530_vm8 = vcmp.eq.s32.totalorder %v11170_v62, %v18320_v52 }
 0x31f   :  { %10032 = vmatmul.mubr.msk.bf16.gmra.mxu0 %vm3508_vm2, %v18318_v1  ;;  %v6605_v31 = vunpack.c.l.b16 %v6553_v15  ;;  %v4556_v41 = vadd.f32 %v4555_v13, %v13720_v0  ;;  %v4084_v24 = vpop.f32.mrf.mxu1  ;;  %v10419_v0 = vld [vmem:[%s17433_s10 + $0x1e4] ss:$16 sps:$4 sm:$0xff]   ;;  %vm9375_vm7 = vmpackc.low %vm2531_vm6, %vm2528_vm10 }
 0x320   :  { %10035 = vmatprep.mubr.msk.bf16.mxu0 %vm10824_vm11, %v17908_v8  ;;  %v9937_v12 = vpop.f32.mrf.mxu0  ;;  %6290 = vmatprep.subr.bf16.mxu1 %v10419_v0 }
 0x321   :  { %v15011_v40 = vsel %vm18319_vm4, %v6605_v31, %v6604_v56  ;;  %v5365_v5 = vsel %vm5311_vm3, %v4556_v41, -inf  ;;  %v15014_v18 = vpop.f32.mrf.mxu1  ;;  %v18322_v31 = vld [vmem:[#allocation95_spill] sm:$0xff]  ;;  %v18323_v41 = vld [vmem:[#allocation94_spill] sm:$0xff]  ;;  %vm2527_vm4 = vcmp.eq.s32.totalorder %v11170_v62, %v18321_v45 }
 0x322   :  { %v5366_v15 = vmax.f32 %v5364_v23, %v5365_v5  ;;  %v4558_v3 = vpop.f32.mrf.mxu0  ;;  %6291 = vmatpush2.bf16.msra.mxu1 %v10417_v26  ;;  %v18324_v24 = vpack.c.bf16 %v18322_v31, %v18323_v41  ;;  %v10420_v12 = vld [vmem:[%s17433_s10 + $0x1c0] ss:$16 sps:$4 sm:$0xff]   ;;  %vm9377_vm9 = vmpackc.low %vm2530_vm8, %vm2527_vm4 }
 0x323   :  { %v4559_v13 = vadd.f32 %v4558_v3, %v13771_v21  ;;  %v4087_v29 = vpop.f32.mrf.mxu1  ;;  %v10422_v21 = vld [vmem:[%s17433_s10 + $0x1c4] ss:$16 sps:$4 sm:$0xff]  }
 0x324   :  { %v9938_v1 = vpop.f32.mrf.mxu0  ;;  %6292 = vmatprep.subr.bf16.mxu1 %v10422_v21  ;;  %v18325_v29 = vld [vmem:[#allocation175_spill] sm:$0xff] }
 0x325   :  { %v5367_v23 = vsel %vm5311_vm3, %v4559_v13, -inf  ;;  %v15030_v17 = vpop.f32.mrf.mxu1  ;;  %9374 = vmatmul.mubr.msk.bf16.gmra.mxu1 %vm9373_vm12, %v17904_v57  ;;  %v10425_v13 = vld [vmem:[%s17433_s10 + $0x1a4] ss:$16 sps:$4 sm:$0xff]   ;;  %vm2537_vm13 = vcmp.eq.s32.totalorder %v11756_v63, %v18325_v29  ;;  %vm2536_vm12 = vcmp.eq.s32.totalorder %v11170_v62, %v18325_v29 }
 0x326   :  { %v5368_v38 = vmax.f32 %v5366_v15, %v5367_v23  ;;  %9376 = vmatprep.mubr.msk.bf16.mxu1 %vm9375_vm7, %v17904_v57  ;;  %6293 = vmatpush2.bf16.msra.mxu1 %v10420_v12  ;;  %v10423_v23 = vld [vmem:[%s17433_s10 + $0x1a0] ss:$16 sps:$4 sm:$0xff]   ;;  %v18327_v12 = vld [vmem:[#allocation99_spill] sm:$0xff] }
 0x327   :  { %v4563_v56 = vpop.f32.mrf.mxu0  ;;  %10036 = vmatmul.mubr.msk.bf16.gmra.mxu0 %vm3508_vm2, %v18324_v24  ;;  %v4092_v0 = vpop.f32.mrf.mxu1  ;;  %6294 = vmatprep.subr.bf16.mxu1 %v10425_v13 }
 0x328   :  { %v4564_v5 = vadd.f32 %v4563_v56, %v13813_v46  ;;  %10039 = vmatprep.mubr.msk.bf16.mxu0 %vm10824_vm11, %v17908_v8  ;;  %v18326_v56 = vld [vmem:[#allocation159_spill] sm:$0xff] }
 0x329   :  { %v9941_v15 = vpop.f32.mrf.mxu0  ;;  %v15053_v26 = vpop.f32.mrf.mxu1  ;;  %vm2534_vm6 = vcmp.eq.s32.totalorder %v11756_v63, %v18326_v56  ;;  %vm2533_vm8 = vcmp.eq.s32.totalorder %v11170_v62, %v18326_v56  ;;  %v10434_v56 = vld [vmem:[%s17433_s10 + $0x144] ss:$16 sps:$4 sm:$0xff]  }
 0x32a   :  { %v5369_v3 = vsel %vm5311_vm3, %v4564_v5, -inf  ;;  %6295 = vmatpush2.bf16.msra.mxu1 %v10423_v23  ;;  %vm9379_vm10 = vmpackc.low %vm2537_vm13, %vm2534_vm6  ;;  %v18328_v5 = vld [vmem:[#allocation96_spill] sm:$0xff] }
 0x32b   :  { %v5370_v46 = vmax.f32 %v5368_v38, %v5369_v3  ;;  %v4566_v1 = vpop.f32.mrf.mxu0  ;;  %v4095_v21 = vpop.f32.mrf.mxu1  ;;  %v18329_v0 = vpack.c.bf16 %v18327_v12, %v18328_v5  ;;  %v10426_v15 = vld [vmem:[%s17433_s10 + $0x180] ss:$16 sps:$4 sm:$0xff]   ;;  %vm9381_vm4 = vmpackc.low %vm2536_vm12, %vm2533_vm8 }
 0x32c   :  { %v4567_v52 = vadd.f32 %v4566_v1, %v13847_v44  ;;  %v10428_v44 = vld [vmem:[%s17433_s10 + $0x184] ss:$16 sps:$4 sm:$0xff]  }
 0x32d   :  { %v9942_v31 = vpop.f32.mrf.mxu0  ;;  %v15069_v41 = vpop.f32.mrf.mxu1  ;;  %9378 = vmatmul.mubr.msk.bf16.gmra.mxu1 %vm9377_vm9, %v17904_v57  ;;  %6296 = vmatprep.subr.bf16.mxu1 %v10428_v44 }
 0x32e   :  { %v5371_v38 = vsel %vm5311_vm3, %v4567_v52, -inf  ;;  %9380 = vmatprep.mubr.msk.bf16.mxu1 %vm9379_vm10, %v17904_v57  ;;  %6297 = vmatpush2.bf16.msra.mxu1 %v10426_v15  ;;  %v10431_v52 = vld [vmem:[%s17433_s10 + $0x164] ss:$16 sps:$4 sm:$0xff]  }
 0x32f   :  { %v5372_v45 = vmax.f32 %v5370_v46, %v5371_v38  ;;  %v4571_v24 = vpop.f32.mrf.mxu0  ;;  %10040 = vmatmul.mubr.msk.bf16.gmra.mxu0 %vm3508_vm2, %v18329_v0  ;;  %v4100_v13 = vpop.f32.mrf.mxu1  ;;  %v10429_v38 = vld [vmem:[%s17433_s10 + $0x160] ss:$16 sps:$4 sm:$0xff]   ;;  %6298 = vmatprep.subr.bf16.mxu1 %v10431_v52  ;;  %v10437_v52 = vld [vmem:[%s17433_s10 + $0x4c] ss:$16 sps:$4 sm:$0xff]  }
 0x330   :  { %v4572_v3 = vadd.f32 %v4571_v24, %v13884_v30  ;;  %10043 = vmatprep.mubr.msk.bf16.mxu0 %vm10824_vm11, %v17908_v8  ;;  %v18330_v30 = vld [vmem:[#allocation176_spill] sm:$0xff]  ;;  %v18331_v24 = vld [vmem:[#allocation165_spill] sm:$0xff]  ;;  %6335 = vmatprep.subr.bf16.mxu0 %v10437_v52 }
 0x331   :  { %v9945_v46 = vpop.f32.mrf.mxu0  ;;  %v15093_v23 = vpop.f32.mrf.mxu1  ;;  %vm2543_vm7 = vcmp.eq.s32.totalorder %v11756_v63, %v18330_v30  ;;  %vm2540_vm13 = vcmp.eq.s32.totalorder %v11756_v63, %v18331_v24  ;;  %v18333_v13 = vld [vmem:[#allocation100_spill] sm:$0xff]  ;;  %vm2542_vm9 = vcmp.eq.s32.totalorder %v11170_v62, %v18330_v30  ;;  %vm2539_vm12 = vcmp.eq.s32.totalorder %v11170_v62, %v18331_v24 }
 0x332   :  { %v5175_v1 = vsel %vm5130_vm14, %v4572_v3, -inf  ;;  %6299 = vmatpush2.bf16.msra.mxu1 %v10429_v38  ;;  %vm9383_vm6 = vmpackc.low %vm2543_vm7, %vm2540_vm13  ;;  %v18332_v3 = vld [vmem:[#allocation102_spill] sm:$0xff] }
 0x333   :  { %v5373_v21 = vsel %vm5311_vm3, %v5175_v1, -inf  ;;  %v4574_v31 = vpop.f32.mrf.mxu0  ;;  %v4103_v44 = vpop.f32.mrf.mxu1  ;;  %v18334_v46 = vpack.c.bf16 %v18332_v3, %v18333_v13  ;;  %v10435_v1 = vld [vmem:[%s17433_s10 + $0x48] ss:$16 sps:$4 sm:$0xff]   ;;  %6300 = vmatprep.subr.bf16.mxu1 %v10434_v56  ;;  %vm9385_vm8 = vmpackc.low %vm2542_vm9, %vm2539_vm12  ;;  %v10441_v30 = vld [vmem:[%s17433_s10 + $0x100] ss:$16 sps:$4 sm:$0xff]  }
 0x334   :  { %v5374_v29 = vmax.f32 %v5372_v45, %v5373_v21  ;;  %v4575_v0 = vadd.f32 %v4574_v31, %v13939_v36  ;;  %v10432_v36 = vld [vmem:[%s17433_s10 + $0x140] ss:$16 sps:$4 sm:$0xff]   ;;  %6336 = vmatpush1.bf16.msra.mxu0 %v10435_v1 }
 0x335   :  { %v9946_v12 = vpop.f32.mrf.mxu0  ;;  %v15109_v15 = vpop.f32.mrf.mxu1  ;;  %9382 = vmatmul.mubr.msk.bf16.gmra.mxu1 %vm9381_vm4, %v17904_v57 }
 0x336   :  { %v5375_v5 = vrot.slane %v5374_v29, 4  ;;  %9384 = vmatprep.mubr.msk.bf16.mxu1 %vm9383_vm6, %v17904_v57  ;;  %6301 = vmatpush2.bf16.msra.mxu1 %v10432_v36  ;;  %v5381_v3 = vsel %vm5311_vm3, %v4575_v0, -inf }
 0x337   :  { %v4579_v45 = vpop.f32.mrf.mxu0  ;;  %10044 = vmatmul.mubr.msk.bf16.gmra.mxu0 %vm3508_vm2, %v18334_v46  ;;  %v4108_v38 = vpop.f32.mrf.mxu1 }
 0x338   :  { %v5376_v21 = vmax.f32 %v5374_v29, %v5375_v5  ;;  %v4580_v31 = vadd.f32 %v4579_v45, %v13972_v37  ;;  %10047 = vmatprep.mubr.msk.bf16.mxu0 %vm10824_vm11, %v17908_v8  ;;  %v10440_v37 = vld [vmem:[%s17433_s10 + $0x124] ss:$16 sps:$4 sm:$0xff]   ;;  %v18335_v29 = vld [vmem:[#allocation179_spill] sm:$0xff]  ;;  %v10438_v45 = vld [vmem:[%s17433_s10 + $0x120] ss:$16 sps:$4 sm:$0xff]  }
 0x339   :  { %v9949_v44 = vpop.f32.mrf.mxu0  ;;  %v15139_v46 = vpop.f32.mrf.mxu1  ;;  %vm2549_vm10 = vcmp.eq.s32.totalorder %v11756_v63, %v18335_v29  ;;  %6302 = vmatprep.subr.bf16.mxu1 %v10440_v37  ;;  %v10443_v37 = vld [vmem:[%s17433_s10 + $0x104] ss:$16 sps:$4 sm:$0xff]   ;;  %vm2548_vm4 = vcmp.eq.s32.totalorder %v11170_v62, %v18335_v29 }
 0x33a   :  { %v5377_v12 = vrot.slane %v5376_v21, 2  ;;  %v5382_v13 = vsel %vm5311_vm3, %v4580_v31, -inf  ;;  %v18336_v31 = vld [vmem:[#allocation9_spill] sm:$0xff]  ;;  %6303 = vmatpush2.bf16.msra.mxu1 %v10438_v45 }
 0x33b   :  { %v5383_v5 = vmax.f32 %v5381_v3, %v5382_v13  ;;  %v4582_v56 = vpop.f32.mrf.mxu0  ;;  %v4111_v52 = vpop.f32.mrf.mxu1  ;;  %vm2546_vm7 = vcmp.eq.s32.totalorder %v11756_v63, %v18336_v31  ;;  %6304 = vmatprep.subr.bf16.mxu1 %v10443_v37  ;;  %vm2545_vm9 = vcmp.eq.s32.totalorder %v11170_v62, %v18336_v31 }
 0x33c   :  { %v5378_v0 = vmax.f32 %v5376_v21, %v5377_v12  ;;  %v4583_v36 = vadd.f32 %v4582_v56, %v14010_v16  ;;  %vm9387_vm13 = vmpackc.low %vm2549_vm10, %vm2546_vm7  ;;  %v18337_v21 = vld [vmem:[#allocation105_spill] sm:$0xff]  ;;  %v18338_v12 = vld [vmem:[#allocation104_spill] sm:$0xff]  ;;  %vm18342_vm7 = vcmask 1042434  }
 0x33d   :  { %v9950_v1 = vpop.f32.mrf.mxu0  ;;  %v15158_v3 = vpop.f32.mrf.mxu1  ;;  %9386 = vmatmul.mubr.msk.bf16.gmra.mxu1 %vm9385_vm8, %v17904_v57  ;;  %v18339_v13 = vpack.c.bf16 %v18337_v21, %v18338_v12  ;;  %v18340_v21 = vld [vmem:[#allocation183_spill] sm:$0xff]  ;;  %vm9389_vm12 = vmpackc.low %vm2548_vm4, %vm2545_vm9 }
 0x33e   :  { %v5379_v38 = vrot.slane %v5378_v0, 1  ;;  %v5384_v44 = vsel %vm5311_vm3, %v4583_v36, -inf  ;;  %9388 = vmatprep.mubr.msk.bf16.mxu1 %vm9387_vm13, %v17904_v57  ;;  %6305 = vmatpush2.bf16.msra.mxu1 %v10441_v30  ;;  %vm2555_vm6 = vcmp.eq.s32.totalorder %v11756_v63, %v18340_v21  ;;  %vm2554_vm13 = vcmp.eq.s32.totalorder %v11170_v62, %v18340_v21 }
 0x33f   :  { %v5385_v16 = vmax.f32 %v5383_v5, %v5384_v44  ;;  %v4587_v24 = vpop.f32.mrf.mxu0  ;;  %10048 = vmatmul.mubr.msk.bf16.gmra.mxu0 %vm3508_vm2, %v18339_v13  ;;  %v4116_v5 = vpop.f32.mrf.mxu1  ;;  %v18341_v13 = vld [vmem:[#allocation34_spill] sm:$0xff] }
 0x340   :  { %v5380_v56 = vmax.f32 %v5378_v0, %v5379_v38  ;;  %v4588_v45 = vadd.f32 %v4587_v24, %v14041_v54  ;;  %10051 = vmatprep.mubr.msk.bf16.mxu0 %vm10824_vm11, %v17908_v8  ;;  %vm2552_vm10 = vcmp.eq.s32.totalorder %v11756_v63, %v18341_v13 }
 0x341   :  { %v9953_v36 = vpop.f32.mrf.mxu0  ;;  %v15181_v44 = vpop.f32.mrf.mxu1  ;;  %vm9391_vm8 = vmpackc.low %vm2555_vm6, %vm2552_vm10  ;;  %vm2551_vm6 = vcmp.eq.s32.totalorder %v11170_v62, %v18341_v13 }
 0x342   :  { %v6554_v52 = vpack.c.bf16 %v5380_v56, %v5380_v56  ;;  %v5386_v1 = vsel %vm5311_vm3, %v4588_v45, -inf  ;;  %v18344_v45 = vld [vmem:[#allocation106_spill] sm:$0xff]  ;;  %vm9393_vm10 = vmpackc.low %vm2554_vm13, %vm2551_vm6 }
 0x343   :  { %v5387_v0 = vmax.f32 %v5385_v16, %v5386_v1  ;;  %v4590_v54 = vpop.f32.mrf.mxu0  ;;  %v4119_v12 = vpop.f32.mrf.mxu1 }
 0x344   :  { %v6606_v38 = vunpack.c.l.b16 %v6554_v52  ;;  %v4591_v24 = vadd.f32 %v4590_v54, %v14081_v27  ;;  %v18343_v27 = vld [vmem:[#allocation108_spill] sm:$0xff]  ;;  %v18346_v54 = vld [vmem:[#allocation187_spill] sm:$0xff] }
 0x345   :  { %v9954_v29 = vpop.f32.mrf.mxu0  ;;  %v15195_v16 = vpop.f32.mrf.mxu1  ;;  %9390 = vmatmul.mubr.msk.bf16.gmra.mxu1 %vm9389_vm12, %v17904_v57  ;;  %v18345_v5 = vpack.c.bf16 %v18343_v27, %v18344_v45  ;;  %vm2561_vm4 = vcmp.eq.s32.totalorder %v11756_v63, %v18346_v54  ;;  %v18348_v45 = vld [vmem:[#allocation110_spill] sm:$0xff] }
 0x346   :  { %v15192_v30 = vsel %vm18342_vm7, %v6606_v38, %v15011_v40  ;;  %v5388_v37 = vsel %vm5311_vm3, %v4591_v24, -inf  ;;  %9392 = vmatprep.mubr.msk.bf16.mxu1 %vm9391_vm8, %v17904_v57  ;;  %v18347_v29 = vld [vmem:[#allocation40_spill] sm:$0xff]  ;;  %vm2560_vm7 = vcmp.eq.s32.totalorder %v11170_v62, %v18346_v54 }
 0x347   :  { %v5389_v31 = vmax.f32 %v5387_v0, %v5388_v37  ;;  %v4595_v56 = vpop.f32.mrf.mxu0  ;;  %10052 = vmatmul.mubr.msk.bf16.gmra.mxu0 %vm3508_vm2, %v18345_v5  ;;  %v4124_v40 = vpop.f32.mrf.mxu1  ;;  %vm2558_vm9 = vcmp.eq.s32.totalorder %v11756_v63, %v18347_v29  ;;  %v18349_v5 = vld [vmem:[#allocation109_spill] sm:$0xff]  ;;  %vm2557_vm13 = vcmp.eq.s32.totalorder %v11170_v62, %v18347_v29 }
 0x348   :  { %v4596_v36 = vadd.f32 %v4595_v56, %v14114_v11  ;;  %10055 = vmatprep.mubr.msk.bf16.mxu0 %vm10824_vm11, %v17908_v8  ;;  %vm9395_vm12 = vmpackc.low %vm2561_vm4, %vm2558_vm9  ;;  %v18350_v13 = vpack.c.bf16 %v18348_v45, %v18349_v5  ;;  %v5734_v40 = vld [vmem:[%s17434_s9 + $0x28] sm:$0xff]  ;;  %v18353_v29 = vld [vmem:[#allocation113_spill] sm:$0xff] }
 0x349   :  { %v9957_v52 = vpop.f32.mrf.mxu0  ;;  %v15209_v0 = vpop.f32.mrf.mxu1  ;;  %6414 = vmatprep.subr.mxu1 %v5734_v40  ;;  %vm9397_vm6 = vmpackc.low %vm2560_vm7, %vm2557_vm13 }
 0x34a   :  { %v5390_v1 = vsel %vm5311_vm3, %v4596_v36, -inf }
 0x34b   :  { %v5391_v38 = vmax.f32 %v5389_v31, %v5390_v1  ;;  %v4598_v24 = vpop.f32.mrf.mxu0  ;;  %v4127_v12 = vpop.f32.mrf.mxu1 }
 0x34c   :  { %v4599_v11 = vadd.f32 %v4598_v24, %v14142_v58  ;;  %v18351_v24 = vld [vmem:[#allocation191_spill] sm:$0xff] }
 0x34d   :  { %v9958_v21 = vpop.f32.mrf.mxu0  ;;  %v15219_v56 = vpop.f32.mrf.mxu1  ;;  %9394 = vmatmul.mubr.msk.bf16.gmra.mxu1 %vm9393_vm10, %v17904_v57  ;;  %vm2567_vm8 = vcmp.eq.s32.totalorder %v11756_v63, %v18351_v24  ;;  %vm2566_vm10 = vcmp.eq.s32.totalorder %v11170_v62, %v18351_v24 }
 0x34e   :  { %v5392_v37 = vsel %vm5311_vm3, %v4599_v11, -inf  ;;  %9396 = vmatprep.mubr.msk.bf16.mxu1 %vm9395_vm12, %v17904_v57  ;;  %vm2573_vm12 = vcmp.eq.s32.totalorder %v11756_v63, %v13673_v51 }
 0x34f   :  { %v5393_v31 = vmax.f32 %v5391_v38, %v5392_v37  ;;  %v4603_v27 = vpop.f32.mrf.mxu0  ;;  %10056 = vmatmul.mubr.msk.bf16.gmra.mxu0 %vm3508_vm2, %v18350_v13  ;;  %v4132_v36 = vpop.f32.mrf.mxu1  ;;  %v18352_v37 = vld [vmem:[#allocation172_spill] sm:$0xff] }
 0x350   :  { %v4604_v58 = vadd.f32 %v4603_v27, %v14156_v49  ;;  %10059 = vmatprep.mubr.msk.bf16.mxu0 %vm10824_vm11, %v17908_v8  ;;  %vm2564_vm4 = vcmp.eq.s32.totalorder %v11756_v63, %v18352_v37  ;;  %v18354_v13 = vld [vmem:[#allocation112_spill] sm:$0xff]  ;;  %vm2563_vm7 = vcmp.eq.s32.totalorder %v11170_v62, %v18352_v37 }
 0x351   :  { %v9961_v52 = vpop.f32.mrf.mxu0  ;;  %v15236_v38 = vpop.f32.mrf.mxu1  ;;  %vm9399_vm9 = vmpackc.low %vm2567_vm8, %vm2564_vm4 }
 0x352   :  { %v5394_v1 = vsel %vm5311_vm3, %v4604_v58, -inf  ;;  %vm9401_vm13 = vmpackc.low %vm2566_vm10, %vm2563_vm7 }
 0x353   :  { %v5395_v49 = vmax.f32 %v5393_v31, %v5394_v1  ;;  %v4606_v11 = vpop.f32.mrf.mxu0  ;;  %v4135_v21 = vpop.f32.mrf.mxu1 }
 0x354   :  { %v4607_v12 = vadd.f32 %v4606_v11, %v14180_v28  ;;  %v18355_v28 = vpack.c.bf16 %v18353_v29, %v18354_v13 }
 0x355   :  { %v9962_v54 = vpop.f32.mrf.mxu0  ;;  %v15247_v45 = vpop.f32.mrf.mxu1  ;;  %9398 = vmatmul.mubr.msk.bf16.gmra.mxu1 %vm9397_vm6, %v17904_v57  ;;  %vm2572_vm6 = vcmp.eq.s32.totalorder %v11170_v62, %v13673_v51 }
 0x356   :  { %v5184_v27 = vsel %vm5130_vm14, %v4607_v12, -inf  ;;  %9400 = vmatprep.mubr.msk.bf16.mxu1 %vm9399_vm9, %v17904_v57 }
 0x357   :  { %v5396_v31 = vsel %vm5311_vm3, %v5184_v27, -inf  ;;  %v4611_v5 = vpop.f32.mrf.mxu0  ;;  %10060 = vmatmul.mubr.msk.bf16.gmra.mxu0 %vm3508_vm2, %v18355_v28  ;;  %v4140_v36 = vpop.f32.mrf.mxu1  ;;  %v18356_v27 = vld [vmem:[#allocation50_spill] sm:$0xff]  ;;  %v18357_v28 = vld [vmem:[#allocation116_spill] sm:$0xff] }
 0x358   :  { %v5397_v58 = vmax.f32 %v5395_v49, %v5396_v31  ;;  %10063 = vmatprep.mubr.msk.bf16.mxu0 %vm10824_vm11, %v17908_v8  ;;  %v4612_v1 = vadd.f32 %v4611_v5, %v14191_v48  ;;  %vm2570_vm8 = vcmp.eq.s32.totalorder %v11756_v63, %v18356_v27  ;;  %v10444_v36 = vld [vmem:[%s17433_s10 + $0x28] ss:$16 sps:$4 sm:$0xff]   ;;  %vm2569_vm10 = vcmp.eq.s32.totalorder %v11170_v62, %v18356_v27  ;;  %v18362_v27 = vld [vmem:[#allocation118_spill] sm:$0xff] }
 0x359   :  { %v9965_v40 = vpop.f32.mrf.mxu0  ;;  %v15261_v11 = vpop.f32.mrf.mxu1  ;;  %vm9403_vm4 = vmpackc.low %vm2573_vm12, %vm2570_vm8 }
 0x35a   :  { %v5398_v52 = vrot.slane %v5397_v58, 4  ;;  %v5404_v48 = vsel %vm5311_vm3, %v4612_v1, -inf  ;;  %v10446_v40 = vld [vmem:[%s17433_s10 + $0x2c] ss:$16 sps:$4 sm:$0xff]   ;;  %vm9405_vm7 = vmpackc.low %vm2572_vm6, %vm2569_vm10 }
 0x35b   :  { %v4614_v12 = vpop.f32.mrf.mxu0  ;;  %v4143_v54 = vpop.f32.mrf.mxu1  ;;  %6337 = vmatprep.subr.bf16.mxu0 %v10446_v40 }
 0x35c   :  { %v5399_v49 = vmax.f32 %v5397_v58, %v5398_v52  ;;  %v4615_v21 = vadd.f32 %v4614_v12, %v14233_v9  ;;  %v18358_v9 = vld [vmem:[#allocation114_spill] sm:$0xff]  ;;  %6338 = vmatpush1.bf16.msra.mxu0 %v10444_v36 }
 0x35d   :  { %v9966_v24 = vpop.f32.mrf.mxu0  ;;  %v15272_v29 = vpop.f32.mrf.mxu1  ;;  %9402 = vmatmul.mubr.msk.bf16.gmra.mxu1 %vm9401_vm13, %v17904_v57  ;;  %v18359_v58 = vpack.c.bf16 %v18357_v28, %v18358_v9  ;;  %v18361_v9 = vld [vmem:[#allocation52_spill] sm:$0xff] }
 0x35e   :  { %v5400_v31 = vrot.slane %v5399_v49, 2  ;;  %v5405_v5 = vsel %vm5311_vm3, %v4615_v21, -inf  ;;  %9404 = vmatprep.mubr.msk.bf16.mxu1 %vm9403_vm4, %v17904_v57  ;;  %vm2576_vm12 = vcmp.eq.s32.totalorder %v11756_v63, %v18361_v9  ;;  %vm2575_vm6 = vcmp.eq.s32.totalorder %v11170_v62, %v18361_v9 }
 0x35f   :  { %v5406_v37 = vmax.f32 %v5404_v48, %v5405_v5  ;;  %v4619_v13 = vpop.f32.mrf.mxu0  ;;  %10064 = vmatmul.mubr.msk.bf16.gmra.mxu0 %vm3508_vm2, %v18359_v58  ;;  %v4148_v12 = vpop.f32.mrf.mxu1  ;;  %v18360_v5 = vld [vmem:[#allocation196_spill] sm:$0xff] }
 0x360   :  { %v5401_v52 = vmax.f32 %v5399_v49, %v5400_v31  ;;  %v4620_v1 = vadd.f32 %v4619_v13, %v14248_v20  ;;  %10067 = vmatprep.mubr.msk.bf16.mxu0 %vm10824_vm11, %v17908_v8  ;;  %vm2579_vm9 = vcmp.eq.s32.totalorder %v11756_v63, %v18360_v5  ;;  %vm2578_vm13 = vcmp.eq.s32.totalorder %v11170_v62, %v18360_v5  ;;  %v18367_v5 = vld [vmem:[#allocation182_spill] sm:$0xff] }
 0x361   :  { %v9969_v21 = vpop.f32.mrf.mxu0  ;;  %v15292_v48 = vpop.f32.mrf.mxu1  ;;  %vm9407_vm8 = vmpackc.low %vm2579_vm9, %vm2576_vm12  ;;  %vm2582_vm9 = vcmp.eq.s32.totalorder %v11756_v63, %v18367_v5 }
 0x362   :  { %v5402_v54 = vrot.slane %v5401_v52, 1  ;;  %v5407_v24 = vsel %vm5311_vm3, %v4620_v1, -inf  ;;  %vm9409_vm10 = vmpackc.low %vm2578_vm13, %vm2575_vm6  ;;  %vm2581_vm13 = vcmp.eq.s32.totalorder %v11170_v62, %v18367_v5 }
 0x363   :  { %v5408_v49 = vmax.f32 %v5406_v37, %v5407_v24  ;;  %v4622_v20 = vpop.f32.mrf.mxu0  ;;  %v4151_v28 = vpop.f32.mrf.mxu1 }
 0x364   :  { %v5403_v31 = vmax.f32 %v5401_v52, %v5402_v54  ;;  %v4623_v13 = vadd.f32 %v4622_v20, %v14275_v53  ;;  %v18363_v52 = vld [vmem:[#allocation117_spill] sm:$0xff] }
 0x365   :  { %v9970_v51 = vpop.f32.mrf.mxu0  ;;  %v15302_v40 = vpop.f32.mrf.mxu1  ;;  %9406 = vmatmul.mubr.msk.bf16.gmra.mxu1 %vm9405_vm7, %v17904_v57  ;;  %v18364_v12 = vpack.c.bf16 %v18362_v27, %v18363_v52 }
 0x366   :  { %v6555_v58 = vpack.c.bf16 %v5403_v31, %v5403_v31  ;;  %v5409_v36 = vsel %vm5311_vm3, %v4623_v13, -inf  ;;  %9408 = vmatprep.mubr.msk.bf16.mxu1 %vm9407_vm8, %v17904_v57  ;;  %v18365_v13 = vld [vmem:[#allocation199_spill] sm:$0xff]  ;;  %v18366_v51 = vld [vmem:[#allocation57_spill] sm:$0xff] }
 0x367   :  { %v5410_v37 = vmax.f32 %v5408_v49, %v5409_v36  ;;  %v4627_v1 = vpop.f32.mrf.mxu0  ;;  %10068 = vmatmul.mubr.msk.bf16.gmra.mxu0 %vm3508_vm2, %v18364_v12  ;;  %v4156_v54 = vpop.f32.mrf.mxu1  ;;  %vm2585_vm4 = vcmp.eq.s32.totalorder %v11756_v63, %v18365_v13  ;;  %v18368_v12 = vld [vmem:[#allocation122_spill] sm:$0xff]  ;;  %vm2584_vm7 = vcmp.eq.s32.totalorder %v11170_v62, %v18365_v13 }
 0x368   :  { %v6607_v53 = vunpack.c.l.b16 %v6555_v58  ;;  %v4628_v21 = vadd.f32 %v4627_v1, %v14286_v59  ;;  %10071 = vmatprep.mubr.msk.bf16.mxu0 %vm10824_vm11, %v17908_v8  ;;  %vm9411_vm12 = vmpackc.low %vm2585_vm4, %vm2582_vm9 }
 0x369   :  { %v9973_v24 = vpop.f32.mrf.mxu0  ;;  %v15320_v31 = vpop.f32.mrf.mxu1  ;;  %vm9413_vm6 = vmpackc.low %vm2584_vm7, %vm2581_vm13 }
 0x36a   :  { %v15317_v49 = vsel %vm5913_vm0, %v6607_v53, %v15192_v30  ;;  %v5411_v20 = vsel %vm5311_vm3, %v4628_v21, -inf  ;;  %v18369_v53 = vld [vmem:[#allocation120_spill] sm:$0xff]  ;;  %v18371_v21 = vld [vmem:[#allocation18_spill] sm:$0xff] }
 0x36b   :  { %v5412_v59 = vmax.f32 %v5410_v37, %v5411_v20  ;;  %v4630_v28 = vpop.f32.mrf.mxu0  ;;  %v4159_v36 = vpop.f32.mrf.mxu1  ;;  %v18370_v9 = vpack.c.bf16 %v18368_v12, %v18369_v53  ;;  %v18374_v12 = vld [vmem:[#allocation189_spill] sm:$0xff] }
 0x36c   :  { %v4631_v58 = vadd.f32 %v4630_v28, %v18366_v51  ;;  %v18372_v51 = vld [vmem:[#allocation203_spill] sm:$0xff]  ;;  %vm2588_vm4 = vcmp.eq.s32.totalorder %v11756_v63, %v18374_v12  ;;  %vm2587_vm7 = vcmp.eq.s32.totalorder %v11170_v62, %v18374_v12 }
 0x36d   :  { %v9974_v30 = vpop.f32.mrf.mxu0  ;;  %v15330_v27 = vpop.f32.mrf.mxu1  ;;  %9410 = vmatmul.mubr.msk.bf16.gmra.mxu1 %vm9409_vm10, %v17904_v57  ;;  %vm2591_vm8 = vcmp.eq.s32.totalorder %v11756_v63, %v18372_v51  ;;  %vm2590_vm10 = vcmp.eq.s32.totalorder %v11170_v62, %v18372_v51 }
 0x36e   :  { %v5413_v1 = vsel %vm5311_vm3, %v4631_v58, -inf  ;;  %9412 = vmatprep.mubr.msk.bf16.mxu1 %vm9411_vm12, %v17904_v57  ;;  %v18373_v30 = vld [vmem:[#allocation58_spill] sm:$0xff]  ;;  %vm9415_vm9 = vmpackc.low %vm2591_vm8, %vm2588_vm4 }
 0x36f   :  { %v5414_v37 = vmax.f32 %v5412_v59, %v5413_v1  ;;  %v4635_v52 = vpop.f32.mrf.mxu0  ;;  %10072 = vmatmul.mubr.msk.bf16.gmra.mxu0 %vm3508_vm2, %v18370_v9  ;;  %v4164_v24 = vpop.f32.mrf.mxu1  ;;  %vm9417_vm13 = vmpackc.low %vm2590_vm10, %vm2587_vm7 }
 0x370   :  { %v4636_v54 = vadd.f32 %v4635_v52, %v18371_v21  ;;  %10075 = vmatprep.mubr.msk.bf16.mxu0 %vm10824_vm11, %v17908_v8  ;;  %v18376_v24 = vld [vmem:[#allocation123_spill] sm:$0xff] }
 0x371   :  { %v9977_v20 = vpop.f32.mrf.mxu0  ;;  %v15344_v28 = vpop.f32.mrf.mxu1 }
 0x372   :  { %v5415_v59 = vsel %vm5311_vm3, %v4636_v54, -inf  ;;  %v18375_v54 = vld [vmem:[#allocation126_spill] sm:$0xff] }
 0x373   :  { %v5416_v58 = vmax.f32 %v5414_v37, %v5415_v59  ;;  %v4638_v36 = vpop.f32.mrf.mxu0  ;;  %v4167_v52 = vpop.f32.mrf.mxu1  ;;  %v18377_v5 = vpack.c.bf16 %v18375_v54, %v18376_v24 }
 0x374   :  { %v4639_v1 = vadd.f32 %v4638_v36, %v18373_v30 }
 0x375   :  { %v9978_v13 = vpop.f32.mrf.mxu0  ;;  %v15354_v9 = vpop.f32.mrf.mxu1  ;;  %9414 = vmatmul.mubr.msk.bf16.gmra.mxu1 %vm9413_vm6, %v17904_v57 }
 0x376   :  { %v5417_v53 = vsel %vm5311_vm3, %v4639_v1, -inf  ;;  %9416 = vmatprep.mubr.msk.bf16.mxu1 %vm9415_vm9, %v17904_v57  ;;  %v18378_v1 = vld [vmem:[#allocation205_spill] sm:$0xff] }
 0x377   :  { %v5418_v37 = vmax.f32 %v5416_v58, %v5417_v53  ;;  %v4643_v21 = vpop.f32.mrf.mxu0  ;;  %10076 = vmatmul.mubr.msk.bf16.gmra.mxu0 %vm3508_vm2, %v18377_v5  ;;  %v4172_v59 = vpop.f32.mrf.mxu1  ;;  %vm2597_vm12 = vcmp.eq.s32.totalorder %v11756_v63, %v18378_v1  ;;  %vm2596_vm6 = vcmp.eq.s32.totalorder %v11170_v62, %v18378_v1  ;;  %v18386_v1 = vld [vmem:[#allocation197_spill] sm:$0xff] }
 0x378   :  { %v4644_v20 = vadd.f32 %v4643_v21, %v14396_v4  ;;  %10079 = vmatprep.mubr.msk.bf16.mxu0 %vm10824_vm11, %v17908_v8  ;;  %v18379_v21 = vld [vmem:[#allocation56_spill] sm:$0xff]  ;;  %v18380_v59 = vld [vmem:[#allocation129_spill] sm:$0xff] }
 0x379   :  { %v9981_v36 = vpop.f32.mrf.mxu0  ;;  %v15369_v30 = vpop.f32.mrf.mxu1  ;;  %vm2594_vm8 = vcmp.eq.s32.totalorder %v11756_v63, %v18379_v21  ;;  %vm2593_vm10 = vcmp.eq.s32.totalorder %v11170_v62, %v18379_v21  ;;  %v18388_v21 = vld [vmem:[#allocation133_spill] sm:$0xff] }
 0x37a   :  { %v5193_v58 = vsel %vm5130_vm14, %v4644_v20, -inf  ;;  %vm9419_vm4 = vmpackc.low %vm2597_vm12, %vm2594_vm8  ;;  %v18381_v36 = vld [vmem:[#allocation127_spill] sm:$0xff]  ;;  %vm2600_vm12 = vcmp.eq.s32.totalorder %v11756_v63, %v18386_v1 }
 0x37b   :  { %v5419_v52 = vsel %vm5311_vm3, %v5193_v58, -inf  ;;  %v4646_v13 = vpop.f32.mrf.mxu0  ;;  %v4175_v53 = vpop.f32.mrf.mxu1  ;;  %v18382_v58 = vpack.c.bf16 %v18380_v59, %v18381_v36  ;;  %v18384_v36 = vld [vmem:[#allocation207_spill] sm:$0xff]  ;;  %vm9421_vm7 = vmpackc.low %vm2596_vm6, %vm2593_vm10  ;;  %vm2599_vm6 = vcmp.eq.s32.totalorder %v11170_v62, %v18386_v1 }
 0x37c   :  { %v5420_v4 = vmax.f32 %v5418_v37, %v5419_v52  ;;  %v4647_v24 = vadd.f32 %v4646_v13, %v14423_v6  ;;  %vm2603_vm9 = vcmp.eq.s32.totalorder %v11756_v63, %v18384_v36 }
 0x37d   :  { %v9982_v51 = vpop.f32.mrf.mxu0  ;;  %v15379_v5 = vpop.f32.mrf.mxu1  ;;  %9418 = vmatmul.mubr.msk.bf16.gmra.mxu1 %vm9417_vm13, %v17904_v57  ;;  %vm9423_vm8 = vmpackc.low %vm2603_vm9, %vm2600_vm12  ;;  %vm2602_vm13 = vcmp.eq.s32.totalorder %v11170_v62, %v18384_v36 }
 0x37e   :  { %v5421_v54 = vrot.slane %v5420_v4, 4  ;;  %9420 = vmatprep.mubr.msk.bf16.mxu1 %vm9419_vm4, %v17904_v57  ;;  %v5427_v53 = vsel %vm5311_vm3, %v4647_v24, -inf  ;;  %vm9425_vm10 = vmpackc.low %vm2602_vm13, %vm2599_vm6 }
 0x37f   :  { %v4651_v20 = vpop.f32.mrf.mxu0  ;;  %10080 = vmatmul.mubr.msk.bf16.gmra.mxu0 %vm3508_vm2, %v18382_v58  ;;  %v4180_v52 = vpop.f32.mrf.mxu1 }
 0x380   :  { %v5422_v12 = vmax.f32 %v5420_v4, %v5421_v54  ;;  %v4652_v37 = vadd.f32 %v4651_v20, %v14441_v61  ;;  %10083 = vmatprep.mubr.msk.bf16.mxu0 %vm10824_vm11, %v17908_v8  ;;  %v18385_v20 = vld [vmem:[#allocation19_spill] sm:$0xff] }
 0x381   :  { %v9985_v6 = vpop.f32.mrf.mxu0  ;;  %v15394_v59 = vpop.f32.mrf.mxu1 }
 0x382   :  { %v5423_v13 = vrot.slane %v5422_v12, 2  ;;  %v5428_v51 = vsel %vm5311_vm3, %v4652_v37, -inf  ;;  %18383 = vst [vmem:[#allocation23_spill] sm:$0xff] %v15394_v59 }
 0x383   :  { %v5429_v4 = vmax.f32 %v5427_v53, %v5428_v51  ;;  %v4654_v61 = vpop.f32.mrf.mxu0  ;;  %v4183_v52 = vpop.f32.mrf.mxu1 }
 0x384   :  { %v5424_v54 = vmax.f32 %v5422_v12, %v5423_v13  ;;  %v4655_v58 = vadd.f32 %v4654_v61, %v18385_v20  ;;  %v18389_v12 = vld [vmem:[#allocation131_spill] sm:$0xff]  ;;  %v18391_v20 = vld [vmem:[#allocation60_spill] sm:$0xff] }
 0x385   :  { %v9986_v24 = vpop.f32.mrf.mxu0  ;;  %v15404_v59 = vpop.f32.mrf.mxu1  ;;  %9422 = vmatmul.mubr.msk.bf16.gmra.mxu1 %vm9421_vm7, %v17904_v57  ;;  %v18390_v13 = vpack.c.bf16 %v18388_v21, %v18389_v12  ;;  %v18392_v21 = vld [vmem:[#allocation211_spill] sm:$0xff] }
 0x386   :  { %v5425_v37 = vrot.slane %v5424_v54, 1  ;;  %v5430_v6 = vsel %vm5311_vm3, %v4655_v58, -inf  ;;  %18387 = vst [vmem:[#allocation65_spill] sm:$0xff] %v15404_v59  ;;  %9424 = vmatprep.mubr.msk.bf16.mxu1 %vm9423_vm8, %v17904_v57  ;;  %vm2609_vm4 = vcmp.eq.s32.totalorder %v11756_v63, %v18392_v21  ;;  %vm2608_vm7 = vcmp.eq.s32.totalorder %v11170_v62, %v18392_v21 }
 0x387   :  { %v5431_v53 = vmax.f32 %v5429_v4, %v5430_v6  ;;  %v4659_v51 = vpop.f32.mrf.mxu0  ;;  %10084 = vmatmul.mubr.msk.bf16.gmra.mxu0 %vm3508_vm2, %v18390_v13  ;;  %v4188_v24 = vpop.f32.mrf.mxu1 }
 0x388   :  { %v5426_v61 = vmax.f32 %v5424_v54, %v5425_v37  ;;  %v4660_v52 = vadd.f32 %v4659_v51, %v18391_v20  ;;  %10087 = vmatprep.mubr.msk.bf16.mxu0 %vm10824_vm11, %v17908_v8  ;;  %v18393_v51 = vld [vmem:[#allocation70_spill] sm:$0xff] }
 0x389   :  { %v9989_v58 = vpop.f32.mrf.mxu0  ;;  %v15418_v59 = vpop.f32.mrf.mxu1  ;;  %v18394_v24 = vld [vmem:[#allocation202_spill] sm:$0xff] }
 0x38a   :  { %v6556_v4 = vpack.c.bf16 %v5426_v61, %v5426_v61  ;;  %v5432_v6 = vsel %vm5311_vm3, %v4660_v52, -inf  ;;  %vm2606_vm9 = vcmp.eq.s32.totalorder %v11756_v63, %v18394_v24  ;;  %vm2605_vm13 = vcmp.eq.s32.totalorder %v11170_v62, %v18394_v24 }
 0x38b   :  { %v5433_v12 = vmax.f32 %v5431_v53, %v5432_v6  ;;  %v4662_v54 = vpop.f32.mrf.mxu0  ;;  %v4191_v20 = vpop.f32.mrf.mxu1  ;;  %vm9427_vm12 = vmpackc.low %vm2609_vm4, %vm2606_vm9  ;;  %v18396_v6 = vld [vmem:[#allocation135_spill] sm:$0xff] }
 0x38c   :  { %v6608_v37 = vunpack.c.l.b16 %v6556_v4  ;;  %v4663_v13 = vadd.f32 %v4662_v54, %v18393_v51  ;;  %v18395_v4 = vld [vmem:[#allocation138_spill] sm:$0xff]  ;;  %vm9429_vm6 = vmpackc.low %vm2608_vm7, %vm2605_vm13 }
 0x38d   :  { %v9990_v36 = vpop.f32.mrf.mxu0  ;;  %v15432_v53 = vpop.f32.mrf.mxu1  ;;  %9426 = vmatmul.mubr.msk.bf16.gmra.mxu1 %vm9425_vm10, %v17904_v57  ;;  %v18397_v54 = vpack.c.bf16 %v18395_v4, %v18396_v6  ;;  %v18398_v20 = vld [vmem:[#allocation214_spill] sm:$0xff]  ;;  %v18399_v4 = vld [vmem:[#allocation101_spill] sm:$0xff] }
 0x38e   :  { %v15429_v61 = vsel %vm5915_vm5, %v6608_v37, %v15317_v49  ;;  %v5434_v52 = vsel %vm5311_vm3, %v4663_v13, -inf  ;;  %9428 = vmatprep.mubr.msk.bf16.mxu1 %vm9427_vm12, %v17904_v57  ;;  %vm2615_vm8 = vcmp.eq.s32.totalorder %v11756_v63, %v18398_v20  ;;  %vm2612_vm4 = vcmp.eq.s32.totalorder %v11756_v63, %v18399_v4 }
 0x38f   :  { %v5435_v1 = vmax.f32 %v5433_v12, %v5434_v52  ;;  %v4667_v58 = vpop.f32.mrf.mxu0  ;;  %10088 = vmatmul.mubr.msk.bf16.gmra.mxu0 %vm3508_vm2, %v18397_v54  ;;  %v4196_v49 = vpop.f32.mrf.mxu1  ;;  %vm9431_vm9 = vmpackc.low %vm2615_vm8, %vm2612_vm4  ;;  %vm2614_vm10 = vcmp.eq.s32.totalorder %v11170_v62, %v18398_v20  ;;  %vm2611_vm7 = vcmp.eq.s32.totalorder %v11170_v62, %v18399_v4  ;;  %v10449_v20 = vld [vmem:[%s17433_s10 + $0xc] ss:$16 sps:$4 sm:$0xff]  }
 0x390   :  { %v4668_v51 = vadd.f32 %v4667_v58, %v14539_v22  ;;  %10091 = vmatprep.mubr.msk.bf16.mxu0 %vm10824_vm11, %v17908_v8  ;;  %v18400_v49 = vld [vmem:[#allocation142_spill] sm:$0xff]  ;;  %vm9433_vm13 = vmpackc.low %vm2614_vm10, %vm2611_vm7  ;;  %6339 = vmatprep.subr.bf16.mxu0 %v10449_v20 }
 0x391   :  { %v9993_v37 = vpop.f32.mrf.mxu0  ;;  %v15446_v13 = vpop.f32.mrf.mxu1 }
 0x392   :  { %v5436_v12 = vsel %vm5311_vm3, %v4668_v51, -inf  ;;  %v18401_v37 = vld [vmem:[#allocation140_spill] sm:$0xff] }
 0x393   :  { %v5437_v36 = vmax.f32 %v5435_v1, %v5436_v12  ;;  %v4670_v52 = vpop.f32.mrf.mxu0  ;;  %v4199_v58 = vpop.f32.mrf.mxu1  ;;  %v18402_v24 = vpack.c.bf16 %v18400_v49, %v18401_v37  ;;  %v10447_v49 = vld [vmem:[%s17433_s10 + $0x8] ss:$16 sps:$4 sm:$0xff]   ;;  %v18404_v37 = vld [vmem:[#allocation210_spill] sm:$0xff] }
 0x394   :  { %v4671_v22 = vadd.f32 %v4670_v52, %v14571_v19  ;;  %v18403_v58 = vld [vmem:[#allocation217_spill] sm:$0xff]  ;;  %vm2618_vm8 = vcmp.eq.s32.totalorder %v11756_v63, %v18404_v37  ;;  %6340 = vmatpush1.bf16.msra.mxu0 %v10447_v49  ;;  %vm2617_vm10 = vcmp.eq.s32.totalorder %v11170_v62, %v18404_v37 }
 0x395   :  { %v9994_v21 = vpop.f32.mrf.mxu0  ;;  %v15456_v54 = vpop.f32.mrf.mxu1  ;;  %9430 = vmatmul.mubr.msk.bf16.gmra.mxu1 %vm9429_vm6, %v17904_v57  ;;  %vm2621_vm12 = vcmp.eq.s32.totalorder %v11756_v63, %v18403_v58  ;;  %vm2620_vm6 = vcmp.eq.s32.totalorder %v11170_v62, %v18403_v58 }
 0x396   :  { %v5438_v6 = vsel %vm5311_vm3, %v4671_v22, -inf  ;;  %9432 = vmatprep.mubr.msk.bf16.mxu1 %vm9431_vm9, %v17904_v57  ;;  %vm9435_vm4 = vmpackc.low %vm2621_vm12, %vm2618_vm8 }
 0x397   :  { %v5439_v1 = vmax.f32 %v5437_v36, %v5438_v6  ;;  %v4675_v51 = vpop.f32.mrf.mxu0  ;;  %10092 = vmatmul.mubr.msk.bf16.gmra.mxu0 %vm3508_vm2, %v18402_v24  ;;  %v4204_v12 = vpop.f32.mrf.mxu1  ;;  %vm9437_vm7 = vmpackc.low %vm2620_vm6, %vm2617_vm10 }
 0x398   :  { %v4676_v19 = vadd.f32 %v4675_v51, %v14595_v32  ;;  %10095 = vmatprep.mubr.msk.bf16.mxu0 %vm10824_vm11, %v17908_v8  ;;  %v18405_v12 = vld [vmem:[#allocation144_spill] sm:$0xff] }
 0x399   :  { %v9997_v52 = vpop.f32.mrf.mxu0  ;;  %v15470_v22 = vpop.f32.mrf.mxu1 }
 0x39a   :  { %v5440_v36 = vsel %vm5311_vm3, %v4676_v19, -inf  ;;  %v18406_v52 = vld [vmem:[#allocation24_spill] sm:$0xff] }
 0x39b   :  { %v5441_v21 = vmax.f32 %v5439_v1, %v5440_v36  ;;  %v4678_v6 = vpop.f32.mrf.mxu0  ;;  %v4207_v51 = vpop.f32.mrf.mxu1  ;;  %v18407_v36 = vpack.c.bf16 %v18405_v12, %v18406_v52  ;;  %v18408_v12 = vld [vmem:[#allocation17_spill] sm:$0xff] }
 0x39c   :  { %v4679_v32 = vadd.f32 %v4678_v6, %v14633_v14  ;;  %vm2627_vm9 = vcmp.eq.s32.totalorder %v11756_v63, %v18408_v12 }
 0x39d   :  { %v9998_v1 = vpop.f32.mrf.mxu0  ;;  %v15487_v4 = vpop.f32.mrf.mxu1  ;;  %9434 = vmatmul.mubr.msk.bf16.gmra.mxu1 %vm9433_vm13, %v17904_v57  ;;  %vm2626_vm13 = vcmp.eq.s32.totalorder %v11170_v62, %v18408_v12 }
 0x39e   :  { %v5202_v24 = vsel %vm5130_vm14, %v4679_v32, -inf  ;;  %9436 = vmatprep.mubr.msk.bf16.mxu1 %vm9435_vm4, %v17904_v57 }
 0x39f   :  { %v5442_v14 = vsel %vm5311_vm3, %v5202_v24, -inf  ;;  %v4683_v19 = vpop.f32.mrf.mxu0  ;;  %10096 = vmatmul.mubr.msk.bf16.gmra.mxu0 %vm3508_vm2, %v18407_v36  ;;  %v4212_v51 = vpop.f32.mrf.mxu1  ;;  %v18409_v36 = vld [vmem:[#allocation216_spill] sm:$0xff] }
 0x3a0   :  { %v5443_v6 = vmax.f32 %v5441_v21, %v5442_v14  ;;  %10099 = vmatprep.mubr.msk.bf16.mxu0 %vm10824_vm11, %v17908_v8  ;;  %v4684_v1 = vadd.f32 %v4683_v19, %v14650_v50  ;;  %vm2624_vm12 = vcmp.eq.s32.totalorder %v11756_v63, %v18409_v36  ;;  %vm2623_vm6 = vcmp.eq.s32.totalorder %v11170_v62, %v18409_v36  ;;  %v18416_v36 = vld [vmem:[#allocation28_spill] sm:$0xff] }
 0x3a1   :  { %v10001_v32 = vpop.f32.mrf.mxu0  ;;  %v15501_v24 = vpop.f32.mrf.mxu1  ;;  %vm9439_vm8 = vmpackc.low %vm2627_vm9, %vm2624_vm12 }
 0x3a2   :  { %v5444_v20 = vrot.slane %v5443_v6, 4  ;;  %v5450_v50 = vsel %vm5311_vm3, %v4684_v1, -inf  ;;  %vm9441_vm10 = vmpackc.low %vm2626_vm13, %vm2623_vm6  ;;  %vm18472_vm6 = vcmask 1047559  }
 0x3a3   :  { %v4686_v52 = vpop.f32.mrf.mxu0  ;;  %v4215_v49 = vpop.f32.mrf.mxu1 }
 0x3a4   :  { %v5445_v21 = vmax.f32 %v5443_v6, %v5444_v20  ;;  %v4687_v14 = vadd.f32 %v4686_v52, %v14677_v55  ;;  %v18411_v20 = vld [vmem:[#allocation149_spill] sm:$0xff]  ;;  %v18412_v55 = vld [vmem:[#allocation146_spill] sm:$0xff] }
 0x3a5   :  { %v10002_v58 = vpop.f32.mrf.mxu0  ;;  %v15512_v32 = vpop.f32.mrf.mxu1  ;;  %9438 = vmatmul.mubr.msk.bf16.gmra.mxu1 %vm9437_vm7, %v17904_v57  ;;  %v18413_v52 = vpack.c.bf16 %v18411_v20, %v18412_v55  ;;  %v18414_v20 = vld [vmem:[#allocation223_spill] sm:$0xff] }
 0x3a6   :  { %v5446_v51 = vrot.slane %v5445_v21, 2  ;;  %v5451_v19 = vsel %vm5311_vm3, %v4687_v14, -inf  ;;  %18410 = vst [vmem:[#allocation25_spill] sm:$0xff] %v15512_v32  ;;  %9440 = vmatprep.mubr.msk.bf16.mxu1 %vm9439_vm8, %v17904_v57  ;;  %vm2633_vm4 = vcmp.eq.s32.totalorder %v11756_v63, %v18414_v20  ;;  %vm2632_vm7 = vcmp.eq.s32.totalorder %v11170_v62, %v18414_v20 }
 0x3a7   :  { %v5452_v37 = vmax.f32 %v5450_v50, %v5451_v19  ;;  %v4691_v6 = vpop.f32.mrf.mxu0  ;;  %10100 = vmatmul.mubr.msk.bf16.gmra.mxu0 %vm3508_vm2, %v18413_v52  ;;  %v4220_v1 = vpop.f32.mrf.mxu1  ;;  %v18415_v52 = vld [vmem:[#allocation220_spill] sm:$0xff] }
 0x3a8   :  { %v5447_v49 = vmax.f32 %v5445_v21, %v5446_v51  ;;  %v4692_v58 = vadd.f32 %v4691_v6, %v14693_v25  ;;  %10103 = vmatprep.mubr.msk.bf16.mxu0 %vm10824_vm11, %v17908_v8  ;;  %vm2630_vm9 = vcmp.eq.s32.totalorder %v11756_v63, %v18415_v52  ;;  %vm2629_vm8 = vcmp.eq.s32.totalorder %v11170_v62, %v18415_v52 }
 0x3a9   :  { %v10005_v14 = vpop.f32.mrf.mxu0  ;;  %v15526_v32 = vpop.f32.mrf.mxu1  ;;  %vm9443_vm12 = vmpackc.low %vm2633_vm4, %vm2630_vm9  ;;  %vm6376_vm4 = vcmask 130048   ;;  %vm18501_vm9 = vcmask 1041409  }
 0x3aa   :  { %v5448_v50 = vrot.slane %v5447_v49, 1  ;;  %v5453_v19 = vsel %vm5311_vm3, %v4692_v58, -inf  ;;  %vm9445_vm13 = vmpackc.low %vm2632_vm7, %vm2629_vm8 }
 0x3ab   :  { %v5454_v55 = vmax.f32 %v5452_v37, %v5453_v19  ;;  %v4694_v21 = vpop.f32.mrf.mxu0  ;;  %v4223_v6 = vpop.f32.mrf.mxu1 }
 0x3ac   :  { %v5449_v25 = vmax.f32 %v5447_v49, %v5448_v50  ;;  %v4695_v51 = vadd.f32 %v4694_v21, %v14720_v35  ;;  %v18417_v49 = vld [vmem:[#allocation26_spill] sm:$0xff] }
 0x3ad   :  { %v10006_v12 = vpop.f32.mrf.mxu0  ;;  %v15536_v14 = vpop.f32.mrf.mxu1  ;;  %9442 = vmatmul.mubr.msk.bf16.gmra.mxu1 %vm9441_vm10, %v17904_v57  ;;  %v18418_v50 = vpack.c.bf16 %v18416_v36, %v18417_v49  ;;  %vm18517_vm10 = vcmask 1042434  }
 0x3ae   :  { %v6557_v58 = vpack.c.bf16 %v5449_v25, %v5449_v25  ;;  %v5455_v1 = vsel %vm5311_vm3, %v4695_v51, -inf  ;;  %9444 = vmatprep.mubr.msk.bf16.mxu1 %vm9443_vm12, %v17904_v57 }
 0x3af   :  { %v5456_v37 = vmax.f32 %v5454_v55, %v5455_v1  ;;  %v4699_v19 = vpop.f32.mrf.mxu0  ;;  %10104 = vmatmul.mubr.msk.bf16.gmra.mxu0 %vm3508_vm2, %v18418_v50  ;;  %v4228_v21 = vpop.f32.mrf.mxu1  ;;  %v18419_v50 = vld [vmem:[#allocation156_spill] sm:$0xff] }
 0x3b0   :  { %v6609_v63 = vunpack.c.l.b16 %v6557_v58  ;;  %v4700_v35 = vadd.f32 %v4699_v19, %v14730_v43  ;;  %10107 = vmatprep.mubr.msk.bf16.mxu0 %vm10824_vm11, %v17908_v8 }
 0x3b1   :  { %v10009_v25 = vpop.f32.mrf.mxu0  ;;  %v15554_v6 = vpop.f32.mrf.mxu1 }
 0x3b2   :  { %v15551_v55 = vsel %vm5917_vm15, %v6609_v63, %v15429_v61  ;;  %v5457_v51 = vsel %vm5311_vm3, %v4700_v35, -inf  ;;  %v18420_v63 = vld [vmem:[#allocation155_spill] sm:$0xff]  ;;  %v18422_v35 = vld [vmem:[#allocation62_spill] sm:$0xff] }
 0x3b3   :  { %v5458_v12 = vmax.f32 %v5456_v37, %v5457_v51  ;;  %v4702_v58 = vpop.f32.mrf.mxu0  ;;  %v4231_v1 = vpop.f32.mrf.mxu1  ;;  %v18421_v37 = vpack.c.bf16 %v18419_v50, %v18420_v63 }
 0x3b4   :  { %v4703_v43 = vadd.f32 %v4702_v58, %v14747_v47  ;;  %v18424_v58 = vld [vmem:[#allocation21_spill] sm:$0xff] }
 0x3b5   :  { %v10010_v19 = vpop.f32.mrf.mxu0  ;;  %v15560_v36 = vpop.f32.mrf.mxu1  ;;  %9446 = vmatmul.mubr.msk.bf16.gmra.mxu1 %vm9445_vm13, %v17904_v57 }
 0x3b6   :  { %v5459_v20 = vsel %vm5311_vm3, %v4703_v43, -inf  ;;  %6306 = vmatprep.mubr.bf16.mxu1 %v18422_v35 }
 0x3b7   :  { %v5460_v61 = vmax.f32 %v5458_v12, %v5459_v20  ;;  %v4707_v49 = vpop.f32.mrf.mxu0  ;;  %10108 = vmatmul.mubr.msk.bf16.gmra.mxu0 %vm3508_vm2, %v18421_v37  ;;  %v4236_v52 = vpop.f32.mrf.mxu1  ;;  %v18425_v20 = vld [vmem:[#allocation121_spill] sm:$0xff]  ;;  %v18428_v37 = vld [vmem:[#allocation20_spill] sm:$0xff] }
 0x3b8   :  { %v4708_v47 = vadd.f32 %v4707_v49, %v14762_v33  ;;  %10111 = vmatprep.mubr.msk.bf16.mxu0 %vm10824_vm11, %v17908_v8  ;;  %v15577_v50 = vpack.c.b16 %v18425_v20, %v18425_v20  ;;  %v5733_v33 = vld [vmem:[%s17434_s9 + $0x20] sm:$0xff] }
 0x3b9   :  { %v10013_v21 = vpop.f32.mrf.mxu0  ;;  %v15572_v51 = vpop.f32.mrf.mxu1 }
 0x3ba   :  { %v5461_v25 = vsel %vm5311_vm3, %v4708_v47, -inf  ;;  %18423 = vst [vmem:[#allocation80_spill] sm:$0xff] %v15572_v51  ;;  %18426 = vst [vmem:[#allocation132_spill] sm:$0xff] %v15577_v50  ;;  %v18429_v21 = vld [vmem:[#allocation30_spill] sm:$0xff] }
 0x3bb   :  { %v5462_v57 = vmax.f32 %v5460_v61, %v5461_v25  ;;  %v4710_v12 = vpop.f32.mrf.mxu0  ;;  %v4239_v1 = vpop.f32.mrf.mxu1  ;;  %v5730_v61 = vld [vmem:[%s17434_s9 + $0x8] sm:$0xff]  ;;  %v18430_v25 = vld [vmem:[#allocation4_spill] sm:$0xff] }
 0x3bc   :  { %v4711_v43 = vadd.f32 %v4710_v12, %v18424_v58  ;;  %v18431_v12 = vpack.c.bf16 %v18429_v21, %v18430_v25  ;;  %v5729_v58 = vld [vmem:[%s17434_s9] sm:$0xff] }
 0x3bd   :  { %v10014_v19 = vpop.f32.mrf.mxu0  ;;  %v15583_v63 = vpop.f32.mrf.mxu1  ;;  %6307 = vmatmul.mubr.bf16.vlgmr.msra.gmra.mxu1 %v18428_v37  ;;  %v18457_v37 = vld [vmem:[#allocation12_spill] sm:$0xff] }
 0x3be   :  { %v5463_v49 = vsel %vm5311_vm3, %v4711_v43, -inf  ;;  %18427 = vst [vmem:[#allocation66_spill] sm:$0xff] %v15583_v63  ;;  %6316 = vmatprep.mubr.bf16.mxu1 %v15577_v50  ;;  %6415 = vmatpush1.msra.mxu1 %v5733_v33 }
 0x3bf   :  { %v5464_v47 = vmax.f32 %v5462_v57, %v5463_v49  ;;  %v4715_v52 = vpop.f32.mrf.mxu0  ;;  %10112 = vmatmul.mubr.msk.bf16.gmra.mxu0 %vm3508_vm2, %v18431_v12  ;;  %v4244_v1 = vpop.f32.mrf.mxu1  ;;  %6416 = vmatprep.subr.mxu1 %v5730_v61  ;;  %v10450_v49 = vld [vmem:[%s17433_s10 + $0x1e8] ss:$16 sps:$4 sm:$0xff]   ;;  %v18433_v61 = vld [vmem:[#allocation72_spill] sm:$0xff] }
 0x3c0   :  { %v4716_v43 = vadd.f32 %v4715_v52, %v14811_v34  ;;  %10115 = vmatprep.mubr.msk.bf16.mxu0 %vm10824_vm11, %v17908_v8  ;;  %6417 = vmatpush1.msra.mxu1 %v5729_v58  ;;  %v10452_v34 = vld [vmem:[%s17433_s10 + $0x1ec] ss:$16 sps:$4 sm:$0xff]   ;;  %v15613_v12 = vpack.c.b16 %v18433_v61, %v18433_v61 }
 0x3c1   :  { %v10017_v57 = vpop.f32.mrf.mxu0  ;;  %v15602_v20 = vpop.f32.mrf.mxu1  ;;  %6341 = vmatprep.subr.bf16.mxu0 %v10452_v34 }
 0x3c2   :  { %v5211_v19 = vsel %vm5130_vm14, %v4716_v43, -inf  ;;  %18432 = vst [vmem:[#allocation83_spill] sm:$0xff] %v15602_v20  ;;  %18434 = vst [vmem:[#allocation134_spill] sm:$0xff] %v15613_v12  ;;  %6342 = vmatpush2.bf16.msra.mxu0 %v10450_v49  ;;  %v18436_v20 = vld [vmem:[#allocation163_spill] sm:$0xff] }
 0x3c3   :  { %v5465_v52 = vsel %vm5311_vm3, %v5211_v19, -inf  ;;  %v4718_v21 = vpop.f32.mrf.mxu0  ;;  %v4247_v25 = vpop.f32.mrf.mxu1  ;;  %v18437_v19 = vld [vmem:[#allocation162_spill] sm:$0xff] }
 0x3c4   :  { %v5466_v33 = vmax.f32 %v5464_v47, %v5465_v52  ;;  %v4719_v1 = vadd.f32 %v4718_v21, %v14830_v42  ;;  %v18438_v50 = vpack.c.bf16 %v18436_v20, %v18437_v19  ;;  %v18439_v52 = vld [vmem:[#allocation63_spill] sm:$0xff] }
 0x3c5   :  { %v10018_v43 = vpop.f32.mrf.mxu0  ;;  %v15616_v57 = vpop.f32.mrf.mxu1  ;;  %6317 = vmatmul.mubr.bf16.gmra.mxu1 %v15613_v12 }
 0x3c6   :  { %v5467_v58 = vrot.slane %v5466_v33, 4  ;;  %18435 = vst [vmem:[#allocation27_spill] sm:$0xff] %v15616_v57  ;;  %6450 = vmatprep.mubr.f32.mxu1 %v17908_v8  ;;  %v5473_v21 = vsel %vm5311_vm3, %v4719_v1, -inf }
 0x3c7   :  { %v4723_v62 = vpop.f32.mrf.mxu0  ;;  %10116 = vmatmul.mubr.msk.bf16.gmra.mxu0 %vm3508_vm2, %v18438_v50  ;;  %v4252_v25 = vpop.f32.mrf.mxu1  ;;  %v15634_v50 = vld [vmem:[%s17435_s0] sm:$0xff] }
 0x3c8   :  { %v5468_v47 = vmax.f32 %v5466_v33, %v5467_v58  ;;  %v4724_v34 = vadd.f32 %v4723_v62, %v18439_v52  ;;  %10119 = vmatprep.mubr.msk.bf16.mxu0 %vm10824_vm11, %v17908_v8  ;;  %v18441_v33 = vld [vmem:[#allocation75_spill] sm:$0xff] }
 0x3c9   :  { %v10021_v42 = vpop.f32.mrf.mxu0  ;;  %v15629_v43 = vpop.f32.mrf.mxu1 }
 0x3ca   :  { %v5469_v49 = vrot.slane %v5468_v47, 2  ;;  %v5474_v61 = vsel %vm5311_vm3, %v4724_v34, -inf  ;;  %18440 = vst [vmem:[#allocation67_spill] sm:$0xff] %v15629_v43  ;;  %v18444_v43 = vld [vmem:[#allocation6_spill] sm:$0xff] }
 0x3cb   :  { %v5475_v20 = vmax.f32 %v5473_v21, %v5474_v61  ;;  %v4726_v19 = vpop.f32.mrf.mxu0  ;;  %v4255_v52 = vpop.f32.mrf.mxu1  ;;  %v18443_v61 = vld [vmem:[#allocation7_spill] sm:$0xff] }
 0x3cc   :  { %v5470_v62 = vmax.f32 %v5468_v47, %v5469_v49  ;;  %v4727_v58 = vadd.f32 %v4726_v19, %v18441_v33  ;;  %v18445_v12 = vpack.c.bf16 %v18443_v61, %v18444_v43  ;;  %v15650_v47 = vld [vmem:[%s17435_s0 + $0x8] sm:$0xff]  ;;  %v18446_v19 = vld [vmem:[#allocation124_spill] sm:$0xff] }
 0x3cd   :  { %v10022_v25 = vpop.f32.mrf.mxu0  ;;  %v15638_v57 = vpop.f32.mrf.mxu1  ;;  %9592 = vmatmul.mubr.msk.f32.vlgmr.msra.gmra.mxu1 %vm6376_vm4, %v15634_v50 }
 0x3ce   :  { %v5471_v42 = vrot.slane %v5470_v62, 1  ;;  %v5476_v1 = vsel %vm5311_vm3, %v4727_v58, -inf  ;;  %18442 = vst [vmem:[#allocation89_spill] sm:$0xff] %v15638_v57  ;;  %6456 = vmatprep.mubr.f32.mxu1 %v17908_v8  ;;  %v18451_v57 = vld [vmem:[#allocation10_spill] sm:$0xff] }
 0x3cf   :  { %v5477_v34 = vmax.f32 %v5475_v20, %v5476_v1  ;;  %v4731_v21 = vpop.f32.mrf.mxu0  ;;  %10120 = vmatmul.mubr.msk.bf16.gmra.mxu0 %vm3508_vm2, %v18445_v12  ;;  %v4260_v58 = vpop.f32.mrf.mxu1 }
 0x3d0   :  { %v5472_v49 = vmax.f32 %v5470_v62, %v5471_v42  ;;  %v4732_v33 = vadd.f32 %v4731_v21, %v18446_v19  ;;  %10123 = vmatprep.mubr.msk.bf16.mxu0 %vm10824_vm11, %v17908_v8  ;;  %v15664_v62 = vld [vmem:[%s17435_s0 + $0x10] sm:$0x3]  ;;  %v18448_v21 = vld [vmem:[#allocation22_spill] sm:$0xff] }
 0x3d1   :  { %v10025_v20 = vpop.f32.mrf.mxu0  ;;  %v15656_v25 = vpop.f32.mrf.mxu1  ;;  %9593 = vmatmul.mubr.msk.f32.gmra.mxu1 %vm6376_vm4, %v15650_v47 }
 0x3d2   :  { %v6558_v52 = vpack.c.bf16 %v5472_v49, %v5472_v49  ;;  %v5478_v43 = vsel %vm5311_vm3, %v4732_v33, -inf  ;;  %18447 = vst [vmem:[#allocation139_spill] sm:$0xff] %v15656_v25  ;;  %6462 = vmatprep.mubr.f32.mxu1 %v17908_v8  ;;  %v18450_v25 = vld [vmem:[#allocation166_spill] sm:$0xff] }
 0x3d3   :  { %v5479_v12 = vmax.f32 %v5477_v34, %v5478_v43  ;;  %v4734_v1 = vpop.f32.mrf.mxu0  ;;  %v4263_v49 = vpop.f32.mrf.mxu1 }
 0x3d4   :  { %v6610_v42 = vunpack.c.l.b16 %v6558_v52  ;;  %v4735_v61 = vadd.f32 %v4734_v1, %v18448_v21  ;;  %v18452_v52 = vpack.c.bf16 %v18450_v25, %v18451_v57  ;;  %v18453_v1 = vld [vmem:[#allocation64_spill] sm:$0xff] }
 0x3d5   :  { %v10026_v19 = vpop.f32.mrf.mxu0  ;;  %v15672_v34 = vpop.f32.mrf.mxu1  ;;  %9594 = vmatmul.mubr.msk.f32.gmra.mxu1 %vm6376_vm4, %v15664_v62 }
 0x3d6   :  { %v15669_v33 = vsel %vm5919_vm1, %v6610_v42, %v15551_v55  ;;  %v5480_v58 = vsel %vm5311_vm3, %v4735_v61, -inf  ;;  %18449 = vst [vmem:[#allocation29_spill] sm:$0xff] %v15672_v34  ;;  %6533 = vmatprep.mubr.f32.mxu1 %v17908_v8 }
 0x3d7   :  { %v5481_v20 = vmax.f32 %v5479_v12, %v5480_v58  ;;  %v4739_v43 = vpop.f32.mrf.mxu0  ;;  %10124 = vmatmul.mubr.msk.bf16.gmra.mxu0 %vm3508_vm2, %v18452_v52  ;;  %v4268_v55 = vpop.f32.mrf.mxu1  ;;  %v18455_v58 = vld [vmem:[#allocation77_spill] sm:$0xff] }
 0x3d8   :  { %v4740_v21 = vadd.f32 %v4739_v43, %v18453_v1  ;;  %10127 = vmatprep.mubr.msk.bf16.mxu0 %vm10824_vm11, %v17908_v8  ;;  %v18456_v55 = vld [vmem:[#allocation13_spill] sm:$0xff] }
 0x3d9   :  { %v10029_v42 = vpop.f32.mrf.mxu0  ;;  %v15685_v49 = vpop.f32.mrf.mxu1  ;;  %v18458_v51 = vpack.c.bf16 %v18456_v55, %v18457_v37  ;;  %v18462_v55 = vld [vmem:[#allocation36_spill] sm:$0xff] }
 0x3da   :  { %v5482_v61 = vsel %vm5311_vm3, %v4740_v21, -inf  ;;  %18454 = vst [vmem:[#allocation68_spill] sm:$0xff] %v15685_v49  ;;  %v18459_v21 = vld [vmem:[#allocation128_spill] sm:$0xff] }
 0x3db   :  { %v5483_v12 = vmax.f32 %v5481_v20, %v5482_v61  ;;  %v4742_v19 = vpop.f32.mrf.mxu0  ;;  %v4271_v57 = vpop.f32.mrf.mxu1 }
 0x3dc   :  { %v4743_v34 = vadd.f32 %v4742_v19, %v18455_v58 }
 0x3dd   :  { %v10030_v25 = vpop.f32.mrf.mxu0  ;;  %v15689_v63 = vpop.f32.mrf.mxu1 }
 0x3de   :  { %v5484_v52 = vsel %vm5311_vm3, %v4743_v34, -inf }
 0x3df   :  { %v5485_v43 = vmax.f32 %v5483_v12, %v5484_v52  ;;  %v4747_v1 = vpop.f32.mrf.mxu0  ;;  %10128 = vmatmul.mubr.msk.bf16.gmra.mxu0 %vm3508_vm2, %v18458_v51  ;;  %v4276_v49 = vpop.f32.mrf.mxu1  ;;  %v10455_v52 = vld [vmem:[%s17433_s10 + $0x1cc] ss:$16 sps:$4 sm:$0xff]  }
 0x3e0   :  { %v4748_v42 = vadd.f32 %v4747_v1, %v18459_v21  ;;  %10131 = vmatprep.mubr.msk.bf16.mxu0 %vm10824_vm11, %v17908_v8  ;;  %v10453_v49 = vld [vmem:[%s17433_s10 + $0x1c8] ss:$16 sps:$4 sm:$0xff]   ;;  %6343 = vmatprep.subr.bf16.mxu0 %v10455_v52 }
 0x3e1   :  { %v10033_v20 = vpop.f32.mrf.mxu0  ;;  %v15699_v19 = vpop.f32.mrf.mxu1  ;;  %6344 = vmatpush2.bf16.msra.mxu0 %v10453_v49 }
 0x3e2   :  { %v5486_v61 = vsel %vm5311_vm3, %v4748_v42, -inf  ;;  %18460 = vst [vmem:[#allocation31_spill] sm:$0xff] %v15699_v19  ;;  %v18467_v19 = vld [vmem:[#allocation42_spill] sm:$0xff] }
 0x3e3   :  { %v5487_v34 = vmax.f32 %v5485_v43, %v5486_v61  ;;  %v4750_v58 = vpop.f32.mrf.mxu0  ;;  %v4279_v57 = vpop.f32.mrf.mxu1 }
 0x3e4   :  { %v4751_v12 = vadd.f32 %v4750_v58, %v14941_v2  ;;  %v18463_v2 = vld [vmem:[#allocation16_spill] sm:$0xff] }
 0x3e5   :  { %v10034_v25 = vpop.f32.mrf.mxu0  ;;  %v15704_v37 = vpop.f32.mrf.mxu1  ;;  %v18464_v21 = vpack.c.bf16 %v18462_v55, %v18463_v2 }
 0x3e6   :  { %v5220_v51 = vsel %vm5130_vm14, %v4751_v12, -inf  ;;  %18461 = vst [vmem:[#allocation93_spill] sm:$0xff] %v15704_v37 }
 0x3e7   :  { %v5488_v43 = vsel %vm5311_vm3, %v5220_v51, -inf  ;;  %v4755_v1 = vpop.f32.mrf.mxu0  ;;  %10132 = vmatmul.mubr.msk.bf16.gmra.mxu0 %vm3508_vm2, %v18464_v21  ;;  %v4284_v20 = vpop.f32.mrf.mxu1 }
 0x3e8   :  { %v5489_v42 = vmax.f32 %v5487_v34, %v5488_v43  ;;  %10135 = vmatprep.mubr.msk.bf16.mxu0 %vm10824_vm11, %v17908_v8  ;;  %v4756_v12 = vadd.f32 %v4755_v1, %v14952_v39 }
 0x3e9   :  { %v10037_v61 = vpop.f32.mrf.mxu0  ;;  %v15720_v57 = vpop.f32.mrf.mxu1 }
 0x3ea   :  { %v5490_v58 = vrot.slane %v5489_v42, 4  ;;  %v5496_v34 = vsel %vm5311_vm3, %v4756_v12, -inf  ;;  %v18466_v61 = vld [vmem:[#allocation169_spill] sm:$0xff] }
 0x3eb   :  { %v4758_v25 = vpop.f32.mrf.mxu0  ;;  %v4287_v55 = vpop.f32.mrf.mxu1  ;;  %v18468_v39 = vpack.c.bf16 %v18466_v61, %v18467_v19 }
 0x3ec   :  { %v5491_v51 = vmax.f32 %v5489_v42, %v5490_v58  ;;  %v4759_v37 = vadd.f32 %v4758_v25, %v14969_v60 }
 0x3ed   :  { %v10038_v2 = vpop.f32.mrf.mxu0  ;;  %v15725_v20 = vpop.f32.mrf.mxu1 }
 0x3ee   :  { %v5492_v21 = vrot.slane %v5491_v51, 2  ;;  %v5497_v43 = vsel %vm5311_vm3, %v4759_v37, -inf  ;;  %18465 = vst [vmem:[#allocation143_spill] sm:$0xff] %v15725_v20 }
 0x3ef   :  { %v5498_v52 = vmax.f32 %v5496_v34, %v5497_v43  ;;  %v4763_v49 = vpop.f32.mrf.mxu0  ;;  %10136 = vmatmul.mubr.msk.bf16.gmra.mxu0 %vm3508_vm2, %v18468_v39  ;;  %v4292_v60 = vpop.f32.mrf.mxu1 }
 0x3f0   :  { %v5493_v1 = vmax.f32 %v5491_v51, %v5492_v21  ;;  %v4764_v42 = vadd.f32 %v4763_v49, %v14988_v7  ;;  %10139 = vmatprep.mubr.msk.bf16.mxu0 %vm10824_vm11, %v17908_v8  ;;  %v18469_v60 = vld [vmem:[#allocation173_spill] sm:$0xff] }
 0x3f1   :  { %v10041_v58 = vpop.f32.mrf.mxu0  ;;  %v15735_v25 = vpop.f32.mrf.mxu1 }
 0x3f2   :  { %v5494_v12 = vrot.slane %v5493_v1, 1  ;;  %v5499_v37 = vsel %vm5311_vm3, %v4764_v42, -inf  ;;  %v18470_v58 = vld [vmem:[#allocation46_spill] sm:$0xff] }
 0x3f3   :  { %v5500_v55 = vmax.f32 %v5498_v52, %v5499_v37  ;;  %v4766_v2 = vpop.f32.mrf.mxu0  ;;  %v4295_v43 = vpop.f32.mrf.mxu1  ;;  %v18471_v20 = vpack.c.bf16 %v18469_v60, %v18470_v58  ;;  %v18474_v60 = vld [vmem:[#allocation51_spill] sm:$0xff] }
 0x3f4   :  { %v5495_v34 = vmax.f32 %v5493_v1, %v5494_v12  ;;  %v4767_v19 = vadd.f32 %v4766_v2, %v15014_v18  ;;  %v10456_v43 = vld [vmem:[%s17433_s10 + $0x1a8] ss:$16 sps:$4 sm:$0xff]  }
 0x3f5   :  { %v10042_v61 = vpop.f32.mrf.mxu0  ;;  %v15739_v21 = vpop.f32.mrf.mxu1 }
 0x3f6   :  { %v6559_v51 = vpack.c.bf16 %v5495_v34, %v5495_v34  ;;  %v5501_v7 = vsel %vm5311_vm3, %v4767_v19, -inf }
 0x3f7   :  { %v5502_v49 = vmax.f32 %v5500_v55, %v5501_v7  ;;  %v4771_v39 = vpop.f32.mrf.mxu0  ;;  %10140 = vmatmul.mubr.msk.bf16.gmra.mxu0 %vm3508_vm2, %v18471_v20  ;;  %v4300_v1 = vpop.f32.mrf.mxu1  ;;  %v10458_v20 = vld [vmem:[%s17433_s10 + $0x1ac] ss:$16 sps:$4 sm:$0xff]  }
 0x3f8   :  { %v6611_v42 = vunpack.c.l.b16 %v6559_v51  ;;  %v4772_v52 = vadd.f32 %v4771_v39, %v15030_v17  ;;  %10143 = vmatprep.mubr.msk.bf16.mxu0 %vm10824_vm11, %v17908_v8  ;;  %6345 = vmatprep.subr.bf16.mxu0 %v10458_v20  ;;  %v18473_v39 = vld [vmem:[#allocation174_spill] sm:$0xff]  ;;  %v10459_v1 = vld [vmem:[%s17433_s10 + $0x188] ss:$16 sps:$4 sm:$0xff]  }
 0x3f9   :  { %v10045_v18 = vpop.f32.mrf.mxu0  ;;  %v15753_v55 = vpop.f32.mrf.mxu1  ;;  %6346 = vmatpush2.bf16.msra.mxu0 %v10456_v43  ;;  %v18475_v58 = vpack.c.bf16 %v18473_v39, %v18474_v60  ;;  %v10462_v43 = vld [vmem:[%s17433_s10 + $0x168] ss:$16 sps:$4 sm:$0xff]   ;;  %v18476_v60 = vld [vmem:[#allocation54_spill] sm:$0xff] }
 0x3fa   :  { %v15750_v12 = vsel %vm18472_vm6, %v6611_v42, %v15669_v33  ;;  %v5503_v37 = vsel %vm5311_vm3, %v4772_v52, -inf }
 0x3fb   :  { %v5504_v2 = vmax.f32 %v5502_v49, %v5503_v37  ;;  %v4774_v34 = vpop.f32.mrf.mxu0  ;;  %v4303_v19 = vpop.f32.mrf.mxu1 }
 0x3fc   :  { %v4775_v17 = vadd.f32 %v4774_v34, %v15053_v26  ;;  %v10461_v26 = vld [vmem:[%s17433_s10 + $0x18c] ss:$16 sps:$4 sm:$0xff]  }
 0x3fd   :  { %v10046_v61 = vpop.f32.mrf.mxu0  ;;  %v15763_v51 = vpop.f32.mrf.mxu1  ;;  %6347 = vmatprep.subr.bf16.mxu0 %v10461_v26 }
 0x3fe   :  { %v5505_v33 = vsel %vm5311_vm3, %v4775_v17, -inf  ;;  %6348 = vmatpush2.bf16.msra.mxu0 %v10459_v1  ;;  %v10465_v1 = vld [vmem:[%s17433_s10 + $0x148] ss:$16 sps:$4 sm:$0xff]  }
 0x3ff   :  { %v5506_v7 = vmax.f32 %v5504_v2, %v5505_v33  ;;  %v4779_v49 = vpop.f32.mrf.mxu0  ;;  %10144 = vmatmul.mubr.msk.bf16.gmra.mxu0 %vm3508_vm2, %v18475_v58  ;;  %v4308_v52 = vpop.f32.mrf.mxu1  ;;  %v18477_v58 = vld [vmem:[#allocation85_spill] sm:$0xff] }
 0x400   :  { %v4780_v42 = vadd.f32 %v4779_v49, %v15069_v41  ;;  %10147 = vmatprep.mubr.msk.bf16.mxu0 %vm10824_vm11, %v17908_v8  ;;  %v10464_v41 = vld [vmem:[%s17433_s10 + $0x16c] ss:$16 sps:$4 sm:$0xff]   ;;  %v18478_v26 = vpack.c.bf16 %v18476_v60, %v18477_v58  ;;  %v18479_v58 = vld [vmem:[#allocation178_spill] sm:$0xff] }
 0x401   :  { %v10049_v18 = vpop.f32.mrf.mxu0  ;;  %v15779_v2 = vpop.f32.mrf.mxu1  ;;  %6349 = vmatprep.subr.bf16.mxu0 %v10464_v41 }
 0x402   :  { %v5507_v37 = vsel %vm5311_vm3, %v4780_v42, -inf  ;;  %6350 = vmatpush2.bf16.msra.mxu0 %v10462_v43 }
 0x403   :  { %v5508_v34 = vmax.f32 %v5506_v7, %v5507_v37  ;;  %v4782_v20 = vpop.f32.mrf.mxu0  ;;  %v4311_v19 = vpop.f32.mrf.mxu1 }
 0x404   :  { %v4783_v17 = vadd.f32 %v4782_v20, %v15093_v23  ;;  %v10467_v23 = vld [vmem:[%s17433_s10 + $0x14c] ss:$16 sps:$4 sm:$0xff]  }
 0x405   :  { %v10050_v61 = vpop.f32.mrf.mxu0  ;;  %v15789_v49 = vpop.f32.mrf.mxu1  ;;  %6351 = vmatprep.subr.bf16.mxu0 %v10467_v23 }
 0x406   :  { %v5509_v33 = vsel %vm5311_vm3, %v4783_v17, -inf  ;;  %6352 = vmatpush2.bf16.msra.mxu0 %v10465_v1  ;;  %v10470_v17 = vld [vmem:[%s17433_s10 + $0x12c] ss:$16 sps:$4 sm:$0xff]  }
 0x407   :  { %v5510_v7 = vmax.f32 %v5508_v34, %v5509_v33  ;;  %v4787_v39 = vpop.f32.mrf.mxu0  ;;  %10148 = vmatmul.mubr.msk.bf16.gmra.mxu0 %vm3508_vm2, %v18478_v26  ;;  %v4316_v52 = vpop.f32.mrf.mxu1  ;;  %6353 = vmatprep.subr.bf16.mxu0 %v10470_v17  ;;  %v18480_v26 = vld [vmem:[#allocation177_spill] sm:$0xff] }
 0x408   :  { %v4788_v42 = vadd.f32 %v4787_v39, %v15109_v15  ;;  %10151 = vmatprep.mubr.msk.bf16.mxu0 %vm10824_vm11, %v17908_v8  ;;  %v10468_v15 = vld [vmem:[%s17433_s10 + $0x128] ss:$16 sps:$4 sm:$0xff]   ;;  %v18481_v23 = vpack.c.bf16 %v18479_v58, %v18480_v26 }
 0x409   :  { %v10053_v18 = vpop.f32.mrf.mxu0  ;;  %v15806_v34 = vpop.f32.mrf.mxu1 }
 0x40a   :  { %v5229_v37 = vsel %vm5130_vm14, %v4788_v42, -inf  ;;  %6354 = vmatpush2.bf16.msra.mxu0 %v10468_v15  ;;  %v10471_v42 = vld [vmem:[%s17433_s10 + $0x108] ss:$16 sps:$4 sm:$0xff]   ;;  %v5735_v18 = vld [vmem:[%s17434_s9 + $0x30] sm:$0xff] }
 0x40b   :  { %v5511_v20 = vsel %vm5311_vm3, %v5229_v37, -inf  ;;  %v4790_v41 = vpop.f32.mrf.mxu0  ;;  %v4319_v43 = vpop.f32.mrf.mxu1  ;;  %v5732_v37 = vld [vmem:[%s17434_s9 + $0x18] sm:$0xff] }
 0x40c   :  { %v15815_v19 = vmax.f32 %v5510_v7, %v5511_v20  ;;  %v4791_v33 = vadd.f32 %v4790_v41, %v15139_v46  ;;  %v10473_v7 = vld [vmem:[%s17433_s10 + $0x10c] ss:$16 sps:$4 sm:$0xff]   ;;  %v5731_v20 = vld [vmem:[%s17434_s9 + $0x10] sm:$0xff] }
 0x40d   :  { %v10054_v61 = vpop.f32.mrf.mxu0  ;;  %v15818_v39 = vpop.f32.mrf.mxu1  ;;  %v5736_v46 = vld [vmem:[%s17434_s9 + $0x38] sm:$0xff]  ;;  %6355 = vmatprep.subr.bf16.mxu0 %v10473_v7 }
 0x40e   :  { %6497 = vmatprep.subr.mxu1 %v5736_v46  ;;  %6356 = vmatpush2.bf16.msra.mxu0 %v10471_v42  ;;  %v18482_v42 = vld [vmem:[#allocation181_spill] sm:$0xff] }
 0x40f   :  { %v4795_v60 = vpop.f32.mrf.mxu0  ;;  %10152 = vmatmul.mubr.msk.bf16.gmra.mxu0 %vm3508_vm2, %v18481_v23  ;;  %v4324_v1 = vpop.f32.mrf.mxu1  ;;  %6498 = vmatpush1.msra.mxu1 %v5735_v18 }
 0x410   :  { %v4796_v52 = vadd.f32 %v4795_v60, %v15158_v3  ;;  %10155 = vmatprep.mubr.msk.bf16.mxu0 %vm10824_vm11, %v17908_v8  ;;  %v5519_v3 = vsel %vm5311_vm3, %v4791_v33, -inf  ;;  %6499 = vmatprep.subr.mxu1 %v5732_v37 }
 0x411   :  { %v10057_v41 = vpop.f32.mrf.mxu0  ;;  %v15847_v17 = vpop.f32.mrf.mxu1  ;;  %6500 = vmatpush1.msra.mxu1 %v5731_v20 }
 0x412   :  { %v5520_v15 = vsel %vm5311_vm3, %v4796_v52, -inf  ;;  %9595 = vmatmul.mubr.msk.f32.vlgmr.msra.gmra.mxu1 %vm6376_vm4, %v15634_v50  ;;  %v18483_v52 = vld [vmem:[#allocation180_spill] sm:$0xff] }
 0x413   :  { %v5521_v43 = vmax.f32 %v5519_v3, %v5520_v15  ;;  %v4798_v61 = vpop.f32.mrf.mxu0  ;;  %v4327_v58 = vpop.f32.mrf.mxu1  ;;  %6539 = vmatprep.mubr.f32.mxu1 %v17908_v8  ;;  %v18484_v1 = vpack.c.bf16 %v18482_v42, %v18483_v52 }
 0x414   :  { %v4799_v60 = vadd.f32 %v4798_v61, %v15181_v44  ;;  %v18485_v61 = vmov 0  }
 0x415   :  { %v10058_v26 = vpop.f32.mrf.mxu0  ;;  %v15854_v23 = vpop.f32.mrf.mxu1 }
 0x416   :  { %v5522_v33 = vsel %vm5311_vm3, %v4799_v60, -inf  ;;  %9596 = vmatmul.mubr.msk.f32.gmra.mxu1 %vm6376_vm4, %v15650_v47 }
 0x417   :  { %v5523_v7 = vmax.f32 %v5521_v43, %v5522_v33  ;;  %v4803_v46 = vpop.f32.mrf.mxu0  ;;  %10156 = vmatmul.mubr.msk.bf16.gmra.mxu0 %vm3508_vm2, %v18484_v1  ;;  %v4332_v18 = vpop.f32.mrf.mxu1  ;;  %6545 = vmatprep.mubr.f32.mxu1 %v17908_v8  ;;  %v18486_v33 = vld [vmem:[#allocation186_spill] sm:$0xff] }
 0x418   :  { %v4804_v44 = vadd.f32 %v4803_v46, %v15195_v16  ;;  %10159 = vmatprep.mubr.msk.bf16.mxu0 %vm10824_vm11, %v17908_v8  ;;  %v18487_v46 = vld [vmem:[#allocation184_spill] sm:$0xff] }
 0x419   :  { %v10061_v50 = vpop.f32.mrf.mxu0  ;;  %v15867_v20 = vpop.f32.mrf.mxu1  ;;  %v18488_v42 = vpack.c.bf16 %v18486_v33, %v18487_v46 }
 0x41a   :  { %v5524_v37 = vsel %vm5311_vm3, %v4804_v44, -inf  ;;  %9597 = vmatmul.mubr.msk.f32.gmra.mxu1 %vm6376_vm4, %v15664_v62  ;;  %v5513_v50 = vrot.slane %v15815_v19, 4 }
 0x41b   :  { %v5525_v41 = vmax.f32 %v5523_v7, %v5524_v37  ;;  %v4806_v3 = vpop.f32.mrf.mxu0  ;;  %v4335_v43 = vpop.f32.mrf.mxu1  ;;  %6757 = vmatprep.mubr.bf16.mxu1 %v18485_v61 }
 0x41c   :  { %v4807_v15 = vadd.f32 %v4806_v3, %v15209_v0 }
 0x41d   :  { %v10062_v16 = vpop.f32.mrf.mxu0  ;;  %v15874_v60 = vpop.f32.mrf.mxu1 }
 0x41e   :  { %v5526_v47 = vsel %vm5311_vm3, %v4807_v15, -inf }
 0x41f   :  { %v5527_v58 = vmax.f32 %v5525_v41, %v5526_v47  ;;  %v4811_v26 = vpop.f32.mrf.mxu0  ;;  %10160 = vmatmul.mubr.msk.bf16.gmra.mxu0 %vm3508_vm2, %v18488_v42  ;;  %v4340_v7 = vpop.f32.mrf.mxu1  ;;  %v18489_v47 = vld [vmem:[#allocation190_spill] sm:$0xff] }
 0x420   :  { %v4812_v0 = vadd.f32 %v4811_v26, %v15219_v56  ;;  %10163 = vmatprep.mubr.msk.bf16.mxu0 %vm10824_vm11, %v17908_v8  ;;  %v18490_v26 = vld [vmem:[#allocation188_spill] sm:$0xff] }
 0x421   :  { %v10065_v62 = vpop.f32.mrf.mxu0  ;;  %v15884_v1 = vpop.f32.mrf.mxu1  ;;  %v18491_v33 = vpack.c.bf16 %v18489_v47, %v18490_v26 }
 0x422   :  { %v5528_v52 = vsel %vm5311_vm3, %v4812_v0, -inf }
 0x423   :  { %v5529_v44 = vmax.f32 %v5527_v58, %v5528_v52  ;;  %v4814_v18 = vpop.f32.mrf.mxu0  ;;  %v4343_v41 = vpop.f32.mrf.mxu1  ;;  %v5514_v58 = vmax.f32 %v15815_v19, %v5513_v50 }
 0x424   :  { %v4815_v37 = vadd.f32 %v4814_v18, %v15236_v38 }
 0x425   :  { %v10066_v3 = vpop.f32.mrf.mxu0  ;;  %v15889_v56 = vpop.f32.mrf.mxu1 }
 0x426   :  { %v5530_v15 = vsel %vm5311_vm3, %v4815_v37, -inf }
 0x427   :  { %v5531_v43 = vmax.f32 %v5529_v44, %v5530_v15  ;;  %v4819_v16 = vpop.f32.mrf.mxu0  ;;  %10164 = vmatmul.mubr.msk.bf16.gmra.mxu0 %vm3508_vm2, %v18491_v33  ;;  %v4348_v42 = vpop.f32.mrf.mxu1  ;;  %v5515_v44 = vrot.slane %v5514_v58, 2  ;;  %v18492_v15 = vld [vmem:[#allocation193_spill] sm:$0xff] }
 0x428   :  { %v4820_v46 = vadd.f32 %v4819_v16, %v15247_v45  ;;  %10167 = vmatprep.mubr.msk.bf16.mxu0 %vm10824_vm11, %v17908_v8  ;;  %v18493_v16 = vld [vmem:[#allocation192_spill] sm:$0xff] }
 0x429   :  { %v10069_v38 = vpop.f32.mrf.mxu0  ;;  %v15900_v7 = vpop.f32.mrf.mxu1  ;;  %v18494_v47 = vpack.c.bf16 %v18492_v15, %v18493_v16 }
 0x42a   :  { %v5532_v0 = vsel %vm5311_vm3, %v4820_v46, -inf }
 0x42b   :  { %v5533_v62 = vmax.f32 %v5531_v43, %v5532_v0  ;;  %v4822_v52 = vpop.f32.mrf.mxu0  ;;  %v4351_v37 = vpop.f32.mrf.mxu1  ;;  %v5516_v43 = vmax.f32 %v5514_v58, %v5515_v44 }
 0x42c   :  { %v4823_v18 = vadd.f32 %v4822_v52, %v15261_v11 }
 0x42d   :  { %v10070_v41 = vpop.f32.mrf.mxu0  ;;  %v15905_v45 = vpop.f32.mrf.mxu1  ;;  %v5517_v52 = vrot.slane %v5516_v43, 1 }
 0x42e   :  { %v5238_v19 = vsel %vm5130_vm14, %v4823_v18, -inf }
 0x42f   :  { %v5534_v50 = vsel %vm5311_vm3, %v5238_v19, -inf  ;;  %v4827_v3 = vpop.f32.mrf.mxu0  ;;  %10168 = vmatmul.mubr.msk.bf16.gmra.mxu0 %vm3508_vm2, %v18494_v47  ;;  %v4356_v33 = vpop.f32.mrf.mxu1  ;;  %v18495_v47 = vld [vmem:[#allocation195_spill] sm:$0xff] }
 0x430   :  { %v5535_v26 = vmax.f32 %v5533_v62, %v5534_v50  ;;  %10171 = vmatprep.mubr.msk.bf16.mxu0 %vm10824_vm11, %v17908_v8  ;;  %v4828_v42 = vadd.f32 %v4827_v3, %v15272_v29  ;;  %v18496_v29 = vld [vmem:[#allocation194_spill] sm:$0xff]  ;;  %v5518_v33 = vmax.f32 %v5516_v43, %v5517_v52 }
 0x431   :  { %v10073_v11 = vpop.f32.mrf.mxu0  ;;  %v15915_v38 = vpop.f32.mrf.mxu1  ;;  %v18497_v3 = vpack.c.bf16 %v18495_v47, %v18496_v29 }
 0x432   :  { %v5536_v46 = vrot.slane %v5535_v26, 4  ;;  %v5542_v58 = vsel %vm5311_vm3, %v4828_v42, -inf }
 0x433   :  { %v4830_v0 = vpop.f32.mrf.mxu0  ;;  %v4359_v41 = vpop.f32.mrf.mxu1 }
 0x434   :  { %v5537_v18 = vmax.f32 %v5535_v26, %v5536_v46  ;;  %v4831_v37 = vadd.f32 %v4830_v0, %v15292_v48 }
 0x435   :  { %v10074_v19 = vpop.f32.mrf.mxu0  ;;  %v15920_v44 = vpop.f32.mrf.mxu1 }
 0x436   :  { %v5538_v15 = vrot.slane %v5537_v18, 2  ;;  %v5543_v62 = vsel %vm5311_vm3, %v4831_v37, -inf }
 0x437   :  { %v5544_v50 = vmax.f32 %v5542_v58, %v5543_v62  ;;  %v4835_v16 = vpop.f32.mrf.mxu0  ;;  %10172 = vmatmul.mubr.msk.bf16.gmra.mxu0 %vm3508_vm2, %v18497_v3  ;;  %v4364_v11 = vpop.f32.mrf.mxu1  ;;  %v6560_v58 = vpack.c.bf16 %v5518_v33, %v5518_v33  ;;  %v18498_v3 = vld [vmem:[#allocation198_spill] sm:$0xff] }
 0x438   :  { %v5539_v26 = vmax.f32 %v5537_v18, %v5538_v15  ;;  %v4836_v48 = vadd.f32 %v4835_v16, %v15302_v40  ;;  %10175 = vmatprep.mubr.msk.bf16.mxu0 %vm10824_vm11, %v17908_v8  ;;  %v18499_v11 = vld [vmem:[#allocation97_spill] sm:$0xff] }
 0x439   :  { %v10077_v46 = vpop.f32.mrf.mxu0  ;;  %v15930_v37 = vpop.f32.mrf.mxu1 }
 0x43a   :  { %v5540_v42 = vrot.slane %v5539_v26, 1  ;;  %v5545_v0 = vsel %vm5311_vm3, %v4836_v48, -inf  ;;  %v18500_v48 = vpack.c.bf16 %v18498_v3, %v18499_v11  ;;  %v18503_v3 = vld [vmem:[#allocation200_spill] sm:$0xff] }
 0x43b   :  { %v5546_v41 = vmax.f32 %v5544_v50, %v5545_v0  ;;  %v4838_v19 = vpop.f32.mrf.mxu0  ;;  %v4367_v43 = vpop.f32.mrf.mxu1  ;;  %v6612_v50 = vunpack.c.l.b16 %v6560_v58 }
 0x43c   :  { %v5541_v62 = vmax.f32 %v5539_v26, %v5540_v42  ;;  %v4839_v47 = vadd.f32 %v4838_v19, %v15320_v31 }
 0x43d   :  { %v10078_v52 = vpop.f32.mrf.mxu0  ;;  %v15934_v15 = vpop.f32.mrf.mxu1 }
 0x43e   :  { %v6561_v18 = vpack.c.bf16 %v5541_v62, %v5541_v62  ;;  %v5547_v40 = vsel %vm5311_vm3, %v4839_v47, -inf }
 0x43f   :  { %v5548_v16 = vmax.f32 %v5546_v41, %v5547_v40  ;;  %v4843_v29 = vpop.f32.mrf.mxu0  ;;  %10176 = vmatmul.mubr.msk.bf16.gmra.mxu0 %vm3508_vm2, %v18500_v48  ;;  %v4372_v26 = vpop.f32.mrf.mxu1 }
 0x440   :  { %v6613_v46 = vunpack.c.l.b16 %v6561_v18  ;;  %v4844_v33 = vadd.f32 %v4843_v29, %v15330_v27  ;;  %10179 = vmatprep.mubr.msk.bf16.mxu0 %vm10824_vm11, %v17908_v8  ;;  %v18502_v29 = vld [vmem:[#allocation201_spill] sm:$0xff] }
 0x441   :  { %v10081_v31 = vpop.f32.mrf.mxu0  ;;  %v15947_v41 = vpop.f32.mrf.mxu1  ;;  %v18504_v11 = vpack.c.bf16 %v18502_v29, %v18503_v3 }
 0x442   :  { %v15944_v42 = vsel %vm18501_vm9, %v6613_v46, %v6612_v50  ;;  %v5549_v0 = vsel %vm5311_vm3, %v4844_v33, -inf }
 0x443   :  { %v5550_v19 = vmax.f32 %v5548_v16, %v5549_v0  ;;  %v4846_v62 = vpop.f32.mrf.mxu0  ;;  %v4375_v58 = vpop.f32.mrf.mxu1 }
 0x444   :  { %v4847_v47 = vadd.f32 %v4846_v62, %v15344_v28 }
 0x445   :  { %v10082_v43 = vpop.f32.mrf.mxu0  ;;  %v15951_v52 = vpop.f32.mrf.mxu1 }
 0x446   :  { %v5551_v27 = vsel %vm5311_vm3, %v4847_v47, -inf  ;;  %v18505_v43 = vld [vmem:[#allocation204_spill] sm:$0xff] }
 0x447   :  { %v5552_v18 = vmax.f32 %v5550_v19, %v5551_v27  ;;  %v4851_v40 = vpop.f32.mrf.mxu0  ;;  %10180 = vmatmul.mubr.msk.bf16.gmra.mxu0 %vm3508_vm2, %v18504_v11  ;;  %v4380_v50 = vpop.f32.mrf.mxu1  ;;  %v18506_v27 = vld [vmem:[#allocation59_spill] sm:$0xff] }
 0x448   :  { %v4852_v48 = vadd.f32 %v4851_v40, %v15354_v9  ;;  %10183 = vmatprep.mubr.msk.bf16.mxu0 %vm10824_vm11, %v17908_v8  ;;  %v18507_v40 = vpack.c.bf16 %v18505_v43, %v18506_v27 }
 0x449   :  { %v10085_v28 = vpop.f32.mrf.mxu0  ;;  %v15961_v46 = vpop.f32.mrf.mxu1 }
 0x44a   :  { %v5553_v16 = vsel %vm5311_vm3, %v4852_v48, -inf }
 0x44b   :  { %v5554_v33 = vmax.f32 %v5552_v18, %v5553_v16  ;;  %v4854_v26 = vpop.f32.mrf.mxu0  ;;  %v4383_v0 = vpop.f32.mrf.mxu1 }
 0x44c   :  { %v4855_v31 = vadd.f32 %v4854_v26, %v15369_v30 }
 0x44d   :  { %v10086_v19 = vpop.f32.mrf.mxu0  ;;  %v15965_v47 = vpop.f32.mrf.mxu1 }
 0x44e   :  { %v5555_v62 = vsel %vm5311_vm3, %v4855_v31, -inf  ;;  %v18509_v31 = vld [vmem:[#allocation23_spill] sm:$0xff] }
 0x44f   :  { %v5556_v9 = vmax.f32 %v5554_v33, %v5555_v62  ;;  %v4859_v58 = vpop.f32.mrf.mxu0  ;;  %10184 = vmatmul.mubr.msk.bf16.gmra.mxu0 %vm3508_vm2, %v18507_v40  ;;  %v4388_v3 = vpop.f32.mrf.mxu1  ;;  %v18510_v62 = vld [vmem:[#allocation206_spill] sm:$0xff]  ;;  %v18513_v40 = vld [vmem:[#allocation65_spill] sm:$0xff] }
 0x450   :  { %v4860_v29 = vadd.f32 %v4859_v58, %v15379_v5  ;;  %10187 = vmatprep.mubr.msk.bf16.mxu0 %vm10824_vm11, %v17908_v8  ;;  %v18511_v58 = vld [vmem:[#allocation61_spill] sm:$0xff] }
 0x451   :  { %v10089_v30 = vpop.f32.mrf.mxu0  ;;  %v15976_v11 = vpop.f32.mrf.mxu1  ;;  %v18512_v43 = vpack.c.bf16 %v18510_v62, %v18511_v58 }
 0x452   :  { %v5247_v18 = vsel %vm5130_vm14, %v4860_v29, -inf  ;;  %18508 = vst [vmem:[#allocation69_spill] sm:$0xff] %v15976_v11 }
 0x453   :  { %v5557_v48 = vsel %vm5311_vm3, %v5247_v18, -inf  ;;  %v4862_v50 = vpop.f32.mrf.mxu0  ;;  %v4391_v16 = vpop.f32.mrf.mxu1 }
 0x454   :  { %v5558_v28 = vmax.f32 %v5556_v9, %v5557_v48  ;;  %v4863_v0 = vadd.f32 %v4862_v50, %v18509_v31 }
 0x455   :  { %v10090_v33 = vpop.f32.mrf.mxu0  ;;  %v15980_v5 = vpop.f32.mrf.mxu1 }
 0x456   :  { %v5559_v26 = vrot.slane %v5558_v28, 4  ;;  %v5565_v18 = vsel %vm5311_vm3, %v4863_v0, -inf  ;;  %v18515_v0 = vld [vmem:[#allocation208_spill] sm:$0xff] }
 0x457   :  { %v4867_v19 = vpop.f32.mrf.mxu0  ;;  %10188 = vmatmul.mubr.msk.bf16.gmra.mxu0 %vm3508_vm2, %v18512_v43  ;;  %v4396_v3 = vpop.f32.mrf.mxu1 }
 0x458   :  { %v5560_v27 = vmax.f32 %v5558_v28, %v5559_v26  ;;  %v4868_v29 = vadd.f32 %v4867_v19, %v18513_v40  ;;  %10191 = vmatprep.mubr.msk.bf16.mxu0 %vm10824_vm11, %v17908_v8 }
 0x459   :  { %v10093_v9 = vpop.f32.mrf.mxu0  ;;  %v15991_v50 = vpop.f32.mrf.mxu1 }
 0x45a   :  { %v5561_v30 = vrot.slane %v5560_v27, 2  ;;  %v5566_v48 = vsel %vm5311_vm3, %v4868_v29, -inf  ;;  %v18514_v9 = vld [vmem:[#allocation209_spill] sm:$0xff] }
 0x45b   :  { %v5567_v16 = vmax.f32 %v5565_v18, %v5566_v48  ;;  %v4870_v33 = vpop.f32.mrf.mxu0  ;;  %v4399_v28 = vpop.f32.mrf.mxu1  ;;  %v18516_v11 = vpack.c.bf16 %v18514_v9, %v18515_v0  ;;  %v18518_v0 = vld [vmem:[#allocation213_spill] sm:$0xff] }
 0x45c   :  { %v5562_v31 = vmax.f32 %v5560_v27, %v5561_v30  ;;  %v4871_v62 = vadd.f32 %v4870_v33, %v15418_v59 }
 0x45d   :  { %v10094_v26 = vpop.f32.mrf.mxu0  ;;  %v15995_v43 = vpop.f32.mrf.mxu1 }
 0x45e   :  { %v5563_v19 = vrot.slane %v5562_v31, 1  ;;  %v5568_v58 = vsel %vm5311_vm3, %v4871_v62, -inf }
 0x45f   :  { %v5569_v40 = vmax.f32 %v5567_v16, %v5568_v58  ;;  %v4875_v3 = vpop.f32.mrf.mxu0  ;;  %10192 = vmatmul.mubr.msk.bf16.gmra.mxu0 %vm3508_vm2, %v18516_v11  ;;  %v4404_v27 = vpop.f32.mrf.mxu1 }
 0x460   :  { %v5564_v29 = vmax.f32 %v5562_v31, %v5563_v19  ;;  %v4876_v18 = vadd.f32 %v4875_v3, %v15432_v53  ;;  %10195 = vmatprep.mubr.msk.bf16.mxu0 %vm10824_vm11, %v17908_v8 }
 0x461   :  { %v10097_v59 = vpop.f32.mrf.mxu0  ;;  %v16005_v33 = vpop.f32.mrf.mxu1 }
 0x462   :  { %v6562_v30 = vpack.c.bf16 %v5564_v29, %v5564_v29  ;;  %v5570_v48 = vsel %vm5311_vm3, %v4876_v18, -inf  ;;  %v18519_v29 = vld [vmem:[#allocation212_spill] sm:$0xff] }
 0x463   :  { %v5571_v16 = vmax.f32 %v5569_v40, %v5570_v48  ;;  %v4878_v62 = vpop.f32.mrf.mxu0  ;;  %v4407_v58 = vpop.f32.mrf.mxu1  ;;  %v18520_v18 = vpack.c.bf16 %v18518_v0, %v18519_v29 }
 0x464   :  { %v6614_v28 = vunpack.c.l.b16 %v6562_v30  ;;  %v4879_v26 = vadd.f32 %v4878_v62, %v15446_v13 }
 0x465   :  { %v10098_v11 = vpop.f32.mrf.mxu0  ;;  %v16013_v19 = vpop.f32.mrf.mxu1 }
 0x466   :  { %v16010_v53 = vsel %vm18517_vm10, %v6614_v28, %v15944_v42  ;;  %v5572_v31 = vsel %vm5311_vm3, %v4879_v26, -inf }
 0x467   :  { %v5573_v3 = vmax.f32 %v5571_v16, %v5572_v31  ;;  %v4883_v9 = vpop.f32.mrf.mxu0  ;;  %10196 = vmatmul.mubr.msk.bf16.gmra.mxu0 %vm3508_vm2, %v18520_v18  ;;  %v4412_v13 = vpop.f32.mrf.mxu1  ;;  %v18521_v31 = vld [vmem:[#allocation215_spill] sm:$0xff] }
 0x468   :  { %v4884_v40 = vadd.f32 %v4883_v9, %v15456_v54  ;;  %10199 = vmatprep.mubr.msk.bf16.mxu0 %vm10824_vm11, %v17908_v8  ;;  %v18522_v9 = vld [vmem:[#allocation55_spill] sm:$0xff] }
 0x469   :  { %v10101_v27 = vpop.f32.mrf.mxu0  ;;  %v16023_v59 = vpop.f32.mrf.mxu1  ;;  %v18523_v0 = vpack.c.bf16 %v18521_v31, %v18522_v9 }
 0x46a   :  { %v5574_v42 = vsel %vm5311_vm3, %v4884_v40, -inf }
 0x46b   :  { %v5575_v30 = vmax.f32 %v5573_v3, %v5574_v42  ;;  %v4886_v48 = vpop.f32.mrf.mxu0  ;;  %v4415_v62 = vpop.f32.mrf.mxu1 }
 0x46c   :  { %v4887_v16 = vadd.f32 %v4886_v48, %v15470_v22 }
 0x46d   :  { %v10102_v28 = vpop.f32.mrf.mxu0  ;;  %v16027_v58 = vpop.f32.mrf.mxu1 }
 0x46e   :  { %v5576_v26 = vsel %vm5311_vm3, %v4887_v16, -inf }
 0x46f   :  { %v5577_v54 = vmax.f32 %v5575_v30, %v5576_v26  ;;  %v4891_v11 = vpop.f32.mrf.mxu0  ;;  %10200 = vmatmul.mubr.msk.bf16.gmra.mxu0 %vm3508_vm2, %v18523_v0  ;;  %v4420_v18 = vpop.f32.mrf.mxu1  ;;  %v18524_v26 = vld [vmem:[#allocation219_spill] sm:$0xff] }
 0x470   :  { %v4892_v29 = vadd.f32 %v4891_v11, %v15487_v4  ;;  %10203 = vmatprep.mubr.msk.bf16.mxu0 %vm10824_vm11, %v17908_v8  ;;  %v18525_v11 = vld [vmem:[#allocation218_spill] sm:$0xff] }
 0x471   :  { %v10105_v22 = vpop.f32.mrf.mxu0  ;;  %v16037_v40 = vpop.f32.mrf.mxu1  ;;  %v18526_v31 = vpack.c.bf16 %v18524_v26, %v18525_v11 }
 0x472   :  { %v5578_v3 = vsel %vm5311_vm3, %v4892_v29, -inf  ;;  %v18527_v29 = vld [vmem:[#allocation25_spill] sm:$0xff] }
 0x473   :  { %v5579_v13 = vmax.f32 %v5577_v54, %v5578_v3  ;;  %v4894_v27 = vpop.f32.mrf.mxu0  ;;  %v4423_v30 = vpop.f32.mrf.mxu1 }
 0x474   :  { %v4895_v42 = vadd.f32 %v4894_v27, %v15501_v24 }
 0x475   :  { %v10106_v48 = vpop.f32.mrf.mxu0  ;;  %v16042_v62 = vpop.f32.mrf.mxu1 }
 0x476   :  { %v5256_v16 = vsel %vm5130_vm14, %v4895_v42, -inf }
 0x477   :  { %v5580_v4 = vsel %vm5311_vm3, %v5256_v16, -inf  ;;  %v4899_v28 = vpop.f32.mrf.mxu0  ;;  %10204 = vmatmul.mubr.msk.bf16.gmra.mxu0 %vm3508_vm2, %v18526_v31  ;;  %v4428_v54 = vpop.f32.mrf.mxu1 }
 0x478   :  { %v5581_v9 = vmax.f32 %v5579_v13, %v5580_v4  ;;  %10207 = vmatprep.mubr.msk.bf16.mxu0 %vm10824_vm11, %v17908_v8  ;;  %v4900_v18 = vadd.f32 %v4899_v28, %v18527_v29  ;;  %v18529_v54 = vld [vmem:[#allocation222_spill] sm:$0xff] }
 0x479   :  { %v10109_v24 = vpop.f32.mrf.mxu0  ;;  %v16052_v22 = vpop.f32.mrf.mxu1 }
 0x47a   :  { %v5582_v0 = vrot.slane %v5581_v9, 4  ;;  %v5588_v26 = vsel %vm5311_vm3, %v4900_v18, -inf  ;;  %v18530_v24 = vld [vmem:[#allocation221_spill] sm:$0xff] }
 0x47b   :  { %v4902_v3 = vpop.f32.mrf.mxu0  ;;  %v4431_v30 = vpop.f32.mrf.mxu1  ;;  %v18531_v28 = vpack.c.bf16 %v18529_v54, %v18530_v24 }
 0x47c   :  { %v5583_v27 = vmax.f32 %v5581_v9, %v5582_v0  ;;  %v4903_v42 = vadd.f32 %v4902_v3, %v15526_v32 }
 0x47d   :  { %v10110_v48 = vpop.f32.mrf.mxu0  ;;  %v16057_v4 = vpop.f32.mrf.mxu1 }
 0x47e   :  { %v5584_v16 = vrot.slane %v5583_v27, 2  ;;  %v5589_v13 = vsel %vm5311_vm3, %v4903_v42, -inf  ;;  %18528 = vst [vmem:[#allocation98_spill] sm:$0xff] %v16057_v4 }
 0x47f   :  { %v5590_v11 = vmax.f32 %v5588_v26, %v5589_v13  ;;  %v4907_v31 = vpop.f32.mrf.mxu0  ;;  %10208 = vmatmul.mubr.msk.bf16.gmra.mxu0 %vm3508_vm2, %v18531_v28  ;;  %v16064_v32 = vpop.f32.mrf.mxu1 }
 0x480   :  { %v5585_v29 = vmax.f32 %v5583_v27, %v5584_v16  ;;  %v4908_v9 = vadd.f32 %v4907_v31, %v15536_v14  ;;  %18532 = vst [vmem:[#allocation137_spill] sm:$0xff] %v16064_v32  ;;  %10211 = vmatprep.mubr.msk.bf16.mxu0 %vm10824_vm11, %v17908_v8  ;;  %v18536_v32 = vld [vmem:[#allocation224_spill] sm:$0xff] }
 0x481   :  { %v10113_v0 = vpop.f32.mrf.mxu0  ;;  %v16069_v42 = vpop.f32.mrf.mxu1 }
 0x482   :  { %v5586_v18 = vrot.slane %v5585_v29, 1  ;;  %v5591_v3 = vsel %vm5311_vm3, %v4908_v9, -inf  ;;  %18533 = vst [vmem:[#allocation147_spill] sm:$0xff] %v16069_v42  ;;  %v18535_v0 = vld [vmem:[#allocation225_spill] sm:$0xff] }
 0x483   :  { %v5592_v30 = vmax.f32 %v5590_v11, %v5591_v3  ;;  %v4910_v48 = vpop.f32.mrf.mxu0  ;;  %v16072_v54 = vpop.f32.mrf.mxu1  ;;  %v18537_v4 = vpack.c.bf16 %v18535_v0, %v18536_v32  ;;  %v18540_v0 = vld [vmem:[#allocation66_spill] sm:$0xff] }
 0x484   :  { %v5587_v26 = vmax.f32 %v5585_v29, %v5586_v18  ;;  %v4911_v13 = vadd.f32 %v4910_v48, %v15554_v6  ;;  %18534 = vst [vmem:[#allocation141_spill] sm:$0xff] %v16072_v54 }
 0x485   :  { %v10114_v27 = vpop.f32.mrf.mxu0  ;;  %v6318_v31 = vpop.f32.mrf.mxu1 }
 0x486   :  { %v6563_v14 = vpack.c.bf16 %v5587_v26, %v5587_v26  ;;  %v5593_v16 = vsel %vm5311_vm3, %v4911_v13, -inf  ;;  %v18538_v13 = vld [vmem:[#allocation80_spill] sm:$0xff] }
 0x487   :  { %v5594_v24 = vmax.f32 %v5592_v30, %v5593_v16  ;;  %v4915_v28 = vpop.f32.mrf.mxu0  ;;  %10212 = vmatmul.mubr.msk.bf16.gmra.mxu0 %vm3508_vm2, %v18537_v4  ;;  %v6320_v6 = vpop.f32.mrf.mxu1  ;;  %vm18558_vm2 = vmmov %vm18472_vm6 }
 0x488   :  { %v6615_v9 = vunpack.c.l.b16 %v6563_v14  ;;  %v4916_v11 = vadd.f32 %v4915_v28, %v15560_v36  ;;  %6357 = vmatprep.mubr.bf16.mxu0 %v18422_v35  ;;  %v18539_v28 = vld [vmem:[#allocation20_spill] sm:$0xff] }
 0x489   :  { %v10117_v29 = vpop.f32.mrf.mxu0  ;;  %v6322_v30 = vpop.f32.mrf.mxu1 }
 0x48a   :  { %v16083_v18 = vsel %vm5913_vm0, %v6615_v9, %v16010_v53  ;;  %v5595_v3 = vsel %vm5311_vm3, %v4916_v11, -inf  ;;  %v18541_v9 = vld [vmem:[#allocation132_spill] sm:$0xff]  ;;  %vm18560_vm0 = vmmov %vm18501_vm9 }
 0x48b   :  { %v5596_v48 = vmax.f32 %v5594_v24, %v5595_v3  ;;  %v4918_v26 = vpop.f32.mrf.mxu0  ;;  %v6323_v27 = vpop.f32.mrf.mxu1  ;;  %v10476_v29 = vld [vmem:[%s17436_s11 + $0x64] ss:$16 sps:$4 sm:$0xff]  }
 0x48c   :  { %v4919_v32 = vadd.f32 %v4918_v26, %v18538_v13  ;;  %6733 = vmatprep.subr.bf16.mxu1 %v10476_v29 }
 0x48d   :  { %v10118_v4 = vpop.f32.mrf.mxu0  ;;  %v16088_v36 = vpop.f32.mrf.mxu1 }
 0x48e   :  { %v5597_v14 = vsel %vm5311_vm3, %v4919_v32, -inf  ;;  %v18544_v32 = vld [vmem:[#allocation83_spill] sm:$0xff] }
 0x48f   :  { %v5598_v35 = vmax.f32 %v5596_v48, %v5597_v14  ;;  %v4923_v16 = vpop.f32.mrf.mxu0  ;;  %6358 = vmatmul.mubr.bf16.vlgmr.msra.gmra.mxu0 %v18539_v28  ;;  %v16093_v11 = vpop.f32.mrf.mxu1  ;;  %v10474_v48 = vld [vmem:[%s17436_s11 + $0x60] ss:$16 sps:$4 sm:$0xff]  }
 0x490   :  { %v4924_v53 = vadd.f32 %v4923_v16, %v18540_v0  ;;  %6367 = vmatprep.mubr.bf16.mxu0 %v18541_v9  ;;  %18542 = vst [vmem:[#allocation33_spill] sm:$0xff] %v16093_v11  ;;  %6734 = vmatpush1.bf16.msra.mxu1 %v10474_v48  ;;  %v10479_v16 = vld [vmem:[%s17436_s11 + $0x44] ss:$16 sps:$4 sm:$0xff]  }
 0x491   :  { %v10121_v24 = vpop.f32.mrf.mxu0  ;;  %v16099_v30 = vpop.f32.mrf.mxu1  ;;  %6735 = vmatprep.subr.bf16.mxu1 %v10479_v16 }
 0x492   :  { %v5599_v3 = vsel %vm5311_vm3, %v4924_v53, -inf  ;;  %18543 = vst [vmem:[#allocation71_spill] sm:$0xff] %v16099_v30  ;;  %v10477_v53 = vld [vmem:[%s17436_s11 + $0x40] ss:$16 sps:$4 sm:$0xff]   ;;  %v18552_v30 = vld [vmem:[#allocation139_spill] sm:$0xff] }
 0x493   :  { %v5600_v26 = vmax.f32 %v5598_v35, %v5599_v3  ;;  %v4926_v13 = vpop.f32.mrf.mxu0  ;;  %v16105_v4 = vpop.f32.mrf.mxu1  ;;  %v18546_v24 = vld [vmem:[#allocation134_spill] sm:$0xff]  ;;  %v18548_v3 = vld [vmem:[#allocation27_spill] sm:$0xff] }
 0x494   :  { %v4927_v27 = vadd.f32 %v4926_v13, %v18544_v32  ;;  %18545 = vst [vmem:[#allocation145_spill] sm:$0xff] %v16105_v4  ;;  %6736 = vmatpush1.bf16.msra.mxu1 %v10477_v53  ;;  %v10483_v53 = vld [vmem:[%s17436_s11] ss:$16 sps:$4 sm:$0xff]  }
 0x495   :  { %v10122_v14 = vpop.f32.mrf.mxu0  ;;  %v6464_v0 = vpop.f32.mrf.mxu1 }
 0x496   :  { %v5601_v28 = vsel %vm5311_vm3, %v4927_v27, -inf  ;;  %v16115_v29 = vadd.f32 %v6464_v0, %v6318_v31  ;;  %v10482_v27 = vld [vmem:[%s17436_s11 + $0x24] ss:$16 sps:$4 sm:$0xff]   ;;  %v10480_v31 = vld [vmem:[%s17436_s11 + $0x20] ss:$16 sps:$4 sm:$0xff]  }
 0x497   :  { %v5602_v35 = vmax.f32 %v5600_v26, %v5601_v28  ;;  %v4931_v9 = vpop.f32.mrf.mxu0  ;;  %6368 = vmatmul.mubr.bf16.gmra.mxu0 %v18546_v24  ;;  %v6466_v13 = vpop.f32.mrf.mxu1  ;;  %6737 = vmatprep.subr.bf16.mxu1 %v10482_v27 }
 0x498   :  { %18547 = vst [vmem:[#allocation151_spill] sm:$0xff] %v16115_v29  ;;  %v4932_v48 = vadd.f32 %v4931_v9, %v18548_v3  ;;  %v16118_v14 = vadd.f32 %v6466_v13, %v6320_v6  ;;  %v10485_v6 = vld [vmem:[%s17436_s11 + $0x4] ss:$16 sps:$4 sm:$0xff]   ;;  %6738 = vmatpush1.bf16.msra.mxu1 %v10480_v31  ;;  %v18550_v3 = vld [vmem:[#allocation67_spill] sm:$0xff] }
 0x499   :  { %v10125_v32 = vpop.f32.mrf.mxu0  ;;  %6739 = vmatprep.subr.bf16.mxu1 %v10485_v6 }
 0x49a   :  { %18549 = vst [vmem:[#allocation150_spill] sm:$0xff] %v16118_v14  ;;  %v5265_v26 = vsel %vm5130_vm14, %v4932_v48, -inf }
 0x49b   :  { %v5603_v16 = vsel %vm5311_vm3, %v5265_v26, -inf  ;;  %v4934_v28 = vpop.f32.mrf.mxu0  ;;  %v18551_v26 = vld [vmem:[#allocation89_spill] sm:$0xff] }
 0x49c   :  { %v5604_v0 = vmax.f32 %v5602_v35, %v5603_v16  ;;  %v4935_v48 = vadd.f32 %v4934_v28, %v18550_v3  ;;  %6740 = vmatpush1.bf16.msra.mxu1 %v10483_v53 }
 0x49d   :  { %v10126_v9 = vpop.f32.mrf.mxu0 }
 0x49e   :  { %v5605_v24 = vrot.slane %v5604_v0, 4  ;;  %v5611_v4 = vsel %vm5311_vm3, %v4935_v48, -inf }
 0x49f   :  { %v4939_v13 = vpop.f32.mrf.mxu0 }
 0x4a0   :  { %v5606_v32 = vmax.f32 %v5604_v0, %v5605_v24  ;;  %v4940_v14 = vadd.f32 %v4939_v13, %v18551_v26  ;;  %v18553_v13 = vld [vmem:[#allocation29_spill] sm:$0xff] }
 0x4a1   :  { %v10129_v27 = vpop.f32.mrf.mxu0 }
 0x4a2   :  { %v5607_v29 = vrot.slane %v5606_v32, 2  ;;  %v5612_v35 = vsel %vm5311_vm3, %v4940_v14, -inf }
 0x4a3   :  { %v5613_v31 = vmax.f32 %v5611_v4, %v5612_v35  ;;  %v4942_v16 = vpop.f32.mrf.mxu0  ;;  %v18554_v35 = vld [vmem:[#allocation68_spill] sm:$0xff] }
 0x4a4   :  { %v5608_v54 = vmax.f32 %v5606_v32, %v5607_v29  ;;  %v4943_v9 = vadd.f32 %v4942_v16, %v18552_v30 }
 0x4a5   :  { %v10130_v6 = vpop.f32.mrf.mxu0 }
 0x4a6   :  { %v5609_v42 = vrot.slane %v5608_v54, 1  ;;  %v5614_v28 = vsel %vm5311_vm3, %v4943_v9, -inf }
 0x4a7   :  { %v5615_v3 = vmax.f32 %v5613_v31, %v5614_v28  ;;  %v4947_v0 = vpop.f32.mrf.mxu0 }
 0x4a8   :  { %v5610_v24 = vmax.f32 %v5608_v54, %v5609_v42  ;;  %v4948_v53 = vadd.f32 %v4947_v0, %v18553_v13 }
 0x4a9   :  { %v10133_v26 = vpop.f32.mrf.mxu0 }
 0x4aa   :  { %v6564_v27 = vpack.c.bf16 %v5610_v24, %v5610_v24  ;;  %v5616_v48 = vsel %vm5311_vm3, %v4948_v53, -inf }
 0x4ab   :  { %v5617_v11 = vmax.f32 %v5615_v3, %v5616_v48  ;;  %v4950_v14 = vpop.f32.mrf.mxu0  ;;  %v18555_v3 = vld [vmem:[#allocation31_spill] sm:$0xff]  ;;  %v18556_v48 = vld [vmem:[#allocation93_spill] sm:$0xff] }
 0x4ac   :  { %v6616_v4 = vunpack.c.l.b16 %v6564_v27  ;;  %v4951_v29 = vadd.f32 %v4950_v14, %v18554_v35 }
 0x4ad   :  { %v10134_v32 = vpop.f32.mrf.mxu0 }
 0x4ae   :  { %v6632_v30 = vsel %vm5915_vm5, %v6616_v4, %v16083_v18  ;;  %v5618_v16 = vsel %vm5311_vm3, %v4951_v29, -inf  ;;  %vm7297_vm5 = vcmask 1040384  }
 0x4af   :  { %v5619_v31 = vmax.f32 %v5617_v11, %v5618_v16  ;;  %v4955_v9 = vpop.f32.mrf.mxu0 }
 0x4b0   :  { %v4956_v42 = vadd.f32 %v4955_v9, %v15689_v63 }
 0x4b1   :  { %v10137_v54 = vpop.f32.mrf.mxu0 }
 0x4b2   :  { %v5620_v6 = vsel %vm5311_vm3, %v4956_v42, -inf }
 0x4b3   :  { %v5621_v28 = vmax.f32 %v5619_v31, %v5620_v6  ;;  %v4958_v0 = vpop.f32.mrf.mxu0 }
 0x4b4   :  { %v4959_v24 = vadd.f32 %v4958_v0, %v18555_v3 }
 0x4b5   :  { %v10138_v13 = vpop.f32.mrf.mxu0 }
 0x4b6   :  { %v5622_v53 = vsel %vm5311_vm3, %v4959_v24, -inf }
 0x4b7   :  { %v5623_v26 = vmax.f32 %v5621_v28, %v5622_v53  ;;  %v4963_v27 = vpop.f32.mrf.mxu0 }
 0x4b8   :  { %v4964_v18 = vadd.f32 %v4963_v27, %v18556_v48 }
 0x4b9   :  { %v10141_v14 = vpop.f32.mrf.mxu0 }
 0x4ba   :  { %v5624_v11 = vsel %vm5311_vm3, %v4964_v18, -inf }
 0x4bb   :  { %v5625_v4 = vmax.f32 %v5623_v26, %v5624_v11  ;;  %v4966_v35 = vpop.f32.mrf.mxu0 }
 0x4bc   :  { %v4967_v63 = vadd.f32 %v4966_v35, %v15720_v57 }
 0x4bd   :  { %v10142_v29 = vpop.f32.mrf.mxu0 }
 0x4be   :  { %v5274_v32 = vsel %vm5130_vm14, %v4967_v63, -inf }
 0x4bf   :  { %v5626_v16 = vsel %vm5311_vm3, %v5274_v32, -inf  ;;  %v4971_v31 = vpop.f32.mrf.mxu0 }
 0x4c0   :  { %v5627_v9 = vmax.f32 %v5625_v4, %v5626_v16 }
 0x4c1   :  { %v10145_v42 = vpop.f32.mrf.mxu0 }
 0x4c2   :  { %v5628_v54 = vrot.slane %v5627_v9, 4 }
 0x4c3   :  { %v4974_v6 = vpop.f32.mrf.mxu0 }
 0x4c4   :  { %v5629_v28 = vmax.f32 %v5627_v9, %v5628_v54  ;;  %v4975_v42 = vadd.f32 %v4974_v6, %v15735_v25 }
 0x4c5   :  { %v10146_v0 = vpop.f32.mrf.mxu0 }
 0x4c6   :  { %v5630_v3 = vrot.slane %v5629_v28, 2 }
 0x4c7   :  { %v4979_v24 = vpop.f32.mrf.mxu0 }
 0x4c8   :  { %v5631_v13 = vmax.f32 %v5629_v28, %v5630_v3  ;;  %v18557_v28 = vld [vmem:[#allocation143_spill] sm:$0xff]  ;;  %v4980_v3 = vadd.f32 %v4979_v24, %v15739_v21 }
 0x4c9   :  { %v10149_v53 = vpop.f32.mrf.mxu0  ;;  %v4972_v0 = vadd.f32 %v4971_v31, %v18557_v28 }
 0x4ca   :  { %v5632_v26 = vrot.slane %v5631_v13, 1  ;;  %v10488_v53 = vld [vmem:[%s17436_s11 + $0x6c] ss:$16 sps:$4 sm:$0xff]   ;;  %v5637_v25 = vsel %vm5311_vm3, %v4980_v3, -inf }
 0x4cb   :  { %v4982_v27 = vpop.f32.mrf.mxu0  ;;  %6784 = vmatprep.subr.bf16.mxu1 %v10488_v53 }
 0x4cc   :  { %v5633_v57 = vmax.f32 %v5631_v13, %v5632_v26  ;;  %v4983_v26 = vadd.f32 %v4982_v27, %v15753_v55 }
 0x4cd   :  { %v10150_v48 = vpop.f32.mrf.mxu0 }
 0x4ce   :  { %v6565_v18 = vpack.c.bf16 %v5633_v57, %v5633_v57  ;;  %v5634_v48 = vsel %vm5311_vm3, %v4972_v0, -inf  ;;  %v5639_v21 = vsel %vm5311_vm3, %v4983_v26, -inf }
 0x4cf   :  { %v4987_v14 = vpop.f32.mrf.mxu0 }
 0x4d0   :  { %v6617_v11 = vunpack.c.l.b16 %v6565_v18  ;;  %v4988_v6 = vadd.f32 %v4987_v14, %v15763_v51 }
 0x4d1   :  { %v10153_v35 = vpop.f32.mrf.mxu0 }
 0x4d2   :  { %v16158_v63 = vsel %vm5917_vm15, %v6617_v11, %v6632_v30  ;;  %v5635_v30 = vsel %vm5311_vm3, %v4975_v42, -inf  ;;  %vm7281_vm15 = vcmask 146432  }
 0x4d3   :  { %v4990_v4 = vpop.f32.mrf.mxu0  ;;  %v5636_v18 = vmax.f32 %v5634_v48, %v5635_v30 }
 0x4d4   :  { %v4991_v24 = vadd.f32 %v4990_v4, %v15779_v2 }
 0x4d5   :  { %v10154_v29 = vpop.f32.mrf.mxu0  ;;  %v5638_v35 = vmax.f32 %v5636_v18, %v5637_v25 }
 0x4d6   :  { %v5641_v29 = vsel %vm5311_vm3, %v4988_v6, -inf }
 0x4d7   :  { %v4995_v32 = vpop.f32.mrf.mxu0 }
 0x4d8   :  { %v4996_v55 = vadd.f32 %v4995_v32, %v15789_v49 }
 0x4d9   :  { %v10157_v16 = vpop.f32.mrf.mxu0 }
 0x4da   :  { %v5640_v16 = vmax.f32 %v5638_v35, %v5639_v21  ;;  %v5645_v0 = vsel %vm5311_vm3, %v4996_v55, -inf }
 0x4db   :  { %v4998_v9 = vpop.f32.mrf.mxu0 }
 0x4dc   :  { %v4999_v51 = vadd.f32 %v4998_v9, %v15806_v34  ;;  %v5642_v28 = vmax.f32 %v5640_v16, %v5641_v29 }
 0x4dd   :  { %v10158_v54 = vpop.f32.mrf.mxu0 }
 0x4de   :  { %v5643_v54 = vsel %vm5311_vm3, %v4991_v24, -inf  ;;  %v5647_v53 = vsel %vm5311_vm3, %v4999_v51, -inf }
 0x4df   :  { %v5003_v13 = vpop.f32.mrf.mxu0  ;;  %v5644_v2 = vmax.f32 %v5642_v28, %v5643_v54 }
 0x4e0   :  { %v5004_v42 = vadd.f32 %v5003_v13, %v15818_v39 }
 0x4e1   :  { %v10161_v57 = vpop.f32.mrf.mxu0  ;;  %v5646_v32 = vmax.f32 %v5644_v2, %v5645_v0 }
 0x4e2   :  { %v5283_v4 = vsel %vm5130_vm14, %v5004_v42, -inf }
 0x4e3   :  { %v5006_v31 = vpop.f32.mrf.mxu0  ;;  %v5649_v30 = vsel %vm5311_vm3, %v5283_v4, -inf  ;;  %v5648_v13 = vmax.f32 %v5646_v32, %v5647_v53 }
 0x4e4   :  { %v5007_v48 = vadd.f32 %v5006_v31, %v15847_v17 }
 0x4e5   :  { %v10162_v11 = vpop.f32.mrf.mxu0  ;;  %v5650_v57 = vmax.f32 %v5648_v13, %v5649_v30 }
 0x4e6   :  { %v5657_v35 = vsel %vm5311_vm3, %v5007_v48, -inf }
 0x4e7   :  { %v5011_v27 = vpop.f32.mrf.mxu0  ;;  %v5651_v18 = vrot.slane %v5650_v57, 4 }
 0x4e8   :  { %v5012_v34 = vadd.f32 %v5011_v27, %v15854_v23 }
 0x4e9   :  { %v10165_v14 = vpop.f32.mrf.mxu0  ;;  %v5652_v23 = vmax.f32 %v5650_v57, %v5651_v18 }
 0x4ea   :  { %v5658_v21 = vsel %vm5311_vm3, %v5012_v34, -inf }
 0x4eb   :  { %v5014_v3 = vpop.f32.mrf.mxu0  ;;  %v5659_v27 = vmax.f32 %v5657_v35, %v5658_v21  ;;  %v5653_v14 = vrot.slane %v5652_v23, 2 }
 0x4ec   :  { %v5015_v25 = vadd.f32 %v5014_v3, %v15867_v20 }
 0x4ed   :  { %v10166_v49 = vpop.f32.mrf.mxu0  ;;  %v5654_v32 = vmax.f32 %v5652_v23, %v5653_v14 }
 0x4ee   :  { %v5660_v29 = vsel %vm5311_vm3, %v5015_v25, -inf }
 0x4ef   :  { %v5019_v39 = vpop.f32.mrf.mxu0  ;;  %v5661_v42 = vmax.f32 %v5659_v27, %v5660_v29  ;;  %v5655_v34 = vrot.slane %v5654_v32, 1 }
 0x4f0   :  { %v5020_v24 = vadd.f32 %v5019_v39, %v15874_v60 }
 0x4f1   :  { %v10169_v26 = vpop.f32.mrf.mxu0 }
 0x4f2   :  { %v5662_v20 = vsel %vm5311_vm3, %v5020_v24, -inf  ;;  %v5656_v24 = vmax.f32 %v5654_v32, %v5655_v34 }
 0x4f3   :  { %v5022_v9 = vpop.f32.mrf.mxu0  ;;  %v5663_v28 = vmax.f32 %v5661_v42, %v5662_v20 }
 0x4f4   :  { %v5023_v55 = vadd.f32 %v5022_v9, %v15884_v1 }
 0x4f5   :  { %v10170_v6 = vpop.f32.mrf.mxu0 }
 0x4f6   :  { %v5664_v60 = vsel %vm5311_vm3, %v5023_v55, -inf }
 0x4f7   :  { %v5027_v11 = vpop.f32.mrf.mxu0  ;;  %v5665_v2 = vmax.f32 %v5663_v28, %v5664_v60 }
 0x4f8   :  { %v5028_v17 = vadd.f32 %v5027_v11, %v15889_v56 }
 0x4f9   :  { %v10173_v16 = vpop.f32.mrf.mxu0 }
 0x4fa   :  { %v5666_v0 = vsel %vm5311_vm3, %v5028_v17, -inf }
 0x4fb   :  { %v5030_v31 = vpop.f32.mrf.mxu0  ;;  %v5667_v53 = vmax.f32 %v5665_v2, %v5666_v0  ;;  %v10486_v0 = vld [vmem:[%s17436_s11 + $0x68] ss:$16 sps:$4 sm:$0xff]   ;;  %v10491_v2 = vld [vmem:[%s17436_s11 + $0x4c] ss:$16 sps:$4 sm:$0xff]  }
 0x4fc   :  { %v5031_v54 = vadd.f32 %v5030_v31, %v15900_v7 }
 0x4fd   :  { %v10174_v51 = vpop.f32.mrf.mxu0 }
 0x4fe   :  { %v5668_v1 = vsel %vm5311_vm3, %v5031_v54, -inf }
 0x4ff   :  { %v5035_v3 = vpop.f32.mrf.mxu0  ;;  %v5669_v7 = vmax.f32 %v5667_v53, %v5668_v1 }
 0x500   :  { %v5036_v4 = vadd.f32 %v5035_v3, %v15905_v45 }
 0x501   :  { %v10177_v56 = vpop.f32.mrf.mxu0 }
 0x502   :  { %v5670_v49 = vsel %vm5311_vm3, %v5036_v4, -inf }
 0x503   :  { %v5038_v30 = vpop.f32.mrf.mxu0  ;;  %v5671_v26 = vmax.f32 %v5669_v7, %v5670_v49  ;;  %v10492_v49 = vld [vmem:[%s17436_s11 + $0x28] ss:$16 sps:$4 sm:$0xff]  }
 0x504   :  { %v5039_v39 = vadd.f32 %v5038_v30, %v15915_v38  ;;  %v6566_v38 = vpack.c.bf16 %v5656_v24, %v5656_v24  ;;  %v10497_v30 = vld [vmem:[%s17436_s11 + $0xc] ss:$16 sps:$4 sm:$0xff]  }
 0x505   :  { %v10178_v13 = vpop.f32.mrf.mxu0 }
 0x506   :  { %v5292_v57 = vsel %vm5130_vm14, %v5039_v39, -inf  ;;  %v6618_v20 = vunpack.c.l.b16 %v6566_v38  ;;  %v10495_v39 = vld [vmem:[%s17436_s11 + $0x8] ss:$16 sps:$4 sm:$0xff]  }
 0x507   :  { %v5672_v9 = vsel %vm5311_vm3, %v5292_v57, -inf  ;;  %v5043_v48 = vpop.f32.mrf.mxu0 }
 0x508   :  { %v5673_v25 = vmax.f32 %v5671_v26, %v5672_v9  ;;  %v6634_v51 = vsel %vm5919_vm1, %v6618_v20, %v16158_v63  ;;  %v10489_v63 = vld [vmem:[%s17436_s11 + $0x48] ss:$16 sps:$4 sm:$0xff]  }
 0x509   :  { %v10181_v45 = vpop.f32.mrf.mxu0  ;;  %v10498_v26 = vld [vmem:[%s17437_s12 + $0x78] sm:$0xff]  }
 0x50a   :  { %v5674_v6 = vrot.slane %v5673_v25, 4 }
 0x50b   :  { %v5046_v18 = vpop.f32.mrf.mxu0 }
 0x50c   :  { %v5675_v21 = vmax.f32 %v5673_v25, %v5674_v6  ;;  %v5047_v34 = vadd.f32 %v5046_v18, %v15930_v37  ;;  %v5044_v25 = vadd.f32 %v5043_v48, %v15920_v44 }
 0x50d   :  { %v10182_v11 = vpop.f32.mrf.mxu0 }
 0x50e   :  { %v5676_v35 = vrot.slane %v5675_v21, 2 }
 0x50f   :  { %v5051_v29 = vpop.f32.mrf.mxu0 }
 0x510   :  { %v5677_v55 = vmax.f32 %v5675_v21, %v5676_v35  ;;  %v5052_v45 = vadd.f32 %v5051_v29, %v15934_v15  ;;  %v5681_v21 = vsel %vm5311_vm3, %v5047_v34, -inf  ;;  %v5680_v35 = vsel %vm5311_vm3, %v5044_v25, -inf }
 0x511   :  { %v10185_v16 = vpop.f32.mrf.mxu0  ;;  %v5682_v37 = vmax.f32 %v5680_v35, %v5681_v21 }
 0x512   :  { %v5678_v23 = vrot.slane %v5677_v55, 1 }
 0x513   :  { %v5054_v27 = vpop.f32.mrf.mxu0 }
 0x514   :  { %v5679_v17 = vmax.f32 %v5677_v55, %v5678_v23  ;;  %v5055_v24 = vadd.f32 %v5054_v27, %v15947_v41  ;;  %v5683_v55 = vsel %vm5311_vm3, %v5052_v45, -inf }
 0x515   :  { %v10186_v31 = vpop.f32.mrf.mxu0  ;;  %v5684_v15 = vmax.f32 %v5682_v37, %v5683_v55 }
 0x516   :  { %v6567_v42 = vpack.c.bf16 %v5679_v17, %v5679_v17  ;;  %v5685_v18 = vsel %vm5311_vm3, %v5055_v24, -inf  ;;  %v18559_v31 = vld [vmem:[#allocation69_spill] sm:$0xff] }
 0x517   :  { %v5059_v54 = vpop.f32.mrf.mxu0  ;;  %v5686_v27 = vmax.f32 %v5684_v15, %v5685_v18 }
 0x518   :  { %v6619_v60 = vunpack.c.l.b16 %v6567_v42  ;;  %v5060_v38 = vadd.f32 %v5059_v54, %v15951_v52 }
 0x519   :  { %v10189_v14 = vpop.f32.mrf.mxu0 }
 0x51a   :  { %v6635_v28 = vsel %vm18558_vm2, %v6619_v60, %v6634_v51  ;;  %v5687_v29 = vsel %vm5311_vm3, %v5060_v38, -inf }
 0x51b   :  { %v16210_v1 = vpack.c.b16 %v6635_v28, %v15750_v12  ;;  %v5062_v3 = vpop.f32.mrf.mxu0  ;;  %v10494_v12 = vld [vmem:[%s17436_s11 + $0x2c] ss:$16 sps:$4 sm:$0xff]   ;;  %v5688_v54 = vmax.f32 %v5686_v27, %v5687_v29 }
 0x51c   :  { %v5063_v44 = vadd.f32 %v5062_v3, %v15961_v46 }
 0x51d   :  { %v10190_v4 = vpop.f32.mrf.mxu0  ;;  %9614 = vmatmul.mubr.msk.bf16.vlgmr.msra.gmra.mxu1 %vm5311_vm3, %v16210_v1 }
 0x51e   :  { %6785 = vmatpush1.bf16.msra.mxu1 %v10486_v0  ;;  %6767 = vmatprep.mubr.bf16.mxu1 %v18485_v61  ;;  %v5689_v20 = vsel %vm5311_vm3, %v5063_v44, -inf }
 0x51f   :  { %v5067_v56 = vpop.f32.mrf.mxu0  ;;  %6786 = vmatprep.subr.bf16.mxu1 %v10491_v2  ;;  %v5690_v46 = vmax.f32 %v5688_v54, %v5689_v20 }
 0x520   :  { %v5068_v23 = vadd.f32 %v5067_v56, %v15965_v47 }
 0x521   :  { %v10193_v53 = vpop.f32.mrf.mxu0 }
 0x522   :  { %6787 = vmatpush1.bf16.msra.mxu1 %v10489_v63  ;;  %v5691_v60 = vsel %vm5311_vm3, %v5068_v23, -inf }
 0x523   :  { %v5070_v32 = vpop.f32.mrf.mxu0  ;;  %6788 = vmatprep.subr.bf16.mxu1 %v10494_v12  ;;  %v5692_v3 = vmax.f32 %v5690_v46, %v5691_v60 }
 0x524   :  { %v5071_v52 = vadd.f32 %v5070_v32, %v18559_v31 }
 0x525   :  { %v10194_v7 = vpop.f32.mrf.mxu0 }
 0x526   :  { %6789 = vmatpush1.bf16.msra.mxu1 %v10492_v49  ;;  %v5693_v28 = vsel %vm5311_vm3, %v5071_v52, -inf }
 0x527   :  { %v5075_v13 = vpop.f32.mrf.mxu0  ;;  %6790 = vmatprep.subr.bf16.mxu1 %v10497_v30  ;;  %v5694_v56 = vmax.f32 %v5692_v3, %v5693_v28 }
 0x528   :  { %v5076_v17 = vadd.f32 %v5075_v13, %v15980_v5 }
 0x529   :  { %v10197_v57 = vpop.f32.mrf.mxu0 }
 0x52a   :  { %6791 = vmatpush1.bf16.msra.mxu1 %v10495_v39  ;;  %v5301_v14 = vsel %vm5130_vm14, %v5076_v17, -inf }
 0x52b   :  { %v5078_v9 = vpop.f32.mrf.mxu0  ;;  %9815 = vmatprep.subr.bf16.mxu1 %v10498_v26  ;;  %v5695_v5 = vsel %vm5311_vm3, %v5301_v14, -inf }
 0x52c   :  { %v5079_v2 = vadd.f32 %v5078_v9, %v15991_v50  ;;  %v5696_v32 = vmax.f32 %v5694_v56, %v5695_v5  ;;  %v10499_v56 = vld [vmem:[%s17437_s12 + $0x38] sm:$0xff]  }
 0x52d   :  { %v10198_v6 = vpop.f32.mrf.mxu0 }
 0x52e   :  { %v5703_v30 = vsel %vm5311_vm3, %v5079_v2, -inf  ;;  %v5697_v57 = vrot.slane %v5696_v32, 4 }
 0x52f   :  { %v5083_v11 = vpop.f32.mrf.mxu0 }
 0x530   :  { %v5084_v47 = vadd.f32 %v5083_v11, %v15995_v43  ;;  %v5698_v24 = vmax.f32 %v5696_v32, %v5697_v57  ;;  %v10516_v32 = vld [vmem:[%s17437_s12 + $0xf0] sm:$0xff]  }
 0x531   :  { %v10201_v16 = vpop.f32.mrf.mxu0  ;;  %v10509_v57 = vld [vmem:[%s17437_s12 + $0x10] sm:$0xff]  }
 0x532   :  { %v5704_v12 = vsel %vm5311_vm3, %v5084_v47, -inf  ;;  %v5699_v37 = vrot.slane %v5698_v24, 2 }
 0x533   :  { %v5086_v48 = vpop.f32.mrf.mxu0  ;;  %v5705_v13 = vmax.f32 %v5703_v30, %v5704_v12  ;;  %v10500_v12 = vld [vmem:[%s17437_s12 + $0x70] sm:$0xff]  }
 0x534   :  { %v5087_v4 = vadd.f32 %v5086_v48, %v16005_v33  ;;  %v10501_v30 = vld [vmem:[%s17437_s12 + $0x30] sm:$0xff]  }
 0x535   :  { %v10202_v41 = vpop.f32.mrf.mxu0 }
 0x536   :  { %v5706_v43 = vsel %vm5311_vm3, %v5087_v4, -inf }
 0x537   :  { %v5091_v42 = vpop.f32.mrf.mxu0  ;;  %v5707_v34 = vmax.f32 %v5705_v13, %v5706_v43  ;;  %v10517_v43 = vld [vmem:[%s17437_s12 + $0xb0] sm:$0xff]   ;;  %v10505_v13 = vld [vmem:[%s17437_s12 + $0x20] sm:$0xff]  }
 0x538   :  { %v5092_v53 = vadd.f32 %v5091_v42, %v16013_v19 }
 0x539   :  { %v10205_v51 = vpop.f32.mrf.mxu0 }
 0x53a   :  { %v5708_v50 = vsel %vm5311_vm3, %v5092_v53, -inf  ;;  %v10514_v53 = vld [vmem:[%s17437_s12 + $0xf8] sm:$0xff]  }
 0x53b   :  { %v5094_v0 = vpop.f32.mrf.mxu0  ;;  %v5709_v45 = vmax.f32 %v5707_v34, %v5708_v50  ;;  %9843 = vmatprep.subr.bf16.mxu0 %v10514_v53  ;;  %v10506_v50 = vld [vmem:[%s17437_s12 + $0x58] sm:$0xff]   ;;  %v10510_v34 = vld [vmem:[%s17437_s12 + $0x48] sm:$0xff]  }
 0x53c   :  { %v5095_v7 = vadd.f32 %v5094_v0, %v16023_v59 }
 0x53d   :  { %v10206_v63 = vpop.f32.mrf.mxu0 }
 0x53e   :  { %v5710_v9 = vsel %vm5311_vm3, %v5095_v7, -inf  ;;  %v10503_v7 = vld [vmem:[%s17437_s12 + $0x28] sm:$0xff]  }
 0x53f   :  { %v5099_v49 = vpop.f32.mrf.mxu0  ;;  %v5711_v59 = vmax.f32 %v5709_v45, %v5710_v9  ;;  %v10511_v9 = vld [vmem:[%s17437_s12 + $0x8] sm:$0xff]  }
 0x540   :  { %v5100_v33 = vadd.f32 %v5099_v49, %v16027_v58  ;;  %v10515_v49 = vld [vmem:[%s17437_s12 + $0xb8] sm:$0xff]   ;;  %v10518_v45 = vld [vmem:[%s17437_s12 + $0xe8] sm:$0xff]  }
 0x541   :  { %v10209_v39 = vpop.f32.mrf.mxu0  ;;  %9844 = vmatpush3.bf16.msra.mxu0 %v10515_v49 }
 0x542   :  { %v5712_v6 = vsel %vm5311_vm3, %v5100_v33, -inf  ;;  %9845 = vmatprep.subr.bf16.mxu0 %v10516_v32  ;;  %v10504_v39 = vld [vmem:[%s17437_s12 + $0x60] sm:$0xff]   ;;  %v10507_v33 = vld [vmem:[%s17437_s12 + $0x18] sm:$0xff]  }
 0x543   :  { %v5102_v26 = vpop.f32.mrf.mxu0  ;;  %v5713_v58 = vmax.f32 %v5711_v59, %v5712_v6  ;;  %v10519_v6 = vld [vmem:[%s17437_s12 + $0xa8] sm:$0xff]   ;;  %v10522_v59 = vld [vmem:[%s17437_s12 + $0xd8] sm:$0xff]  }
 0x544   :  { %v5103_v19 = vadd.f32 %v5102_v26, %v16037_v40  ;;  %v10508_v26 = vld [vmem:[%s17437_s12 + $0x50] sm:$0xff]  }
 0x545   :  { %v10210_v25 = vpop.f32.mrf.mxu0  ;;  %9846 = vmatpush3.bf16.msra.mxu0 %v10517_v43 }
 0x546   :  { %v5714_v35 = vsel %vm5311_vm3, %v5103_v19, -inf  ;;  %v10512_v19 = vld [vmem:[%s17437_s12 + $0x40] sm:$0xff]   ;;  %9847 = vmatprep.subr.bf16.mxu0 %v10518_v45 }
 0x547   :  { %v5107_v21 = vpop.f32.mrf.mxu0  ;;  %v5715_v18 = vmax.f32 %v5713_v58, %v5714_v35  ;;  %v10513_v25 = vld [vmem:[%s17437_s12] sm:$0xff]   ;;  %v10524_v35 = vld [vmem:[%s17437_s12 + $0xd0] sm:$0xff]   ;;  %v10526_v58 = vld [vmem:[%s17437_s12 + $0xc8] sm:$0xff]  }
 0x548   :  { %v5108_v11 = vadd.f32 %v5107_v21, %v16042_v62  ;;  %v5700_v62 = vmax.f32 %v5698_v24, %v5699_v37  ;;  %v10520_v21 = vld [vmem:[%s17437_s12 + $0xe0] sm:$0xff]  }
 0x549   :  { %v10213_v55 = vpop.f32.mrf.mxu0  ;;  %9848 = vmatpush3.bf16.msra.mxu0 %v10519_v6  ;;  %v10521_v24 = vld [vmem:[%s17437_s12 + $0xa0] sm:$0xff]  }
 0x54a   :  { %v5716_v38 = vsel %vm5311_vm3, %v5108_v11, -inf  ;;  %v5701_v31 = vrot.slane %v5700_v62, 1  ;;  %9849 = vmatprep.subr.bf16.mxu0 %v10520_v21  ;;  %v10523_v11 = vld [vmem:[%s17437_s12 + $0x98] sm:$0xff]   ;;  %v10525_v55 = vld [vmem:[%s17437_s12 + $0x90] sm:$0xff]   ;;  %v10529_v37 = vld [vmem:[%s17437_s12 + $0x80] sm:$0xff]  }
 0x54b   :  { %v5110_v16 = vpop.f32.mrf.mxu0  ;;  %v5717_v48 = vmax.f32 %v5715_v18, %v5716_v38  ;;  %v10527_v38 = vld [vmem:[%s17437_s12 + $0x88] sm:$0xff]   ;;  %v6535_v18 = vpop.f32.mrf.mxu1  ;;  %v18571_v6 = vld [vmem:[#allocation150_spill] sm:$0xff] }
 0x54c   :  { %v5111_v40 = vadd.f32 %v5110_v16, %v16052_v22  ;;  %v5702_v10 = vmax.f32 %v5700_v62, %v5701_v31  ;;  %v10528_v16 = vld [vmem:[%s17437_s12 + $0xc0] sm:$0xff]  }
 0x54d   :  { %v10214_v44 = vpop.f32.mrf.mxu0  ;;  %9850 = vmatpush3.bf16.msra.mxu0 %v10521_v24  ;;  %v9036_v62 = vld [vmem:[%s17432_s16 + $0x2] ss:$8 sm:$0xf] }
 0x54e   :  { %v5310_v15 = vsel %vm5130_vm14, %v5111_v40, -inf  ;;  %v6568_v28 = vpack.c.bf16 %v5702_v10, %v5702_v10  ;;  %9851 = vmatprep.subr.bf16.mxu0 %v10522_v59  ;;  %v6537_v40 = vpop.f32.mrf.mxu1 }
 0x54f   :  { %v5718_v29 = vsel %vm5311_vm3, %v5310_v15, -inf  ;;  %v16276_v23 = vpop.f32.mrf.mxu0 }
 0x550   :  { %v5719_v41 = vmax.f32 %v5717_v48, %v5718_v29  ;;  %v6620_v5 = vunpack.c.l.b16 %v6568_v28  ;;  %v6541_v44 = vpop.f32.mrf.mxu1 }
 0x551   :  { %v16278_v27 = vpop.f32.mrf.mxu0  ;;  %9852 = vmatpush3.bf16.msra.mxu0 %v10523_v11  ;;  %v18572_v11 = vld [vmem:[#allocation44_spill] sm:$0xff] }
 0x552   :  { %v5720_v17 = vrot.slane %v5719_v41, 4  ;;  %9853 = vmatprep.subr.bf16.mxu0 %v10524_v35  ;;  %v6543_v48 = vpop.f32.mrf.mxu1  ;;  %v6850_v35 = vsub.s32 2, %v18572_v11 }
 0x553   :  { %v16280_v20 = vpop.f32.mrf.mxu0 }
 0x554   :  { %v5721_v52 = vmax.f32 %v5719_v41, %v5720_v17  ;;  %v16389_v15 = vpop.f32.mrf.mxu1  ;;  %v18561_v41 = vld [vmem:[#allocation98_spill] sm:$0xff] }
 0x555   :  { %v16282_v42 = vpop.f32.mrf.mxu0  ;;  %9854 = vmatpush3.bf16.msra.mxu0 %v10525_v55  ;;  %v6453_v17 = vadd.f32 %v16088_v36, %v18561_v41 }
 0x556   :  { %v5722_v22 = vrot.slane %v5721_v52, 2  ;;  %9855 = vmatprep.subr.bf16.mxu0 %v10526_v58  ;;  %v16391_v29 = vpop.f32.mrf.mxu1 }
 0x557   :  { %v16284_v54 = vpop.f32.mrf.mxu0 }
 0x558   :  { %v5723_v60 = vmax.f32 %v5721_v52, %v5722_v22  ;;  %v18562_v52 = vld [vmem:[#allocation137_spill] sm:$0xff] }
 0x559   :  { %v16286_v51 = vpop.f32.mrf.mxu0  ;;  %9856 = vmatpush3.bf16.msra.mxu0 %v10527_v38  ;;  %v18563_v22 = vld [vmem:[#allocation33_spill] sm:$0xff]  ;;  %v6536_v38 = vadd.f32 %v6535_v18, %v16276_v23  ;;  %v6544_v18 = vadd.f32 %v6543_v48, %v16282_v42 }
 0x55a   :  { %v5724_v46 = vrot.slane %v5723_v60, 1  ;;  %9857 = vmatprep.subr.bf16.mxu0 %v10528_v16  ;;  %v6455_v10 = vadd.f32 %v18563_v22, %v18562_v52  ;;  %v6851_v22 = vrot.slane %v9036_v62, %v6850_v35 }
 0x55b   :  { %v6373_v14 = vpop.f32.mrf.mxu0 }
 0x55c   :  { %v5725_v47 = vmax.f32 %v5723_v60, %v5724_v46  ;;  %v18564_v46 = vld [vmem:[#allocation48_spill] sm:$0xff] }
 0x55d   :  { %v6374_v0 = vpop.f32.mrf.mxu0  ;;  %9858 = vmatpush3.bf16.msra.mxu0 %v10529_v37  ;;  %v6843_v14 = vrot.slane %v9036_v62, %v18564_v46  ;;  %v6854_v37 = vsub.s32 3, %v18572_v11 }
 0x55e   :  { %v6569_v3 = vpack.c.bf16 %v5725_v47, %v5725_v47  ;;  %v18565_v47 = vld [vmem:[#allocation147_spill] sm:$0xff] }
 0x55f   :  { %v18566_v0 = vld [vmem:[#allocation71_spill] sm:$0xff] }
 0x560   :  { %v6621_v2 = vunpack.c.l.b16 %v6569_v3  ;;  %v6459_v3 = vadd.f32 %v18566_v0, %v18565_v47  ;;  %v6855_v47 = vrot.slane %v9036_v62, %v6854_v37 }
 0x562   :  { %v6636_v4 = vsel %vm18560_vm0, %v6621_v2, %v6620_v5  ;;  %v18567_v2 = vld [vmem:[#allocation47_spill] sm:$0xff] }
 0x563   :  { %v6638_v63 = vpack.c.b16 %v6636_v4, %v6636_v4  ;;  %v6847_v4 = vrot.slane %v9036_v62, %v18567_v2  ;;  %v6550_v62 = vadd.f32 %v16391_v29, %v16286_v51  ;;  %v10535_v29 = vld [vmem:[%s17439_s13 + $0xe0] ss:$16 sps:$4 sm:$0xff]  }
 0x565   :  { %9615 = vmatmul.mubr.msk.bf16.gmra.mxu1 %vm5311_vm3, %v6638_v63 }
 0x566   :  { %6808 = vmatprep.mubr.bf16.mxu1 %v18485_v61 }
 0x56d   :  { %9616 = vmatmul.mubr.msk.bf16.vlgmr.msra.gmra.mxu1 %vm5311_vm3, %v16210_v1  ;;  %v10502_v1 = vld [vmem:[%s17437_s12 + $0x68] sm:$0xff]  }
 0x56e   :  { %6818 = vmatprep.mubr.bf16.mxu1 %v18485_v61  ;;  %9816 = vmatpush3.bf16.msra.mxu1 %v10499_v56  ;;  %v18568_v56 = vld [vmem:[#allocation141_spill] sm:$0xff] }
 0x56f   :  { %9817 = vmatprep.subr.bf16.mxu1 %v10500_v12  ;;  %v18569_v12 = vld [vmem:[#allocation145_spill] sm:$0xff] }
 0x570   :  { %v6461_v53 = vadd.f32 %v18569_v12, %v18568_v56 }
 0x572   :  { %9818 = vmatpush3.bf16.msra.mxu1 %v10501_v30 }
 0x573   :  { %9819 = vmatprep.subr.bf16.mxu1 %v10502_v1 }
 0x575   :  { %9617 = vmatmul.mubr.msk.bf16.gmra.mxu1 %vm5311_vm3, %v6638_v63 }
 0x576   :  { %9820 = vmatpush3.bf16.msra.mxu1 %v10503_v7 }
 0x577   :  { %9821 = vmatprep.subr.bf16.mxu1 %v10504_v39 }
 0x57a   :  { %9822 = vmatpush3.bf16.msra.mxu1 %v10505_v13 }
 0x57b   :  { %9823 = vmatprep.subr.bf16.mxu1 %v10506_v50 }
 0x57e   :  { %9824 = vmatpush3.bf16.msra.mxu1 %v10507_v33 }
 0x57f   :  { %9825 = vmatprep.subr.bf16.mxu1 %v10508_v26 }
 0x582   :  { %9826 = vmatpush3.bf16.msra.mxu1 %v10509_v57 }
 0x583   :  { %9827 = vmatprep.subr.bf16.mxu1 %v10510_v34 }
 0x586   :  { %9828 = vmatpush3.bf16.msra.mxu1 %v10511_v9  ;;  %v18570_v9 = vld [vmem:[#allocation151_spill] sm:$0xff] }
 0x587   :  { %9829 = vmatprep.subr.bf16.mxu1 %v10512_v19 }
 0x58a   :  { %9830 = vmatpush3.bf16.msra.mxu1 %v10513_v25 }
 0x58b   :  { %10215 = vmatprep.subr.bf16.mxu1 %v17908_v8 }
 0x5dd   :  { %v6759_v31 = vpop.f32.mrf.mxu1 }
 0x5de   :  { %v6827_v60 = vadd.f32 %v6759_v31, %v6453_v17  ;;  %v6538_v17 = vadd.f32 %v6537_v40, %v16278_v27 }
 0x5df   :  { %v6761_v28 = vpop.f32.mrf.mxu1 }
 0x5e0   :  { %v6828_v5 = vadd.f32 %v6761_v28, %v6455_v10  ;;  %v6860_v49 = vadd.f32 %v6843_v14, %v6827_v60 }
 0x5e1   :  { %v6763_v63 = vpop.f32.mrf.mxu1 }
 0x5e2   :  { %v6831_v36 = vadd.f32 %v6763_v63, %v6459_v3  ;;  %v6861_v30 = vadd.f32 %v6847_v4, %v6828_v5  ;;  %v6872_v7 = vmax.f32 %v6860_v49, 0.0 }
 0x5e3   :  { %v6765_v32 = vpop.f32.mrf.mxu1 }
 0x5e4   :  { %v6864_v1 = vadd.f32 %v6843_v14, %v6831_v36  ;;  %v6832_v43 = vadd.f32 %v6765_v32, %v6461_v53  ;;  %v6873_v50 = vmax.f32 %v6861_v30, 0.0 }
 0x5e6   :  { %v6876_v39 = vmax.f32 %v6864_v1, 0.0  ;;  %v6865_v13 = vadd.f32 %v6847_v4, %v6832_v43 }
 0x5e8   :  { %v6884_v33 = vpack.c.bf16 %v6876_v39, %v6872_v7  ;;  %v6877_v26 = vmax.f32 %v6865_v13, 0.0 }
 0x5ea   :  { %v6885_v57 = vpack.c.bf16 %v6877_v26, %v6873_v50  ;;  %v10537_v50 = vld [vmem:[%s17439_s13 + $0xe4] ss:$16 sps:$4 sm:$0xff]   ;;  %v10541_v26 = vld [vmem:[%s17439_s13 + $0xc0] ss:$16 sps:$4 sm:$0xff]  }
 0x5eb   :  { %7591 = vmatprep.subr.bf16.mxu0 %v10537_v50  ;;  %v10556_v50 = vld [vmem:[%s17439_s13 + $0x88] ss:$16 sps:$4 sm:$0xff]  }
 0x5ec   :  { %7180 = vmatprep.mubr.bf16.mxu1 %v6885_v57  ;;  %v10549_v57 = vld [vmem:[%s17439_s13 + $0xa4] ss:$16 sps:$4 sm:$0xff]  }
 0x5ed   :  { %7181 = vmatmul.mubr.bf16.vlgmr.msra.gmra.mxu1 %v6884_v33  ;;  %v10543_v33 = vld [vmem:[%s17439_s13 + $0xc4] ss:$16 sps:$4 sm:$0xff]  }
 0x625   :  { %v6769_v34 = vpop.f32.mrf.mxu1 }
 0x626   :  { %v6835_v19 = vadd.f32 %v6769_v34, %v18570_v9  ;;  %v10547_v34 = vld [vmem:[%s17439_s13 + $0xa0] ss:$16 sps:$4 sm:$0xff]   ;;  %v10555_v9 = vld [vmem:[%s17439_s13 + $0x84] ss:$16 sps:$4 sm:$0xff]  }
 0x627   :  { %v6771_v25 = vpop.f32.mrf.mxu1 }
 0x628   :  { %v6868_v45 = vadd.f32 %v6843_v14, %v6835_v19  ;;  %v6836_v21 = vadd.f32 %v6771_v25, %v18571_v6  ;;  %v6542_v14 = vadd.f32 %v6541_v44, %v16280_v20  ;;  %v6548_v20 = vadd.f32 %v16389_v15, %v16284_v54  ;;  %v10553_v19 = vld [vmem:[%s17439_s13 + $0x80] ss:$16 sps:$4 sm:$0xff]   ;;  %v10561_v25 = vld [vmem:[%s17439_s13 + $0x64] ss:$16 sps:$4 sm:$0xff]  }
 0x629   :  { %v6773_v24 = vpop.f32.mrf.mxu1  ;;  %v10567_v6 = vld [vmem:[%s17439_s13 + $0x44] ss:$16 sps:$4 sm:$0xff]  }
 0x62a   :  { %v6869_v59 = vadd.f32 %v6847_v4, %v6836_v21  ;;  %v6880_v55 = vmax.f32 %v6868_v45, 0.0  ;;  %v10559_v45 = vld [vmem:[%s17439_s13 + $0x60] ss:$16 sps:$4 sm:$0xff]   ;;  %v10573_v24 = vld [vmem:[%s17439_s13 + $0x24] ss:$16 sps:$4 sm:$0xff]  }
 0x62b   :  { %v6774_v58 = vpop.f32.mrf.mxu1  ;;  %v10565_v21 = vld [vmem:[%s17439_s13 + $0x40] ss:$16 sps:$4 sm:$0xff]  }
 0x62c   :  { %v6881_v16 = vmax.f32 %v6869_v59, 0.0  ;;  %v6888_v10 = vpack.c.bf16 %v6880_v55, %v6880_v55  ;;  %v10571_v59 = vld [vmem:[%s17439_s13 + $0x20] ss:$16 sps:$4 sm:$0xff]  }
 0x62d   :  { %v6810_v41 = vpop.f32.mrf.mxu1 }
 0x62e   :  { %v6889_v31 = vpack.c.bf16 %v6881_v16, %v6881_v16  ;;  %v6829_v52 = vadd.f32 %v6810_v41, %v6536_v38 }
 0x62f   :  { %v6812_v60 = vpop.f32.mrf.mxu1 }
 0x630   :  { %v6830_v28 = vadd.f32 %v6812_v60, %v6538_v17  ;;  %7188 = vmatprep.mubr.bf16.mxu1 %v6889_v31  ;;  %v6862_v0 = vadd.f32 %v6851_v22, %v6829_v52 }
 0x631   :  { %v6814_v23 = vpop.f32.mrf.mxu1  ;;  %7189 = vmatmul.mubr.bf16.gmra.mxu1 %v6888_v10 }
 0x632   :  { %v6833_v27 = vadd.f32 %v6814_v23, %v6542_v14  ;;  %10219 = vmatprep.mubr.msk.bf16.mxu1 %vm10824_vm11, %v17908_v8  ;;  %v6863_v3 = vadd.f32 %v6855_v47, %v6830_v28  ;;  %v6874_v63 = vmax.f32 %v6862_v0, 0.0 }
 0x633   :  { %v6816_v40 = vpop.f32.mrf.mxu1 }
 0x634   :  { %v6866_v5 = vadd.f32 %v6851_v22, %v6833_v27  ;;  %v6834_v4 = vadd.f32 %v6816_v40, %v6544_v18  ;;  %v6875_v53 = vmax.f32 %v6863_v3, 0.0  ;;  %v62_v18 = vld [vmem:[%s17432_s16 + $0x3] ss:$0 sm:$0xff] }
 0x635   :  { %v6820_v44 = vpop.f32.mrf.mxu1 }
 0x636   :  { %v6878_v56 = vmax.f32 %v6866_v5, 0.0  ;;  %v6867_v12 = vadd.f32 %v6855_v47, %v6834_v4  ;;  %v6837_v42 = vadd.f32 %v6820_v44, %v6548_v20 }
 0x637   :  { %v6822_v48 = vpop.f32.mrf.mxu1 }
 0x638   :  { %v6886_v49 = vpack.c.bf16 %v6878_v56, %v6874_v63  ;;  %v6879_v36 = vmax.f32 %v6867_v12, 0.0  ;;  %v6838_v32 = vadd.f32 %v6822_v48, %v6550_v62  ;;  %v6870_v7 = vadd.f32 %v6851_v22, %v6837_v42 }
 0x639   :  { %v6824_v30 = vpop.f32.mrf.mxu1 }
 0x63a   :  { %v6871_v1 = vadd.f32 %v6855_v47, %v6838_v32  ;;  %v6887_v43 = vpack.c.bf16 %v6879_v36, %v6875_v53  ;;  %v6882_v15 = vmax.f32 %v6870_v7, 0.0  ;;  %v10540_v30 = vld [vmem:[%s17439_s13 + $0xec] ss:$16 sps:$4 sm:$0xff]   ;;  %v10538_v7 = vld [vmem:[%s17439_s13 + $0xe8] ss:$16 sps:$4 sm:$0xff]  }
 0x63b   :  { %v6825_v39 = vpop.f32.mrf.mxu1 }
 0x63c   :  { %v6883_v13 = vmax.f32 %v6871_v1, 0.0  ;;  %7228 = vmatprep.mubr.bf16.mxu0 %v6887_v43  ;;  %v6890_v51 = vpack.c.bf16 %v6882_v15, %v6882_v15  ;;  %v10530_v43 = vld [vmem:[%s17438_s4] sm:$0xff]   ;;  %v10546_v39 = vld [vmem:[%s17439_s13 + $0xcc] ss:$16 sps:$4 sm:$0xff]  }
 0x63d   :  { %7229 = vmatmul.mubr.bf16.vlgmr.msra.gmra.mxu0 %v6886_v49  ;;  %v10531_v15 = vld [vmem:[%s17438_s4 + $0x8] sm:$0xff]  }
 0x63e   :  { %v6891_v54 = vpack.c.bf16 %v6883_v13, %v6883_v13  ;;  %7592 = vmatpush1.bf16.msra.mxu0 %v10535_v29  ;;  %v10544_v13 = vld [vmem:[%s17439_s13 + $0xc8] ss:$16 sps:$4 sm:$0xff]   ;;  %v10558_v29 = vld [vmem:[%s17439_s13 + $0x8c] ss:$16 sps:$4 sm:$0xff]  }
 0x63f   :  { %7593 = vmatprep.subr.bf16.mxu0 %v10543_v33  ;;  %v10564_v33 = vld [vmem:[%s17439_s13 + $0x6c] ss:$16 sps:$4 sm:$0xff]  }
 0x640   :  { %7236 = vmatprep.mubr.bf16.mxu0 %v6891_v54  ;;  %v10552_v54 = vld [vmem:[%s17439_s13 + $0xac] ss:$16 sps:$4 sm:$0xff]  }
 0x642   :  { %7594 = vmatpush1.bf16.msra.mxu0 %v10541_v26  ;;  %v10532_v26 = vld [vmem:[%s17438_s4 + $0x10] sm:$0xff]  }
 0x643   :  { %7595 = vmatprep.subr.bf16.mxu0 %v10549_v57  ;;  %v10562_v57 = vld [vmem:[%s17439_s13 + $0x68] ss:$16 sps:$4 sm:$0xff]  }
 0x645   :  { %7237 = vmatmul.mubr.bf16.gmra.mxu0 %v6890_v51  ;;  %v10550_v51 = vld [vmem:[%s17439_s13 + $0xa8] ss:$16 sps:$4 sm:$0xff]  }
 0x646   :  { %7623 = vmatprep.mubr.bf16.mxu0 %v18485_v61  ;;  %7596 = vmatpush1.bf16.msra.mxu0 %v10547_v34  ;;  %v10570_v34 = vld [vmem:[%s17439_s13 + $0x4c] ss:$16 sps:$4 sm:$0xff]  }
 0x647   :  { %7597 = vmatprep.subr.bf16.mxu0 %v10555_v9  ;;  %v10568_v9 = vld [vmem:[%s17439_s13 + $0x48] ss:$16 sps:$4 sm:$0xff]  }
 0x64a   :  { %7598 = vmatpush1.bf16.msra.mxu0 %v10553_v19  ;;  %v10576_v19 = vld [vmem:[%s17439_s13 + $0x2c] ss:$16 sps:$4 sm:$0xff]  }
 0x64b   :  { %7599 = vmatprep.subr.bf16.mxu0 %v10561_v25  ;;  %v10533_v25 = vld [vmem:[%s17438_s4 + $0x18] sm:$0xff]  }
 0x64e   :  { %7600 = vmatpush1.bf16.msra.mxu0 %v10559_v45  ;;  %v10574_v45 = vld [vmem:[%s17439_s13 + $0x28] ss:$16 sps:$4 sm:$0xff]  }
 0x64f   :  { %7601 = vmatprep.subr.bf16.mxu0 %v10567_v6  ;;  %v10534_v6 = vld [vmem:[%s17438_s4 + $0x20] ss:$0 sps:$4 sm:$0xff]  }
 0x652   :  { %7602 = vmatpush1.bf16.msra.mxu0 %v10565_v21  ;;  %v10577_v21 = vld [vmem:[%s17439_s13] ss:$16 sps:$4 sm:$0xff]  }
 0x653   :  { %7603 = vmatprep.subr.bf16.mxu0 %v10573_v24  ;;  %v10579_v24 = vld [vmem:[%s17439_s13 + $0x4] ss:$16 sps:$4 sm:$0xff]  }
 0x656   :  { %7604 = vmatpush1.bf16.msra.mxu0 %v10571_v59  ;;  %v10580_v59 = vld [vmem:[%s17439_s13 + $0x8] ss:$16 sps:$4 sm:$0xff]  }
 0x657   :  { %7605 = vmatprep.subr.bf16.mxu0 %v10579_v24 }
 0x65a   :  { %7606 = vmatpush1.bf16.msra.mxu0 %v10577_v21 }
 0x6ad   :  { %v9831_v55 = vpop.f32.mrf.mxu1 }
 0x6af   :  { %v9832_v58 = vpop.f32.mrf.mxu1 }
 0x6b0   :  { %v9833_v0 = vadd.f32 %v9832_v58, %v9831_v55  ;;  %v10582_v55 = vld [vmem:[%s17439_s13 + $0xc] ss:$16 sps:$4 sm:$0xff]   ;;  %v16557_v58 = vld [vmem:[%s17440_s14 + $0xe4] ss:$16 sps:$4 sm:$0xff]  }
 0x6b1   :  { %v9834_v38 = vpop.f32.mrf.mxu1  ;;  %7945 = vmatprep.subr.bf16.mxu0 %v16557_v58 }
 0x6b2   :  { %v7183_v63 = vadd.f32 %v9833_v0, %v62_v18  ;;  %v16605_v0 = vld [vmem:[%s17440_s14 + $0xa4] ss:$16 sps:$4 sm:$0xff]  }
 0x6b3   :  { %v9835_v16 = vpop.f32.mrf.mxu1 }
 0x6b4   :  { %v9836_v47 = vadd.f32 %v9835_v16, %v9834_v38  ;;  %v16562_v38 = vld [vmem:[%s17440_s14 + $0xec] ss:$16 sps:$4 sm:$0xff]  }
 0x6b6   :  { %v7186_v4 = vadd.f32 %v9836_v47, %v62_v18  ;;  %v16593_v47 = vld [vmem:[%s17440_s14 + $0xc0] ss:$16 sps:$4 sm:$0xff]  }
 0x6f1   :  { %v9837_v41 = vpop.f32.mrf.mxu1 }
 0x6f3   :  { %v9838_v17 = vpop.f32.mrf.mxu1 }
 0x6f4   :  { %v9839_v28 = vadd.f32 %v9838_v17, %v9837_v41 }
 0x6f5   :  { %v9840_v31 = vpop.f32.mrf.mxu1 }
 0x6f6   :  { %v7191_v3 = vadd.f32 %v9839_v28, %v62_v18 }
 0x6f7   :  { %v9841_v52 = vpop.f32.mrf.mxu1 }
 0x6f8   :  { %v16569_v52 = vld [vmem:[%s17440_s14 + $0xe0] ss:$16 sps:$4 sm:$0xff]  }
 0x6fd   :  { %v9859_v22 = vpop.f32.mrf.mxu0 }
 0x6ff   :  { %v9860_v10 = vpop.f32.mrf.mxu0 }
 0x700   :  { %v9861_v20 = vadd.f32 %v9860_v10, %v9859_v22  ;;  %v16574_v22 = vld [vmem:[%s17440_s14 + $0xe8] ss:$16 sps:$4 sm:$0xff]  }
 0x701   :  { %v9862_v60 = vpop.f32.mrf.mxu0 }
 0x702   :  { %v7231_v48 = vadd.f32 %v9861_v20, %v7183_v63 }
 0x703   :  { %v9863_v14 = vpop.f32.mrf.mxu0 }
 0x704   :  { %v9864_v27 = vadd.f32 %v9863_v14, %v9862_v60  ;;  %v7244_v32 = vmax.f32 %v7231_v48, 0.0  ;;  %v16579_v60 = vld [vmem:[%s17440_s14 + $0xc4] ss:$16 sps:$4 sm:$0xff]   ;;  %v16584_v14 = vld [vmem:[%s17440_s14 + $0xcc] ss:$16 sps:$4 sm:$0xff]  }
 0x705   :  { %v9865_v23 = vpop.f32.mrf.mxu0  ;;  %v16655_v48 = vld [vmem:[%s17440_s14 + $0x64] ss:$16 sps:$4 sm:$0xff]  }
 0x706   :  { %v7234_v56 = vadd.f32 %v9864_v27, %v7186_v4  ;;  %v16610_v27 = vld [vmem:[%s17440_s14 + $0xac] ss:$16 sps:$4 sm:$0xff]   ;;  %v16622_v4 = vld [vmem:[%s17440_s14 + $0xa8] ss:$16 sps:$4 sm:$0xff]  }
 0x707   :  { %v9866_v40 = vpop.f32.mrf.mxu0 }
 0x708   :  { %v9867_v5 = vadd.f32 %v9866_v40, %v9865_v23  ;;  %v7245_v49 = vmax.f32 %v7234_v56, 0.0  ;;  %v16598_v23 = vld [vmem:[%s17440_s14 + $0xc8] ss:$16 sps:$4 sm:$0xff]   ;;  %v16643_v56 = vld [vmem:[%s17440_s14 + $0x80] ss:$16 sps:$4 sm:$0xff]  }
 0x709   :  { %v9868_v44 = vpop.f32.mrf.mxu0 }
 0x70a   :  { %v7239_v62 = vadd.f32 %v9867_v5, %v7191_v3  ;;  %v7256_v1 = vpack.c.bf16 %v7245_v49, %v7244_v32  ;;  %v16617_v5 = vld [vmem:[%s17440_s14 + $0xa0] ss:$16 sps:$4 sm:$0xff]   ;;  %v16629_v44 = vld [vmem:[%s17440_s14 + $0x84] ss:$16 sps:$4 sm:$0xff]  }
 0x70b   :  { %v9869_v12 = vpop.f32.mrf.mxu0  ;;  %v16667_v32 = vld [vmem:[%s17440_s14 + $0x60] ss:$16 sps:$4 sm:$0xff]  }
 0x70c   :  { %v7246_v42 = vmax.f32 %v7239_v62, 0.0  ;;  %v16634_v62 = vld [vmem:[%s17440_s14 + $0x8c] ss:$16 sps:$4 sm:$0xff]   ;;  %v16648_v12 = vld [vmem:[%s17440_s14 + $0x88] ss:$16 sps:$4 sm:$0xff]  }
 0x70e   :  { %v7257_v53 = vpack.c.bf16 %v7246_v42, %v7246_v42 }
 0x710   :  { %v7299_v36 = vsel %vm7297_vm5, %v7257_v53, 0  ;;  %v16660_v53 = vld [vmem:[%s17440_s14 + $0x6c] ss:$16 sps:$4 sm:$0xff]  }
 0x711   :  { %10216 = vmatpush3.bf16.msra.mxu1 %v7299_v36 }
 0x712   :  { %10217 = vmatprep.subr.bf16.mxu1 %v17908_v8 }
 0x715   :  { %10218 = vmatpush3.bf16.msra.mxu1 %v7256_v1 }
 0x716   :  { %7672 = vmatprep.subr.bf16.mxu1 %v10540_v30  ;;  %v16672_v30 = vld [vmem:[%s17440_s14 + $0x68] ss:$16 sps:$4 sm:$0xff]  }
 0x718   :  { %10220 = vmatmul.mubr.msk.bf16.vlgmr.msra.gmra.mxu1 %vm7281_vm15, %v10530_v43  ;;  %v16679_v43 = vld [vmem:[%s17440_s14 + $0x44] ss:$16 sps:$4 sm:$0xff]  }
 0x719   :  { %10223 = vmatprep.mubr.msk.bf16.mxu1 %vm10824_vm11, %v17908_v8  ;;  %7673 = vmatpush1.bf16.msra.mxu1 %v10538_v7  ;;  %v16684_v7 = vld [vmem:[%s17440_s14 + $0x4c] ss:$16 sps:$4 sm:$0xff]  }
 0x71a   :  { %7674 = vmatprep.subr.bf16.mxu1 %v10546_v39 }
 0x71d   :  { %7675 = vmatpush1.bf16.msra.mxu1 %v10544_v13  ;;  %v16693_v13 = vld [vmem:[%s17440_s14 + $0x40] ss:$16 sps:$4 sm:$0xff]  }
 0x71e   :  { %7676 = vmatprep.subr.bf16.mxu1 %v10552_v54  ;;  %v16698_v54 = vld [vmem:[%s17440_s14 + $0x48] ss:$16 sps:$4 sm:$0xff]  }
 0x720   :  { %10224 = vmatmul.mubr.msk.bf16.gmra.mxu1 %vm7281_vm15, %v10531_v15 }
 0x721   :  { %10227 = vmatprep.mubr.msk.bf16.mxu1 %vm10824_vm11, %v17908_v8  ;;  %7677 = vmatpush1.bf16.msra.mxu1 %v10550_v51  ;;  %v16705_v51 = vld [vmem:[%s17440_s14 + $0x24] ss:$16 sps:$4 sm:$0xff]  }
 0x722   :  { %7678 = vmatprep.subr.bf16.mxu1 %v10558_v29  ;;  %v16710_v29 = vld [vmem:[%s17440_s14 + $0x2c] ss:$16 sps:$4 sm:$0xff]  }
 0x725   :  { %7679 = vmatpush1.bf16.msra.mxu1 %v10556_v50 }
 0x726   :  { %7680 = vmatprep.subr.bf16.mxu1 %v10564_v33 }
 0x728   :  { %10228 = vmatmul.mubr.msk.bf16.gmra.mxu1 %vm7281_vm15, %v10532_v26  ;;  %v16717_v26 = vld [vmem:[%s17440_s14 + $0x20] ss:$16 sps:$4 sm:$0xff]  }
 0x729   :  { %10231 = vmatprep.mubr.msk.bf16.mxu1 %vm10824_vm11, %v17908_v8  ;;  %7681 = vmatpush1.bf16.msra.mxu1 %v10562_v57  ;;  %v16722_v57 = vld [vmem:[%s17440_s14 + $0x28] ss:$16 sps:$4 sm:$0xff]  }
 0x72a   :  { %7682 = vmatprep.subr.bf16.mxu1 %v10570_v34 }
 0x72d   :  { %7683 = vmatpush1.bf16.msra.mxu1 %v10568_v9  ;;  %v16729_v9 = vld [vmem:[%s17440_s14 + $0x4] ss:$16 sps:$4 sm:$0xff]  }
 0x72e   :  { %7684 = vmatprep.subr.bf16.mxu1 %v10576_v19  ;;  %v16734_v19 = vld [vmem:[%s17440_s14 + $0xc] ss:$16 sps:$4 sm:$0xff]  }
 0x730   :  { %10232 = vmatmul.mubr.msk.bf16.gmra.mxu1 %vm7281_vm15, %v10533_v25 }
 0x731   :  { %10235 = vmatprep.mubr.msk.bf16.mxu1 %vm10824_vm11, %v17908_v8  ;;  %7685 = vmatpush1.bf16.msra.mxu1 %v10574_v45  ;;  %v16743_v45 = vld [vmem:[%s17440_s14] ss:$16 sps:$4 sm:$0xff]  }
 0x732   :  { %7686 = vmatprep.subr.bf16.mxu1 %v10582_v55 }
 0x735   :  { %7687 = vmatpush1.bf16.msra.mxu1 %v10580_v59 }
 0x736   :  { %7986 = vmatprep.subr.bf16.mxu1 %v16562_v38 }
 0x738   :  { %10236 = vmatmul.mubr.msk.bf16.gmra.mxu1 %vm7281_vm15, %v10534_v6  ;;  %v16748_v6 = vld [vmem:[%s17440_s14 + $0x8] ss:$16 sps:$4 sm:$0xff]  }
 0x739   :  { %7704 = vmatprep.mubr.bf16.mxu1 %v18485_v61 }
 0x7d8   :  { %v7335_v16 = vpop.f32.mrf.mxu1 }
 0x7da   :  { %v10221_v41 = vpop.f32.mrf.mxu1 }
 0x7dc   :  { %v7338_v17 = vpop.f32.mrf.mxu1 }
 0x7dd   :  { %v7373_v31 = vpack.c.bf16 %v7338_v17, %v7335_v16  ;;  %v9037_v16 = vld [vmem:[%s17432_s16 + $0x4] ss:$8 sm:$0xf] }
 0x7de   :  { %v10222_v10 = vpop.f32.mrf.mxu1 }
 0x7df   :  { %7624 = vmatmul.mubr.bf16.vlgmr.msra.gmra.mxu0 %v7373_v31  ;;  %7705 = vmatmul.mubr.bf16.vlgmr.msra.gmra.mxu1 %v7373_v31 }
 0x7e0   :  { %v7343_v28 = vpop.f32.mrf.mxu1  ;;  %7633 = vmatprep.mubr.bf16.mxu0 %v18485_v61  ;;  %7714 = vmatprep.mubr.bf16.mxu1 %v18485_v61 }
 0x7e1   :  { %7946 = vmatpush1.bf16.msra.mxu0 %v16569_v52  ;;  %7987 = vmatpush1.bf16.msra.mxu1 %v16574_v22 }
 0x7e2   :  { %v10225_v18 = vpop.f32.mrf.mxu1  ;;  %7947 = vmatprep.subr.bf16.mxu0 %v16579_v60  ;;  %7988 = vmatprep.subr.bf16.mxu1 %v16584_v14 }
 0x7e3   :  { %v16810_v18 = vrot.slane %v9037_v16, %v18564_v46 }
 0x7e4   :  { %v7346_v40 = vpop.f32.mrf.mxu1 }
 0x7e5   :  { %v7374_v3 = vpack.c.bf16 %v7346_v40, %v7343_v28  ;;  %7948 = vmatpush1.bf16.msra.mxu0 %v16593_v47  ;;  %7989 = vmatpush1.bf16.msra.mxu1 %v16598_v23  ;;  %v16807_v28 = vrot.slane %v9037_v16, %v6850_v35 }
 0x7e6   :  { %v10226_v20 = vpop.f32.mrf.mxu1  ;;  %7949 = vmatprep.subr.bf16.mxu0 %v16605_v0  ;;  %7990 = vmatprep.subr.bf16.mxu1 %v16610_v27 }
 0x7e7   :  { %7634 = vmatmul.mubr.bf16.gmra.mxu0 %v7374_v3  ;;  %7715 = vmatmul.mubr.bf16.gmra.mxu1 %v7374_v3  ;;  %v16814_v20 = vrot.slane %v9037_v16, %v6854_v37 }
 0x7e8   :  { %v7351_v63 = vpop.f32.mrf.mxu1  ;;  %7643 = vmatprep.mubr.bf16.mxu0 %v18485_v61  ;;  %7724 = vmatprep.mubr.bf16.mxu1 %v18485_v61 }
 0x7e9   :  { %7950 = vmatpush1.bf16.msra.mxu0 %v16617_v5  ;;  %7991 = vmatpush1.bf16.msra.mxu1 %v16622_v4 }
 0x7ea   :  { %v10229_v42 = vpop.f32.mrf.mxu1  ;;  %7951 = vmatprep.subr.bf16.mxu0 %v16629_v44  ;;  %7992 = vmatprep.subr.bf16.mxu1 %v16634_v62 }
 0x7ec   :  { %v7354_v49 = vpop.f32.mrf.mxu1 }
 0x7ed   :  { %v7375_v36 = vpack.c.bf16 %v7354_v49, %v7351_v63  ;;  %7952 = vmatpush1.bf16.msra.mxu0 %v16643_v56  ;;  %7993 = vmatpush1.bf16.msra.mxu1 %v16648_v12  ;;  %v16817_v63 = vrot.slane %v9037_v16, %v18567_v2 }
 0x7ee   :  { %v10230_v1 = vpop.f32.mrf.mxu1  ;;  %7953 = vmatprep.subr.bf16.mxu0 %v16655_v48  ;;  %7994 = vmatprep.subr.bf16.mxu1 %v16660_v53 }
 0x7ef   :  { %7644 = vmatmul.mubr.bf16.gmra.mxu0 %v7375_v36  ;;  %7725 = vmatmul.mubr.bf16.gmra.mxu1 %v7375_v36 }
 0x7f0   :  { %v7359_v39 = vpop.f32.mrf.mxu1  ;;  %7653 = vmatprep.mubr.bf16.mxu0 %v18485_v61  ;;  %7734 = vmatprep.mubr.bf16.mxu1 %v18485_v61 }
 0x7f1   :  { %7954 = vmatpush1.bf16.msra.mxu0 %v16667_v32  ;;  %7995 = vmatpush1.bf16.msra.mxu1 %v16672_v30 }
 0x7f2   :  { %v10233_v15 = vpop.f32.mrf.mxu1  ;;  %7955 = vmatprep.subr.bf16.mxu0 %v16679_v43  ;;  %7996 = vmatprep.subr.bf16.mxu1 %v16684_v7 }
 0x7f4   :  { %v7362_v50 = vpop.f32.mrf.mxu1 }
 0x7f5   :  { %v7376_v33 = vpack.c.bf16 %v7362_v50, %v7359_v39  ;;  %7956 = vmatpush1.bf16.msra.mxu0 %v16693_v13  ;;  %7997 = vmatpush1.bf16.msra.mxu1 %v16698_v54 }
 0x7f6   :  { %v10234_v34 = vpop.f32.mrf.mxu1  ;;  %7957 = vmatprep.subr.bf16.mxu0 %v16705_v51  ;;  %7998 = vmatprep.subr.bf16.mxu1 %v16710_v29 }
 0x7f7   :  { %7654 = vmatmul.mubr.bf16.gmra.mxu0 %v7376_v33  ;;  %7735 = vmatmul.mubr.bf16.gmra.mxu1 %v7376_v33 }
 0x7f8   :  { %v7367_v25 = vpop.f32.mrf.mxu1  ;;  %7663 = vmatprep.mubr.bf16.mxu0 %v18485_v61  ;;  %7744 = vmatprep.mubr.bf16.mxu1 %v18485_v61 }
 0x7f9   :  { %7958 = vmatpush1.bf16.msra.mxu0 %v16717_v26  ;;  %7999 = vmatpush1.bf16.msra.mxu1 %v16722_v57  ;;  %v7377_v24 = vpack.c.bf16 %v7367_v25, %v7367_v25 }
 0x7fa   :  { %v10237_v21 = vpop.f32.mrf.mxu1  ;;  %7959 = vmatprep.subr.bf16.mxu0 %v16729_v9  ;;  %8000 = vmatprep.subr.bf16.mxu1 %v16734_v19 }
 0x7fc   :  { %v7370_v59 = vpop.f32.mrf.mxu1 }
 0x7fd   :  { %7960 = vmatpush1.bf16.msra.mxu0 %v16743_v45  ;;  %8001 = vmatpush1.bf16.msra.mxu1 %v16748_v6 }
 0x7fe   :  { %v10238_v55 = vpop.f32.mrf.mxu1  ;;  %8053 = vmatprep.subr.bf16.mxu0 %v16557_v58  ;;  %8094 = vmatprep.subr.bf16.mxu1 %v16562_v38 }
 0x7ff   :  { %7664 = vmatmul.mubr.bf16.gmra.mxu0 %v7377_v24  ;;  %7745 = vmatmul.mubr.bf16.gmra.mxu1 %v7377_v24 }
 0x800   :  { %7977 = vmatprep.mubr.bf16.mxu0 %v18485_v61  ;;  %8018 = vmatprep.mubr.bf16.mxu1 %v18485_v61 }
 0x807   :  { %7978 = vmatmul.mubr.bf16.vlgmr.msra.gmra.mxu0 %v18485_v61  ;;  %8019 = vmatmul.mubr.bf16.vlgmr.msra.gmra.mxu1 %v18485_v61 }
 0x808   :  { %8054 = vmatpush1.bf16.msra.mxu0 %v16569_v52  ;;  %8095 = vmatpush1.bf16.msra.mxu1 %v16574_v22 }
 0x809   :  { %8055 = vmatprep.subr.bf16.mxu0 %v16579_v60  ;;  %8096 = vmatprep.subr.bf16.mxu1 %v16584_v14 }
 0x80a   :  { %8085 = vmatprep.mubr.bf16.mxu0 %v18485_v61  ;;  %8126 = vmatprep.mubr.bf16.mxu1 %v18485_v61 }
 0x80c   :  { %8056 = vmatpush1.bf16.msra.mxu0 %v16593_v47  ;;  %8097 = vmatpush1.bf16.msra.mxu1 %v16598_v23 }
 0x80d   :  { %8057 = vmatprep.subr.bf16.mxu0 %v16605_v0  ;;  %8098 = vmatprep.subr.bf16.mxu1 %v16610_v27 }
 0x810   :  { %8058 = vmatpush1.bf16.msra.mxu0 %v16617_v5  ;;  %8099 = vmatpush1.bf16.msra.mxu1 %v16622_v4 }
 0x811   :  { %8059 = vmatprep.subr.bf16.mxu0 %v16629_v44  ;;  %8100 = vmatprep.subr.bf16.mxu1 %v16634_v62 }
 0x814   :  { %8060 = vmatpush1.bf16.msra.mxu0 %v16643_v56  ;;  %8101 = vmatpush1.bf16.msra.mxu1 %v16648_v12 }
 0x815   :  { %8061 = vmatprep.subr.bf16.mxu0 %v16655_v48  ;;  %8102 = vmatprep.subr.bf16.mxu1 %v16660_v53 }
 0x818   :  { %8062 = vmatpush1.bf16.msra.mxu0 %v16667_v32  ;;  %8103 = vmatpush1.bf16.msra.mxu1 %v16672_v30 }
 0x819   :  { %8063 = vmatprep.subr.bf16.mxu0 %v16679_v43  ;;  %8104 = vmatprep.subr.bf16.mxu1 %v16684_v7 }
 0x81c   :  { %8064 = vmatpush1.bf16.msra.mxu0 %v16693_v13  ;;  %8105 = vmatpush1.bf16.msra.mxu1 %v16698_v54 }
 0x81d   :  { %8065 = vmatprep.subr.bf16.mxu0 %v16705_v51  ;;  %8106 = vmatprep.subr.bf16.mxu1 %v16710_v29 }
 0x820   :  { %8066 = vmatpush1.bf16.msra.mxu0 %v16717_v26  ;;  %8107 = vmatpush1.bf16.msra.mxu1 %v16722_v57 }
 0x821   :  { %8067 = vmatprep.subr.bf16.mxu0 %v16729_v9  ;;  %8108 = vmatprep.subr.bf16.mxu1 %v16734_v19 }
 0x824   :  { %8068 = vmatpush1.bf16.msra.mxu0 %v16743_v45  ;;  %8109 = vmatpush1.bf16.msra.mxu1 %v16748_v6 }
 0x825   :  { %8161 = vmatprep.subr.bf16.mxu0 %v16557_v58  ;;  %8202 = vmatprep.subr.bf16.mxu1 %v16562_v38 }
 0x89f   :  { %v16797_v41 = vpop.f32.mrf.mxu0  ;;  %v16799_v17 = vpop.f32.mrf.mxu1 }
 0x8a1   :  { %v16801_v31 = vpop.f32.mrf.mxu0  ;;  %v16803_v10 = vpop.f32.mrf.mxu1 }
 0x8a3   :  { %v7629_v40 = vpop.f32.mrf.mxu0  ;;  %v7710_v3 = vpop.f32.mrf.mxu1 }
 0x8a4   :  { %v16820_v42 = vadd.f32 %v7629_v40, %v16810_v18  ;;  %v16823_v49 = vadd.f32 %v7710_v3, %v16807_v28 }
 0x8a5   :  { %v7631_v35 = vpop.f32.mrf.mxu0  ;;  %v7712_v36 = vpop.f32.mrf.mxu1 }
 0x8a6   :  { %v16826_v46 = vadd.f32 %v7631_v35, %v16817_v63  ;;  %v16829_v1 = vadd.f32 %v7712_v36, %v16814_v20 }
 0x8a7   :  { %v7635_v11 = vpop.f32.mrf.mxu0  ;;  %v7716_v37 = vpop.f32.mrf.mxu1 }
 0x8a8   :  { %v16832_v39 = vadd.f32 %v7635_v11, %v16810_v18  ;;  %v16835_v2 = vadd.f32 %v7716_v37, %v16807_v28 }
 0x8a9   :  { %v7637_v15 = vpop.f32.mrf.mxu0  ;;  %v7718_v50 = vpop.f32.mrf.mxu1 }
 0x8aa   :  { %18573 = vst [vmem:[#allocation103_spill] sm:$0xff] %v16835_v2  ;;  %v16838_v33 = vadd.f32 %v7637_v15, %v16817_v63  ;;  %v16841_v34 = vadd.f32 %v7718_v50, %v16814_v20 }
 0x8ab   :  { %v7639_v25 = vpop.f32.mrf.mxu0  ;;  %v7720_v21 = vpop.f32.mrf.mxu1 }
 0x8ac   :  { %18574 = vst [vmem:[#allocation35_spill] sm:$0xff] %v16841_v34  ;;  %v16844_v24 = vadd.f32 %v7639_v25, %v16810_v18  ;;  %v16847_v59 = vadd.f32 %v7720_v21, %v16807_v28 }
 0x8ad   :  { %v7641_v55 = vpop.f32.mrf.mxu0  ;;  %v7722_v16 = vpop.f32.mrf.mxu1 }
 0x8ae   :  { %18575 = vst [vmem:[#allocation73_spill] sm:$0xff] %v16844_v24  ;;  %18576 = vst [vmem:[#allocation152_spill] sm:$0xff] %v16847_v59  ;;  %v16850_v40 = vadd.f32 %v7641_v55, %v16817_v63  ;;  %v16853_v3 = vadd.f32 %v7722_v16, %v16814_v20 }
 0x8af   :  { %v7645_v35 = vpop.f32.mrf.mxu0  ;;  %v7726_v36 = vpop.f32.mrf.mxu1 }
 0x8b0   :  { %18577 = vst [vmem:[#allocation154_spill] sm:$0xff] %v16850_v40  ;;  %18578 = vst [vmem:[#allocation157_spill] sm:$0xff] %v16853_v3  ;;  %v16856_v11 = vadd.f32 %v7645_v35, %v16810_v18  ;;  %v16859_v37 = vadd.f32 %v7726_v36, %v16807_v28  ;;  %v7626_v3 = vadd.f32 %v16797_v41, %v16810_v18 }
 0x8b1   :  { %v7647_v15 = vpop.f32.mrf.mxu0  ;;  %v7728_v50 = vpop.f32.mrf.mxu1  ;;  %v7709_v41 = vadd.f32 %v16803_v10, %v16814_v20 }
 0x8b2   :  { %18579 = vst [vmem:[#allocation107_spill] sm:$0xff] %v16856_v11  ;;  %18580 = vst [vmem:[#allocation37_spill] sm:$0xff] %v16859_v37  ;;  %v16862_v25 = vadd.f32 %v7647_v15, %v16817_v63  ;;  %v16865_v21 = vadd.f32 %v7728_v50, %v16814_v20 }
 0x8b3   :  { %v7649_v55 = vpop.f32.mrf.mxu0  ;;  %v7730_v8 = vpop.f32.mrf.mxu1 }
 0x8b4   :  { %18581 = vst [vmem:[#allocation74_spill] sm:$0xff] %v16862_v25  ;;  %18582 = vst [vmem:[#allocation160_spill] sm:$0xff] %v16865_v21  ;;  %v16868_v16 = vadd.f32 %v7649_v55, %v16810_v18  ;;  %v16871_v59 = vadd.f32 %v7730_v8, %v16807_v28 }
 0x8b5   :  { %v7651_v35 = vpop.f32.mrf.mxu0  ;;  %v7732_v11 = vpop.f32.mrf.mxu1 }
 0x8b6   :  { %18583 = vst [vmem:[#allocation158_spill] sm:$0xff] %v16868_v16  ;;  %18584 = vst [vmem:[#allocation164_spill] sm:$0xff] %v16871_v59  ;;  %v16874_v36 = vadd.f32 %v7651_v35, %v16817_v63  ;;  %v16877_v37 = vadd.f32 %v7732_v11, %v16814_v20 }
 0x8b7   :  { %v7655_v15 = vpop.f32.mrf.mxu0  ;;  %v7736_v25 = vpop.f32.mrf.mxu1 }
 0x8b8   :  { %18585 = vst [vmem:[#allocation111_spill] sm:$0xff] %v16874_v36  ;;  %18586 = vst [vmem:[#allocation39_spill] sm:$0xff] %v16877_v37  ;;  %v16880_v50 = vadd.f32 %v7655_v15, %v16810_v18  ;;  %v16883_v21 = vadd.f32 %v7736_v25, %v16807_v28 }
 0x8b9   :  { %v7657_v55 = vpop.f32.mrf.mxu0  ;;  %v7738_v16 = vpop.f32.mrf.mxu1 }
 0x8ba   :  { %18587 = vst [vmem:[#allocation76_spill] sm:$0xff] %v16880_v50  ;;  %18588 = vst [vmem:[#allocation32_spill] sm:$0xff] %v16883_v21  ;;  %v16886_v8 = vadd.f32 %v7657_v55, %v16817_v63  ;;  %v16889_v59 = vadd.f32 %v7738_v16, %v16814_v20 }
 0x8bb   :  { %v7659_v35 = vpop.f32.mrf.mxu0  ;;  %v7740_v36 = vpop.f32.mrf.mxu1 }
 0x8bc   :  { %18589 = vst [vmem:[#allocation161_spill] sm:$0xff] %v16886_v8  ;;  %18590 = vst [vmem:[#allocation115_spill] sm:$0xff] %v16889_v59  ;;  %v16892_v11 = vadd.f32 %v7659_v35, %v16810_v18  ;;  %v16895_v37 = vadd.f32 %v7740_v36, %v16807_v28 }
 0x8bd   :  { %v7661_v15 = vpop.f32.mrf.mxu0  ;;  %v7742_v50 = vpop.f32.mrf.mxu1 }
 0x8be   :  { %18591 = vst [vmem:[#allocation41_spill] sm:$0xff] %v16892_v11  ;;  %18592 = vst [vmem:[#allocation167_spill] sm:$0xff] %v16895_v37  ;;  %v16898_v25 = vadd.f32 %v7661_v15, %v16817_v63  ;;  %v16901_v21 = vadd.f32 %v7742_v50, %v16814_v20 }
 0x8bf   :  { %v7665_v55 = vpop.f32.mrf.mxu0  ;;  %v7746_v8 = vpop.f32.mrf.mxu1 }
 0x8c0   :  { %18593 = vst [vmem:[#allocation78_spill] sm:$0xff] %v16898_v25  ;;  %18594 = vst [vmem:[#allocation14_spill] sm:$0xff] %v16901_v21  ;;  %v16904_v16 = vadd.f32 %v7665_v55, %v16810_v18  ;;  %v16907_v59 = vadd.f32 %v7746_v8, %v16807_v28  ;;  %v7628_v8 = vadd.f32 %v16801_v31, %v16817_v63 }
 0x8c1   :  { %v7667_v35 = vpop.f32.mrf.mxu0  ;;  %v7748_v11 = vpop.f32.mrf.mxu1  ;;  %v7707_v31 = vadd.f32 %v16799_v17, %v16807_v28 }
 0x8c2   :  { %18595 = vst [vmem:[#allocation5_spill] sm:$0xff] %v16904_v16  ;;  %18596 = vst [vmem:[#allocation168_spill] sm:$0xff] %v16907_v59  ;;  %v16910_v36 = vadd.f32 %v7667_v35, %v16817_v63  ;;  %v16913_v37 = vadd.f32 %v7748_v11, %v16814_v20 }
 0x8c3   :  { %v7669_v15 = vpop.f32.mrf.mxu0  ;;  %v7750_v25 = vpop.f32.mrf.mxu1 }
 0x8c4   :  { %18597 = vst [vmem:[#allocation119_spill] sm:$0xff] %v16910_v36  ;;  %18598 = vst [vmem:[#allocation43_spill] sm:$0xff] %v16913_v37 }
 0x8c5   :  { %v7670_v50 = vpop.f32.mrf.mxu0  ;;  %v7751_v21 = vpop.f32.mrf.mxu1 }
 0x8c7   :  { %v7979_v55 = vpop.f32.mrf.mxu0  ;;  %v8020_v16 = vpop.f32.mrf.mxu1 }
 0x8c8   :  { %v8027_v59 = vadd.f32 %v7979_v55, %v7626_v3 }
 0x8c9   :  { %v7981_v40 = vpop.f32.mrf.mxu0  ;;  %v8022_v24 = vpop.f32.mrf.mxu1 }
 0x8ca   :  { %v8031_v35 = vsub.f32 0.0, %v8027_v59  ;;  %v8028_v36 = vadd.f32 %v7981_v40, %v7628_v8  ;;  %v8030_v18 = vadd.f32 %v8022_v24, %v7709_v41  ;;  %v8029_v40 = vadd.f32 %v8020_v16, %v7707_v31 }
 0x8cb   :  { %v7983_v2 = vpop.f32.mrf.mxu0  ;;  %v8024_v11 = vpop.f32.mrf.mxu1 }
 0x8cc   :  { %v8032_v37 = vmul.f32 1.442695, %v8031_v35  ;;  %v8036_v15 = vsub.f32 0.0, %v8028_v36  ;;  %v8042_v34 = vsub.f32 0.0, %v8030_v18 }
 0x8cd   :  { %v7984_v25 = vpop.f32.mrf.mxu0  ;;  %v8025_v50 = vpop.f32.mrf.mxu1 }
 0x8ce   :  { %10639 = vpow2.f32 %v8032_v37  ;;  %v8037_v21 = vmul.f32 1.442695, %v8036_v15  ;;  %v8043_v63 = vmul.f32 1.442695, %v8042_v34 }
 0x8d0   :  { %10641 = vpow2.f32 %v8037_v21 }
 0x8d1   :  { %10643 = vpow2.f32 %v8043_v63 }
 0x8db   :  { %v10640_v59 = vpop.eup %10639 }
 0x8dc   :  { %v8034_v2 = vadd.f32 1.0, %v10640_v59 }
 0x8dd   :  { %v10642_v3 = vpop.eup %10641 }
 0x8de   :  { %10645 = vrcp.f32 %v8034_v2  ;;  %v8039_v36 = vadd.f32 1.0, %v10642_v3  ;;  %v10644_v37 = vpop.eup %10643 }
 0x8df   :  { %10647 = vtanh.f32 %v8029_v40  ;;  %v8045_v20 = vadd.f32 1.0, %v10644_v37 }
 0x8e0   :  { %10649 = vrcp.f32 %v8039_v36 }
 0x8e1   :  { %10651 = vrcp.f32 %v8045_v20 }
 0x8eb   :  { %v10646_v55 = vpop.eup %10645 }
 0x8ec   :  { %v10648_v8 = vpop.eup %10647 }
 0x8ed   :  { %v10650_v10 = vpop.eup %10649  ;;  %v8048_v35 = vmul.f32 %v10648_v8, %v10646_v55 }
 0x8ee   :  { %v8047_v24 = vmul.f32 0.0, %v10650_v10  ;;  %v10652_v17 = vpop.eup %10651 }
 0x8f0   :  { %v16923_v11 = vadd.f32 %v8048_v35, %v8047_v24 }
 0x8f2   :  { %10653 = vtanh.f32 %v16923_v11 }
 0x8ff   :  { %v10654_v28 = vpop.eup %10653 }
 0x900   :  { %v8051_v34 = vmul.f32 %v10654_v28, %v10652_v17 }
 0x902   :  { %v8052_v16 = vpack.c.bf16 %v8051_v34, %v8051_v34 }
 0x904   :  { %8086 = vmatmul.mubr.bf16.vlgmr.msra.gmra.mxu0 %v8052_v16  ;;  %8127 = vmatmul.mubr.bf16.vlgmr.msra.gmra.mxu1 %v8052_v16 }
 0x905   :  { %8162 = vmatpush1.bf16.msra.mxu0 %v16569_v52  ;;  %8203 = vmatpush1.bf16.msra.mxu1 %v16574_v22 }
 0x906   :  { %8163 = vmatprep.subr.bf16.mxu0 %v16579_v60  ;;  %8204 = vmatprep.subr.bf16.mxu1 %v16584_v14 }
 0x907   :  { %8193 = vmatprep.mubr.bf16.mxu0 %v18485_v61  ;;  %8234 = vmatprep.mubr.bf16.mxu1 %v18485_v61 }
 0x909   :  { %8164 = vmatpush1.bf16.msra.mxu0 %v16593_v47  ;;  %8205 = vmatpush1.bf16.msra.mxu1 %v16598_v23 }
 0x90a   :  { %8165 = vmatprep.subr.bf16.mxu0 %v16605_v0  ;;  %8206 = vmatprep.subr.bf16.mxu1 %v16610_v27 }
 0x90d   :  { %8166 = vmatpush1.bf16.msra.mxu0 %v16617_v5  ;;  %8207 = vmatpush1.bf16.msra.mxu1 %v16622_v4 }
 0x90e   :  { %8167 = vmatprep.subr.bf16.mxu0 %v16629_v44  ;;  %8208 = vmatprep.subr.bf16.mxu1 %v16634_v62 }
 0x911   :  { %8168 = vmatpush1.bf16.msra.mxu0 %v16643_v56  ;;  %8209 = vmatpush1.bf16.msra.mxu1 %v16648_v12 }
 0x912   :  { %8169 = vmatprep.subr.bf16.mxu0 %v16655_v48  ;;  %8210 = vmatprep.subr.bf16.mxu1 %v16660_v53 }
 0x915   :  { %8170 = vmatpush1.bf16.msra.mxu0 %v16667_v32  ;;  %8211 = vmatpush1.bf16.msra.mxu1 %v16672_v30 }
 0x916   :  { %8171 = vmatprep.subr.bf16.mxu0 %v16679_v43  ;;  %8212 = vmatprep.subr.bf16.mxu1 %v16684_v7 }
 0x919   :  { %8172 = vmatpush1.bf16.msra.mxu0 %v16693_v13  ;;  %8213 = vmatpush1.bf16.msra.mxu1 %v16698_v54 }
 0x91a   :  { %8173 = vmatprep.subr.bf16.mxu0 %v16705_v51  ;;  %8214 = vmatprep.subr.bf16.mxu1 %v16710_v29 }
 0x91d   :  { %8174 = vmatpush1.bf16.msra.mxu0 %v16717_v26  ;;  %8215 = vmatpush1.bf16.msra.mxu1 %v16722_v57 }
 0x91e   :  { %8175 = vmatprep.subr.bf16.mxu0 %v16729_v9  ;;  %8216 = vmatprep.subr.bf16.mxu1 %v16734_v19 }
 0x921   :  { %8176 = vmatpush1.bf16.msra.mxu0 %v16743_v45  ;;  %8217 = vmatpush1.bf16.msra.mxu1 %v16748_v6 }
 0x922   :  { %8269 = vmatprep.subr.bf16.mxu0 %v16557_v58  ;;  %8310 = vmatprep.subr.bf16.mxu1 %v16562_v38 }
 0x9c4   :  { %v8087_v15 = vpop.f32.mrf.mxu0  ;;  %v8128_v25 = vpop.f32.mrf.mxu1 }
 0x9c5   :  { %v8135_v50 = vadd.f32 %v8087_v15, %v16820_v42  ;;  %v8137_v10 = vadd.f32 %v8128_v25, %v16823_v49 }
 0x9c6   :  { %v8089_v21 = vpop.f32.mrf.mxu0  ;;  %v8130_v41 = vpop.f32.mrf.mxu1 }
 0x9c7   :  { %v8139_v18 = vsub.f32 0.0, %v8135_v50  ;;  %v8136_v31 = vadd.f32 %v8089_v21, %v16826_v46  ;;  %v8138_v55 = vadd.f32 %v8130_v41, %v16829_v1 }
 0x9c8   :  { %v8091_v63 = vpop.f32.mrf.mxu0  ;;  %v8132_v59 = vpop.f32.mrf.mxu1 }
 0x9c9   :  { %v8140_v40 = vmul.f32 1.442695, %v8139_v18  ;;  %v8144_v2 = vsub.f32 0.0, %v8136_v31  ;;  %v8150_v8 = vsub.f32 0.0, %v8138_v55 }
 0x9ca   :  { %v8092_v3 = vpop.f32.mrf.mxu0  ;;  %v8133_v36 = vpop.f32.mrf.mxu1 }
 0x9cb   :  { %10655 = vpow2.f32 %v8140_v40  ;;  %v8145_v37 = vmul.f32 1.442695, %v8144_v2  ;;  %v8151_v42 = vmul.f32 1.442695, %v8150_v8 }
 0x9cd   :  { %10657 = vpow2.f32 %v8145_v37 }
 0x9ce   :  { %10659 = vtanh.f32 %v8137_v10 }
 0x9cf   :  { %10661 = vpow2.f32 %v8151_v42 }
 0x9d8   :  { %v10656_v20 = vpop.eup %10655 }
 0x9d9   :  { %v8142_v24 = vadd.f32 1.0, %v10656_v20 }
 0x9da   :  { %v10658_v35 = vpop.eup %10657 }
 0x9db   :  { %10663 = vrcp.f32 %v8142_v24  ;;  %v8147_v46 = vadd.f32 1.0, %v10658_v35  ;;  %v10660_v17 = vpop.eup %10659  ;;  %v18599_v24 = vld [vmem:[#allocation35_spill] sm:$0xff] }
 0x9dc   :  { %v10662_v28 = vpop.eup %10661 }
 0x9dd   :  { %10665 = vrcp.f32 %v8147_v46  ;;  %v8153_v50 = vadd.f32 1.0, %v10662_v28 }
 0x9df   :  { %10667 = vrcp.f32 %v8153_v50 }
 0x9e8   :  { %v10664_v34 = vpop.eup %10663 }
 0x9e9   :  { %v8156_v16 = vmul.f32 %v10664_v34, %v10660_v17  ;;  %v18600_v17 = vld [vmem:[#allocation103_spill] sm:$0xff] }
 0x9ea   :  { %v10666_v15 = vpop.eup %10665 }
 0x9eb   :  { %v8155_v1 = vmul.f32 %v10666_v15, %v16923_v11 }
 0x9ec   :  { %v10668_v49 = vpop.eup %10667 }
 0x9ed   :  { %v16965_v21 = vadd.f32 %v8156_v16, %v8155_v1 }
 0x9ef   :  { %10669 = vtanh.f32 %v16965_v21 }
 0x9fc   :  { %v10670_v25 = vpop.eup %10669 }
 0x9fd   :  { %v8159_v41 = vmul.f32 %v10670_v25, %v10668_v49 }
 0x9ff   :  { %v8160_v18 = vpack.c.bf16 %v8159_v41, %v8159_v41 }
 0xa01   :  { %8194 = vmatmul.mubr.bf16.vlgmr.msra.gmra.mxu0 %v8160_v18  ;;  %8235 = vmatmul.mubr.bf16.vlgmr.msra.gmra.mxu1 %v8160_v18 }
 0xa02   :  { %8270 = vmatpush1.bf16.msra.mxu0 %v16569_v52  ;;  %8311 = vmatpush1.bf16.msra.mxu1 %v16574_v22 }
 0xa03   :  { %8271 = vmatprep.subr.bf16.mxu0 %v16579_v60  ;;  %8312 = vmatprep.subr.bf16.mxu1 %v16584_v14 }
 0xa04   :  { %8301 = vmatprep.mubr.bf16.mxu0 %v18485_v61  ;;  %8342 = vmatprep.mubr.bf16.mxu1 %v18485_v61 }
 0xa06   :  { %8272 = vmatpush1.bf16.msra.mxu0 %v16593_v47  ;;  %8313 = vmatpush1.bf16.msra.mxu1 %v16598_v23 }
 0xa07   :  { %8273 = vmatprep.subr.bf16.mxu0 %v16605_v0  ;;  %8314 = vmatprep.subr.bf16.mxu1 %v16610_v27 }
 0xa0a   :  { %8274 = vmatpush1.bf16.msra.mxu0 %v16617_v5  ;;  %8315 = vmatpush1.bf16.msra.mxu1 %v16622_v4 }
 0xa0b   :  { %8275 = vmatprep.subr.bf16.mxu0 %v16629_v44  ;;  %8316 = vmatprep.subr.bf16.mxu1 %v16634_v62 }
 0xa0e   :  { %8276 = vmatpush1.bf16.msra.mxu0 %v16643_v56  ;;  %8317 = vmatpush1.bf16.msra.mxu1 %v16648_v12 }
 0xa0f   :  { %8277 = vmatprep.subr.bf16.mxu0 %v16655_v48  ;;  %8318 = vmatprep.subr.bf16.mxu1 %v16660_v53 }
 0xa12   :  { %8278 = vmatpush1.bf16.msra.mxu0 %v16667_v32  ;;  %8319 = vmatpush1.bf16.msra.mxu1 %v16672_v30 }
 0xa13   :  { %8279 = vmatprep.subr.bf16.mxu0 %v16679_v43  ;;  %8320 = vmatprep.subr.bf16.mxu1 %v16684_v7 }
 0xa16   :  { %8280 = vmatpush1.bf16.msra.mxu0 %v16693_v13  ;;  %8321 = vmatpush1.bf16.msra.mxu1 %v16698_v54 }
 0xa17   :  { %8281 = vmatprep.subr.bf16.mxu0 %v16705_v51  ;;  %8322 = vmatprep.subr.bf16.mxu1 %v16710_v29 }
 0xa1a   :  { %8282 = vmatpush1.bf16.msra.mxu0 %v16717_v26  ;;  %8323 = vmatpush1.bf16.msra.mxu1 %v16722_v57 }
 0xa1b   :  { %8283 = vmatprep.subr.bf16.mxu0 %v16729_v9  ;;  %8324 = vmatprep.subr.bf16.mxu1 %v16734_v19 }
 0xa1e   :  { %8284 = vmatpush1.bf16.msra.mxu0 %v16743_v45  ;;  %8325 = vmatpush1.bf16.msra.mxu1 %v16748_v6 }
 0xa1f   :  { %8377 = vmatprep.subr.bf16.mxu0 %v16557_v58  ;;  %8418 = vmatprep.subr.bf16.mxu1 %v16562_v38 }
 0xac1   :  { %v8195_v11 = vpop.f32.mrf.mxu0  ;;  %v8236_v31 = vpop.f32.mrf.mxu1 }
 0xac2   :  { %v8243_v63 = vadd.f32 %v8195_v11, %v16832_v39  ;;  %v8245_v28 = vadd.f32 %v8236_v31, %v18600_v17 }
 0xac3   :  { %v8197_v59 = vpop.f32.mrf.mxu0  ;;  %v8238_v40 = vpop.f32.mrf.mxu1 }
 0xac4   :  { %v8247_v2 = vsub.f32 0.0, %v8243_v63  ;;  %v8244_v3 = vadd.f32 %v8197_v59, %v16838_v33  ;;  %v8246_v35 = vadd.f32 %v8238_v40, %v18599_v24 }
 0xac5   :  { %v8199_v36 = vpop.f32.mrf.mxu0  ;;  %v8240_v37 = vpop.f32.mrf.mxu1 }
 0xac6   :  { %v8248_v55 = vmul.f32 1.442695, %v8247_v2  ;;  %v8252_v8 = vsub.f32 0.0, %v8244_v3  ;;  %v8258_v46 = vsub.f32 0.0, %v8246_v35  ;;  %v18601_v36 = vld [vmem:[#allocation73_spill] sm:$0xff] }
 0xac7   :  { %v8200_v10 = vpop.f32.mrf.mxu0  ;;  %v8241_v42 = vpop.f32.mrf.mxu1 }
 0xac8   :  { %10671 = vpow2.f32 %v8248_v55  ;;  %v8253_v20 = vmul.f32 1.442695, %v8252_v8  ;;  %v8259_v39 = vmul.f32 1.442695, %v8258_v46  ;;  %v18602_v42 = vld [vmem:[#allocation154_spill] sm:$0xff] }
 0xaca   :  { %10673 = vpow2.f32 %v8253_v20 }
 0xacb   :  { %10675 = vtanh.f32 %v8245_v28 }
 0xacc   :  { %10677 = vpow2.f32 %v8259_v39 }
 0xad5   :  { %v10672_v34 = vpop.eup %10671 }
 0xad6   :  { %v8250_v16 = vadd.f32 1.0, %v10672_v34 }
 0xad7   :  { %v10674_v15 = vpop.eup %10673 }
 0xad8   :  { %10679 = vrcp.f32 %v8250_v16  ;;  %v8255_v33 = vadd.f32 1.0, %v10674_v15  ;;  %v10676_v50 = vpop.eup %10675  ;;  %v18604_v15 = vld [vmem:[#allocation152_spill] sm:$0xff] }
 0xad9   :  { %v10678_v1 = vpop.eup %10677 }
 0xada   :  { %10681 = vrcp.f32 %v8255_v33  ;;  %v8261_v18 = vadd.f32 1.0, %v10678_v1 }
 0xadc   :  { %10683 = vrcp.f32 %v8261_v18 }
 0xae5   :  { %v10680_v49 = vpop.eup %10679 }
 0xae6   :  { %v8264_v25 = vmul.f32 %v10680_v49, %v10676_v50 }
 0xae7   :  { %v10682_v41 = vpop.eup %10681 }
 0xae8   :  { %v8263_v11 = vmul.f32 %v10682_v41, %v16965_v21 }
 0xae9   :  { %v10684_v31 = vpop.eup %10683 }
 0xaea   :  { %v17007_v63 = vadd.f32 %v8264_v25, %v8263_v11 }
 0xaec   :  { %10685 = vtanh.f32 %v17007_v63 }
 0xaf9   :  { %v10686_v59 = vpop.eup %10685 }
 0xafa   :  { %v8267_v40 = vmul.f32 %v10686_v59, %v10684_v31 }
 0xafc   :  { %v8268_v2 = vpack.c.bf16 %v8267_v40, %v8267_v40 }
 0xafe   :  { %8302 = vmatmul.mubr.bf16.vlgmr.msra.gmra.mxu0 %v8268_v2  ;;  %8343 = vmatmul.mubr.bf16.vlgmr.msra.gmra.mxu1 %v8268_v2 }
 0xaff   :  { %8378 = vmatpush1.bf16.msra.mxu0 %v16569_v52  ;;  %8419 = vmatpush1.bf16.msra.mxu1 %v16574_v22 }
 0xb00   :  { %8379 = vmatprep.subr.bf16.mxu0 %v16579_v60  ;;  %8420 = vmatprep.subr.bf16.mxu1 %v16584_v14 }
 0xb01   :  { %8409 = vmatprep.mubr.bf16.mxu0 %v18485_v61  ;;  %8450 = vmatprep.mubr.bf16.mxu1 %v18485_v61 }
 0xb03   :  { %8380 = vmatpush1.bf16.msra.mxu0 %v16593_v47  ;;  %8421 = vmatpush1.bf16.msra.mxu1 %v16598_v23 }
 0xb04   :  { %8381 = vmatprep.subr.bf16.mxu0 %v16605_v0  ;;  %8422 = vmatprep.subr.bf16.mxu1 %v16610_v27 }
 0xb07   :  { %8382 = vmatpush1.bf16.msra.mxu0 %v16617_v5  ;;  %8423 = vmatpush1.bf16.msra.mxu1 %v16622_v4 }
 0xb08   :  { %8383 = vmatprep.subr.bf16.mxu0 %v16629_v44  ;;  %8424 = vmatprep.subr.bf16.mxu1 %v16634_v62 }
 0xb0b   :  { %8384 = vmatpush1.bf16.msra.mxu0 %v16643_v56  ;;  %8425 = vmatpush1.bf16.msra.mxu1 %v16648_v12 }
 0xb0c   :  { %8385 = vmatprep.subr.bf16.mxu0 %v16655_v48  ;;  %8426 = vmatprep.subr.bf16.mxu1 %v16660_v53 }
 0xb0f   :  { %8386 = vmatpush1.bf16.msra.mxu0 %v16667_v32  ;;  %8427 = vmatpush1.bf16.msra.mxu1 %v16672_v30 }
 0xb10   :  { %8387 = vmatprep.subr.bf16.mxu0 %v16679_v43  ;;  %8428 = vmatprep.subr.bf16.mxu1 %v16684_v7 }
 0xb13   :  { %8388 = vmatpush1.bf16.msra.mxu0 %v16693_v13  ;;  %8429 = vmatpush1.bf16.msra.mxu1 %v16698_v54 }
 0xb14   :  { %8389 = vmatprep.subr.bf16.mxu0 %v16705_v51  ;;  %8430 = vmatprep.subr.bf16.mxu1 %v16710_v29 }
 0xb17   :  { %8390 = vmatpush1.bf16.msra.mxu0 %v16717_v26  ;;  %8431 = vmatpush1.bf16.msra.mxu1 %v16722_v57 }
 0xb18   :  { %8391 = vmatprep.subr.bf16.mxu0 %v16729_v9  ;;  %8432 = vmatprep.subr.bf16.mxu1 %v16734_v19 }
 0xb1b   :  { %8392 = vmatpush1.bf16.msra.mxu0 %v16743_v45  ;;  %8433 = vmatpush1.bf16.msra.mxu1 %v16748_v6 }
 0xb1c   :  { %8485 = vmatprep.subr.bf16.mxu0 %v16557_v58  ;;  %8526 = vmatprep.subr.bf16.mxu1 %v16562_v38  ;;  %v18603_v58 = vld [vmem:[#allocation157_spill] sm:$0xff] }
 0xbbe   :  { %v8303_v21 = vpop.f32.mrf.mxu0  ;;  %v8344_v3 = vpop.f32.mrf.mxu1 }
 0xbbf   :  { %v8351_v37 = vadd.f32 %v8303_v21, %v18601_v36  ;;  %v8353_v33 = vadd.f32 %v8344_v3, %v18604_v15  ;;  %v17133_v15 = vld [vmem:[%s17440_s14 + $0xc0] ss:$16 sps:$4 sm:$0xff]  }
 0xbc0   :  { %v8305_v55 = vpop.f32.mrf.mxu0  ;;  %v8346_v8 = vpop.f32.mrf.mxu1 }
 0xbc1   :  { %v8355_v10 = vsub.f32 0.0, %v8351_v37  ;;  %v8352_v20 = vadd.f32 %v8305_v55, %v18602_v42  ;;  %v8354_v38 = vadd.f32 %v8346_v8, %v18603_v58  ;;  %v17113_v58 = vld [vmem:[%s17440_s14 + $0xe8] ss:$16 sps:$4 sm:$0xff]  }
 0xbc2   :  { %v8307_v24 = vpop.f32.mrf.mxu0  ;;  %v8348_v35 = vpop.f32.mrf.mxu1 }
 0xbc3   :  { %v8356_v46 = vmul.f32 1.442695, %v8355_v10  ;;  %v8360_v17 = vsub.f32 0.0, %v8352_v20  ;;  %v8366_v16 = vsub.f32 0.0, %v8354_v38  ;;  %v17119_v38 = vld [vmem:[%s17440_s14 + $0xc4] ss:$16 sps:$4 sm:$0xff]  }
 0xbc4   :  { %v8308_v28 = vpop.f32.mrf.mxu0  ;;  %v8349_v39 = vpop.f32.mrf.mxu1 }
 0xbc5   :  { %10687 = vpow2.f32 %v8356_v46  ;;  %v8361_v34 = vmul.f32 1.442695, %v8360_v17  ;;  %v8367_v50 = vmul.f32 1.442695, %v8366_v16  ;;  %v17125_v16 = vld [vmem:[%s17440_s14 + $0xcc] ss:$16 sps:$4 sm:$0xff]  }
 0xbc7   :  { %10689 = vpow2.f32 %v8361_v34  ;;  %v17107_v34 = vld [vmem:[%s17440_s14 + $0xe0] ss:$16 sps:$4 sm:$0xff]  }
 0xbc8   :  { %10691 = vtanh.f32 %v8353_v33  ;;  %v17139_v33 = vld [vmem:[%s17440_s14 + $0xc8] ss:$16 sps:$4 sm:$0xff]  }
 0xbc9   :  { %10693 = vpow2.f32 %v8367_v50  ;;  %v17145_v50 = vld [vmem:[%s17440_s14 + $0xa4] ss:$16 sps:$4 sm:$0xff]  }
 0xbd2   :  { %v10688_v1 = vpop.eup %10687 }
 0xbd3   :  { %v8358_v49 = vadd.f32 1.0, %v10688_v1  ;;  %v17151_v1 = vld [vmem:[%s17440_s14 + $0xac] ss:$16 sps:$4 sm:$0xff]  }
 0xbd4   :  { %v10690_v25 = vpop.eup %10689 }
 0xbd5   :  { %10695 = vrcp.f32 %v8358_v49  ;;  %v8363_v41 = vadd.f32 1.0, %v10690_v25  ;;  %v10692_v18 = vpop.eup %10691  ;;  %v17157_v49 = vld [vmem:[%s17440_s14 + $0xa0] ss:$16 sps:$4 sm:$0xff]   ;;  %v17163_v25 = vld [vmem:[%s17440_s14 + $0xa8] ss:$16 sps:$4 sm:$0xff]  }
 0xbd6   :  { %v10694_v11 = vpop.eup %10693 }
 0xbd7   :  { %10697 = vrcp.f32 %v8363_v41  ;;  %v8369_v2 = vadd.f32 1.0, %v10694_v11  ;;  %v17169_v41 = vld [vmem:[%s17440_s14 + $0x84] ss:$16 sps:$4 sm:$0xff]   ;;  %v17181_v11 = vld [vmem:[%s17440_s14 + $0x80] ss:$16 sps:$4 sm:$0xff]  }
 0xbd9   :  { %10699 = vrcp.f32 %v8369_v2  ;;  %v17205_v2 = vld [vmem:[%s17440_s14 + $0x60] ss:$16 sps:$4 sm:$0xff]  }
 0xbe2   :  { %v10696_v31 = vpop.eup %10695 }
 0xbe3   :  { %v8372_v59 = vmul.f32 %v10696_v31, %v10692_v18  ;;  %v17175_v18 = vld [vmem:[%s17440_s14 + $0x8c] ss:$16 sps:$4 sm:$0xff]   ;;  %v17187_v31 = vld [vmem:[%s17440_s14 + $0x88] ss:$16 sps:$4 sm:$0xff]  }
 0xbe4   :  { %v10698_v40 = vpop.eup %10697 }
 0xbe5   :  { %v8371_v21 = vmul.f32 %v10698_v40, %v17007_v63  ;;  %v17199_v40 = vld [vmem:[%s17440_s14 + $0x6c] ss:$16 sps:$4 sm:$0xff]  }
 0xbe6   :  { %v10700_v3 = vpop.eup %10699 }
 0xbe7   :  { %v17049_v36 = vadd.f32 %v8372_v59, %v8371_v21  ;;  %v17193_v59 = vld [vmem:[%s17440_s14 + $0x64] ss:$16 sps:$4 sm:$0xff]   ;;  %v17211_v21 = vld [vmem:[%s17440_s14 + $0x68] ss:$16 sps:$4 sm:$0xff]  }
 0xbe9   :  { %10701 = vtanh.f32 %v17049_v36 }
 0xbf6   :  { %v10702_v37 = vpop.eup %10701 }
 0xbf7   :  { %v8375_v55 = vmul.f32 %v10702_v37, %v10700_v3  ;;  %v17223_v3 = vld [vmem:[%s17440_s14 + $0x4c] ss:$16 sps:$4 sm:$0xff]   ;;  %v17229_v37 = vld [vmem:[%s17440_s14 + $0x40] ss:$16 sps:$4 sm:$0xff]  }
 0xbf9   :  { %v8376_v8 = vpack.c.bf16 %v8375_v55, %v8375_v55  ;;  %v17235_v55 = vld [vmem:[%s17440_s14 + $0x48] ss:$16 sps:$4 sm:$0xff]  }
 0xbfb   :  { %8410 = vmatmul.mubr.bf16.vlgmr.msra.gmra.mxu0 %v8376_v8  ;;  %8451 = vmatmul.mubr.bf16.vlgmr.msra.gmra.mxu1 %v8376_v8  ;;  %v17241_v8 = vld [vmem:[%s17440_s14 + $0x24] ss:$16 sps:$4 sm:$0xff]  }
 0xbfc   :  { %8486 = vmatpush1.bf16.msra.mxu0 %v16569_v52  ;;  %8527 = vmatpush1.bf16.msra.mxu1 %v16574_v22  ;;  %v17087_v52 = vld [vmem:[%s17440_s14 + $0xe4] ss:$16 sps:$4 sm:$0xff]   ;;  %v17093_v22 = vld [vmem:[%s17440_s14 + $0xec] ss:$16 sps:$4 sm:$0xff]  }
 0xbfd   :  { %8487 = vmatprep.subr.bf16.mxu0 %v16579_v60  ;;  %8528 = vmatprep.subr.bf16.mxu1 %v16584_v14 }
 0xbfe   :  { %8517 = vmatprep.mubr.bf16.mxu0 %v18485_v61  ;;  %8558 = vmatprep.mubr.bf16.mxu1 %v18485_v61 }
 0xc00   :  { %8488 = vmatpush1.bf16.msra.mxu0 %v16593_v47  ;;  %8529 = vmatpush1.bf16.msra.mxu1 %v16598_v23  ;;  %v18605_v47 = vld [vmem:[#allocation107_spill] sm:$0xff] }
 0xc01   :  { %8489 = vmatprep.subr.bf16.mxu0 %v16605_v0  ;;  %8530 = vmatprep.subr.bf16.mxu1 %v16610_v27 }
 0xc04   :  { %8490 = vmatpush1.bf16.msra.mxu0 %v16617_v5  ;;  %8531 = vmatpush1.bf16.msra.mxu1 %v16622_v4  ;;  %v18606_v4 = vld [vmem:[#allocation74_spill] sm:$0xff] }
 0xc05   :  { %8491 = vmatprep.subr.bf16.mxu0 %v16629_v44  ;;  %8532 = vmatprep.subr.bf16.mxu1 %v16634_v62 }
 0xc08   :  { %8492 = vmatpush1.bf16.msra.mxu0 %v16643_v56  ;;  %8533 = vmatpush1.bf16.msra.mxu1 %v16648_v12 }
 0xc09   :  { %8493 = vmatprep.subr.bf16.mxu0 %v16655_v48  ;;  %8534 = vmatprep.subr.bf16.mxu1 %v16660_v53 }
 0xc0c   :  { %8494 = vmatpush1.bf16.msra.mxu0 %v16667_v32  ;;  %8535 = vmatpush1.bf16.msra.mxu1 %v16672_v30 }
 0xc0d   :  { %8495 = vmatprep.subr.bf16.mxu0 %v16679_v43  ;;  %8536 = vmatprep.subr.bf16.mxu1 %v16684_v7  ;;  %v18607_v43 = vld [vmem:[#allocation160_spill] sm:$0xff] }
 0xc10   :  { %8496 = vmatpush1.bf16.msra.mxu0 %v16693_v13  ;;  %8537 = vmatpush1.bf16.msra.mxu1 %v16698_v54  ;;  %v18608_v54 = vld [vmem:[#allocation37_spill] sm:$0xff] }
 0xc11   :  { %8497 = vmatprep.subr.bf16.mxu0 %v16705_v51  ;;  %8538 = vmatprep.subr.bf16.mxu1 %v16710_v29 }
 0xc14   :  { %8498 = vmatpush1.bf16.msra.mxu0 %v16717_v26  ;;  %8539 = vmatpush1.bf16.msra.mxu1 %v16722_v57 }
 0xc15   :  { %8499 = vmatprep.subr.bf16.mxu0 %v16729_v9  ;;  %8540 = vmatprep.subr.bf16.mxu1 %v16734_v19 }
 0xc18   :  { %8500 = vmatpush1.bf16.msra.mxu0 %v16743_v45  ;;  %8541 = vmatpush1.bf16.msra.mxu1 %v16748_v6 }
 0xc19   :  { %8593 = vmatprep.subr.bf16.mxu0 %v17087_v52  ;;  %8634 = vmatprep.subr.bf16.mxu1 %v17093_v22 }
 0xcbb   :  { %v8411_v60 = vpop.f32.mrf.mxu0  ;;  %v8452_v14 = vpop.f32.mrf.mxu1 }
 0xcbc   :  { %v8459_v23 = vadd.f32 %v8411_v60, %v18605_v47  ;;  %v8461_v51 = vadd.f32 %v8452_v14, %v18608_v54  ;;  %v17247_v60 = vld [vmem:[%s17440_s14 + $0x2c] ss:$16 sps:$4 sm:$0xff]   ;;  %v17253_v14 = vld [vmem:[%s17440_s14 + $0x20] ss:$16 sps:$4 sm:$0xff]   ;;  %v17259_v47 = vld [vmem:[%s17440_s14 + $0x28] ss:$16 sps:$4 sm:$0xff]  }
 0xcbd   :  { %v8413_v0 = vpop.f32.mrf.mxu0  ;;  %v8454_v27 = vpop.f32.mrf.mxu1 }
 0xcbe   :  { %v8463_v5 = vsub.f32 0.0, %v8459_v23  ;;  %v8460_v44 = vadd.f32 %v8413_v0, %v18606_v4  ;;  %v8462_v7 = vadd.f32 %v8454_v27, %v18607_v43  ;;  %v17265_v23 = vld [vmem:[%s17440_s14 + $0x4] ss:$16 sps:$4 sm:$0xff]   ;;  %v17271_v0 = vld [vmem:[%s17440_s14 + $0xc] ss:$16 sps:$4 sm:$0xff]  }
 0xcbf   :  { %v8415_v62 = vpop.f32.mrf.mxu0  ;;  %v8456_v56 = vpop.f32.mrf.mxu1  ;;  %v17277_v27 = vld [vmem:[%s17440_s14] ss:$16 sps:$4 sm:$0xff]  }
 0xcc0   :  { %v8464_v12 = vmul.f32 1.442695, %v8463_v5  ;;  %v8468_v48 = vsub.f32 0.0, %v8460_v44  ;;  %v8474_v13 = vsub.f32 0.0, %v8462_v7  ;;  %v17283_v5 = vld [vmem:[%s17440_s14 + $0x8] ss:$16 sps:$4 sm:$0xff]  }
 0xcc1   :  { %v8416_v53 = vpop.f32.mrf.mxu0  ;;  %v8457_v32 = vpop.f32.mrf.mxu1  ;;  %v18609_v62 = vld [vmem:[#allocation158_spill] sm:$0xff] }
 0xcc2   :  { %10703 = vpow2.f32 %v8464_v12  ;;  %v8469_v30 = vmul.f32 1.442695, %v8468_v48  ;;  %v8475_v29 = vmul.f32 1.442695, %v8474_v13  ;;  %v18610_v32 = vld [vmem:[#allocation111_spill] sm:$0xff] }
 0xcc4   :  { %10705 = vpow2.f32 %v8469_v30 }
 0xcc5   :  { %10707 = vtanh.f32 %v8461_v51 }
 0xcc6   :  { %10709 = vpow2.f32 %v8475_v29 }
 0xccf   :  { %v10704_v26 = vpop.eup %10703 }
 0xcd0   :  { %v8466_v57 = vadd.f32 1.0, %v10704_v26 }
 0xcd1   :  { %v10706_v9 = vpop.eup %10705 }
 0xcd2   :  { %10711 = vrcp.f32 %v8466_v57  ;;  %v8471_v19 = vadd.f32 1.0, %v10706_v9  ;;  %v10708_v45 = vpop.eup %10707  ;;  %v18611_v57 = vld [vmem:[#allocation39_spill] sm:$0xff] }
 0xcd3   :  { %v10710_v6 = vpop.eup %10709 }
 0xcd4   :  { %10713 = vrcp.f32 %v8471_v19  ;;  %v8477_v20 = vadd.f32 1.0, %v10710_v6 }
 0xcd6   :  { %10715 = vrcp.f32 %v8477_v20 }
 0xcdf   :  { %v10712_v63 = vpop.eup %10711 }
 0xce0   :  { %v8480_v10 = vmul.f32 %v10712_v63, %v10708_v45  ;;  %v18612_v45 = vld [vmem:[#allocation164_spill] sm:$0xff] }
 0xce1   :  { %v10714_v42 = vpop.eup %10713 }
 0xce2   :  { %v8479_v24 = vmul.f32 %v10714_v42, %v17049_v36  ;;  %v17217_v36 = vld [vmem:[%s17440_s14 + $0x44] ss:$16 sps:$4 sm:$0xff]  }
 0xce3   :  { %v10716_v46 = vpop.eup %10715 }
 0xce4   :  { %v17101_v35 = vadd.f32 %v8480_v10, %v8479_v24 }
 0xce6   :  { %10717 = vtanh.f32 %v17101_v35 }
 0xcf3   :  { %v10718_v17 = vpop.eup %10717 }
 0xcf4   :  { %v8483_v28 = vmul.f32 %v10718_v17, %v10716_v46 }
 0xcf6   :  { %v8484_v39 = vpack.c.bf16 %v8483_v28, %v8483_v28 }
 0xcf8   :  { %8518 = vmatmul.mubr.bf16.vlgmr.msra.gmra.mxu0 %v8484_v39  ;;  %8559 = vmatmul.mubr.bf16.vlgmr.msra.gmra.mxu1 %v8484_v39 }
 0xcf9   :  { %8594 = vmatpush1.bf16.msra.mxu0 %v17107_v34  ;;  %8635 = vmatpush1.bf16.msra.mxu1 %v17113_v58 }
 0xcfa   :  { %8595 = vmatprep.subr.bf16.mxu0 %v17119_v38  ;;  %8636 = vmatprep.subr.bf16.mxu1 %v17125_v16 }
 0xcfb   :  { %8625 = vmatprep.mubr.bf16.mxu0 %v18485_v61  ;;  %8666 = vmatprep.mubr.bf16.mxu1 %v18485_v61 }
 0xcfd   :  { %8596 = vmatpush1.bf16.msra.mxu0 %v17133_v15  ;;  %8637 = vmatpush1.bf16.msra.mxu1 %v17139_v33 }
 0xcfe   :  { %8597 = vmatprep.subr.bf16.mxu0 %v17145_v50  ;;  %8638 = vmatprep.subr.bf16.mxu1 %v17151_v1 }
 0xd01   :  { %8598 = vmatpush1.bf16.msra.mxu0 %v17157_v49  ;;  %8639 = vmatpush1.bf16.msra.mxu1 %v17163_v25 }
 0xd02   :  { %8599 = vmatprep.subr.bf16.mxu0 %v17169_v41  ;;  %8640 = vmatprep.subr.bf16.mxu1 %v17175_v18 }
 0xd05   :  { %8600 = vmatpush1.bf16.msra.mxu0 %v17181_v11  ;;  %8641 = vmatpush1.bf16.msra.mxu1 %v17187_v31 }
 0xd06   :  { %8601 = vmatprep.subr.bf16.mxu0 %v17193_v59  ;;  %8642 = vmatprep.subr.bf16.mxu1 %v17199_v40 }
 0xd09   :  { %8602 = vmatpush1.bf16.msra.mxu0 %v17205_v2  ;;  %8643 = vmatpush1.bf16.msra.mxu1 %v17211_v21 }
 0xd0a   :  { %8603 = vmatprep.subr.bf16.mxu0 %v17217_v36  ;;  %8644 = vmatprep.subr.bf16.mxu1 %v17223_v3 }
 0xd0d   :  { %8604 = vmatpush1.bf16.msra.mxu0 %v17229_v37  ;;  %8645 = vmatpush1.bf16.msra.mxu1 %v17235_v55 }
 0xd0e   :  { %8605 = vmatprep.subr.bf16.mxu0 %v17241_v8  ;;  %8646 = vmatprep.subr.bf16.mxu1 %v17247_v60 }
 0xd11   :  { %8606 = vmatpush1.bf16.msra.mxu0 %v17253_v14  ;;  %8647 = vmatpush1.bf16.msra.mxu1 %v17259_v47 }
 0xd12   :  { %8607 = vmatprep.subr.bf16.mxu0 %v17265_v23  ;;  %8648 = vmatprep.subr.bf16.mxu1 %v17271_v0 }
 0xd15   :  { %8608 = vmatpush1.bf16.msra.mxu0 %v17277_v27  ;;  %8649 = vmatpush1.bf16.msra.mxu1 %v17283_v5 }
 0xd16   :  { %8701 = vmatprep.subr.bf16.mxu0 %v17087_v52  ;;  %8742 = vmatprep.subr.bf16.mxu1 %v17093_v22 }
 0xdb8   :  { %v8519_v4 = vpop.f32.mrf.mxu0  ;;  %v8560_v44 = vpop.f32.mrf.mxu1 }
 0xdb9   :  { %v8567_v56 = vadd.f32 %v8519_v4, %v18609_v62  ;;  %v8569_v6 = vadd.f32 %v8560_v44, %v18612_v45 }
 0xdba   :  { %v8521_v12 = vpop.f32.mrf.mxu0  ;;  %v8562_v48 = vpop.f32.mrf.mxu1 }
 0xdbb   :  { %v8571_v53 = vsub.f32 0.0, %v8567_v56  ;;  %v8568_v30 = vadd.f32 %v8521_v12, %v18610_v32  ;;  %v8570_v9 = vadd.f32 %v8562_v48, %v18611_v57 }
 0xdbc   :  { %v8523_v43 = vpop.f32.mrf.mxu0  ;;  %v8564_v7 = vpop.f32.mrf.mxu1 }
 0xdbd   :  { %v8572_v13 = vmul.f32 1.442695, %v8571_v53  ;;  %v8576_v54 = vsub.f32 0.0, %v8568_v30  ;;  %v8582_v19 = vsub.f32 0.0, %v8570_v9  ;;  %v18613_v43 = vld [vmem:[#allocation76_spill] sm:$0xff] }
 0xdbe   :  { %v8524_v51 = vpop.f32.mrf.mxu0  ;;  %v8565_v29 = vpop.f32.mrf.mxu1 }
 0xdbf   :  { %10719 = vpow2.f32 %v8572_v13  ;;  %v8577_v26 = vmul.f32 1.442695, %v8576_v54  ;;  %v8583_v63 = vmul.f32 1.442695, %v8582_v19  ;;  %v18614_v29 = vld [vmem:[#allocation161_spill] sm:$0xff] }
 0xdc1   :  { %10721 = vpow2.f32 %v8577_v26 }
 0xdc2   :  { %10723 = vtanh.f32 %v8569_v6 }
 0xdc3   :  { %10725 = vpow2.f32 %v8583_v63 }
 0xdcc   :  { %v10720_v10 = vpop.eup %10719 }
 0xdcd   :  { %v8574_v42 = vadd.f32 1.0, %v10720_v10 }
 0xdce   :  { %v10722_v20 = vpop.eup %10721 }
 0xdcf   :  { %10727 = vrcp.f32 %v8574_v42  ;;  %v8579_v24 = vadd.f32 1.0, %v10722_v20  ;;  %v10724_v46 = vpop.eup %10723  ;;  %v18616_v20 = vld [vmem:[#allocation32_spill] sm:$0xff] }
 0xdd0   :  { %v10726_v17 = vpop.eup %10725 }
 0xdd1   :  { %10729 = vrcp.f32 %v8579_v24  ;;  %v8585_v62 = vadd.f32 1.0, %v10726_v17 }
 0xdd3   :  { %10731 = vrcp.f32 %v8585_v62 }
 0xddc   :  { %v10728_v28 = vpop.eup %10727 }
 0xddd   :  { %v8588_v39 = vmul.f32 %v10728_v28, %v10724_v46 }
 0xdde   :  { %v10730_v4 = vpop.eup %10729 }
 0xddf   :  { %v8587_v56 = vmul.f32 %v10730_v4, %v17101_v35 }
 0xde0   :  { %v10732_v44 = vpop.eup %10731 }
 0xde1   :  { %v17293_v12 = vadd.f32 %v8588_v39, %v8587_v56 }
 0xde3   :  { %10733 = vtanh.f32 %v17293_v12 }
 0xdf0   :  { %v10734_v48 = vpop.eup %10733 }
 0xdf1   :  { %v8591_v53 = vmul.f32 %v10734_v48, %v10732_v44 }
 0xdf3   :  { %v8592_v32 = vpack.c.bf16 %v8591_v53, %v8591_v53 }
 0xdf5   :  { %8626 = vmatmul.mubr.bf16.vlgmr.msra.gmra.mxu0 %v8592_v32  ;;  %8667 = vmatmul.mubr.bf16.vlgmr.msra.gmra.mxu1 %v8592_v32 }
 0xdf6   :  { %8702 = vmatpush1.bf16.msra.mxu0 %v17107_v34  ;;  %8743 = vmatpush1.bf16.msra.mxu1 %v17113_v58 }
 0xdf7   :  { %8703 = vmatprep.subr.bf16.mxu0 %v17119_v38  ;;  %8744 = vmatprep.subr.bf16.mxu1 %v17125_v16 }
 0xdf8   :  { %8733 = vmatprep.mubr.bf16.mxu0 %v18485_v61  ;;  %8774 = vmatprep.mubr.bf16.mxu1 %v18485_v61 }
 0xdfa   :  { %8704 = vmatpush1.bf16.msra.mxu0 %v17133_v15  ;;  %8745 = vmatpush1.bf16.msra.mxu1 %v17139_v33 }
 0xdfb   :  { %8705 = vmatprep.subr.bf16.mxu0 %v17145_v50  ;;  %8746 = vmatprep.subr.bf16.mxu1 %v17151_v1 }
 0xdfe   :  { %8706 = vmatpush1.bf16.msra.mxu0 %v17157_v49  ;;  %8747 = vmatpush1.bf16.msra.mxu1 %v17163_v25 }
 0xdff   :  { %8707 = vmatprep.subr.bf16.mxu0 %v17169_v41  ;;  %8748 = vmatprep.subr.bf16.mxu1 %v17175_v18 }
 0xe02   :  { %8708 = vmatpush1.bf16.msra.mxu0 %v17181_v11  ;;  %8749 = vmatpush1.bf16.msra.mxu1 %v17187_v31 }
 0xe03   :  { %8709 = vmatprep.subr.bf16.mxu0 %v17193_v59  ;;  %8750 = vmatprep.subr.bf16.mxu1 %v17199_v40 }
 0xe06   :  { %8710 = vmatpush1.bf16.msra.mxu0 %v17205_v2  ;;  %8751 = vmatpush1.bf16.msra.mxu1 %v17211_v21 }
 0xe07   :  { %8711 = vmatprep.subr.bf16.mxu0 %v17217_v36  ;;  %8752 = vmatprep.subr.bf16.mxu1 %v17223_v3 }
 0xe0a   :  { %8712 = vmatpush1.bf16.msra.mxu0 %v17229_v37  ;;  %8753 = vmatpush1.bf16.msra.mxu1 %v17235_v55 }
 0xe0b   :  { %8713 = vmatprep.subr.bf16.mxu0 %v17241_v8  ;;  %8754 = vmatprep.subr.bf16.mxu1 %v17247_v60 }
 0xe0e   :  { %8714 = vmatpush1.bf16.msra.mxu0 %v17253_v14  ;;  %8755 = vmatpush1.bf16.msra.mxu1 %v17259_v47 }
 0xe0f   :  { %8715 = vmatprep.subr.bf16.mxu0 %v17265_v23  ;;  %8756 = vmatprep.subr.bf16.mxu1 %v17271_v0 }
 0xe12   :  { %8716 = vmatpush1.bf16.msra.mxu0 %v17277_v27  ;;  %8757 = vmatpush1.bf16.msra.mxu1 %v17283_v5 }
 0xe13   :  { %8809 = vmatprep.subr.bf16.mxu0 %v17087_v52  ;;  %8850 = vmatprep.subr.bf16.mxu1 %v17093_v22  ;;  %v18615_v52 = vld [vmem:[#allocation115_spill] sm:$0xff] }
 0xeb5   :  { %v8627_v35 = vpop.f32.mrf.mxu0  ;;  %v8668_v30 = vpop.f32.mrf.mxu1 }
 0xeb6   :  { %v8675_v7 = vadd.f32 %v8627_v35, %v18613_v43  ;;  %v8677_v24 = vadd.f32 %v8668_v30, %v18616_v20  ;;  %v10637_v20 = vld [vmem:[%s17441_s15 + $0x8] sm:$0xff]  }
 0xeb7   :  { %v8629_v13 = vpop.f32.mrf.mxu0  ;;  %v8670_v54 = vpop.f32.mrf.mxu1 }
 0xeb8   :  { %v8679_v51 = vsub.f32 0.0, %v8675_v7  ;;  %v8676_v26 = vadd.f32 %v8629_v13, %v18614_v29  ;;  %v8678_v22 = vadd.f32 %v8670_v54, %v18615_v52  ;;  %v10634_v52 = vld [vmem:[%s17441_s15 + $0x20] sm:$0xff]  }
 0xeb9   :  { %v8631_v57 = vpop.f32.mrf.mxu0  ;;  %v8672_v9 = vpop.f32.mrf.mxu1 }
 0xeba   :  { %v8680_v19 = vmul.f32 1.442695, %v8679_v51  ;;  %v8684_v45 = vsub.f32 0.0, %v8676_v26  ;;  %v8690_v42 = vsub.f32 0.0, %v8678_v22  ;;  %v10635_v22 = vld [vmem:[%s17441_s15 + $0x18] sm:$0xff]  }
 0xebb   :  { %v8632_v6 = vpop.f32.mrf.mxu0  ;;  %v8673_v63 = vpop.f32.mrf.mxu1 }
 0xebc   :  { %10735 = vpow2.f32 %v8680_v19  ;;  %v8685_v10 = vmul.f32 1.442695, %v8684_v45  ;;  %v8691_v46 = vmul.f32 1.442695, %v8690_v42  ;;  %v10631_v6 = vld [vmem:[%s17441_s15 + $0x38] sm:$0xff]   ;;  %v10632_v63 = vld [vmem:[%s17441_s15 + $0x30] sm:$0xff]  }
 0xebd   :  { %v10636_v42 = vld [vmem:[%s17441_s15 + $0x10] sm:$0xff]  }
 0xebe   :  { %10737 = vpow2.f32 %v8685_v10  ;;  %v10633_v10 = vld [vmem:[%s17441_s15 + $0x28] sm:$0xff]  }
 0xebf   :  { %10739 = vtanh.f32 %v8677_v24  ;;  %v10638_v24 = vld [vmem:[%s17441_s15] sm:$0xff]  }
 0xec0   :  { %10741 = vpow2.f32 %v8691_v46 }
 0xec9   :  { %v10736_v17 = vpop.eup %10735 }
 0xeca   :  { %v8682_v28 = vadd.f32 1.0, %v10736_v17 }
 0xecb   :  { %v10738_v39 = vpop.eup %10737 }
 0xecc   :  { %10743 = vrcp.f32 %v8682_v28  ;;  %v8687_v4 = vadd.f32 1.0, %v10738_v39  ;;  %v10740_v62 = vpop.eup %10739  ;;  %v18622_v28 = vld [vmem:[#allocation5_spill] sm:$0xff] }
 0xecd   :  { %v10742_v56 = vpop.eup %10741 }
 0xece   :  { %10745 = vrcp.f32 %v8687_v4  ;;  %v8693_v32 = vadd.f32 1.0, %v10742_v56 }
 0xed0   :  { %10747 = vrcp.f32 %v8693_v32 }
 0xed9   :  { %v10744_v44 = vpop.eup %10743 }
 0xeda   :  { %v8696_v48 = vmul.f32 %v10744_v44, %v10740_v62  ;;  %v18623_v44 = vld [vmem:[#allocation119_spill] sm:$0xff] }
 0xedb   :  { %v10746_v53 = vpop.eup %10745 }
 0xedc   :  { %v8695_v35 = vmul.f32 %v10746_v53, %v17293_v12 }
 0xedd   :  { %v10748_v30 = vpop.eup %10747 }
 0xede   :  { %v17335_v43 = vadd.f32 %v8696_v48, %v8695_v35 }
 0xee0   :  { %10749 = vtanh.f32 %v17335_v43 }
 0xeed   :  { %v10750_v7 = vpop.eup %10749 }
 0xeee   :  { %v8699_v13 = vmul.f32 %v10750_v7, %v10748_v30 }
 0xef0   :  { %v8700_v54 = vpack.c.bf16 %v8699_v13, %v8699_v13 }
 0xef2   :  { %8734 = vmatmul.mubr.bf16.vlgmr.msra.gmra.mxu0 %v8700_v54  ;;  %8775 = vmatmul.mubr.bf16.vlgmr.msra.gmra.mxu1 %v8700_v54  ;;  %v18624_v54 = vld [vmem:[#allocation43_spill] sm:$0xff] }
 0xef3   :  { %8810 = vmatpush1.bf16.msra.mxu0 %v17107_v34  ;;  %8851 = vmatpush1.bf16.msra.mxu1 %v17113_v58 }
 0xef4   :  { %8811 = vmatprep.subr.bf16.mxu0 %v17119_v38  ;;  %8852 = vmatprep.subr.bf16.mxu1 %v17125_v16  ;;  %v18618_v38 = vld [vmem:[#allocation41_spill] sm:$0xff] }
 0xef5   :  { %8841 = vmatprep.mubr.bf16.mxu0 %v18485_v61  ;;  %8882 = vmatprep.mubr.bf16.mxu1 %v18485_v61  ;;  %v18617_v61 = vmov 0.0  }
 0xef7   :  { %8812 = vmatpush1.bf16.msra.mxu0 %v17133_v15  ;;  %8853 = vmatpush1.bf16.msra.mxu1 %v17139_v33 }
 0xef8   :  { %8813 = vmatprep.subr.bf16.mxu0 %v17145_v50  ;;  %8854 = vmatprep.subr.bf16.mxu1 %v17151_v1  ;;  %v18619_v1 = vld [vmem:[#allocation78_spill] sm:$0xff] }
 0xefb   :  { %8814 = vmatpush1.bf16.msra.mxu0 %v17157_v49  ;;  %8855 = vmatpush1.bf16.msra.mxu1 %v17163_v25 }
 0xefc   :  { %8815 = vmatprep.subr.bf16.mxu0 %v17169_v41  ;;  %8856 = vmatprep.subr.bf16.mxu1 %v17175_v18 }
 0xeff   :  { %8816 = vmatpush1.bf16.msra.mxu0 %v17181_v11  ;;  %8857 = vmatpush1.bf16.msra.mxu1 %v17187_v31 }
 0xf00   :  { %8817 = vmatprep.subr.bf16.mxu0 %v17193_v59  ;;  %8858 = vmatprep.subr.bf16.mxu1 %v17199_v40 }
 0xf03   :  { %8818 = vmatpush1.bf16.msra.mxu0 %v17205_v2  ;;  %8859 = vmatpush1.bf16.msra.mxu1 %v17211_v21  ;;  %v18620_v2 = vld [vmem:[#allocation14_spill] sm:$0xff] }
 0xf04   :  { %8819 = vmatprep.subr.bf16.mxu0 %v17217_v36  ;;  %8860 = vmatprep.subr.bf16.mxu1 %v17223_v3  ;;  %v18621_v3 = vld [vmem:[#allocation167_spill] sm:$0xff] }
 0xf07   :  { %8820 = vmatpush1.bf16.msra.mxu0 %v17229_v37  ;;  %8861 = vmatpush1.bf16.msra.mxu1 %v17235_v55 }
 0xf08   :  { %8821 = vmatprep.subr.bf16.mxu0 %v17241_v8  ;;  %8862 = vmatprep.subr.bf16.mxu1 %v17247_v60 }
 0xf0b   :  { %8822 = vmatpush1.bf16.msra.mxu0 %v17253_v14  ;;  %8863 = vmatpush1.bf16.msra.mxu1 %v17259_v47 }
 0xf0c   :  { %8823 = vmatprep.subr.bf16.mxu0 %v17265_v23  ;;  %8864 = vmatprep.subr.bf16.mxu1 %v17271_v0 }
 0xf0f   :  { %8824 = vmatpush1.bf16.msra.mxu0 %v17277_v27  ;;  %8865 = vmatpush1.bf16.msra.mxu1 %v17283_v5 }
 0xf10   :  { %10239 = vmatprep.subr.bf16.mxu0 %v18617_v61 }
 0xfb2   :  { %v8735_v34 = vpop.f32.mrf.mxu0  ;;  %v8776_v58 = vpop.f32.mrf.mxu1 }
 0xfb3   :  { %v8783_v16 = vadd.f32 %v8735_v34, %v18618_v38  ;;  %v8785_v37 = vadd.f32 %v8776_v58, %v18621_v3  ;;  %v18625_v58 = vld [vmem:[#allocation168_spill] sm:$0xff] }
 0xfb4   :  { %v8737_v15 = vpop.f32.mrf.mxu0  ;;  %v8778_v33 = vpop.f32.mrf.mxu1 }
 0xfb5   :  { %v8787_v50 = vsub.f32 0.0, %v8783_v16  ;;  %v8784_v49 = vadd.f32 %v8737_v15, %v18619_v1  ;;  %v8786_v21 = vadd.f32 %v8778_v33, %v18620_v2 }
 0xfb6   :  { %v8739_v25 = vpop.f32.mrf.mxu0  ;;  %v8780_v41 = vpop.f32.mrf.mxu1 }
 0xfb7   :  { %v8788_v18 = vmul.f32 1.442695, %v8787_v50  ;;  %v8792_v11 = vsub.f32 0.0, %v8784_v49  ;;  %v8798_v36 = vsub.f32 0.0, %v8786_v21 }
 0xfb8   :  { %v8740_v31 = vpop.f32.mrf.mxu0  ;;  %v8781_v59 = vpop.f32.mrf.mxu1 }
 0xfb9   :  { %10751 = vpow2.f32 %v8788_v18  ;;  %v8793_v40 = vmul.f32 1.442695, %v8792_v11  ;;  %v8799_v55 = vmul.f32 1.442695, %v8798_v36 }
 0xfbb   :  { %10753 = vpow2.f32 %v8793_v40 }
 0xfbc   :  { %10755 = vtanh.f32 %v8785_v37  ;;  %v65_v37 = vld [vmem:[%s17432_s16 + $0x5] ss:$0 sm:$0xff] }
 0xfbd   :  { %10757 = vpow2.f32 %v8799_v55 }
 0xfc6   :  { %v10752_v8 = vpop.eup %10751 }
 0xfc7   :  { %v8790_v60 = vadd.f32 1.0, %v10752_v8 }
 0xfc8   :  { %v10754_v14 = vpop.eup %10753 }
 0xfc9   :  { %10759 = vrcp.f32 %v8790_v60  ;;  %v8795_v47 = vadd.f32 1.0, %v10754_v14  ;;  %v10756_v23 = vpop.eup %10755 }
 0xfca   :  { %v10758_v0 = vpop.eup %10757 }
 0xfcb   :  { %10761 = vrcp.f32 %v8795_v47  ;;  %v8801_v51 = vadd.f32 1.0, %v10758_v0 }
 0xfcd   :  { %10763 = vrcp.f32 %v8801_v51 }
 0xfd6   :  { %v10760_v27 = vpop.eup %10759 }
 0xfd7   :  { %v8804_v5 = vmul.f32 %v10760_v27, %v10756_v23 }
 0xfd8   :  { %v10762_v12 = vpop.eup %10761 }
 0xfd9   :  { %v8803_v29 = vmul.f32 %v10762_v12, %v17335_v43  ;;  %v18626_v12 = vld [vmem:[#allocation2_spill] sm:$0xff] }
 0xfda   :  { %v10764_v57 = vpop.eup %10763  ;;  %vm9022_vm1 = vcmp.lt.s32.totalorder %v18626_v12, 28 }
 0xfdb   :  { %v17376_v26 = vadd.f32 %v8804_v5, %v8803_v29 }
 0xfdd   :  { %10765 = vtanh.f32 %v17376_v26 }
 0xfea   :  { %v10766_v9 = vpop.eup %10765 }
 0xfeb   :  { %v8807_v19 = vmul.f32 %v10766_v9, %v10764_v57 }
 0xfed   :  { %v8808_v45 = vpack.c.bf16 %v8807_v19, %v8807_v19 }
 0xfef   :  { %8842 = vmatmul.mubr.bf16.vlgmr.msra.gmra.mxu0 %v8808_v45  ;;  %8883 = vmatmul.mubr.bf16.vlgmr.msra.gmra.mxu1 %v8808_v45 }
 0xff0   :  { %10255 = vmatprep.mubr.msk.bf16.mxu0 %vm10824_vm11, %v18617_v61  ;;  %10240 = vmatpush3.bf16.msra.mxu0 %v10631_v6  ;;  %vm9021_vm11 = vcmp.ge.s32.totalorder %v18626_v12, 26 }
 0xff1   :  { %10241 = vmatprep.subr.bf16.mxu0 %v18617_v61  ;;  %vm9023_vm3 = vmand %vm9021_vm11, %vm9022_vm1 }
 0xff4   :  { %10242 = vmatpush3.bf16.msra.mxu0 %v10632_v63 }
 0xff5   :  { %10243 = vmatprep.subr.bf16.mxu0 %v18617_v61 }
 0xff8   :  { %10244 = vmatpush3.bf16.msra.mxu0 %v10633_v10 }
 0xff9   :  { %10245 = vmatprep.subr.bf16.mxu0 %v18617_v61 }
 0xffc   :  { %10246 = vmatpush3.bf16.msra.mxu0 %v10634_v52 }
 0xffd   :  { %10247 = vmatprep.subr.bf16.mxu0 %v18617_v61 }
0x1000   :  { %10248 = vmatpush3.bf16.msra.mxu0 %v10635_v22 }
0x1001   :  { %10249 = vmatprep.subr.bf16.mxu0 %v18617_v61 }
0x1004   :  { %10250 = vmatpush3.bf16.msra.mxu0 %v10636_v42 }
0x1005   :  { %10251 = vmatprep.subr.bf16.mxu0 %v18617_v61 }
0x1008   :  { %10252 = vmatpush3.bf16.msra.mxu0 %v10637_v20 }
0x1009   :  { %10253 = vmatprep.subr.bf16.mxu0 %v18617_v61 }
0x100c   :  { %10254 = vmatpush3.bf16.msra.mxu0 %v10638_v24 }
0x10af   :  { %v8843_v46 = vpop.f32.mrf.mxu0  ;;  %v8884_v17 = vpop.f32.mrf.mxu1 }
0x10b0   :  { %v8891_v39 = vadd.f32 %v8843_v46, %v18622_v28  ;;  %v8893_v38 = vadd.f32 %v8884_v17, %v18625_v58 }
0x10b1   :  { %v8845_v4 = vpop.f32.mrf.mxu0  ;;  %v8886_v62 = vpop.f32.mrf.mxu1 }
0x10b2   :  { %v8895_v56 = vsub.f32 0.0, %v8891_v39  ;;  %v8892_v48 = vadd.f32 %v8845_v4, %v18623_v44  ;;  %v8894_v61 = vadd.f32 %v8886_v62, %v18624_v54 }
0x10b3   :  { %v8847_v53 = vpop.f32.mrf.mxu0  ;;  %v8888_v32 = vpop.f32.mrf.mxu1 }
0x10b4   :  { %v8896_v35 = vmul.f32 1.442695, %v8895_v56  ;;  %v8900_v43 = vsub.f32 0.0, %v8892_v48  ;;  %v8906_v34 = vsub.f32 0.0, %v8894_v61 }
0x10b5   :  { %v8848_v30 = vpop.f32.mrf.mxu0  ;;  %v8889_v7 = vpop.f32.mrf.mxu1 }
0x10b6   :  { %10767 = vpow2.f32 %v8896_v35  ;;  %v8901_v13 = vmul.f32 1.442695, %v8900_v43  ;;  %v8907_v16 = vmul.f32 1.442695, %v8906_v34 }
0x10b8   :  { %10769 = vpow2.f32 %v8901_v13 }
0x10b9   :  { %10771 = vtanh.f32 %v8893_v38 }
0x10ba   :  { %10773 = vpow2.f32 %v8907_v16 }
0x10c3   :  { %v10768_v15 = vpop.eup %10767 }
0x10c4   :  { %v8898_v33 = vadd.f32 1.0, %v10768_v15 }
0x10c5   :  { %v10770_v50 = vpop.eup %10769 }
0x10c6   :  { %10775 = vrcp.f32 %v8898_v33  ;;  %v8903_v1 = vadd.f32 1.0, %v10770_v50  ;;  %v10772_v49 = vpop.eup %10771 }
0x10c7   :  { %v10774_v25 = vpop.eup %10773 }
0x10c8   :  { %10777 = vrcp.f32 %v8903_v1  ;;  %v8909_v31 = vadd.f32 1.0, %v10774_v25 }
0x10ca   :  { %10779 = vrcp.f32 %v8909_v31 }
0x10d3   :  { %v10776_v41 = vpop.eup %10775 }
0x10d4   :  { %v8912_v18 = vmul.f32 %v10776_v41, %v10772_v49 }
0x10d5   :  { %v10778_v11 = vpop.eup %10777 }
0x10d6   :  { %v8911_v59 = vmul.f32 %v10778_v11, %v17376_v26 }
0x10d7   :  { %v10780_v2 = vpop.eup %10779 }
0x10d8   :  { %v8913_v40 = vadd.f32 %v8912_v18, %v8911_v59 }
0x10da   :  { %10781 = vtanh.f32 %v8913_v40 }
0x10e7   :  { %v10782_v21 = vpop.eup %10781 }
0x10e8   :  { %v8915_v36 = vmul.f32 %v10782_v21, %v10780_v2 }
0x10ea   :  { %v8916_v3 = vpack.c.bf16 %v8915_v36, %v8915_v36 }
0x10ec   :  { %10256 = vmatmul.mubr.bf16.vlgmr.msra.gmra.mxu0 %v8916_v3 }
0x11ac   :  { %v9015_v55 = vpop.f32.mrf.mxu0 }
0x11ad   :  { %v9016_v8 = vadd.f32 %v9015_v55, %v65_v37 }
0x11ae   :  { %v10257_v60 = vpop.f32.mrf.mxu0 }
0x11af   :  { %v9024_v14 = vsub.f32 0.0, %v9016_v8 }
0x11b0   :  { %v9018_v47 = vpop.f32.mrf.mxu0 }
0x11b1   :  { %v9025_v23 = vmul.f32 1.442695, %v9024_v14 }
0x11b2   :  { %v10258_v0 = vpop.f32.mrf.mxu0 }
0x11b3   :  { %10783 = vpow2.f32 %v9025_v23 }
0x11c0   :  { %v10784_v27 = vpop.eup %10783 }
0x11c1   :  { %v9027_v5 = vadd.f32 1.0, %v10784_v27 }
0x11c3   :  { %10785 = vrcp.f32 %v9027_v5 }
0x11d0   :  { %v10786_v51 = vpop.eup %10785 }
0x11d1   :  { %v9029_v29 = vsel %vm9023_vm3, %v10786_v51, %v9016_v8 }
0x11d2   :  { %9030 = vst [vmem:[%s17442_s17] sm:$0xff] %v9029_v29 }

</bundles_post_ra>
